<compile_context>
chip_gen: v7x
topology: tpu7x:2x2x1
jax: 0.10.0
libtpu: 0.0.40
codegen_flags: <defaults>
</compile_context>

<pallas_src>
import functools

import jax
import jax.numpy as jnp
from jax import lax
from jax.experimental import pallas as pl
from jax.experimental.pallas import tpu as pltpu


_LANE = 128
_M_GRAN = 32        # bf16 vregs pack (16, 128); 32 keeps a comfortable margin
_BN_EPS = 1e-5


# ----------------------------------------------------------------------------
# Generation-aware VMEM budget
# ----------------------------------------------------------------------------
def _vmem_limit_bytes():
    cap = 64 * 1024 * 1024  # conservative fallback (v7x physical per TC)
    try:
        info = pltpu.get_tpu_info()
        cap = int(getattr(info, "vmem_capacity_bytes", cap))
    except Exception:
        pass
    # ~3/4 of physical, capped at 96 MiB: 96 MiB on v5e/v6e, ~48 MiB on v7x.
    return int(min(cap * 3 // 4, 96 * 1024 * 1024))


_VMEM_LIMIT = _vmem_limit_bytes()


# ----------------------------------------------------------------------------
# Tiling helpers
# ----------------------------------------------------------------------------
def _round_up(x, m):
    return (x + m - 1) // m * m


def _m_tiling(m):
    """Return (tile_m, padded_m).  Prefer >=2 M tiles so both v7x TCs work."""
    mpad = _round_up(m, _M_GRAN)
    if mpad >= 512 and mpad % 256 == 0:
        return 256, mpad
    if mpad >= 128 and (mpad // 2) % _M_GRAN == 0:
        return mpad // 2, mpad
    return mpad, mpad


def _k_tiling(k):
    """Return (tile_k, padded_k).  Single-shot K whenever it fits VMEM."""
    kpad = _round_up(k, _LANE)
    if kpad <= 2048:
        return kpad, kpad
    return 1024, _round_up(k, 1024)


def _n_tiling(cout):
    """Return (tile_n, padded_n).  256-wide tiles feed v6e/v7x MXU fully."""
    npad = _round_up(cout, _LANE)
    tn = 256 if npad % 256 == 0 else _LANE
    return tn, npad


def _ew_m_tile(mpad):
    """Row-tile for the elementwise BN-apply kernel (big, lane-dense blocks)."""
    if mpad <= 1024:
        return mpad
    for cand in (1024, 512, 256, 128, 64, 32):
        if mpad % cand == 0:
            return cand
    return mpad


def _pad2(x, rows, cols, dtype):
    r, c = x.shape
    return jnp.pad(x, ((0, rows - r), (0, cols - c))).astype(dtype)


# ----------------------------------------------------------------------------
# Pallas kernels
# ----------------------------------------------------------------------------
def _mm_bias_1k_kernel(a_ref, w_ref, b_ref, o_ref, *, relu):
    """Single-K matmul + bias (+ ReLU): no scratch, no pl.when."""
    y = jnp.dot(a_ref[...], w_ref[...], preferred_element_type=jnp.float32)
    y = y + b_ref[...]
    if relu:
        y = jnp.maximum(y, 0.0)
    o_ref[...] = y.astype(o_ref.dtype)


def _mm_bias_multik_kernel(a_ref, w_ref, b_ref, o_ref, acc_ref, *, n_k, relu):
    """Multi-K fallback: f32 VMEM accumulator, bias folded into k==0 init."""
    k = pl.program_id(2)

    @pl.when(k == 0)
    def _init():
        acc_ref[...] = jnp.broadcast_to(b_ref[...], acc_ref.shape)

    acc_ref[...] += jnp.dot(a_ref[...], w_ref[...],
                            preferred_element_type=jnp.float32)

    @pl.when(k == n_k - 1)
    def _finalize():
        y = acc_ref[...]
        if relu:
            y = jnp.maximum(y, 0.0)
        o_ref[...] = y.astype(o_ref.dtype)


def _pack_stats(y, out_dtype, tile_i, tm, tn, m_true):
    """Per-M-tile BN partials packed into one (8, tn) block: row0=s1, row1=s2."""
    yq = y.astype(out_dtype).astype(jnp.float32)   # stats on the rounded values
    rows = lax.broadcasted_iota(jnp.int32, (tm, 1), 0) + tile_i * tm
    valid = (rows < m_true).astype(jnp.float32)
    ym = yq * valid
    s1 = jnp.sum(ym, axis=0, keepdims=True)        # (1, tn)
    s2 = jnp.sum(ym * ym, axis=0, keepdims=True)   # (1, tn)
    ridx = lax.broadcasted_iota(jnp.int32, (8, tn), 0)
    out = jnp.where(ridx == 0, jnp.broadcast_to(s1, (8, tn)), 0.0)
    out = jnp.where(ridx == 1, jnp.broadcast_to(s2, (8, tn)), out)
    return out


def _mm_bias_stats_1k_kernel(a_ref, w_ref, b_ref, o_ref, s_ref,
                             *, m_true, tm, tn):
    i = pl.program_id(0)
    y = jnp.dot(a_ref[...], w_ref[...], preferred_element_type=jnp.float32)
    y = y + b_ref[...]
    o_ref[...] = y.astype(o_ref.dtype)
    s_ref[...] = _pack_stats(y, o_ref.dtype, i, tm, tn, m_true)


def _mm_bias_stats_multik_kernel(a_ref, w_ref, b_ref, o_ref, s_ref, acc_ref,
                                 *, n_k, m_true, tm, tn):
    i = pl.program_id(0)
    k = pl.program_id(2)

    @pl.when(k == 0)
    def _init():
        acc_ref[...] = jnp.broadcast_to(b_ref[...], acc_ref.shape)

    acc_ref[...] += jnp.dot(a_ref[...], w_ref[...],
                            preferred_element_type=jnp.float32)

    @pl.when(k == n_k - 1)
    def _finalize():
        y = acc_ref[...]
        o_ref[...] = y.astype(o_ref.dtype)
        s_ref[...] = _pack_stats(y, o_ref.dtype, i, tm, tn, m_true)


def _affine_relu_kernel(y_ref, s_ref, t_ref, o_ref):
    """Elementwise y*scale + shift, ReLU (training-mode BatchNorm apply)."""
    y = y_ref[...].astype(jnp.float32)
    o_ref[...] = jnp.maximum(y * s_ref[...] + t_ref[...], 0.0).astype(o_ref.dtype)


# ----------------------------------------------------------------------------
# pallas_call wrappers
# ----------------------------------------------------------------------------
def _matmul_cost(n_m, n_n, a_p, w_p, b_p, out_bytes, extra=0):
    return pl.CostEstimate(
        flops=2 * a_p.shape[0] * a_p.shape[1] * w_p.shape[1],
        transcendentals=0,
        bytes_accessed=(n_n * a_p.size * 2 + n_m * w_p.size * 2
                        + n_m * b_p.size * 4 + out_bytes + extra))


def pallas_matmul_bias(a, w, b, *, relu, out_dtype):
    """act(a @ w + b); returns padded (Mpad, Npad) plus (M, Cout, Mpad, Npad)."""
    M, K = a.shape
    Cout = w.shape[1]
    tm, Mpad = _m_tiling(M)
    tk, Kpad = _k_tiling(K)
    tn, Npad = _n_tiling(Cout)
    n_m, n_n, n_k = Mpad // tm, Npad // tn, Kpad // tk

    a_p = _pad2(a, Mpad, Kpad, jnp.bfloat16)
    w_p = _pad2(w, Kpad, Npad, jnp.bfloat16)
    b_p = _pad2(b, 1, Npad, jnp.float32)

    out_bytes = Mpad * Npad * jnp.dtype(out_dtype).itemsize
    cost = _matmul_cost(n_m, n_n, a_p, w_p, b_p, out_bytes)

    if n_k == 1:
        out = pl.pallas_call(
            functools.partial(_mm_bias_1k_kernel, relu=relu),
            out_shape=jax.ShapeDtypeStruct((Mpad, Npad), out_dtype),
            grid=(n_m, n_n),
            in_specs=[pl.BlockSpec((tm, Kpad), lambda i, j: (i, 0)),
                      pl.BlockSpec((Kpad, tn), lambda i, j: (0, j)),
                      pl.BlockSpec((1, tn), lambda i, j: (0, j))],
            out_specs=pl.BlockSpec((tm, tn), lambda i, j: (i, j)),
            compiler_params=pltpu.CompilerParams(
                dimension_semantics=("parallel", "parallel"),
                vmem_limit_bytes=_VMEM_LIMIT),
            cost_estimate=cost,
        )(a_p, w_p, b_p)
    else:
        out = pl.pallas_call(
            functools.partial(_mm_bias_multik_kernel, n_k=n_k, relu=relu),
            out_shape=jax.ShapeDtypeStruct((Mpad, Npad), out_dtype),
            grid=(n_m, n_n, n_k),
            in_specs=[pl.BlockSpec((tm, tk), lambda i, j, k: (i, k)),
                      pl.BlockSpec((tk, tn), lambda i, j, k: (k, j)),
                      pl.BlockSpec((1, tn), lambda i, j, k: (0, j))],
            out_specs=pl.BlockSpec((tm, tn), lambda i, j, k: (i, j)),
            scratch_shapes=[pltpu.VMEM((tm, tn), jnp.float32)],
            compiler_params=pltpu.CompilerParams(
                dimension_semantics=("parallel", "parallel", "arbitrary"),
                vmem_limit_bytes=_VMEM_LIMIT),
            cost_estimate=cost,
        )(a_p, w_p, b_p)
    return out, (M, Cout, Mpad, Npad)


def pallas_matmul_bias_stats(a, w, b, *, out_dtype):
    """a @ w + b (no activation) + packed per-M-tile BN partial sums."""
    M, K = a.shape
    Cout = w.shape[1]
    tm, Mpad = _m_tiling(M)
    tk, Kpad = _k_tiling(K)
    tn, Npad = _n_tiling(Cout)
    n_m, n_n, n_k = Mpad // tm, Npad // tn, Kpad // tk

    a_p = _pad2(a, Mpad, Kpad, jnp.bfloat16)
    w_p = _pad2(w, Kpad, Npad, jnp.bfloat16)
    b_p = _pad2(b, 1, Npad, jnp.float32)

    out_bytes = Mpad * Npad * jnp.dtype(out_dtype).itemsize
    stats_bytes = n_m * 8 * Npad * 4
    cost = _matmul_cost(n_m, n_n, a_p, w_p, b_p, out_bytes, extra=stats_bytes)

    out_shapes = (jax.ShapeDtypeStruct((Mpad, Npad), out_dtype),
                  jax.ShapeDtypeStruct((n_m * 8, Npad), jnp.float32))
    o_spec2 = pl.BlockSpec((tm, tn), lambda i, j: (i, j))
    s_spec2 = pl.BlockSpec((8, tn), lambda i, j: (i, j))

    if n_k == 1:
        y, ps = pl.pallas_call(
            functools.partial(_mm_bias_stats_1k_kernel,
                              m_true=M, tm=tm, tn=tn),
            out_shape=out_shapes,
            grid=(n_m, n_n),
            in_specs=[pl.BlockSpec((tm, Kpad), lambda i, j: (i, 0)),
                      pl.BlockSpec((Kpad, tn), lambda i, j: (0, j)),
                      pl.BlockSpec((1, tn), lambda i, j: (0, j))],
            out_specs=(o_spec2, s_spec2),
            compiler_params=pltpu.CompilerParams(
                dimension_semantics=("parallel", "parallel"),
                vmem_limit_bytes=_VMEM_LIMIT),
            cost_estimate=cost,
        )(a_p, w_p, b_p)
    else:
        y, ps = pl.pallas_call(
            functools.partial(_mm_bias_stats_multik_kernel,
                              n_k=n_k, m_true=M, tm=tm, tn=tn),
            out_shape=out_shapes,
            grid=(n_m, n_n, n_k),
            in_specs=[pl.BlockSpec((tm, tk), lambda i, j, k: (i, k)),
                      pl.BlockSpec((tk, tn), lambda i, j, k: (k, j)),
                      pl.BlockSpec((1, tn), lambda i, j, k: (0, j))],
            out_specs=(pl.BlockSpec((tm, tn), lambda i, j, k: (i, j)),
                       pl.BlockSpec((8, tn), lambda i, j, k: (i, j))),
            scratch_shapes=[pltpu.VMEM((tm, tn), jnp.float32)],
            compiler_params=pltpu.CompilerParams(
                dimension_semantics=("parallel", "parallel", "arbitrary"),
                vmem_limit_bytes=_VMEM_LIMIT),
            cost_estimate=cost,
        )(a_p, w_p, b_p)

    # Reduce per-tile partials (tiny: (n_m, Cout)).
    ps = ps.reshape(n_m, 8, Npad)
    s1 = jnp.sum(ps[:, 0, :Cout], axis=0, keepdims=True)
    s2 = jnp.sum(ps[:, 1, :Cout], axis=0, keepdims=True)
    return y, s1, s2, (M, Cout, Mpad, Npad)


def pallas_affine_relu(y_pad, scale, shift, *, out_dtype):
    """Tiled elementwise BN-apply + ReLU with large lane-dense blocks."""
    Mpad, Npad = y_pad.shape
    tm = _ew_m_tile(Mpad)
    s_p = _pad2(scale, 1, Npad, jnp.float32)
    t_p = _pad2(shift, 1, Npad, jnp.float32)

    y_spec = pl.BlockSpec((tm, Npad), lambda i: (i, 0))
    v_spec = pl.BlockSpec((1, Npad), lambda i: (0, 0))
    cost = pl.CostEstimate(
        flops=2 * Mpad * Npad, transcendentals=0,
        bytes_accessed=(y_pad.size * y_pad.dtype.itemsize
                        + Mpad * Npad * jnp.dtype(out_dtype).itemsize
                        + 2 * (Mpad // tm) * Npad * 4))

    return pl.pallas_call(
        _affine_relu_kernel,
        out_shape=jax.ShapeDtypeStruct((Mpad, Npad), out_dtype),
        grid=(Mpad // tm,),
        in_specs=[y_spec, v_spec, v_spec],
        out_specs=y_spec,
        compiler_params=pltpu.CompilerParams(
            dimension_semantics=("parallel",),
            vmem_limit_bytes=_VMEM_LIMIT),
        cost_estimate=cost,
    )(y_pad, s_p, t_p)


# ----------------------------------------------------------------------------
# Plain-JAX glue: im2col, max-pool, bilinear upsample (align_corners=True)
# TODO(synk): fold these into kernel prologues/epilogues (halo-DMA im2col,
#             in-register 2x2 max before store, upsample via A-load index_map).
# ----------------------------------------------------------------------------
def im2col3x3(x):
    """NHWC -> (N*H*W, 9*C) patches, flattened in (kh, kw, cin) order."""
    N, H, W, C = x.shape
    xp = jnp.pad(x, ((0, 0), (1, 1), (1, 1), (0, 0)))
    cols = [xp[:, dy:dy + H, dx:dx + W, :] for dy in range(3) for dx in range(3)]
    return jnp.concatenate(cols, axis=-1).reshape(N * H * W, 9 * C)


def maxpool2x2(x):
    N, H, W, C = x.shape
    x = x.reshape(N, H // 2, 2, W // 2, 2, C)
    return jnp.max(x, axis=(2, 4))


def upsample2x_bilinear_ac(x):
    """F.interpolate(scale_factor=2, mode='bilinear', align_corners=True)."""
    N, H, W, C = x.shape
    Ho, Wo = 2 * H, 2 * W
    dt = x.dtype

    def coords(n_in, n_out):
        if n_in == 1:
            z = jnp.zeros((n_out,), jnp.int32)
            return z, z, jnp.zeros((n_out,), jnp.float32)
        pos = jnp.arange(n_out, dtype=jnp.float32) * (n_in - 1) / (n_out - 1)
        i0 = jnp.clip(jnp.floor(pos).astype(jnp.int32), 0, n_in - 2)
        return i0, i0 + 1, pos - i0.astype(jnp.float32)

    h0, h1, fh = coords(H, Ho)
    w0, w1, fw = coords(W, Wo)
    xf = x.astype(jnp.float32)
    xh0, xh1 = xf[:, h0], xf[:, h1]
    x00, x01 = xh0[:, :, w0], xh0[:, :, w1]
    x10, x11 = xh1[:, :, w0], xh1[:, :, w1]
    fh = fh.reshape(1, Ho, 1, 1)
    fw = fw.reshape(1, 1, Wo, 1)
    top = x00 * (1.0 - fw) + x01 * fw
    bot = x10 * (1.0 - fw) + x11 * fw
    return (top * (1.0 - fh) + bot * fh).astype(dt)


# ----------------------------------------------------------------------------
# ConvBlock: Conv3x3 -> ReLU -> Conv3x3 -> BatchNorm(train) -> ReLU
# (matches the PyTorch ConvBlock ordering exactly)
# ----------------------------------------------------------------------------
def conv3x3_bias_relu(x, w, b):
    N, H, W_, Cin = x.shape
    Cout = w.shape[-1]
    a = im2col3x3(x.astype(jnp.bfloat16))
    y, (M, _, _, _) = pallas_matmul_bias(
        a, w.reshape(9 * Cin, Cout), b, relu=True, out_dtype=jnp.bfloat16)
    return y[:M, :Cout].reshape(N, H, W_, Cout)


def conv3x3_bias_bn_relu(x, w, b, gamma, beta):
    N, H, W_, Cin = x.shape
    Cout = w.shape[-1]
    a = im2col3x3(x.astype(jnp.bfloat16))
    y, s1, s2, (M, _, _, _) = pallas_matmul_bias_stats(
        a, w.reshape(9 * Cin, Cout), b, out_dtype=jnp.bfloat16)
    # Training-mode BatchNorm: biased batch statistics over all N*H*W rows,
    # finalized in f32 from cross-tile partial sums (tiny per-channel math).
    # TODO(synk): switch to centered/Welford stats if |mean| >> std.
    mean = s1 / M
    var = jnp.maximum(s2 / M - mean * mean, 0.0)
    scale = gamma * lax.rsqrt(var + _BN_EPS)
    shift = beta - mean * scale
    out = pallas_affine_relu(y, scale, shift, out_dtype=jnp.bfloat16)
    return out[:M, :Cout].reshape(N, H, W_, Cout)


def conv_block(x, p):
    h = conv3x3_bias_relu(x, p["w1"], p["b1"])
    return conv3x3_bias_bn_relu(h, p["w2"], p["b2"], p["gamma"], p["beta"])


def conv1x1_bias(x, w, b):
    N, H, W_, Cin = x.shape
    Cout = w.shape[-1]
    a = x.reshape(N * H * W_, Cin).astype(jnp.bfloat16)
    y, (M, _, _, _) = pallas_matmul_bias(a, w, b, relu=False,
                                         out_dtype=jnp.float32)
    return y[:M, :Cout].reshape(N, H, W_, Cout)


# ----------------------------------------------------------------------------
# Parameter construction (deterministic, synthetic)
# ----------------------------------------------------------------------------
def make_params(key, input_channels=1, output_channels=1, base_ch=8):
    Nc = [base_ch * 2 ** i for i in range(5)]

    def cb_params(key, cin, cout):
        k1, k2, k3, k4 = jax.random.split(key, 4)
        return dict(
            w1=0.1 * jax.random.normal(k1, (3, 3, cin, cout), jnp.float32),
            b1=0.01 * jax.random.normal(k2, (1, cout), jnp.float32),
            w2=0.1 * jax.random.normal(k3, (3, 3, cout, cout), jnp.float32),
            b2=0.01 * jax.random.normal(k4, (1, cout), jnp.float32),
            gamma=jnp.ones((1, cout), jnp.float32),
            beta=jnp.zeros((1, cout), jnp.float32),
        )

    names_io = [
        ("conv0_0", input_channels, Nc[0]),
        ("conv1_0", Nc[0], Nc[1]),
        ("conv2_0", Nc[1], Nc[2]),
        ("conv3_0", Nc[2], Nc[3]),
        ("conv4_0", Nc[3], Nc[4]),
        ("conv0_1", Nc[0] + Nc[1], Nc[0]),
        ("conv1_1", Nc[1] + Nc[2], Nc[1]),
        ("conv2_1", Nc[2] + Nc[3], Nc[2]),
        ("conv3_1", Nc[3] + Nc[4], Nc[3]),
        ("conv0_2", Nc[0] * 2 + Nc[1], Nc[0]),
        ("conv1_2", Nc[1] * 2 + Nc[2], Nc[1]),
        ("conv2_2", Nc[2] * 2 + Nc[3], Nc[2]),
        ("conv0_3", Nc[0] * 3 + Nc[1], Nc[0]),
        ("conv1_3", Nc[1] * 3 + Nc[2], Nc[1]),
        ("conv0_4", Nc[0] * 4 + Nc[1], Nc[0]),
    ]
    keys = jax.random.split(key, len(names_io) + 2)
    params = {}
    for k, (name, cin, cout) in zip(keys[:-2], names_io):
        params[name] = cb_params(k, cin, cout)
    params["final_w"] = 0.1 * jax.random.normal(
        keys[-2], (Nc[0], output_channels), jnp.float32)
    params["final_b"] = 0.01 * jax.random.normal(
        keys[-1], (1, output_channels), jnp.float32)
    return params


# ----------------------------------------------------------------------------
# UNet++ forward (mirrors the PyTorch module's forward exactly)
# ----------------------------------------------------------------------------
def unetpp_forward(x_nchw, params):
    x = jnp.transpose(x_nchw, (0, 2, 3, 1))  # NCHW -> NHWC
    up = upsample2x_bilinear_ac
    cat = lambda ts: jnp.concatenate(ts, axis=-1)

    X0_0 = conv_block(x, params["conv0_0"])
    X1_0 = conv_block(maxpool2x2(X0_0), params["conv1_0"])
    X2_0 = conv_block(maxpool2x2(X1_0), params["conv2_0"])
    X3_0 = conv_block(maxpool2x2(X2_0), params["conv3_0"])
    X4_0 = conv_block(maxpool2x2(X3_0), params["conv4_0"])

    X0_1 = conv_block(cat([X0_0, up(X1_0)]), params["conv0_1"])
    X1_1 = conv_block(cat([X1_0, up(X2_0)]), params["conv1_1"])
    X2_1 = conv_block(cat([X2_0, up(X3_0)]), params["conv2_1"])
    X3_1 = conv_block(cat([X3_0, up(X4_0)]), params["conv3_1"])

    X0_2 = conv_block(cat([X0_0, X0_1, up(X1_1)]), params["conv0_2"])
    X1_2 = conv_block(cat([X1_0, X1_1, up(X2_1)]), params["conv1_2"])
    X2_2 = conv_block(cat([X2_0, X2_1, up(X3_1)]), params["conv2_2"])

    X0_3 = conv_block(cat([X0_0, X0_1, X0_2, up(X1_2)]), params["conv0_3"])
    X1_3 = conv_block(cat([X1_0, X1_1, X1_2, up(X2_2)]), params["conv1_3"])

    X0_4 = conv_block(cat([X0_0, X0_1, X0_2, X0_3, up(X1_3)]), params["conv0_4"])

    final = conv1x1_bias(X0_4, params["final_w"], params["final_b"])
    return {"final": jnp.transpose(final, (0, 3, 1, 2))}  # back to NCHW


if __name__ == "__main__":
    key = jax.random.PRNGKey(0)
    k_param, k_input = jax.random.split(key)

    # Small shapes: batch=2, input_channels=1, spatial=16x16, base_ch=8.
    params = make_params(k_param, input_channels=1, output_channels=1, base_ch=8)
    x = jax.random.normal(k_input, (2, 1, 16, 16), jnp.float32)

    fwd = jax.jit(unetpp_forward)
    out = fwd(x, params)
    jax.block_until_ready(out)

    assert out["final"].shape == (2, 1, 16, 16)
    assert out["final"].dtype == jnp.float32
    assert bool(jnp.all(jnp.isfinite(out["final"])))
    print("KERNEL_OK")
</pallas_src>

<mosaic_0001>
module attributes {stable_mosaic.version = 11 : i64} {
  func.func @_mm_bias_1k_kernel(%arg0: i32, %arg1: i32, %arg2: memref<256x128xbf16, #tpu.memory_space<vmem>>, %arg3: memref<128x128xbf16, #tpu.memory_space<vmem>>, %arg4: memref<1x128xf32, #tpu.memory_space<vmem>>, %arg5: memref<256x128xbf16, #tpu.memory_space<vmem>>) attributes {dimension_semantics = [#tpu.dimension_semantics<parallel>, #tpu.dimension_semantics<parallel>], iteration_bounds = array<i64: 2, 1>, scalar_prefetch = 0 : i64, scratch_operands = 0 : i64, tpu.core_type = #tpu.core_type<tc>, window_params = [{transform_indices = @transform_0, window_bounds = array<i64: 256, 128>}, {transform_indices = @transform_1, window_bounds = array<i64: 128, 128>}, {transform_indices = @transform_2, window_bounds = array<i64: 1, 128>}, {transform_indices = @transform_3, window_bounds = array<i64: 256, 128>}]} {
    %c0 = arith.constant 0 : index
    %c0_0 = arith.constant 0 : index
    %0 = vector.load %arg2[%c0, %c0_0] : memref<256x128xbf16, #tpu.memory_space<vmem>>, vector<256x128xbf16>
    %c0_1 = arith.constant 0 : index
    %c0_2 = arith.constant 0 : index
    %1 = vector.load %arg3[%c0_1, %c0_2] : memref<128x128xbf16, #tpu.memory_space<vmem>>, vector<128x128xbf16>
    %cst = arith.constant dense<0.000000e+00> : vector<256x128xf32>
    %2 = tpu.matmul %0, %1, %cst {dimension_numbers = #tpu.dot_dimension_numbers<[1], [0], [0], [1], [0, 0, 1, 1], [], []>} : vector<256x128xbf16>, vector<128x128xbf16>, vector<256x128xf32> -> vector<256x128xf32>
    %c0_3 = arith.constant 0 : index
    %c0_4 = arith.constant 0 : index
    %3 = vector.load %arg4[%c0_3, %c0_4] : memref<1x128xf32, #tpu.memory_space<vmem>>, vector<1x128xf32>
    %4 = vector.broadcast %3 : vector<1x128xf32> to vector<256x128xf32>
    %5 = arith.addf %2, %4 : vector<256x128xf32>
    %cst_5 = arith.constant 0.000000e+00 : f32
    %6 = vector.broadcast %cst_5 : f32 to vector<256x128xf32>
    %7 = arith.maximumf %5, %6 : vector<256x128xf32>
    %8 = arith.truncf %7 : vector<256x128xf32> to vector<256x128xbf16>
    %c0_6 = arith.constant 0 : index
    %c0_7 = arith.constant 0 : index
    %9 = vector.load %arg5[%c0_6, %c0_7] : memref<256x128xbf16, #tpu.memory_space<vmem>>, vector<256x128xbf16>
    tpu.vector_store %arg5[%c0_6, %c0_7], %8 {strides = array<i32>} : memref<256x128xbf16, #tpu.memory_space<vmem>>, vector<256x128xbf16>,
    return
  }
  func.func @transform_0(%arg0: i32, %arg1: i32) -> (i32, i32) {
    %c0_i32 = arith.constant 0 : i32
    %c0_i32_0 = arith.constant 0 : i32
    return %arg0, %c0_i32 : i32, i32
  }
  func.func @transform_1(%arg0: i32, %arg1: i32) -> (i32, i32) {
    %c0_i32 = arith.constant 0 : i32
    %c0_i32_0 = arith.constant 0 : i32
    return %c0_i32, %arg1 : i32, i32
  }
  func.func @transform_2(%arg0: i32, %arg1: i32) -> (i32, i32) {
    %c0_i32 = arith.constant 0 : i32
    %c0_i32_0 = arith.constant 0 : i32
    return %c0_i32, %arg1 : i32, i32
  }
  func.func @transform_3(%arg0: i32, %arg1: i32) -> (i32, i32) {
    %c0_i32 = arith.constant 0 : i32
    return %arg0, %arg1 : i32, i32
  }
}

module attributes {stable_mosaic.version = 11 : i64} {
  func.func @_mm_bias_stats_1k_kernel(%arg0: i32, %arg1: i32, %arg2: memref<256x128xbf16, #tpu.memory_space<vmem>>, %arg3: memref<128x128xbf16, #tpu.memory_space<vmem>>, %arg4: memref<1x128xf32, #tpu.memory_space<vmem>>, %arg5: memref<256x128xbf16, #tpu.memory_space<vmem>>, %arg6: memref<8x128xf32, #tpu.memory_space<vmem>>) attributes {dimension_semantics = [#tpu.dimension_semantics<parallel>, #tpu.dimension_semantics<parallel>], iteration_bounds = array<i64: 2, 1>, scalar_prefetch = 0 : i64, scratch_operands = 0 : i64, tpu.core_type = #tpu.core_type<tc>, window_params = [{transform_indices = @transform_0, window_bounds = array<i64: 256, 128>}, {transform_indices = @transform_1, window_bounds = array<i64: 128, 128>}, {transform_indices = @transform_2, window_bounds = array<i64: 1, 128>}, {transform_indices = @transform_3, window_bounds = array<i64: 256, 128>}, {transform_indices = @transform_4, window_bounds = array<i64: 8, 128>}]} {
    %c0 = arith.constant 0 : index
    %c0_0 = arith.constant 0 : index
    %0 = vector.load %arg2[%c0, %c0_0] : memref<256x128xbf16, #tpu.memory_space<vmem>>, vector<256x128xbf16>
    %c0_1 = arith.constant 0 : index
    %c0_2 = arith.constant 0 : index
    %1 = vector.load %arg3[%c0_1, %c0_2] : memref<128x128xbf16, #tpu.memory_space<vmem>>, vector<128x128xbf16>
    %cst = arith.constant dense<0.000000e+00> : vector<256x128xf32>
    %2 = tpu.matmul %0, %1, %cst {dimension_numbers = #tpu.dot_dimension_numbers<[1], [0], [0], [1], [0, 0, 1, 1], [], []>} : vector<256x128xbf16>, vector<128x128xbf16>, vector<256x128xf32> -> vector<256x128xf32>
    %c0_3 = arith.constant 0 : index
    %c0_4 = arith.constant 0 : index
    %3 = vector.load %arg4[%c0_3, %c0_4] : memref<1x128xf32, #tpu.memory_space<vmem>>, vector<1x128xf32>
    %4 = vector.broadcast %3 : vector<1x128xf32> to vector<256x128xf32>
    %5 = arith.addf %2, %4 : vector<256x128xf32>
    %6 = arith.truncf %5 : vector<256x128xf32> to vector<256x128xbf16>
    %c0_5 = arith.constant 0 : index
    %c0_6 = arith.constant 0 : index
    %7 = vector.load %arg5[%c0_5, %c0_6] : memref<256x128xbf16, #tpu.memory_space<vmem>>, vector<256x128xbf16>
    tpu.vector_store %arg5[%c0_5, %c0_6], %6 {strides = array<i32>} : memref<256x128xbf16, #tpu.memory_space<vmem>>, vector<256x128xbf16>,
    %8 = arith.truncf %5 : vector<256x128xf32> to vector<256x128xbf16>
    %9 = arith.extf %8 : vector<256x128xbf16> to vector<256x128xf32>
    %10 = tpu.iota {dimensions = array<i32: 0>} : vector<256x1xi32>
    %c256_i32 = arith.constant 256 : i32
    %11 = arith.muli %arg0, %c256_i32 : i32
    %12 = vector.broadcast %11 : i32 to vector<256x1xi32>
    %13 = arith.addi %10, %12 : vector<256x1xi32>
    %c512_i32 = arith.constant 512 : i32
    %14 = vector.broadcast %c512_i32 : i32 to vector<256x1xi32>
    %15 = arith.cmpi slt, %13, %14 : vector<256x1xi32>
    %16 = arith.extui %15 : vector<256x1xi1> to vector<256x1xi32>
    %17 = arith.sitofp %16 : vector<256x1xi32> to vector<256x1xf32>
    %18 = vector.broadcast %17 : vector<256x1xf32> to vector<256x128xf32>
    %19 = arith.mulf %9, %18 : vector<256x128xf32>
    %cst_7 = arith.constant dense<0.000000e+00> : vector<128xf32>
    %20 = vector.multi_reduction <add>, %19, %cst_7 [0] : vector<256x128xf32> to vector<128xf32>
    %21 = vector.shape_cast %20 : vector<128xf32> to vector<1x128xf32>
    %22 = arith.mulf %19, %19 : vector<256x128xf32>
    %cst_8 = arith.constant dense<0.000000e+00> : vector<128xf32>
    %23 = vector.multi_reduction <add>, %22, %cst_8 [0] : vector<256x128xf32> to vector<128xf32>
    %24 = vector.shape_cast %23 : vector<128xf32> to vector<1x128xf32>
    %25 = tpu.iota {dimensions = array<i32: 0>} : vector<8x128xi32>
    %c0_i32 = arith.constant 0 : i32
    %26 = vector.broadcast %c0_i32 : i32 to vector<8x128xi32>
    %27 = arith.cmpi eq, %25, %26 : vector<8x128xi32>
    %28 = vector.shape_cast %21 : vector<1x128xf32> to vector<1x128xf32>
    %29 = vector.broadcast %28 : vector<1x128xf32> to vector<8x128xf32>
    %cst_9 = arith.constant 0.000000e+00 : f32
    %30 = vector.broadcast %cst_9 : f32 to vector<8x128xf32>
    %31 = arith.select %27, %29, %30 : vector<8x128xi1>, vector<8x128xf32>
    %c1_i32 = arith.constant 1 : i32
    %32 = vector.broadcast %c1_i32 : i32 to vector<8x128xi32>
    %33 = arith.cmpi eq, %25, %32 : vector<8x128xi32>
    %34 = vector.shape_cast %24 : vector<1x128xf32> to vector<1x128xf32>
    %35 = vector.broadcast %34 : vector<1x128xf32> to vector<8x128xf32>
    %36 = arith.select %33, %35, %31 : vector<8x128xi1>, vector<8x128xf32>
    %c0_10 = arith.constant 0 : index
    %c0_11 = arith.constant 0 : index
    %37 = vector.load %arg6[%c0_10, %c0_11] : memref<8x128xf32, #tpu.memory_space<vmem>>, vector<8x128xf32>
    tpu.vector_store %arg6[%c0_10, %c0_11], %36 {strides = array<i32>} : memref<8x128xf32, #tpu.memory_space<vmem>>, vector<8x128xf32>,
    return
  }
  func.func @transform_0(%arg0: i32, %arg1: i32) -> (i32, i32) {
    %c0_i32 = arith.constant 0 : i32
    %c0_i32_0 = arith.constant 0 : i32
    return %arg0, %c0_i32 : i32, i32
  }
  func.func @transform_1(%arg0: i32, %arg1: i32) -> (i32, i32) {
    %c0_i32 = arith.constant 0 : i32
    %c0_i32_0 = arith.constant 0 : i32
    return %c0_i32, %arg1 : i32, i32
  }
  func.func @transform_2(%arg0: i32, %arg1: i32) -> (i32, i32) {
    %c0_i32 = arith.constant 0 : i32
    %c0_i32_0 = arith.constant 0 : i32
    return %c0_i32, %arg1 : i32, i32
  }
  func.func @transform_3(%arg0: i32, %arg1: i32) -> (i32, i32) {
    %c0_i32 = arith.constant 0 : i32
    return %arg0, %arg1 : i32, i32
  }
  func.func @transform_4(%arg0: i32, %arg1: i32) -> (i32, i32) {
    %c0_i32 = arith.constant 0 : i32
    return %arg0, %arg1 : i32, i32
  }
}

module attributes {stable_mosaic.version = 11 : i64} {
  func.func @_affine_relu_kernel(%arg0: i32, %arg1: memref<512x128xbf16, #tpu.memory_space<vmem>>, %arg2: memref<1x128xf32, #tpu.memory_space<vmem>>, %arg3: memref<1x128xf32, #tpu.memory_space<vmem>>, %arg4: memref<512x128xbf16, #tpu.memory_space<vmem>>) attributes {dimension_semantics = [#tpu.dimension_semantics<parallel>], iteration_bounds = array<i64: 1>, scalar_prefetch = 0 : i64, scratch_operands = 0 : i64, tpu.core_type = #tpu.core_type<tc>, window_params = [{transform_indices = @transform_0, window_bounds = array<i64: 512, 128>}, {pipeline_mode = #tpu.pipeline_mode<synchronous>, transform_indices = @transform_1, window_bounds = array<i64: 1, 128>}, {pipeline_mode = #tpu.pipeline_mode<synchronous>, transform_indices = @transform_2, window_bounds = array<i64: 1, 128>}, {transform_indices = @transform_3, window_bounds = array<i64: 512, 128>}]} {
    %c0 = arith.constant 0 : index
    %c0_0 = arith.constant 0 : index
    %0 = vector.load %arg1[%c0, %c0_0] : memref<512x128xbf16, #tpu.memory_space<vmem>>, vector<512x128xbf16>
    %1 = arith.extf %0 : vector<512x128xbf16> to vector<512x128xf32>
    %c0_1 = arith.constant 0 : index
    %c0_2 = arith.constant 0 : index
    %2 = vector.load %arg2[%c0_1, %c0_2] : memref<1x128xf32, #tpu.memory_space<vmem>>, vector<1x128xf32>
    %3 = vector.broadcast %2 : vector<1x128xf32> to vector<512x128xf32>
    %4 = arith.mulf %1, %3 : vector<512x128xf32>
    %c0_3 = arith.constant 0 : index
    %c0_4 = arith.constant 0 : index
    %5 = vector.load %arg3[%c0_3, %c0_4] : memref<1x128xf32, #tpu.memory_space<vmem>>, vector<1x128xf32>
    %6 = vector.broadcast %5 : vector<1x128xf32> to vector<512x128xf32>
    %7 = arith.addf %4, %6 : vector<512x128xf32>
    %cst = arith.constant 0.000000e+00 : f32
    %8 = vector.broadcast %cst : f32 to vector<512x128xf32>
    %9 = arith.maximumf %7, %8 : vector<512x128xf32>
    %10 = arith.truncf %9 : vector<512x128xf32> to vector<512x128xbf16>
    %c0_5 = arith.constant 0 : index
    %c0_6 = arith.constant 0 : index
    %11 = vector.load %arg4[%c0_5, %c0_6] : memref<512x128xbf16, #tpu.memory_space<vmem>>, vector<512x128xbf16>
    tpu.vector_store %arg4[%c0_5, %c0_6], %10 {strides = array<i32>} : memref<512x128xbf16, #tpu.memory_space<vmem>>, vector<512x128xbf16>,
    return
  }
  func.func @transform_0(%arg0: i32) -> (i32, i32) {
    %c0_i32 = arith.constant 0 : i32
    %c0_i32_0 = arith.constant 0 : i32
    return %arg0, %c0_i32 : i32, i32
  }
  func.func @transform_1(%arg0: i32) -> (i32, i32) {
    %c0_i32 = arith.constant 0 : i32
    %c0_i32_0 = arith.constant 0 : i32
    %c0_i32_1 = arith.constant 0 : i32
    return %c0_i32, %c0_i32_0 : i32, i32
  }
  func.func @transform_2(%arg0: i32) -> (i32, i32) {
    %c0_i32 = arith.constant 0 : i32
    %c0_i32_0 = arith.constant 0 : i32
    %c0_i32_1 = arith.constant 0 : i32
    return %c0_i32, %c0_i32_0 : i32, i32
  }
  func.func @transform_3(%arg0: i32) -> (i32, i32) {
    %c0_i32 = arith.constant 0 : i32
    %c0_i32_0 = arith.constant 0 : i32
    return %arg0, %c0_i32 : i32, i32
  }
}

module attributes {stable_mosaic.version = 11 : i64} {
  func.func @_mm_bias_1k_kernel(%arg0: i32, %arg1: i32, %arg2: memref<64x128xbf16, #tpu.memory_space<vmem>>, %arg3: memref<128x128xbf16, #tpu.memory_space<vmem>>, %arg4: memref<1x128xf32, #tpu.memory_space<vmem>>, %arg5: memref<64x128xbf16, #tpu.memory_space<vmem>>) attributes {dimension_semantics = [#tpu.dimension_semantics<parallel>, #tpu.dimension_semantics<parallel>], iteration_bounds = array<i64: 2, 1>, scalar_prefetch = 0 : i64, scratch_operands = 0 : i64, tpu.core_type = #tpu.core_type<tc>, window_params = [{transform_indices = @transform_0, window_bounds = array<i64: 64, 128>}, {transform_indices = @transform_1, window_bounds = array<i64: 128, 128>}, {transform_indices = @transform_2, window_bounds = array<i64: 1, 128>}, {transform_indices = @transform_3, window_bounds = array<i64: 64, 128>}]} {
    %c0 = arith.constant 0 : index
    %c0_0 = arith.constant 0 : index
    %0 = vector.load %arg2[%c0, %c0_0] : memref<64x128xbf16, #tpu.memory_space<vmem>>, vector<64x128xbf16>
    %c0_1 = arith.constant 0 : index
    %c0_2 = arith.constant 0 : index
    %1 = vector.load %arg3[%c0_1, %c0_2] : memref<128x128xbf16, #tpu.memory_space<vmem>>, vector<128x128xbf16>
    %cst = arith.constant dense<0.000000e+00> : vector<64x128xf32>
    %2 = tpu.matmul %0, %1, %cst {dimension_numbers = #tpu.dot_dimension_numbers<[1], [0], [0], [1], [0, 0, 1, 1], [], []>} : vector<64x128xbf16>, vector<128x128xbf16>, vector<64x128xf32> -> vector<64x128xf32>
    %c0_3 = arith.constant 0 : index
    %c0_4 = arith.constant 0 : index
    %3 = vector.load %arg4[%c0_3, %c0_4] : memref<1x128xf32, #tpu.memory_space<vmem>>, vector<1x128xf32>
    %4 = vector.broadcast %3 : vector<1x128xf32> to vector<64x128xf32>
    %5 = arith.addf %2, %4 : vector<64x128xf32>
    %cst_5 = arith.constant 0.000000e+00 : f32
    %6 = vector.broadcast %cst_5 : f32 to vector<64x128xf32>
    %7 = arith.maximumf %5, %6 : vector<64x128xf32>
    %8 = arith.truncf %7 : vector<64x128xf32> to vector<64x128xbf16>
    %c0_6 = arith.constant 0 : index
    %c0_7 = arith.constant 0 : index
    %9 = vector.load %arg5[%c0_6, %c0_7] : memref<64x128xbf16, #tpu.memory_space<vmem>>, vector<64x128xbf16>
    tpu.vector_store %arg5[%c0_6, %c0_7], %8 {strides = array<i32>} : memref<64x128xbf16, #tpu.memory_space<vmem>>, vector<64x128xbf16>,
    return
  }
  func.func @transform_0(%arg0: i32, %arg1: i32) -> (i32, i32) {
    %c0_i32 = arith.constant 0 : i32
    %c0_i32_0 = arith.constant 0 : i32
    return %arg0, %c0_i32 : i32, i32
  }
  func.func @transform_1(%arg0: i32, %arg1: i32) -> (i32, i32) {
    %c0_i32 = arith.constant 0 : i32
    %c0_i32_0 = arith.constant 0 : i32
    return %c0_i32, %arg1 : i32, i32
  }
  func.func @transform_2(%arg0: i32, %arg1: i32) -> (i32, i32) {
    %c0_i32 = arith.constant 0 : i32
    %c0_i32_0 = arith.constant 0 : i32
    return %c0_i32, %arg1 : i32, i32
  }
  func.func @transform_3(%arg0: i32, %arg1: i32) -> (i32, i32) {
    %c0_i32 = arith.constant 0 : i32
    return %arg0, %arg1 : i32, i32
  }
}

module attributes {stable_mosaic.version = 11 : i64} {
  func.func @_mm_bias_stats_1k_kernel(%arg0: i32, %arg1: i32, %arg2: memref<64x256xbf16, #tpu.memory_space<vmem>>, %arg3: memref<256x128xbf16, #tpu.memory_space<vmem>>, %arg4: memref<1x128xf32, #tpu.memory_space<vmem>>, %arg5: memref<64x128xbf16, #tpu.memory_space<vmem>>, %arg6: memref<8x128xf32, #tpu.memory_space<vmem>>) attributes {dimension_semantics = [#tpu.dimension_semantics<parallel>, #tpu.dimension_semantics<parallel>], iteration_bounds = array<i64: 2, 1>, scalar_prefetch = 0 : i64, scratch_operands = 0 : i64, tpu.core_type = #tpu.core_type<tc>, window_params = [{transform_indices = @transform_0, window_bounds = array<i64: 64, 256>}, {transform_indices = @transform_1, window_bounds = array<i64: 256, 128>}, {transform_indices = @transform_2, window_bounds = array<i64: 1, 128>}, {transform_indices = @transform_3, window_bounds = array<i64: 64, 128>}, {transform_indices = @transform_4, window_bounds = array<i64: 8, 128>}]} {
    %c0 = arith.constant 0 : index
    %c0_0 = arith.constant 0 : index
    %0 = vector.load %arg2[%c0, %c0_0] : memref<64x256xbf16, #tpu.memory_space<vmem>>, vector<64x256xbf16>
    %c0_1 = arith.constant 0 : index
    %c0_2 = arith.constant 0 : index
    %1 = vector.load %arg3[%c0_1, %c0_2] : memref<256x128xbf16, #tpu.memory_space<vmem>>, vector<256x128xbf16>
    %cst = arith.constant dense<0.000000e+00> : vector<64x128xf32>
    %2 = tpu.matmul %0, %1, %cst {dimension_numbers = #tpu.dot_dimension_numbers<[1], [0], [0], [1], [0, 0, 1, 1], [], []>} : vector<64x256xbf16>, vector<256x128xbf16>, vector<64x128xf32> -> vector<64x128xf32>
    %c0_3 = arith.constant 0 : index
    %c0_4 = arith.constant 0 : index
    %3 = vector.load %arg4[%c0_3, %c0_4] : memref<1x128xf32, #tpu.memory_space<vmem>>, vector<1x128xf32>
    %4 = vector.broadcast %3 : vector<1x128xf32> to vector<64x128xf32>
    %5 = arith.addf %2, %4 : vector<64x128xf32>
    %6 = arith.truncf %5 : vector<64x128xf32> to vector<64x128xbf16>
    %c0_5 = arith.constant 0 : index
    %c0_6 = arith.constant 0 : index
    %7 = vector.load %arg5[%c0_5, %c0_6] : memref<64x128xbf16, #tpu.memory_space<vmem>>, vector<64x128xbf16>
    tpu.vector_store %arg5[%c0_5, %c0_6], %6 {strides = array<i32>} : memref<64x128xbf16, #tpu.memory_space<vmem>>, vector<64x128xbf16>,
    %8 = arith.truncf %5 : vector<64x128xf32> to vector<64x128xbf16>
    %9 = arith.extf %8 : vector<64x128xbf16> to vector<64x128xf32>
    %10 = tpu.iota {dimensions = array<i32: 0>} : vector<64x1xi32>
    %c64_i32 = arith.constant 64 : i32
    %11 = arith.muli %arg0, %c64_i32 : i32
    %12 = vector.broadcast %11 : i32 to vector<64x1xi32>
    %13 = arith.addi %10, %12 : vector<64x1xi32>
    %c128_i32 = arith.constant 128 : i32
    %14 = vector.broadcast %c128_i32 : i32 to vector<64x1xi32>
    %15 = arith.cmpi slt, %13, %14 : vector<64x1xi32>
    %16 = arith.extui %15 : vector<64x1xi1> to vector<64x1xi32>
    %17 = arith.sitofp %16 : vector<64x1xi32> to vector<64x1xf32>
    %18 = vector.broadcast %17 : vector<64x1xf32> to vector<64x128xf32>
    %19 = arith.mulf %9, %18 : vector<64x128xf32>
    %cst_7 = arith.constant dense<0.000000e+00> : vector<128xf32>
    %20 = vector.multi_reduction <add>, %19, %cst_7 [0] : vector<64x128xf32> to vector<128xf32>
    %21 = vector.shape_cast %20 : vector<128xf32> to vector<1x128xf32>
    %22 = arith.mulf %19, %19 : vector<64x128xf32>
    %cst_8 = arith.constant dense<0.000000e+00> : vector<128xf32>
    %23 = vector.multi_reduction <add>, %22, %cst_8 [0] : vector<64x128xf32> to vector<128xf32>
    %24 = vector.shape_cast %23 : vector<128xf32> to vector<1x128xf32>
    %25 = tpu.iota {dimensions = array<i32: 0>} : vector<8x128xi32>
    %c0_i32 = arith.constant 0 : i32
    %26 = vector.broadcast %c0_i32 : i32 to vector<8x128xi32>
    %27 = arith.cmpi eq, %25, %26 : vector<8x128xi32>
    %28 = vector.shape_cast %21 : vector<1x128xf32> to vector<1x128xf32>
    %29 = vector.broadcast %28 : vector<1x128xf32> to vector<8x128xf32>
    %cst_9 = arith.constant 0.000000e+00 : f32
    %30 = vector.broadcast %cst_9 : f32 to vector<8x128xf32>
    %31 = arith.select %27, %29, %30 : vector<8x128xi1>, vector<8x128xf32>
    %c1_i32 = arith.constant 1 : i32
    %32 = vector.broadcast %c1_i32 : i32 to vector<8x128xi32>
    %33 = arith.cmpi eq, %25, %32 : vector<8x128xi32>
    %34 = vector.shape_cast %24 : vector<1x128xf32> to vector<1x128xf32>
    %35 = vector.broadcast %34 : vector<1x128xf32> to vector<8x128xf32>
    %36 = arith.select %33, %35, %31 : vector<8x128xi1>, vector<8x128xf32>
    %c0_10 = arith.constant 0 : index
    %c0_11 = arith.constant 0 : index
    %37 = vector.load %arg6[%c0_10, %c0_11] : memref<8x128xf32, #tpu.memory_space<vmem>>, vector<8x128xf32>
    tpu.vector_store %arg6[%c0_10, %c0_11], %36 {strides = array<i32>} : memref<8x128xf32, #tpu.memory_space<vmem>>, vector<8x128xf32>,
    return
  }
  func.func @transform_0(%arg0: i32, %arg1: i32) -> (i32, i32) {
    %c0_i32 = arith.constant 0 : i32
    %c0_i32_0 = arith.constant 0 : i32
    return %arg0, %c0_i32 : i32, i32
  }
  func.func @transform_1(%arg0: i32, %arg1: i32) -> (i32, i32) {
    %c0_i32 = arith.constant 0 : i32
    %c0_i32_0 = arith.constant 0 : i32
    return %c0_i32, %arg1 : i32, i32
  }
  func.func @transform_2(%arg0: i32, %arg1: i32) -> (i32, i32) {
    %c0_i32 = arith.constant 0 : i32
    %c0_i32_0 = arith.constant 0 : i32
    return %c0_i32, %arg1 : i32, i32
  }
  func.func @transform_3(%arg0: i32, %arg1: i32) -> (i32, i32) {
    %c0_i32 = arith.constant 0 : i32
    return %arg0, %arg1 : i32, i32
  }
  func.func @transform_4(%arg0: i32, %arg1: i32) -> (i32, i32) {
    %c0_i32 = arith.constant 0 : i32
    return %arg0, %arg1 : i32, i32
  }
}

module attributes {stable_mosaic.version = 11 : i64} {
  func.func @_affine_relu_kernel(%arg0: i32, %arg1: memref<128x128xbf16, #tpu.memory_space<vmem>>, %arg2: memref<1x128xf32, #tpu.memory_space<vmem>>, %arg3: memref<1x128xf32, #tpu.memory_space<vmem>>, %arg4: memref<128x128xbf16, #tpu.memory_space<vmem>>) attributes {dimension_semantics = [#tpu.dimension_semantics<parallel>], iteration_bounds = array<i64: 1>, scalar_prefetch = 0 : i64, scratch_operands = 0 : i64, tpu.core_type = #tpu.core_type<tc>, window_params = [{transform_indices = @transform_0, window_bounds = array<i64: 128, 128>}, {pipeline_mode = #tpu.pipeline_mode<synchronous>, transform_indices = @transform_1, window_bounds = array<i64: 1, 128>}, {pipeline_mode = #tpu.pipeline_mode<synchronous>, transform_indices = @transform_2, window_bounds = array<i64: 1, 128>}, {transform_indices = @transform_3, window_bounds = array<i64: 128, 128>}]} {
    %c0 = arith.constant 0 : index
    %c0_0 = arith.constant 0 : index
    %0 = vector.load %arg1[%c0, %c0_0] : memref<128x128xbf16, #tpu.memory_space<vmem>>, vector<128x128xbf16>
    %1 = arith.extf %0 : vector<128x128xbf16> to vector<128x128xf32>
    %c0_1 = arith.constant 0 : index
    %c0_2 = arith.constant 0 : index
    %2 = vector.load %arg2[%c0_1, %c0_2] : memref<1x128xf32, #tpu.memory_space<vmem>>, vector<1x128xf32>
    %3 = vector.broadcast %2 : vector<1x128xf32> to vector<128x128xf32>
    %4 = arith.mulf %1, %3 : vector<128x128xf32>
    %c0_3 = arith.constant 0 : index
    %c0_4 = arith.constant 0 : index
    %5 = vector.load %arg3[%c0_3, %c0_4] : memref<1x128xf32, #tpu.memory_space<vmem>>, vector<1x128xf32>
    %6 = vector.broadcast %5 : vector<1x128xf32> to vector<128x128xf32>
    %7 = arith.addf %4, %6 : vector<128x128xf32>
    %cst = arith.constant 0.000000e+00 : f32
    %8 = vector.broadcast %cst : f32 to vector<128x128xf32>
    %9 = arith.maximumf %7, %8 : vector<128x128xf32>
    %10 = arith.truncf %9 : vector<128x128xf32> to vector<128x128xbf16>
    %c0_5 = arith.constant 0 : index
    %c0_6 = arith.constant 0 : index
    %11 = vector.load %arg4[%c0_5, %c0_6] : memref<128x128xbf16, #tpu.memory_space<vmem>>, vector<128x128xbf16>
    tpu.vector_store %arg4[%c0_5, %c0_6], %10 {strides = array<i32>} : memref<128x128xbf16, #tpu.memory_space<vmem>>, vector<128x128xbf16>,
    return
  }
  func.func @transform_0(%arg0: i32) -> (i32, i32) {
    %c0_i32 = arith.constant 0 : i32
    %c0_i32_0 = arith.constant 0 : i32
    return %arg0, %c0_i32 : i32, i32
  }
  func.func @transform_1(%arg0: i32) -> (i32, i32) {
    %c0_i32 = arith.constant 0 : i32
    %c0_i32_0 = arith.constant 0 : i32
    %c0_i32_1 = arith.constant 0 : i32
    return %c0_i32, %c0_i32_0 : i32, i32
  }
  func.func @transform_2(%arg0: i32) -> (i32, i32) {
    %c0_i32 = arith.constant 0 : i32
    %c0_i32_0 = arith.constant 0 : i32
    %c0_i32_1 = arith.constant 0 : i32
    return %c0_i32, %c0_i32_0 : i32, i32
  }
  func.func @transform_3(%arg0: i32) -> (i32, i32) {
    %c0_i32 = arith.constant 0 : i32
    %c0_i32_0 = arith.constant 0 : i32
    return %arg0, %c0_i32 : i32, i32
  }
}

module attributes {stable_mosaic.version = 11 : i64} {
  func.func @_mm_bias_1k_kernel(%arg0: i32, %arg1: i32, %arg2: memref<32x256xbf16, #tpu.memory_space<vmem>>, %arg3: memref<256x128xbf16, #tpu.memory_space<vmem>>, %arg4: memref<1x128xf32, #tpu.memory_space<vmem>>, %arg5: memref<32x128xbf16, #tpu.memory_space<vmem>>) attributes {dimension_semantics = [#tpu.dimension_semantics<parallel>, #tpu.dimension_semantics<parallel>], iteration_bounds = array<i64: 1, 1>, scalar_prefetch = 0 : i64, scratch_operands = 0 : i64, tpu.core_type = #tpu.core_type<tc>, window_params = [{transform_indices = @transform_0, window_bounds = array<i64: 32, 256>}, {transform_indices = @transform_1, window_bounds = array<i64: 256, 128>}, {transform_indices = @transform_2, window_bounds = array<i64: 1, 128>}, {transform_indices = @transform_3, window_bounds = array<i64: 32, 128>}]} {
    %c0 = arith.constant 0 : index
    %c0_0 = arith.constant 0 : index
    %0 = vector.load %arg2[%c0, %c0_0] : memref<32x256xbf16, #tpu.memory_space<vmem>>, vector<32x256xbf16>
    %c0_1 = arith.constant 0 : index
    %c0_2 = arith.constant 0 : index
    %1 = vector.load %arg3[%c0_1, %c0_2] : memref<256x128xbf16, #tpu.memory_space<vmem>>, vector<256x128xbf16>
    %cst = arith.constant dense<0.000000e+00> : vector<32x128xf32>
    %2 = tpu.matmul %0, %1, %cst {dimension_numbers = #tpu.dot_dimension_numbers<[1], [0], [0], [1], [0, 0, 1, 1], [], []>} : vector<32x256xbf16>, vector<256x128xbf16>, vector<32x128xf32> -> vector<32x128xf32>
    %c0_3 = arith.constant 0 : index
    %c0_4 = arith.constant 0 : index
    %3 = vector.load %arg4[%c0_3, %c0_4] : memref<1x128xf32, #tpu.memory_space<vmem>>, vector<1x128xf32>
    %4 = vector.broadcast %3 : vector<1x128xf32> to vector<32x128xf32>
    %5 = arith.addf %2, %4 : vector<32x128xf32>
    %cst_5 = arith.constant 0.000000e+00 : f32
    %6 = vector.broadcast %cst_5 : f32 to vector<32x128xf32>
    %7 = arith.maximumf %5, %6 : vector<32x128xf32>
    %8 = arith.truncf %7 : vector<32x128xf32> to vector<32x128xbf16>
    %c0_6 = arith.constant 0 : index
    %c0_7 = arith.constant 0 : index
    %9 = vector.load %arg5[%c0_6, %c0_7] : memref<32x128xbf16, #tpu.memory_space<vmem>>, vector<32x128xbf16>
    tpu.vector_store %arg5[%c0_6, %c0_7], %8 {strides = array<i32>} : memref<32x128xbf16, #tpu.memory_space<vmem>>, vector<32x128xbf16>,
    return
  }
  func.func @transform_0(%arg0: i32, %arg1: i32) -> (i32, i32) {
    %c0_i32 = arith.constant 0 : i32
    %c0_i32_0 = arith.constant 0 : i32
    return %arg0, %c0_i32 : i32, i32
  }
  func.func @transform_1(%arg0: i32, %arg1: i32) -> (i32, i32) {
    %c0_i32 = arith.constant 0 : i32
    %c0_i32_0 = arith.constant 0 : i32
    return %c0_i32, %arg1 : i32, i32
  }
  func.func @transform_2(%arg0: i32, %arg1: i32) -> (i32, i32) {
    %c0_i32 = arith.constant 0 : i32
    %c0_i32_0 = arith.constant 0 : i32
    return %c0_i32, %arg1 : i32, i32
  }
  func.func @transform_3(%arg0: i32, %arg1: i32) -> (i32, i32) {
    %c0_i32 = arith.constant 0 : i32
    return %arg0, %arg1 : i32, i32
  }
}

module attributes {stable_mosaic.version = 11 : i64} {
  func.func @_mm_bias_stats_1k_kernel(%arg0: i32, %arg1: i32, %arg2: memref<32x384xbf16, #tpu.memory_space<vmem>>, %arg3: memref<384x128xbf16, #tpu.memory_space<vmem>>, %arg4: memref<1x128xf32, #tpu.memory_space<vmem>>, %arg5: memref<32x128xbf16, #tpu.memory_space<vmem>>, %arg6: memref<8x128xf32, #tpu.memory_space<vmem>>) attributes {dimension_semantics = [#tpu.dimension_semantics<parallel>, #tpu.dimension_semantics<parallel>], iteration_bounds = array<i64: 1, 1>, scalar_prefetch = 0 : i64, scratch_operands = 0 : i64, tpu.core_type = #tpu.core_type<tc>, window_params = [{transform_indices = @transform_0, window_bounds = array<i64: 32, 384>}, {transform_indices = @transform_1, window_bounds = array<i64: 384, 128>}, {transform_indices = @transform_2, window_bounds = array<i64: 1, 128>}, {transform_indices = @transform_3, window_bounds = array<i64: 32, 128>}, {transform_indices = @transform_4, window_bounds = array<i64: 8, 128>}]} {
    %c0 = arith.constant 0 : index
    %c0_0 = arith.constant 0 : index
    %0 = vector.load %arg2[%c0, %c0_0] : memref<32x384xbf16, #tpu.memory_space<vmem>>, vector<32x384xbf16>
    %c0_1 = arith.constant 0 : index
    %c0_2 = arith.constant 0 : index
    %1 = vector.load %arg3[%c0_1, %c0_2] : memref<384x128xbf16, #tpu.memory_space<vmem>>, vector<384x128xbf16>
    %cst = arith.constant dense<0.000000e+00> : vector<32x128xf32>
    %2 = tpu.matmul %0, %1, %cst {dimension_numbers = #tpu.dot_dimension_numbers<[1], [0], [0], [1], [0, 0, 1, 1], [], []>} : vector<32x384xbf16>, vector<384x128xbf16>, vector<32x128xf32> -> vector<32x128xf32>
    %c0_3 = arith.constant 0 : index
    %c0_4 = arith.constant 0 : index
    %3 = vector.load %arg4[%c0_3, %c0_4] : memref<1x128xf32, #tpu.memory_space<vmem>>, vector<1x128xf32>
    %4 = vector.broadcast %3 : vector<1x128xf32> to vector<32x128xf32>
    %5 = arith.addf %2, %4 : vector<32x128xf32>
    %6 = arith.truncf %5 : vector<32x128xf32> to vector<32x128xbf16>
    %c0_5 = arith.constant 0 : index
    %c0_6 = arith.constant 0 : index
    %7 = vector.load %arg5[%c0_5, %c0_6] : memref<32x128xbf16, #tpu.memory_space<vmem>>, vector<32x128xbf16>
    tpu.vector_store %arg5[%c0_5, %c0_6], %6 {strides = array<i32>} : memref<32x128xbf16, #tpu.memory_space<vmem>>, vector<32x128xbf16>,
    %8 = arith.truncf %5 : vector<32x128xf32> to vector<32x128xbf16>
    %9 = arith.extf %8 : vector<32x128xbf16> to vector<32x128xf32>
    %10 = tpu.iota {dimensions = array<i32: 0>} : vector<32x1xi32>
    %c32_i32 = arith.constant 32 : i32
    %11 = arith.muli %arg0, %c32_i32 : i32
    %12 = vector.broadcast %11 : i32 to vector<32x1xi32>
    %13 = arith.addi %10, %12 : vector<32x1xi32>
    %c32_i32_7 = arith.constant 32 : i32
    %14 = vector.broadcast %c32_i32_7 : i32 to vector<32x1xi32>
    %15 = arith.cmpi slt, %13, %14 : vector<32x1xi32>
    %16 = arith.extui %15 : vector<32x1xi1> to vector<32x1xi32>
    %17 = arith.sitofp %16 : vector<32x1xi32> to vector<32x1xf32>
    %18 = vector.broadcast %17 : vector<32x1xf32> to vector<32x128xf32>
    %19 = arith.mulf %9, %18 : vector<32x128xf32>
    %cst_8 = arith.constant dense<0.000000e+00> : vector<128xf32>
    %20 = vector.multi_reduction <add>, %19, %cst_8 [0] : vector<32x128xf32> to vector<128xf32>
    %21 = vector.shape_cast %20 : vector<128xf32> to vector<1x128xf32>
    %22 = arith.mulf %19, %19 : vector<32x128xf32>
    %cst_9 = arith.constant dense<0.000000e+00> : vector<128xf32>
    %23 = vector.multi_reduction <add>, %22, %cst_9 [0] : vector<32x128xf32> to vector<128xf32>
    %24 = vector.shape_cast %23 : vector<128xf32> to vector<1x128xf32>
    %25 = tpu.iota {dimensions = array<i32: 0>} : vector<8x128xi32>
    %c0_i32 = arith.constant 0 : i32
    %26 = vector.broadcast %c0_i32 : i32 to vector<8x128xi32>
    %27 = arith.cmpi eq, %25, %26 : vector<8x128xi32>
    %28 = vector.shape_cast %21 : vector<1x128xf32> to vector<1x128xf32>
    %29 = vector.broadcast %28 : vector<1x128xf32> to vector<8x128xf32>
    %cst_10 = arith.constant 0.000000e+00 : f32
    %30 = vector.broadcast %cst_10 : f32 to vector<8x128xf32>
    %31 = arith.select %27, %29, %30 : vector<8x128xi1>, vector<8x128xf32>
    %c1_i32 = arith.constant 1 : i32
    %32 = vector.broadcast %c1_i32 : i32 to vector<8x128xi32>
    %33 = arith.cmpi eq, %25, %32 : vector<8x128xi32>
    %34 = vector.shape_cast %24 : vector<1x128xf32> to vector<1x128xf32>
    %35 = vector.broadcast %34 : vector<1x128xf32> to vector<8x128xf32>
    %36 = arith.select %33, %35, %31 : vector<8x128xi1>, vector<8x128xf32>
    %c0_11 = arith.constant 0 : index
    %c0_12 = arith.constant 0 : index
    %37 = vector.load %arg6[%c0_11, %c0_12] : memref<8x128xf32, #tpu.memory_space<vmem>>, vector<8x128xf32>
    tpu.vector_store %arg6[%c0_11, %c0_12], %36 {strides = array<i32>} : memref<8x128xf32, #tpu.memory_space<vmem>>, vector<8x128xf32>,
    return
  }
  func.func @transform_0(%arg0: i32, %arg1: i32) -> (i32, i32) {
    %c0_i32 = arith.constant 0 : i32
    %c0_i32_0 = arith.constant 0 : i32
    return %arg0, %c0_i32 : i32, i32
  }
  func.func @transform_1(%arg0: i32, %arg1: i32) -> (i32, i32) {
    %c0_i32 = arith.constant 0 : i32
    %c0_i32_0 = arith.constant 0 : i32
    return %c0_i32, %arg1 : i32, i32
  }
  func.func @transform_2(%arg0: i32, %arg1: i32) -> (i32, i32) {
    %c0_i32 = arith.constant 0 : i32
    %c0_i32_0 = arith.constant 0 : i32
    return %c0_i32, %arg1 : i32, i32
  }
  func.func @transform_3(%arg0: i32, %arg1: i32) -> (i32, i32) {
    %c0_i32 = arith.constant 0 : i32
    return %arg0, %arg1 : i32, i32
  }
  func.func @transform_4(%arg0: i32, %arg1: i32) -> (i32, i32) {
    %c0_i32 = arith.constant 0 : i32
    return %arg0, %arg1 : i32, i32
  }
}

module attributes {stable_mosaic.version = 11 : i64} {
  func.func @_affine_relu_kernel(%arg0: i32, %arg1: memref<32x128xbf16, #tpu.memory_space<vmem>>, %arg2: memref<1x128xf32, #tpu.memory_space<vmem>>, %arg3: memref<1x128xf32, #tpu.memory_space<vmem>>, %arg4: memref<32x128xbf16, #tpu.memory_space<vmem>>) attributes {dimension_semantics = [#tpu.dimension_semantics<parallel>], iteration_bounds = array<i64: 1>, scalar_prefetch = 0 : i64, scratch_operands = 0 : i64, tpu.core_type = #tpu.core_type<tc>, window_params = [{transform_indices = @transform_0, window_bounds = array<i64: 32, 128>}, {pipeline_mode = #tpu.pipeline_mode<synchronous>, transform_indices = @transform_1, window_bounds = array<i64: 1, 128>}, {pipeline_mode = #tpu.pipeline_mode<synchronous>, transform_indices = @transform_2, window_bounds = array<i64: 1, 128>}, {transform_indices = @transform_3, window_bounds = array<i64: 32, 128>}]} {
    %c0 = arith.constant 0 : index
    %c0_0 = arith.constant 0 : index
    %0 = vector.load %arg1[%c0, %c0_0] : memref<32x128xbf16, #tpu.memory_space<vmem>>, vector<32x128xbf16>
    %1 = arith.extf %0 : vector<32x128xbf16> to vector<32x128xf32>
    %c0_1 = arith.constant 0 : index
    %c0_2 = arith.constant 0 : index
    %2 = vector.load %arg2[%c0_1, %c0_2] : memref<1x128xf32, #tpu.memory_space<vmem>>, vector<1x128xf32>
    %3 = vector.broadcast %2 : vector<1x128xf32> to vector<32x128xf32>
    %4 = arith.mulf %1, %3 : vector<32x128xf32>
    %c0_3 = arith.constant 0 : index
    %c0_4 = arith.constant 0 : index
    %5 = vector.load %arg3[%c0_3, %c0_4] : memref<1x128xf32, #tpu.memory_space<vmem>>, vector<1x128xf32>
    %6 = vector.broadcast %5 : vector<1x128xf32> to vector<32x128xf32>
    %7 = arith.addf %4, %6 : vector<32x128xf32>
    %cst = arith.constant 0.000000e+00 : f32
    %8 = vector.broadcast %cst : f32 to vector<32x128xf32>
    %9 = arith.maximumf %7, %8 : vector<32x128xf32>
    %10 = arith.truncf %9 : vector<32x128xf32> to vector<32x128xbf16>
    %c0_5 = arith.constant 0 : index
    %c0_6 = arith.constant 0 : index
    %11 = vector.load %arg4[%c0_5, %c0_6] : memref<32x128xbf16, #tpu.memory_space<vmem>>, vector<32x128xbf16>
    tpu.vector_store %arg4[%c0_5, %c0_6], %10 {strides = array<i32>} : memref<32x128xbf16, #tpu.memory_space<vmem>>, vector<32x128xbf16>,
    return
  }
  func.func @transform_0(%arg0: i32) -> (i32, i32) {
    %c0_i32 = arith.constant 0 : i32
    %c0_i32_0 = arith.constant 0 : i32
    return %arg0, %c0_i32 : i32, i32
  }
  func.func @transform_1(%arg0: i32) -> (i32, i32) {
    %c0_i32 = arith.constant 0 : i32
    %c0_i32_0 = arith.constant 0 : i32
    %c0_i32_1 = arith.constant 0 : i32
    return %c0_i32, %c0_i32_0 : i32, i32
  }
  func.func @transform_2(%arg0: i32) -> (i32, i32) {
    %c0_i32 = arith.constant 0 : i32
    %c0_i32_0 = arith.constant 0 : i32
    %c0_i32_1 = arith.constant 0 : i32
    return %c0_i32, %c0_i32_0 : i32, i32
  }
  func.func @transform_3(%arg0: i32) -> (i32, i32) {
    %c0_i32 = arith.constant 0 : i32
    %c0_i32_0 = arith.constant 0 : i32
    return %arg0, %c0_i32 : i32, i32
  }
}

module attributes {stable_mosaic.version = 11 : i64} {
  func.func @_mm_bias_1k_kernel(%arg0: i32, %arg1: i32, %arg2: memref<32x384xbf16, #tpu.memory_space<vmem>>, %arg3: memref<384x128xbf16, #tpu.memory_space<vmem>>, %arg4: memref<1x128xf32, #tpu.memory_space<vmem>>, %arg5: memref<32x128xbf16, #tpu.memory_space<vmem>>) attributes {dimension_semantics = [#tpu.dimension_semantics<parallel>, #tpu.dimension_semantics<parallel>], iteration_bounds = array<i64: 1, 1>, scalar_prefetch = 0 : i64, scratch_operands = 0 : i64, tpu.core_type = #tpu.core_type<tc>, window_params = [{transform_indices = @transform_0, window_bounds = array<i64: 32, 384>}, {transform_indices = @transform_1, window_bounds = array<i64: 384, 128>}, {transform_indices = @transform_2, window_bounds = array<i64: 1, 128>}, {transform_indices = @transform_3, window_bounds = array<i64: 32, 128>}]} {
    %c0 = arith.constant 0 : index
    %c0_0 = arith.constant 0 : index
    %0 = vector.load %arg2[%c0, %c0_0] : memref<32x384xbf16, #tpu.memory_space<vmem>>, vector<32x384xbf16>
    %c0_1 = arith.constant 0 : index
    %c0_2 = arith.constant 0 : index
    %1 = vector.load %arg3[%c0_1, %c0_2] : memref<384x128xbf16, #tpu.memory_space<vmem>>, vector<384x128xbf16>
    %cst = arith.constant dense<0.000000e+00> : vector<32x128xf32>
    %2 = tpu.matmul %0, %1, %cst {dimension_numbers = #tpu.dot_dimension_numbers<[1], [0], [0], [1], [0, 0, 1, 1], [], []>} : vector<32x384xbf16>, vector<384x128xbf16>, vector<32x128xf32> -> vector<32x128xf32>
    %c0_3 = arith.constant 0 : index
    %c0_4 = arith.constant 0 : index
    %3 = vector.load %arg4[%c0_3, %c0_4] : memref<1x128xf32, #tpu.memory_space<vmem>>, vector<1x128xf32>
    %4 = vector.broadcast %3 : vector<1x128xf32> to vector<32x128xf32>
    %5 = arith.addf %2, %4 : vector<32x128xf32>
    %cst_5 = arith.constant 0.000000e+00 : f32
    %6 = vector.broadcast %cst_5 : f32 to vector<32x128xf32>
    %7 = arith.maximumf %5, %6 : vector<32x128xf32>
    %8 = arith.truncf %7 : vector<32x128xf32> to vector<32x128xbf16>
    %c0_6 = arith.constant 0 : index
    %c0_7 = arith.constant 0 : index
    %9 = vector.load %arg5[%c0_6, %c0_7] : memref<32x128xbf16, #tpu.memory_space<vmem>>, vector<32x128xbf16>
    tpu.vector_store %arg5[%c0_6, %c0_7], %8 {strides = array<i32>} : memref<32x128xbf16, #tpu.memory_space<vmem>>, vector<32x128xbf16>,
    return
  }
  func.func @transform_0(%arg0: i32, %arg1: i32) -> (i32, i32) {
    %c0_i32 = arith.constant 0 : i32
    %c0_i32_0 = arith.constant 0 : i32
    return %arg0, %c0_i32 : i32, i32
  }
  func.func @transform_1(%arg0: i32, %arg1: i32) -> (i32, i32) {
    %c0_i32 = arith.constant 0 : i32
    %c0_i32_0 = arith.constant 0 : i32
    return %c0_i32, %arg1 : i32, i32
  }
  func.func @transform_2(%arg0: i32, %arg1: i32) -> (i32, i32) {
    %c0_i32 = arith.constant 0 : i32
    %c0_i32_0 = arith.constant 0 : i32
    return %c0_i32, %arg1 : i32, i32
  }
  func.func @transform_3(%arg0: i32, %arg1: i32) -> (i32, i32) {
    %c0_i32 = arith.constant 0 : i32
    return %arg0, %arg1 : i32, i32
  }
}

module attributes {stable_mosaic.version = 11 : i64} {
  func.func @_mm_bias_stats_1k_kernel(%arg0: i32, %arg1: i32, %arg2: memref<32x640xbf16, #tpu.memory_space<vmem>>, %arg3: memref<640x128xbf16, #tpu.memory_space<vmem>>, %arg4: memref<1x128xf32, #tpu.memory_space<vmem>>, %arg5: memref<32x128xbf16, #tpu.memory_space<vmem>>, %arg6: memref<8x128xf32, #tpu.memory_space<vmem>>) attributes {dimension_semantics = [#tpu.dimension_semantics<parallel>, #tpu.dimension_semantics<parallel>], iteration_bounds = array<i64: 1, 1>, scalar_prefetch = 0 : i64, scratch_operands = 0 : i64, tpu.core_type = #tpu.core_type<tc>, window_params = [{transform_indices = @transform_0, window_bounds = array<i64: 32, 640>}, {transform_indices = @transform_1, window_bounds = array<i64: 640, 128>}, {transform_indices = @transform_2, window_bounds = array<i64: 1, 128>}, {transform_indices = @transform_3, window_bounds = array<i64: 32, 128>}, {transform_indices = @transform_4, window_bounds = array<i64: 8, 128>}]} {
    %c0 = arith.constant 0 : index
    %c0_0 = arith.constant 0 : index
    %0 = vector.load %arg2[%c0, %c0_0] : memref<32x640xbf16, #tpu.memory_space<vmem>>, vector<32x640xbf16>
    %c0_1 = arith.constant 0 : index
    %c0_2 = arith.constant 0 : index
    %1 = vector.load %arg3[%c0_1, %c0_2] : memref<640x128xbf16, #tpu.memory_space<vmem>>, vector<640x128xbf16>
    %cst = arith.constant dense<0.000000e+00> : vector<32x128xf32>
    %2 = tpu.matmul %0, %1, %cst {dimension_numbers = #tpu.dot_dimension_numbers<[1], [0], [0], [1], [0, 0, 1, 1], [], []>} : vector<32x640xbf16>, vector<640x128xbf16>, vector<32x128xf32> -> vector<32x128xf32>
    %c0_3 = arith.constant 0 : index
    %c0_4 = arith.constant 0 : index
    %3 = vector.load %arg4[%c0_3, %c0_4] : memref<1x128xf32, #tpu.memory_space<vmem>>, vector<1x128xf32>
    %4 = vector.broadcast %3 : vector<1x128xf32> to vector<32x128xf32>
    %5 = arith.addf %2, %4 : vector<32x128xf32>
    %6 = arith.truncf %5 : vector<32x128xf32> to vector<32x128xbf16>
    %c0_5 = arith.constant 0 : index
    %c0_6 = arith.constant 0 : index
    %7 = vector.load %arg5[%c0_5, %c0_6] : memref<32x128xbf16, #tpu.memory_space<vmem>>, vector<32x128xbf16>
    tpu.vector_store %arg5[%c0_5, %c0_6], %6 {strides = array<i32>} : memref<32x128xbf16, #tpu.memory_space<vmem>>, vector<32x128xbf16>,
    %8 = arith.truncf %5 : vector<32x128xf32> to vector<32x128xbf16>
    %9 = arith.extf %8 : vector<32x128xbf16> to vector<32x128xf32>
    %10 = tpu.iota {dimensions = array<i32: 0>} : vector<32x1xi32>
    %c32_i32 = arith.constant 32 : i32
    %11 = arith.muli %arg0, %c32_i32 : i32
    %12 = vector.broadcast %11 : i32 to vector<32x1xi32>
    %13 = arith.addi %10, %12 : vector<32x1xi32>
    %c8_i32 = arith.constant 8 : i32
    %14 = vector.broadcast %c8_i32 : i32 to vector<32x1xi32>
    %15 = arith.cmpi slt, %13, %14 : vector<32x1xi32>
    %16 = arith.extui %15 : vector<32x1xi1> to vector<32x1xi32>
    %17 = arith.sitofp %16 : vector<32x1xi32> to vector<32x1xf32>
    %18 = vector.broadcast %17 : vector<32x1xf32> to vector<32x128xf32>
    %19 = arith.mulf %9, %18 : vector<32x128xf32>
    %cst_7 = arith.constant dense<0.000000e+00> : vector<128xf32>
    %20 = vector.multi_reduction <add>, %19, %cst_7 [0] : vector<32x128xf32> to vector<128xf32>
    %21 = vector.shape_cast %20 : vector<128xf32> to vector<1x128xf32>
    %22 = arith.mulf %19, %19 : vector<32x128xf32>
    %cst_8 = arith.constant dense<0.000000e+00> : vector<128xf32>
    %23 = vector.multi_reduction <add>, %22, %cst_8 [0] : vector<32x128xf32> to vector<128xf32>
    %24 = vector.shape_cast %23 : vector<128xf32> to vector<1x128xf32>
    %25 = tpu.iota {dimensions = array<i32: 0>} : vector<8x128xi32>
    %c0_i32 = arith.constant 0 : i32
    %26 = vector.broadcast %c0_i32 : i32 to vector<8x128xi32>
    %27 = arith.cmpi eq, %25, %26 : vector<8x128xi32>
    %28 = vector.shape_cast %21 : vector<1x128xf32> to vector<1x128xf32>
    %29 = vector.broadcast %28 : vector<1x128xf32> to vector<8x128xf32>
    %cst_9 = arith.constant 0.000000e+00 : f32
    %30 = vector.broadcast %cst_9 : f32 to vector<8x128xf32>
    %31 = arith.select %27, %29, %30 : vector<8x128xi1>, vector<8x128xf32>
    %c1_i32 = arith.constant 1 : i32
    %32 = vector.broadcast %c1_i32 : i32 to vector<8x128xi32>
    %33 = arith.cmpi eq, %25, %32 : vector<8x128xi32>
    %34 = vector.shape_cast %24 : vector<1x128xf32> to vector<1x128xf32>
    %35 = vector.broadcast %34 : vector<1x128xf32> to vector<8x128xf32>
    %36 = arith.select %33, %35, %31 : vector<8x128xi1>, vector<8x128xf32>
    %c0_10 = arith.constant 0 : index
    %c0_11 = arith.constant 0 : index
    %37 = vector.load %arg6[%c0_10, %c0_11] : memref<8x128xf32, #tpu.memory_space<vmem>>, vector<8x128xf32>
    tpu.vector_store %arg6[%c0_10, %c0_11], %36 {strides = array<i32>} : memref<8x128xf32, #tpu.memory_space<vmem>>, vector<8x128xf32>,
    return
  }
  func.func @transform_0(%arg0: i32, %arg1: i32) -> (i32, i32) {
    %c0_i32 = arith.constant 0 : i32
    %c0_i32_0 = arith.constant 0 : i32
    return %arg0, %c0_i32 : i32, i32
  }
  func.func @transform_1(%arg0: i32, %arg1: i32) -> (i32, i32) {
    %c0_i32 = arith.constant 0 : i32
    %c0_i32_0 = arith.constant 0 : i32
    return %c0_i32, %arg1 : i32, i32
  }
  func.func @transform_2(%arg0: i32, %arg1: i32) -> (i32, i32) {
    %c0_i32 = arith.constant 0 : i32
    %c0_i32_0 = arith.constant 0 : i32
    return %c0_i32, %arg1 : i32, i32
  }
  func.func @transform_3(%arg0: i32, %arg1: i32) -> (i32, i32) {
    %c0_i32 = arith.constant 0 : i32
    return %arg0, %arg1 : i32, i32
  }
  func.func @transform_4(%arg0: i32, %arg1: i32) -> (i32, i32) {
    %c0_i32 = arith.constant 0 : i32
    return %arg0, %arg1 : i32, i32
  }
}

module attributes {stable_mosaic.version = 11 : i64} {
  func.func @_mm_bias_1k_kernel(%arg0: i32, %arg1: i32, %arg2: memref<32x640xbf16, #tpu.memory_space<vmem>>, %arg3: memref<640x128xbf16, #tpu.memory_space<vmem>>, %arg4: memref<1x128xf32, #tpu.memory_space<vmem>>, %arg5: memref<32x128xbf16, #tpu.memory_space<vmem>>) attributes {dimension_semantics = [#tpu.dimension_semantics<parallel>, #tpu.dimension_semantics<parallel>], iteration_bounds = array<i64: 1, 1>, scalar_prefetch = 0 : i64, scratch_operands = 0 : i64, tpu.core_type = #tpu.core_type<tc>, window_params = [{transform_indices = @transform_0, window_bounds = array<i64: 32, 640>}, {transform_indices = @transform_1, window_bounds = array<i64: 640, 128>}, {transform_indices = @transform_2, window_bounds = array<i64: 1, 128>}, {transform_indices = @transform_3, window_bounds = array<i64: 32, 128>}]} {
    %c0 = arith.constant 0 : index
    %c0_0 = arith.constant 0 : index
    %0 = vector.load %arg2[%c0, %c0_0] : memref<32x640xbf16, #tpu.memory_space<vmem>>, vector<32x640xbf16>
    %c0_1 = arith.constant 0 : index
    %c0_2 = arith.constant 0 : index
    %1 = vector.load %arg3[%c0_1, %c0_2] : memref<640x128xbf16, #tpu.memory_space<vmem>>, vector<640x128xbf16>
    %cst = arith.constant dense<0.000000e+00> : vector<32x128xf32>
    %2 = tpu.matmul %0, %1, %cst {dimension_numbers = #tpu.dot_dimension_numbers<[1], [0], [0], [1], [0, 0, 1, 1], [], []>} : vector<32x640xbf16>, vector<640x128xbf16>, vector<32x128xf32> -> vector<32x128xf32>
    %c0_3 = arith.constant 0 : index
    %c0_4 = arith.constant 0 : index
    %3 = vector.load %arg4[%c0_3, %c0_4] : memref<1x128xf32, #tpu.memory_space<vmem>>, vector<1x128xf32>
    %4 = vector.broadcast %3 : vector<1x128xf32> to vector<32x128xf32>
    %5 = arith.addf %2, %4 : vector<32x128xf32>
    %cst_5 = arith.constant 0.000000e+00 : f32
    %6 = vector.broadcast %cst_5 : f32 to vector<32x128xf32>
    %7 = arith.maximumf %5, %6 : vector<32x128xf32>
    %8 = arith.truncf %7 : vector<32x128xf32> to vector<32x128xbf16>
    %c0_6 = arith.constant 0 : index
    %c0_7 = arith.constant 0 : index
    %9 = vector.load %arg5[%c0_6, %c0_7] : memref<32x128xbf16, #tpu.memory_space<vmem>>, vector<32x128xbf16>
    tpu.vector_store %arg5[%c0_6, %c0_7], %8 {strides = array<i32>} : memref<32x128xbf16, #tpu.memory_space<vmem>>, vector<32x128xbf16>,
    return
  }
  func.func @transform_0(%arg0: i32, %arg1: i32) -> (i32, i32) {
    %c0_i32 = arith.constant 0 : i32
    %c0_i32_0 = arith.constant 0 : i32
    return %arg0, %c0_i32 : i32, i32
  }
  func.func @transform_1(%arg0: i32, %arg1: i32) -> (i32, i32) {
    %c0_i32 = arith.constant 0 : i32
    %c0_i32_0 = arith.constant 0 : i32
    return %c0_i32, %arg1 : i32, i32
  }
  func.func @transform_2(%arg0: i32, %arg1: i32) -> (i32, i32) {
    %c0_i32 = arith.constant 0 : i32
    %c0_i32_0 = arith.constant 0 : i32
    return %c0_i32, %arg1 : i32, i32
  }
  func.func @transform_3(%arg0: i32, %arg1: i32) -> (i32, i32) {
    %c0_i32 = arith.constant 0 : i32
    return %arg0, %arg1 : i32, i32
  }
}

module attributes {stable_mosaic.version = 11 : i64} {
  func.func @_mm_bias_stats_1k_kernel(%arg0: i32, %arg1: i32, %arg2: memref<32x1152xbf16, #tpu.memory_space<vmem>>, %arg3: memref<1152x128xbf16, #tpu.memory_space<vmem>>, %arg4: memref<1x128xf32, #tpu.memory_space<vmem>>, %arg5: memref<32x128xbf16, #tpu.memory_space<vmem>>, %arg6: memref<8x128xf32, #tpu.memory_space<vmem>>) attributes {dimension_semantics = [#tpu.dimension_semantics<parallel>, #tpu.dimension_semantics<parallel>], iteration_bounds = array<i64: 1, 1>, scalar_prefetch = 0 : i64, scratch_operands = 0 : i64, tpu.core_type = #tpu.core_type<tc>, window_params = [{transform_indices = @transform_0, window_bounds = array<i64: 32, 1152>}, {transform_indices = @transform_1, window_bounds = array<i64: 1152, 128>}, {transform_indices = @transform_2, window_bounds = array<i64: 1, 128>}, {transform_indices = @transform_3, window_bounds = array<i64: 32, 128>}, {transform_indices = @transform_4, window_bounds = array<i64: 8, 128>}]} {
    %c0 = arith.constant 0 : index
    %c0_0 = arith.constant 0 : index
    %0 = vector.load %arg2[%c0, %c0_0] : memref<32x1152xbf16, #tpu.memory_space<vmem>>, vector<32x1152xbf16>
    %c0_1 = arith.constant 0 : index
    %c0_2 = arith.constant 0 : index
    %1 = vector.load %arg3[%c0_1, %c0_2] : memref<1152x128xbf16, #tpu.memory_space<vmem>>, vector<1152x128xbf16>
    %cst = arith.constant dense<0.000000e+00> : vector<32x128xf32>
    %2 = tpu.matmul %0, %1, %cst {dimension_numbers = #tpu.dot_dimension_numbers<[1], [0], [0], [1], [0, 0, 1, 1], [], []>} : vector<32x1152xbf16>, vector<1152x128xbf16>, vector<32x128xf32> -> vector<32x128xf32>
    %c0_3 = arith.constant 0 : index
    %c0_4 = arith.constant 0 : index
    %3 = vector.load %arg4[%c0_3, %c0_4] : memref<1x128xf32, #tpu.memory_space<vmem>>, vector<1x128xf32>
    %4 = vector.broadcast %3 : vector<1x128xf32> to vector<32x128xf32>
    %5 = arith.addf %2, %4 : vector<32x128xf32>
    %6 = arith.truncf %5 : vector<32x128xf32> to vector<32x128xbf16>
    %c0_5 = arith.constant 0 : index
    %c0_6 = arith.constant 0 : index
    %7 = vector.load %arg5[%c0_5, %c0_6] : memref<32x128xbf16, #tpu.memory_space<vmem>>, vector<32x128xbf16>
    tpu.vector_store %arg5[%c0_5, %c0_6], %6 {strides = array<i32>} : memref<32x128xbf16, #tpu.memory_space<vmem>>, vector<32x128xbf16>,
    %8 = arith.truncf %5 : vector<32x128xf32> to vector<32x128xbf16>
    %9 = arith.extf %8 : vector<32x128xbf16> to vector<32x128xf32>
    %10 = tpu.iota {dimensions = array<i32: 0>} : vector<32x1xi32>
    %c32_i32 = arith.constant 32 : i32
    %11 = arith.muli %arg0, %c32_i32 : i32
    %12 = vector.broadcast %11 : i32 to vector<32x1xi32>
    %13 = arith.addi %10, %12 : vector<32x1xi32>
    %c2_i32 = arith.constant 2 : i32
    %14 = vector.broadcast %c2_i32 : i32 to vector<32x1xi32>
    %15 = arith.cmpi slt, %13, %14 : vector<32x1xi32>
    %16 = arith.extui %15 : vector<32x1xi1> to vector<32x1xi32>
    %17 = arith.sitofp %16 : vector<32x1xi32> to vector<32x1xf32>
    %18 = vector.broadcast %17 : vector<32x1xf32> to vector<32x128xf32>
    %19 = arith.mulf %9, %18 : vector<32x128xf32>
    %cst_7 = arith.constant dense<0.000000e+00> : vector<128xf32>
    %20 = vector.multi_reduction <add>, %19, %cst_7 [0] : vector<32x128xf32> to vector<128xf32>
    %21 = vector.shape_cast %20 : vector<128xf32> to vector<1x128xf32>
    %22 = arith.mulf %19, %19 : vector<32x128xf32>
    %cst_8 = arith.constant dense<0.000000e+00> : vector<128xf32>
    %23 = vector.multi_reduction <add>, %22, %cst_8 [0] : vector<32x128xf32> to vector<128xf32>
    %24 = vector.shape_cast %23 : vector<128xf32> to vector<1x128xf32>
    %25 = tpu.iota {dimensions = array<i32: 0>} : vector<8x128xi32>
    %c0_i32 = arith.constant 0 : i32
    %26 = vector.broadcast %c0_i32 : i32 to vector<8x128xi32>
    %27 = arith.cmpi eq, %25, %26 : vector<8x128xi32>
    %28 = vector.shape_cast %21 : vector<1x128xf32> to vector<1x128xf32>
    %29 = vector.broadcast %28 : vector<1x128xf32> to vector<8x128xf32>
    %cst_9 = arith.constant 0.000000e+00 : f32
    %30 = vector.broadcast %cst_9 : f32 to vector<8x128xf32>
    %31 = arith.select %27, %29, %30 : vector<8x128xi1>, vector<8x128xf32>
    %c1_i32 = arith.constant 1 : i32
    %32 = vector.broadcast %c1_i32 : i32 to vector<8x128xi32>
    %33 = arith.cmpi eq, %25, %32 : vector<8x128xi32>
    %34 = vector.shape_cast %24 : vector<1x128xf32> to vector<1x128xf32>
    %35 = vector.broadcast %34 : vector<1x128xf32> to vector<8x128xf32>
    %36 = arith.select %33, %35, %31 : vector<8x128xi1>, vector<8x128xf32>
    %c0_10 = arith.constant 0 : index
    %c0_11 = arith.constant 0 : index
    %37 = vector.load %arg6[%c0_10, %c0_11] : memref<8x128xf32, #tpu.memory_space<vmem>>, vector<8x128xf32>
    tpu.vector_store %arg6[%c0_10, %c0_11], %36 {strides = array<i32>} : memref<8x128xf32, #tpu.memory_space<vmem>>, vector<8x128xf32>,
    return
  }
  func.func @transform_0(%arg0: i32, %arg1: i32) -> (i32, i32) {
    %c0_i32 = arith.constant 0 : i32
    %c0_i32_0 = arith.constant 0 : i32
    return %arg0, %c0_i32 : i32, i32
  }
  func.func @transform_1(%arg0: i32, %arg1: i32) -> (i32, i32) {
    %c0_i32 = arith.constant 0 : i32
    %c0_i32_0 = arith.constant 0 : i32
    return %c0_i32, %arg1 : i32, i32
  }
  func.func @transform_2(%arg0: i32, %arg1: i32) -> (i32, i32) {
    %c0_i32 = arith.constant 0 : i32
    %c0_i32_0 = arith.constant 0 : i32
    return %c0_i32, %arg1 : i32, i32
  }
  func.func @transform_3(%arg0: i32, %arg1: i32) -> (i32, i32) {
    %c0_i32 = arith.constant 0 : i32
    return %arg0, %arg1 : i32, i32
  }
  func.func @transform_4(%arg0: i32, %arg1: i32) -> (i32, i32) {
    %c0_i32 = arith.constant 0 : i32
    return %arg0, %arg1 : i32, i32
  }
}

module attributes {stable_mosaic.version = 11 : i64} {
  func.func @_mm_bias_1k_kernel(%arg0: i32, %arg1: i32, %arg2: memref<32x1792xbf16, #tpu.memory_space<vmem>>, %arg3: memref<1792x128xbf16, #tpu.memory_space<vmem>>, %arg4: memref<1x128xf32, #tpu.memory_space<vmem>>, %arg5: memref<32x128xbf16, #tpu.memory_space<vmem>>) attributes {dimension_semantics = [#tpu.dimension_semantics<parallel>, #tpu.dimension_semantics<parallel>], iteration_bounds = array<i64: 1, 1>, scalar_prefetch = 0 : i64, scratch_operands = 0 : i64, tpu.core_type = #tpu.core_type<tc>, window_params = [{transform_indices = @transform_0, window_bounds = array<i64: 32, 1792>}, {transform_indices = @transform_1, window_bounds = array<i64: 1792, 128>}, {transform_indices = @transform_2, window_bounds = array<i64: 1, 128>}, {transform_indices = @transform_3, window_bounds = array<i64: 32, 128>}]} {
    %c0 = arith.constant 0 : index
    %c0_0 = arith.constant 0 : index
    %0 = vector.load %arg2[%c0, %c0_0] : memref<32x1792xbf16, #tpu.memory_space<vmem>>, vector<32x1792xbf16>
    %c0_1 = arith.constant 0 : index
    %c0_2 = arith.constant 0 : index
    %1 = vector.load %arg3[%c0_1, %c0_2] : memref<1792x128xbf16, #tpu.memory_space<vmem>>, vector<1792x128xbf16>
    %cst = arith.constant dense<0.000000e+00> : vector<32x128xf32>
    %2 = tpu.matmul %0, %1, %cst {dimension_numbers = #tpu.dot_dimension_numbers<[1], [0], [0], [1], [0, 0, 1, 1], [], []>} : vector<32x1792xbf16>, vector<1792x128xbf16>, vector<32x128xf32> -> vector<32x128xf32>
    %c0_3 = arith.constant 0 : index
    %c0_4 = arith.constant 0 : index
    %3 = vector.load %arg4[%c0_3, %c0_4] : memref<1x128xf32, #tpu.memory_space<vmem>>, vector<1x128xf32>
    %4 = vector.broadcast %3 : vector<1x128xf32> to vector<32x128xf32>
    %5 = arith.addf %2, %4 : vector<32x128xf32>
    %cst_5 = arith.constant 0.000000e+00 : f32
    %6 = vector.broadcast %cst_5 : f32 to vector<32x128xf32>
    %7 = arith.maximumf %5, %6 : vector<32x128xf32>
    %8 = arith.truncf %7 : vector<32x128xf32> to vector<32x128xbf16>
    %c0_6 = arith.constant 0 : index
    %c0_7 = arith.constant 0 : index
    %9 = vector.load %arg5[%c0_6, %c0_7] : memref<32x128xbf16, #tpu.memory_space<vmem>>, vector<32x128xbf16>
    tpu.vector_store %arg5[%c0_6, %c0_7], %8 {strides = array<i32>} : memref<32x128xbf16, #tpu.memory_space<vmem>>, vector<32x128xbf16>,
    return
  }
  func.func @transform_0(%arg0: i32, %arg1: i32) -> (i32, i32) {
    %c0_i32 = arith.constant 0 : i32
    %c0_i32_0 = arith.constant 0 : i32
    return %arg0, %c0_i32 : i32, i32
  }
  func.func @transform_1(%arg0: i32, %arg1: i32) -> (i32, i32) {
    %c0_i32 = arith.constant 0 : i32
    %c0_i32_0 = arith.constant 0 : i32
    return %c0_i32, %arg1 : i32, i32
  }
  func.func @transform_2(%arg0: i32, %arg1: i32) -> (i32, i32) {
    %c0_i32 = arith.constant 0 : i32
    %c0_i32_0 = arith.constant 0 : i32
    return %c0_i32, %arg1 : i32, i32
  }
  func.func @transform_3(%arg0: i32, %arg1: i32) -> (i32, i32) {
    %c0_i32 = arith.constant 0 : i32
    return %arg0, %arg1 : i32, i32
  }
}

module attributes {stable_mosaic.version = 11 : i64} {
  func.func @_mm_bias_1k_kernel(%arg0: i32, %arg1: i32, %arg2: memref<32x896xbf16, #tpu.memory_space<vmem>>, %arg3: memref<896x128xbf16, #tpu.memory_space<vmem>>, %arg4: memref<1x128xf32, #tpu.memory_space<vmem>>, %arg5: memref<32x128xbf16, #tpu.memory_space<vmem>>) attributes {dimension_semantics = [#tpu.dimension_semantics<parallel>, #tpu.dimension_semantics<parallel>], iteration_bounds = array<i64: 1, 1>, scalar_prefetch = 0 : i64, scratch_operands = 0 : i64, tpu.core_type = #tpu.core_type<tc>, window_params = [{transform_indices = @transform_0, window_bounds = array<i64: 32, 896>}, {transform_indices = @transform_1, window_bounds = array<i64: 896, 128>}, {transform_indices = @transform_2, window_bounds = array<i64: 1, 128>}, {transform_indices = @transform_3, window_bounds = array<i64: 32, 128>}]} {
    %c0 = arith.constant 0 : index
    %c0_0 = arith.constant 0 : index
    %0 = vector.load %arg2[%c0, %c0_0] : memref<32x896xbf16, #tpu.memory_space<vmem>>, vector<32x896xbf16>
    %c0_1 = arith.constant 0 : index
    %c0_2 = arith.constant 0 : index
    %1 = vector.load %arg3[%c0_1, %c0_2] : memref<896x128xbf16, #tpu.memory_space<vmem>>, vector<896x128xbf16>
    %cst = arith.constant dense<0.000000e+00> : vector<32x128xf32>
    %2 = tpu.matmul %0, %1, %cst {dimension_numbers = #tpu.dot_dimension_numbers<[1], [0], [0], [1], [0, 0, 1, 1], [], []>} : vector<32x896xbf16>, vector<896x128xbf16>, vector<32x128xf32> -> vector<32x128xf32>
    %c0_3 = arith.constant 0 : index
    %c0_4 = arith.constant 0 : index
    %3 = vector.load %arg4[%c0_3, %c0_4] : memref<1x128xf32, #tpu.memory_space<vmem>>, vector<1x128xf32>
    %4 = vector.broadcast %3 : vector<1x128xf32> to vector<32x128xf32>
    %5 = arith.addf %2, %4 : vector<32x128xf32>
    %cst_5 = arith.constant 0.000000e+00 : f32
    %6 = vector.broadcast %cst_5 : f32 to vector<32x128xf32>
    %7 = arith.maximumf %5, %6 : vector<32x128xf32>
    %8 = arith.truncf %7 : vector<32x128xf32> to vector<32x128xbf16>
    %c0_6 = arith.constant 0 : index
    %c0_7 = arith.constant 0 : index
    %9 = vector.load %arg5[%c0_6, %c0_7] : memref<32x128xbf16, #tpu.memory_space<vmem>>, vector<32x128xbf16>
    tpu.vector_store %arg5[%c0_6, %c0_7], %8 {strides = array<i32>} : memref<32x128xbf16, #tpu.memory_space<vmem>>, vector<32x128xbf16>,
    return
  }
  func.func @transform_0(%arg0: i32, %arg1: i32) -> (i32, i32) {
    %c0_i32 = arith.constant 0 : i32
    %c0_i32_0 = arith.constant 0 : i32
    return %arg0, %c0_i32 : i32, i32
  }
  func.func @transform_1(%arg0: i32, %arg1: i32) -> (i32, i32) {
    %c0_i32 = arith.constant 0 : i32
    %c0_i32_0 = arith.constant 0 : i32
    return %c0_i32, %arg1 : i32, i32
  }
  func.func @transform_2(%arg0: i32, %arg1: i32) -> (i32, i32) {
    %c0_i32 = arith.constant 0 : i32
    %c0_i32_0 = arith.constant 0 : i32
    return %c0_i32, %arg1 : i32, i32
  }
  func.func @transform_3(%arg0: i32, %arg1: i32) -> (i32, i32) {
    %c0_i32 = arith.constant 0 : i32
    return %arg0, %arg1 : i32, i32
  }
}

module attributes {stable_mosaic.version = 11 : i64} {
  func.func @_mm_bias_1k_kernel(%arg0: i32, %arg1: i32, %arg2: memref<32x1152xbf16, #tpu.memory_space<vmem>>, %arg3: memref<1152x128xbf16, #tpu.memory_space<vmem>>, %arg4: memref<1x128xf32, #tpu.memory_space<vmem>>, %arg5: memref<32x128xbf16, #tpu.memory_space<vmem>>) attributes {dimension_semantics = [#tpu.dimension_semantics<parallel>, #tpu.dimension_semantics<parallel>], iteration_bounds = array<i64: 1, 1>, scalar_prefetch = 0 : i64, scratch_operands = 0 : i64, tpu.core_type = #tpu.core_type<tc>, window_params = [{transform_indices = @transform_0, window_bounds = array<i64: 32, 1152>}, {transform_indices = @transform_1, window_bounds = array<i64: 1152, 128>}, {transform_indices = @transform_2, window_bounds = array<i64: 1, 128>}, {transform_indices = @transform_3, window_bounds = array<i64: 32, 128>}]} {
    %c0 = arith.constant 0 : index
    %c0_0 = arith.constant 0 : index
    %0 = vector.load %arg2[%c0, %c0_0] : memref<32x1152xbf16, #tpu.memory_space<vmem>>, vector<32x1152xbf16>
    %c0_1 = arith.constant 0 : index
    %c0_2 = arith.constant 0 : index
    %1 = vector.load %arg3[%c0_1, %c0_2] : memref<1152x128xbf16, #tpu.memory_space<vmem>>, vector<1152x128xbf16>
    %cst = arith.constant dense<0.000000e+00> : vector<32x128xf32>
    %2 = tpu.matmul %0, %1, %cst {dimension_numbers = #tpu.dot_dimension_numbers<[1], [0], [0], [1], [0, 0, 1, 1], [], []>} : vector<32x1152xbf16>, vector<1152x128xbf16>, vector<32x128xf32> -> vector<32x128xf32>
    %c0_3 = arith.constant 0 : index
    %c0_4 = arith.constant 0 : index
    %3 = vector.load %arg4[%c0_3, %c0_4] : memref<1x128xf32, #tpu.memory_space<vmem>>, vector<1x128xf32>
    %4 = vector.broadcast %3 : vector<1x128xf32> to vector<32x128xf32>
    %5 = arith.addf %2, %4 : vector<32x128xf32>
    %cst_5 = arith.constant 0.000000e+00 : f32
    %6 = vector.broadcast %cst_5 : f32 to vector<32x128xf32>
    %7 = arith.maximumf %5, %6 : vector<32x128xf32>
    %8 = arith.truncf %7 : vector<32x128xf32> to vector<32x128xbf16>
    %c0_6 = arith.constant 0 : index
    %c0_7 = arith.constant 0 : index
    %9 = vector.load %arg5[%c0_6, %c0_7] : memref<32x128xbf16, #tpu.memory_space<vmem>>, vector<32x128xbf16>
    tpu.vector_store %arg5[%c0_6, %c0_7], %8 {strides = array<i32>} : memref<32x128xbf16, #tpu.memory_space<vmem>>, vector<32x128xbf16>,
    return
  }
  func.func @transform_0(%arg0: i32, %arg1: i32) -> (i32, i32) {
    %c0_i32 = arith.constant 0 : i32
    %c0_i32_0 = arith.constant 0 : i32
    return %arg0, %c0_i32 : i32, i32
  }
  func.func @transform_1(%arg0: i32, %arg1: i32) -> (i32, i32) {
    %c0_i32 = arith.constant 0 : i32
    %c0_i32_0 = arith.constant 0 : i32
    return %c0_i32, %arg1 : i32, i32
  }
  func.func @transform_2(%arg0: i32, %arg1: i32) -> (i32, i32) {
    %c0_i32 = arith.constant 0 : i32
    %c0_i32_0 = arith.constant 0 : i32
    return %c0_i32, %arg1 : i32, i32
  }
  func.func @transform_3(%arg0: i32, %arg1: i32) -> (i32, i32) {
    %c0_i32 = arith.constant 0 : i32
    return %arg0, %arg1 : i32, i32
  }
}

module attributes {stable_mosaic.version = 11 : i64} {
  func.func @_mm_bias_1k_kernel(%arg0: i32, %arg1: i32, %arg2: memref<64x512xbf16, #tpu.memory_space<vmem>>, %arg3: memref<512x128xbf16, #tpu.memory_space<vmem>>, %arg4: memref<1x128xf32, #tpu.memory_space<vmem>>, %arg5: memref<64x128xbf16, #tpu.memory_space<vmem>>) attributes {dimension_semantics = [#tpu.dimension_semantics<parallel>, #tpu.dimension_semantics<parallel>], iteration_bounds = array<i64: 2, 1>, scalar_prefetch = 0 : i64, scratch_operands = 0 : i64, tpu.core_type = #tpu.core_type<tc>, window_params = [{transform_indices = @transform_0, window_bounds = array<i64: 64, 512>}, {transform_indices = @transform_1, window_bounds = array<i64: 512, 128>}, {transform_indices = @transform_2, window_bounds = array<i64: 1, 128>}, {transform_indices = @transform_3, window_bounds = array<i64: 64, 128>}]} {
    %c0 = arith.constant 0 : index
    %c0_0 = arith.constant 0 : index
    %0 = vector.load %arg2[%c0, %c0_0] : memref<64x512xbf16, #tpu.memory_space<vmem>>, vector<64x512xbf16>
    %c0_1 = arith.constant 0 : index
    %c0_2 = arith.constant 0 : index
    %1 = vector.load %arg3[%c0_1, %c0_2] : memref<512x128xbf16, #tpu.memory_space<vmem>>, vector<512x128xbf16>
    %cst = arith.constant dense<0.000000e+00> : vector<64x128xf32>
    %2 = tpu.matmul %0, %1, %cst {dimension_numbers = #tpu.dot_dimension_numbers<[1], [0], [0], [1], [0, 0, 1, 1], [], []>} : vector<64x512xbf16>, vector<512x128xbf16>, vector<64x128xf32> -> vector<64x128xf32>
    %c0_3 = arith.constant 0 : index
    %c0_4 = arith.constant 0 : index
    %3 = vector.load %arg4[%c0_3, %c0_4] : memref<1x128xf32, #tpu.memory_space<vmem>>, vector<1x128xf32>
    %4 = vector.broadcast %3 : vector<1x128xf32> to vector<64x128xf32>
    %5 = arith.addf %2, %4 : vector<64x128xf32>
    %cst_5 = arith.constant 0.000000e+00 : f32
    %6 = vector.broadcast %cst_5 : f32 to vector<64x128xf32>
    %7 = arith.maximumf %5, %6 : vector<64x128xf32>
    %8 = arith.truncf %7 : vector<64x128xf32> to vector<64x128xbf16>
    %c0_6 = arith.constant 0 : index
    %c0_7 = arith.constant 0 : index
    %9 = vector.load %arg5[%c0_6, %c0_7] : memref<64x128xbf16, #tpu.memory_space<vmem>>, vector<64x128xbf16>
    tpu.vector_store %arg5[%c0_6, %c0_7], %8 {strides = array<i32>} : memref<64x128xbf16, #tpu.memory_space<vmem>>, vector<64x128xbf16>,
    return
  }
  func.func @transform_0(%arg0: i32, %arg1: i32) -> (i32, i32) {
    %c0_i32 = arith.constant 0 : i32
    %c0_i32_0 = arith.constant 0 : i32
    return %arg0, %c0_i32 : i32, i32
  }
  func.func @transform_1(%arg0: i32, %arg1: i32) -> (i32, i32) {
    %c0_i32 = arith.constant 0 : i32
    %c0_i32_0 = arith.constant 0 : i32
    return %c0_i32, %arg1 : i32, i32
  }
  func.func @transform_2(%arg0: i32, %arg1: i32) -> (i32, i32) {
    %c0_i32 = arith.constant 0 : i32
    %c0_i32_0 = arith.constant 0 : i32
    return %c0_i32, %arg1 : i32, i32
  }
  func.func @transform_3(%arg0: i32, %arg1: i32) -> (i32, i32) {
    %c0_i32 = arith.constant 0 : i32
    return %arg0, %arg1 : i32, i32
  }
}

module attributes {stable_mosaic.version = 11 : i64} {
  func.func @_mm_bias_1k_kernel(%arg0: i32, %arg1: i32, %arg2: memref<64x640xbf16, #tpu.memory_space<vmem>>, %arg3: memref<640x128xbf16, #tpu.memory_space<vmem>>, %arg4: memref<1x128xf32, #tpu.memory_space<vmem>>, %arg5: memref<64x128xbf16, #tpu.memory_space<vmem>>) attributes {dimension_semantics = [#tpu.dimension_semantics<parallel>, #tpu.dimension_semantics<parallel>], iteration_bounds = array<i64: 2, 1>, scalar_prefetch = 0 : i64, scratch_operands = 0 : i64, tpu.core_type = #tpu.core_type<tc>, window_params = [{transform_indices = @transform_0, window_bounds = array<i64: 64, 640>}, {transform_indices = @transform_1, window_bounds = array<i64: 640, 128>}, {transform_indices = @transform_2, window_bounds = array<i64: 1, 128>}, {transform_indices = @transform_3, window_bounds = array<i64: 64, 128>}]} {
    %c0 = arith.constant 0 : index
    %c0_0 = arith.constant 0 : index
    %0 = vector.load %arg2[%c0, %c0_0] : memref<64x640xbf16, #tpu.memory_space<vmem>>, vector<64x640xbf16>
    %c0_1 = arith.constant 0 : index
    %c0_2 = arith.constant 0 : index
    %1 = vector.load %arg3[%c0_1, %c0_2] : memref<640x128xbf16, #tpu.memory_space<vmem>>, vector<640x128xbf16>
    %cst = arith.constant dense<0.000000e+00> : vector<64x128xf32>
    %2 = tpu.matmul %0, %1, %cst {dimension_numbers = #tpu.dot_dimension_numbers<[1], [0], [0], [1], [0, 0, 1, 1], [], []>} : vector<64x640xbf16>, vector<640x128xbf16>, vector<64x128xf32> -> vector<64x128xf32>
    %c0_3 = arith.constant 0 : index
    %c0_4 = arith.constant 0 : index
    %3 = vector.load %arg4[%c0_3, %c0_4] : memref<1x128xf32, #tpu.memory_space<vmem>>, vector<1x128xf32>
    %4 = vector.broadcast %3 : vector<1x128xf32> to vector<64x128xf32>
    %5 = arith.addf %2, %4 : vector<64x128xf32>
    %cst_5 = arith.constant 0.000000e+00 : f32
    %6 = vector.broadcast %cst_5 : f32 to vector<64x128xf32>
    %7 = arith.maximumf %5, %6 : vector<64x128xf32>
    %8 = arith.truncf %7 : vector<64x128xf32> to vector<64x128xbf16>
    %c0_6 = arith.constant 0 : index
    %c0_7 = arith.constant 0 : index
    %9 = vector.load %arg5[%c0_6, %c0_7] : memref<64x128xbf16, #tpu.memory_space<vmem>>, vector<64x128xbf16>
    tpu.vector_store %arg5[%c0_6, %c0_7], %8 {strides = array<i32>} : memref<64x128xbf16, #tpu.memory_space<vmem>>, vector<64x128xbf16>,
    return
  }
  func.func @transform_0(%arg0: i32, %arg1: i32) -> (i32, i32) {
    %c0_i32 = arith.constant 0 : i32
    %c0_i32_0 = arith.constant 0 : i32
    return %arg0, %c0_i32 : i32, i32
  }
  func.func @transform_1(%arg0: i32, %arg1: i32) -> (i32, i32) {
    %c0_i32 = arith.constant 0 : i32
    %c0_i32_0 = arith.constant 0 : i32
    return %c0_i32, %arg1 : i32, i32
  }
  func.func @transform_2(%arg0: i32, %arg1: i32) -> (i32, i32) {
    %c0_i32 = arith.constant 0 : i32
    %c0_i32_0 = arith.constant 0 : i32
    return %c0_i32, %arg1 : i32, i32
  }
  func.func @transform_3(%arg0: i32, %arg1: i32) -> (i32, i32) {
    %c0_i32 = arith.constant 0 : i32
    return %arg0, %arg1 : i32, i32
  }
}

module attributes {stable_mosaic.version = 11 : i64} {
  func.func @_mm_bias_1k_kernel(%arg0: i32, %arg1: i32, %arg2: memref<64x768xbf16, #tpu.memory_space<vmem>>, %arg3: memref<768x128xbf16, #tpu.memory_space<vmem>>, %arg4: memref<1x128xf32, #tpu.memory_space<vmem>>, %arg5: memref<64x128xbf16, #tpu.memory_space<vmem>>) attributes {dimension_semantics = [#tpu.dimension_semantics<parallel>, #tpu.dimension_semantics<parallel>], iteration_bounds = array<i64: 2, 1>, scalar_prefetch = 0 : i64, scratch_operands = 0 : i64, tpu.core_type = #tpu.core_type<tc>, window_params = [{transform_indices = @transform_0, window_bounds = array<i64: 64, 768>}, {transform_indices = @transform_1, window_bounds = array<i64: 768, 128>}, {transform_indices = @transform_2, window_bounds = array<i64: 1, 128>}, {transform_indices = @transform_3, window_bounds = array<i64: 64, 128>}]} {
    %c0 = arith.constant 0 : index
    %c0_0 = arith.constant 0 : index
    %0 = vector.load %arg2[%c0, %c0_0] : memref<64x768xbf16, #tpu.memory_space<vmem>>, vector<64x768xbf16>
    %c0_1 = arith.constant 0 : index
    %c0_2 = arith.constant 0 : index
    %1 = vector.load %arg3[%c0_1, %c0_2] : memref<768x128xbf16, #tpu.memory_space<vmem>>, vector<768x128xbf16>
    %cst = arith.constant dense<0.000000e+00> : vector<64x128xf32>
    %2 = tpu.matmul %0, %1, %cst {dimension_numbers = #tpu.dot_dimension_numbers<[1], [0], [0], [1], [0, 0, 1, 1], [], []>} : vector<64x768xbf16>, vector<768x128xbf16>, vector<64x128xf32> -> vector<64x128xf32>
    %c0_3 = arith.constant 0 : index
    %c0_4 = arith.constant 0 : index
    %3 = vector.load %arg4[%c0_3, %c0_4] : memref<1x128xf32, #tpu.memory_space<vmem>>, vector<1x128xf32>
    %4 = vector.broadcast %3 : vector<1x128xf32> to vector<64x128xf32>
    %5 = arith.addf %2, %4 : vector<64x128xf32>
    %cst_5 = arith.constant 0.000000e+00 : f32
    %6 = vector.broadcast %cst_5 : f32 to vector<64x128xf32>
    %7 = arith.maximumf %5, %6 : vector<64x128xf32>
    %8 = arith.truncf %7 : vector<64x128xf32> to vector<64x128xbf16>
    %c0_6 = arith.constant 0 : index
    %c0_7 = arith.constant 0 : index
    %9 = vector.load %arg5[%c0_6, %c0_7] : memref<64x128xbf16, #tpu.memory_space<vmem>>, vector<64x128xbf16>
    tpu.vector_store %arg5[%c0_6, %c0_7], %8 {strides = array<i32>} : memref<64x128xbf16, #tpu.memory_space<vmem>>, vector<64x128xbf16>,
    return
  }
  func.func @transform_0(%arg0: i32, %arg1: i32) -> (i32, i32) {
    %c0_i32 = arith.constant 0 : i32
    %c0_i32_0 = arith.constant 0 : i32
    return %arg0, %c0_i32 : i32, i32
  }
  func.func @transform_1(%arg0: i32, %arg1: i32) -> (i32, i32) {
    %c0_i32 = arith.constant 0 : i32
    %c0_i32_0 = arith.constant 0 : i32
    return %c0_i32, %arg1 : i32, i32
  }
  func.func @transform_2(%arg0: i32, %arg1: i32) -> (i32, i32) {
    %c0_i32 = arith.constant 0 : i32
    %c0_i32_0 = arith.constant 0 : i32
    return %c0_i32, %arg1 : i32, i32
  }
  func.func @transform_3(%arg0: i32, %arg1: i32) -> (i32, i32) {
    %c0_i32 = arith.constant 0 : i32
    return %arg0, %arg1 : i32, i32
  }
}

module attributes {stable_mosaic.version = 11 : i64} {
  func.func @_mm_bias_1k_kernel(%arg0: i32, %arg1: i32, %arg2: memref<256x256xbf16, #tpu.memory_space<vmem>>, %arg3: memref<256x128xbf16, #tpu.memory_space<vmem>>, %arg4: memref<1x128xf32, #tpu.memory_space<vmem>>, %arg5: memref<256x128xbf16, #tpu.memory_space<vmem>>) attributes {dimension_semantics = [#tpu.dimension_semantics<parallel>, #tpu.dimension_semantics<parallel>], iteration_bounds = array<i64: 2, 1>, scalar_prefetch = 0 : i64, scratch_operands = 0 : i64, tpu.core_type = #tpu.core_type<tc>, window_params = [{transform_indices = @transform_0, window_bounds = array<i64: 256, 256>}, {transform_indices = @transform_1, window_bounds = array<i64: 256, 128>}, {transform_indices = @transform_2, window_bounds = array<i64: 1, 128>}, {transform_indices = @transform_3, window_bounds = array<i64: 256, 128>}]} {
    %c0 = arith.constant 0 : index
    %c0_0 = arith.constant 0 : index
    %0 = vector.load %arg2[%c0, %c0_0] : memref<256x256xbf16, #tpu.memory_space<vmem>>, vector<256x256xbf16>
    %c0_1 = arith.constant 0 : index
    %c0_2 = arith.constant 0 : index
    %1 = vector.load %arg3[%c0_1, %c0_2] : memref<256x128xbf16, #tpu.memory_space<vmem>>, vector<256x128xbf16>
    %cst = arith.constant dense<0.000000e+00> : vector<256x128xf32>
    %2 = tpu.matmul %0, %1, %cst {dimension_numbers = #tpu.dot_dimension_numbers<[1], [0], [0], [1], [0, 0, 1, 1], [], []>} : vector<256x256xbf16>, vector<256x128xbf16>, vector<256x128xf32> -> vector<256x128xf32>
    %c0_3 = arith.constant 0 : index
    %c0_4 = arith.constant 0 : index
    %3 = vector.load %arg4[%c0_3, %c0_4] : memref<1x128xf32, #tpu.memory_space<vmem>>, vector<1x128xf32>
    %4 = vector.broadcast %3 : vector<1x128xf32> to vector<256x128xf32>
    %5 = arith.addf %2, %4 : vector<256x128xf32>
    %cst_5 = arith.constant 0.000000e+00 : f32
    %6 = vector.broadcast %cst_5 : f32 to vector<256x128xf32>
    %7 = arith.maximumf %5, %6 : vector<256x128xf32>
    %8 = arith.truncf %7 : vector<256x128xf32> to vector<256x128xbf16>
    %c0_6 = arith.constant 0 : index
    %c0_7 = arith.constant 0 : index
    %9 = vector.load %arg5[%c0_6, %c0_7] : memref<256x128xbf16, #tpu.memory_space<vmem>>, vector<256x128xbf16>
    tpu.vector_store %arg5[%c0_6, %c0_7], %8 {strides = array<i32>} : memref<256x128xbf16, #tpu.memory_space<vmem>>, vector<256x128xbf16>,
    return
  }
  func.func @transform_0(%arg0: i32, %arg1: i32) -> (i32, i32) {
    %c0_i32 = arith.constant 0 : i32
    %c0_i32_0 = arith.constant 0 : i32
    return %arg0, %c0_i32 : i32, i32
  }
  func.func @transform_1(%arg0: i32, %arg1: i32) -> (i32, i32) {
    %c0_i32 = arith.constant 0 : i32
    %c0_i32_0 = arith.constant 0 : i32
    return %c0_i32, %arg1 : i32, i32
  }
  func.func @transform_2(%arg0: i32, %arg1: i32) -> (i32, i32) {
    %c0_i32 = arith.constant 0 : i32
    %c0_i32_0 = arith.constant 0 : i32
    return %c0_i32, %arg1 : i32, i32
  }
  func.func @transform_3(%arg0: i32, %arg1: i32) -> (i32, i32) {
    %c0_i32 = arith.constant 0 : i32
    return %arg0, %arg1 : i32, i32
  }
}

module attributes {stable_mosaic.version = 11 : i64} {
  func.func @_mm_bias_1k_kernel(%arg0: i32, %arg1: i32, %arg2: memref<256x384xbf16, #tpu.memory_space<vmem>>, %arg3: memref<384x128xbf16, #tpu.memory_space<vmem>>, %arg4: memref<1x128xf32, #tpu.memory_space<vmem>>, %arg5: memref<256x128xbf16, #tpu.memory_space<vmem>>) attributes {dimension_semantics = [#tpu.dimension_semantics<parallel>, #tpu.dimension_semantics<parallel>], iteration_bounds = array<i64: 2, 1>, scalar_prefetch = 0 : i64, scratch_operands = 0 : i64, tpu.core_type = #tpu.core_type<tc>, window_params = [{transform_indices = @transform_0, window_bounds = array<i64: 256, 384>}, {transform_indices = @transform_1, window_bounds = array<i64: 384, 128>}, {transform_indices = @transform_2, window_bounds = array<i64: 1, 128>}, {transform_indices = @transform_3, window_bounds = array<i64: 256, 128>}]} {
    %c0 = arith.constant 0 : index
    %c0_0 = arith.constant 0 : index
    %0 = vector.load %arg2[%c0, %c0_0] : memref<256x384xbf16, #tpu.memory_space<vmem>>, vector<256x384xbf16>
    %c0_1 = arith.constant 0 : index
    %c0_2 = arith.constant 0 : index
    %1 = vector.load %arg3[%c0_1, %c0_2] : memref<384x128xbf16, #tpu.memory_space<vmem>>, vector<384x128xbf16>
    %cst = arith.constant dense<0.000000e+00> : vector<256x128xf32>
    %2 = tpu.matmul %0, %1, %cst {dimension_numbers = #tpu.dot_dimension_numbers<[1], [0], [0], [1], [0, 0, 1, 1], [], []>} : vector<256x384xbf16>, vector<384x128xbf16>, vector<256x128xf32> -> vector<256x128xf32>
    %c0_3 = arith.constant 0 : index
    %c0_4 = arith.constant 0 : index
    %3 = vector.load %arg4[%c0_3, %c0_4] : memref<1x128xf32, #tpu.memory_space<vmem>>, vector<1x128xf32>
    %4 = vector.broadcast %3 : vector<1x128xf32> to vector<256x128xf32>
    %5 = arith.addf %2, %4 : vector<256x128xf32>
    %cst_5 = arith.constant 0.000000e+00 : f32
    %6 = vector.broadcast %cst_5 : f32 to vector<256x128xf32>
    %7 = arith.maximumf %5, %6 : vector<256x128xf32>
    %8 = arith.truncf %7 : vector<256x128xf32> to vector<256x128xbf16>
    %c0_6 = arith.constant 0 : index
    %c0_7 = arith.constant 0 : index
    %9 = vector.load %arg5[%c0_6, %c0_7] : memref<256x128xbf16, #tpu.memory_space<vmem>>, vector<256x128xbf16>
    tpu.vector_store %arg5[%c0_6, %c0_7], %8 {strides = array<i32>} : memref<256x128xbf16, #tpu.memory_space<vmem>>, vector<256x128xbf16>,
    return
  }
  func.func @transform_0(%arg0: i32, %arg1: i32) -> (i32, i32) {
    %c0_i32 = arith.constant 0 : i32
    %c0_i32_0 = arith.constant 0 : i32
    return %arg0, %c0_i32 : i32, i32
  }
  func.func @transform_1(%arg0: i32, %arg1: i32) -> (i32, i32) {
    %c0_i32 = arith.constant 0 : i32
    %c0_i32_0 = arith.constant 0 : i32
    return %c0_i32, %arg1 : i32, i32
  }
  func.func @transform_2(%arg0: i32, %arg1: i32) -> (i32, i32) {
    %c0_i32 = arith.constant 0 : i32
    %c0_i32_0 = arith.constant 0 : i32
    return %c0_i32, %arg1 : i32, i32
  }
  func.func @transform_3(%arg0: i32, %arg1: i32) -> (i32, i32) {
    %c0_i32 = arith.constant 0 : i32
    return %arg0, %arg1 : i32, i32
  }
}

module attributes {stable_mosaic.version = 11 : i64} {
  func.func @_mm_bias_1k_kernel(%arg0: i32, %arg1: i32, %arg2: memref<256x512xbf16, #tpu.memory_space<vmem>>, %arg3: memref<512x128xbf16, #tpu.memory_space<vmem>>, %arg4: memref<1x128xf32, #tpu.memory_space<vmem>>, %arg5: memref<256x128xbf16, #tpu.memory_space<vmem>>) attributes {dimension_semantics = [#tpu.dimension_semantics<parallel>, #tpu.dimension_semantics<parallel>], iteration_bounds = array<i64: 2, 1>, scalar_prefetch = 0 : i64, scratch_operands = 0 : i64, tpu.core_type = #tpu.core_type<tc>, window_params = [{transform_indices = @transform_0, window_bounds = array<i64: 256, 512>}, {transform_indices = @transform_1, window_bounds = array<i64: 512, 128>}, {transform_indices = @transform_2, window_bounds = array<i64: 1, 128>}, {transform_indices = @transform_3, window_bounds = array<i64: 256, 128>}]} {
    %c0 = arith.constant 0 : index
    %c0_0 = arith.constant 0 : index
    %0 = vector.load %arg2[%c0, %c0_0] : memref<256x512xbf16, #tpu.memory_space<vmem>>, vector<256x512xbf16>
    %c0_1 = arith.constant 0 : index
    %c0_2 = arith.constant 0 : index
    %1 = vector.load %arg3[%c0_1, %c0_2] : memref<512x128xbf16, #tpu.memory_space<vmem>>, vector<512x128xbf16>
    %cst = arith.constant dense<0.000000e+00> : vector<256x128xf32>
    %2 = tpu.matmul %0, %1, %cst {dimension_numbers = #tpu.dot_dimension_numbers<[1], [0], [0], [1], [0, 0, 1, 1], [], []>} : vector<256x512xbf16>, vector<512x128xbf16>, vector<256x128xf32> -> vector<256x128xf32>
    %c0_3 = arith.constant 0 : index
    %c0_4 = arith.constant 0 : index
    %3 = vector.load %arg4[%c0_3, %c0_4] : memref<1x128xf32, #tpu.memory_space<vmem>>, vector<1x128xf32>
    %4 = vector.broadcast %3 : vector<1x128xf32> to vector<256x128xf32>
    %5 = arith.addf %2, %4 : vector<256x128xf32>
    %cst_5 = arith.constant 0.000000e+00 : f32
    %6 = vector.broadcast %cst_5 : f32 to vector<256x128xf32>
    %7 = arith.maximumf %5, %6 : vector<256x128xf32>
    %8 = arith.truncf %7 : vector<256x128xf32> to vector<256x128xbf16>
    %c0_6 = arith.constant 0 : index
    %c0_7 = arith.constant 0 : index
    %9 = vector.load %arg5[%c0_6, %c0_7] : memref<256x128xbf16, #tpu.memory_space<vmem>>, vector<256x128xbf16>
    tpu.vector_store %arg5[%c0_6, %c0_7], %8 {strides = array<i32>} : memref<256x128xbf16, #tpu.memory_space<vmem>>, vector<256x128xbf16>,
    return
  }
  func.func @transform_0(%arg0: i32, %arg1: i32) -> (i32, i32) {
    %c0_i32 = arith.constant 0 : i32
    %c0_i32_0 = arith.constant 0 : i32
    return %arg0, %c0_i32 : i32, i32
  }
  func.func @transform_1(%arg0: i32, %arg1: i32) -> (i32, i32) {
    %c0_i32 = arith.constant 0 : i32
    %c0_i32_0 = arith.constant 0 : i32
    return %c0_i32, %arg1 : i32, i32
  }
  func.func @transform_2(%arg0: i32, %arg1: i32) -> (i32, i32) {
    %c0_i32 = arith.constant 0 : i32
    %c0_i32_0 = arith.constant 0 : i32
    return %c0_i32, %arg1 : i32, i32
  }
  func.func @transform_3(%arg0: i32, %arg1: i32) -> (i32, i32) {
    %c0_i32 = arith.constant 0 : i32
    return %arg0, %arg1 : i32, i32
  }
}

module attributes {stable_mosaic.version = 11 : i64} {
  func.func @_mm_bias_1k_kernel(%arg0: i32, %arg1: i32, %arg2: memref<256x128xbf16, #tpu.memory_space<vmem>>, %arg3: memref<128x128xbf16, #tpu.memory_space<vmem>>, %arg4: memref<1x128xf32, #tpu.memory_space<vmem>>, %arg5: memref<256x128xf32, #tpu.memory_space<vmem>>) attributes {dimension_semantics = [#tpu.dimension_semantics<parallel>, #tpu.dimension_semantics<parallel>], iteration_bounds = array<i64: 2, 1>, scalar_prefetch = 0 : i64, scratch_operands = 0 : i64, tpu.core_type = #tpu.core_type<tc>, window_params = [{transform_indices = @transform_0, window_bounds = array<i64: 256, 128>}, {transform_indices = @transform_1, window_bounds = array<i64: 128, 128>}, {transform_indices = @transform_2, window_bounds = array<i64: 1, 128>}, {transform_indices = @transform_3, window_bounds = array<i64: 256, 128>}]} {
    %c0 = arith.constant 0 : index
    %c0_0 = arith.constant 0 : index
    %0 = vector.load %arg2[%c0, %c0_0] : memref<256x128xbf16, #tpu.memory_space<vmem>>, vector<256x128xbf16>
    %c0_1 = arith.constant 0 : index
    %c0_2 = arith.constant 0 : index
    %1 = vector.load %arg3[%c0_1, %c0_2] : memref<128x128xbf16, #tpu.memory_space<vmem>>, vector<128x128xbf16>
    %cst = arith.constant dense<0.000000e+00> : vector<256x128xf32>
    %2 = tpu.matmul %0, %1, %cst {dimension_numbers = #tpu.dot_dimension_numbers<[1], [0], [0], [1], [0, 0, 1, 1], [], []>} : vector<256x128xbf16>, vector<128x128xbf16>, vector<256x128xf32> -> vector<256x128xf32>
    %c0_3 = arith.constant 0 : index
    %c0_4 = arith.constant 0 : index
    %3 = vector.load %arg4[%c0_3, %c0_4] : memref<1x128xf32, #tpu.memory_space<vmem>>, vector<1x128xf32>
    %4 = vector.broadcast %3 : vector<1x128xf32> to vector<256x128xf32>
    %5 = arith.addf %2, %4 : vector<256x128xf32>
    %c0_5 = arith.constant 0 : index
    %c0_6 = arith.constant 0 : index
    %6 = vector.load %arg5[%c0_5, %c0_6] : memref<256x128xf32, #tpu.memory_space<vmem>>, vector<256x128xf32>
    tpu.vector_store %arg5[%c0_5, %c0_6], %5 {strides = array<i32>} : memref<256x128xf32, #tpu.memory_space<vmem>>, vector<256x128xf32>,
    return
  }
  func.func @transform_0(%arg0: i32, %arg1: i32) -> (i32, i32) {
    %c0_i32 = arith.constant 0 : i32
    %c0_i32_0 = arith.constant 0 : i32
    return %arg0, %c0_i32 : i32, i32
  }
  func.func @transform_1(%arg0: i32, %arg1: i32) -> (i32, i32) {
    %c0_i32 = arith.constant 0 : i32
    %c0_i32_0 = arith.constant 0 : i32
    return %c0_i32, %arg1 : i32, i32
  }
  func.func @transform_2(%arg0: i32, %arg1: i32) -> (i32, i32) {
    %c0_i32 = arith.constant 0 : i32
    %c0_i32_0 = arith.constant 0 : i32
    return %c0_i32, %arg1 : i32, i32
  }
  func.func @transform_3(%arg0: i32, %arg1: i32) -> (i32, i32) {
    %c0_i32 = arith.constant 0 : i32
    return %arg0, %arg1 : i32, i32
  }
}

</mosaic_0001>

<bundles_post_ra>
// kernel: unetpp_forward.46
= control target key start
LH: loop header
LB: loop body
LE: loop exit
PB: predicated region body
PF: predicated region fallthrough
CT: control target
= control target key end

     0   :  { %s1257_s12 = smov 0   ;;  %s1259_s13 = smov 0   ;;  %s1394_s0 = inlined_call_operand.vmem [shape: bf16[512,128], index: 0, kind: input, shape index: {}]   ;;  %s1395_s1 = inlined_call_operand.vmem [shape: bf16[128,128], index: 1, kind: input, shape index: {}]   ;;  %s1396_s2 = inlined_call_operand.vmem [shape: f32[1,128], index: 2, kind: input, shape index: {}]   ;;  %s1397_s3 = inlined_call_operand.vmem [shape: bf16[512,128], index: 3, kind: output, shape index: {}]  }
   0x1   :  { %s1261_s14 = smov 0  }
   0x2 LB: > { %s25_s15 = sadd.s32 1, %s1231_s13  ;;  %p886_p0 = scmp.ge.s32.totalorder %s1235_s14, 1  ;;  %s1235_s14 = sphi %s1261_s14, %s13_s14   ;;  %s1231_s13 = sphi %s1259_s13, %s1399_s13   ;;  %s1227_s12 = sphi %s1257_s12, %s1398_s12  }
   0x3   : > { %p27_p1 = scmp.ge.s32.totalorder %s25_s15, 2  ;;  %p169_p2 = scmp.lt.s32.totalorder %s1235_s14, 3 }
   0x5   : > { %s1401_s15 = smov (%p27_p1, %s25_s15), 0  ;;  %p170_p3 = pnand %p886_p0, %p169_p2 }
   0x6   : > { %v1189_v0 = vld [vmem:[%s1395_s1] sm:$0xff] (!%p170_p3)   ;;  %s887_s18 = sshll.u32 (!%p170_p3), %s1227_s12, 5  ;;  %v1190_v1 = vld [vmem:[%s1395_s1 + $0x8] sm:$0xff] (!%p170_p3)   ;;  %v1191_v2 = vld [vmem:[%s1395_s1 + $0x10] sm:$0xff] (!%p170_p3)  }
   0x7   : > { %173 = sbr.rel (%p170_p3) target bundleno = 285 (0x11d), region = 32  ;;  %p204_p4 = scmp.lt.s32.totalorder (!%p170_p3), %s887_s18, 63  ;;  %1101 = vmatprep.subr.bf16.mxu0 (!%p170_p3), %v1189_v0  ;;  %1149 = vmatprep.subr.bf16.mxu1 (!%p170_p3), %v1189_v0  ;;  %v1192_v3 = vld [vmem:[%s1395_s1 + $0x18] sm:$0xff] (!%p170_p3)   ;;  %v1193_v6 = vld [vmem:[%s1395_s1 + $0x20] sm:$0xff] (!%p170_p3)   ;;  %v1194_v7 = vld [vmem:[%s1395_s1 + $0x28] sm:$0xff] (!%p170_p3)  }
   0x8   : > { %1102 = vmatpush3.bf16.msra.mxu0 (!%p170_p3), %v1189_v0  ;;  %1157 = vmatpush3.bf16.msra.mxu1 (!%p170_p3), %v1189_v0  ;;  %v1195_v8 = vld [vmem:[%s1395_s1 + $0x30] sm:$0xff] (!%p170_p3)   ;;  %v1196_v9 = vld [vmem:[%s1395_s1 + $0x38] sm:$0xff] (!%p170_p3)   ;;  %v1328_v24 = vld [vmem:[%s1396_s2] ss:$0 sm:$0xff] (!%p170_p3) }
   0x9   : > { %1103 = vmatprep.subr.bf16.mxu0 (!%p170_p3), %v1190_v1  ;;  %1150 = vmatprep.subr.bf16.mxu1 (!%p170_p3), %v1190_v1 }
   0xc   : > { %1104 = vmatpush3.bf16.msra.mxu0 (!%p170_p3), %v1190_v1  ;;  %1158 = vmatpush3.bf16.msra.mxu1 (!%p170_p3), %v1190_v1 }
   0xd   : > { %1105 = vmatprep.subr.bf16.mxu0 (!%p170_p3), %v1191_v2  ;;  %1151 = vmatprep.subr.bf16.mxu1 (!%p170_p3), %v1191_v2 }
   0xe   : > { %s1403_s18 = smov (!%p204_p4, %s887_s18), 63 }
   0xf   : > { %s888_s23 = sshll.u32 %s1403_s18, 2 }
  0x10   : > { %s1292_s26 = scalar_lea.vmem %s1394_s0, %s888_s23  ;;  %1106 = vmatpush3.bf16.msra.mxu0 %v1191_v2  ;;  %1159 = vmatpush3.bf16.msra.mxu1 %v1191_v2  ;;  %s1343_s17 = scalar_lea.vmem %s1397_s3, %s888_s23 }
  0x11   : > { %v1197_v4 = vld [vmem:[%s1292_s26] sm:$0xff]   ;;  %1107 = vmatprep.subr.bf16.mxu0 %v1192_v3  ;;  %1152 = vmatprep.subr.bf16.mxu1 %v1192_v3  ;;  %v1199_v10 = vld [vmem:[%s1292_s26 + $0x8] sm:$0xff]   ;;  %v1201_v12 = vld [vmem:[%s1292_s26 + $0x10] sm:$0xff]  }
  0x12   : > { %v1198_v5 = vld [vmem:[%s1292_s26 + $0x40] sm:$0xff]   ;;  %1117 = vmatprep.mubr.bf16.mxu0 %v1197_v4  ;;  %v1200_v11 = vld [vmem:[%s1292_s26 + $0x48] sm:$0xff]   ;;  %v1202_v13 = vld [vmem:[%s1292_s26 + $0x50] sm:$0xff]  }
  0x13   : > { %1133 = vmatprep.mubr.bf16.mxu1 %v1198_v5  ;;  %v1203_v14 = vld [vmem:[%s1292_s26 + $0x18] sm:$0xff]   ;;  %v1205_v16 = vld [vmem:[%s1292_s26 + $0x20] sm:$0xff]   ;;  %v1207_v18 = vld [vmem:[%s1292_s26 + $0x28] sm:$0xff]  }
  0x14   : > { %1108 = vmatpush3.bf16.msra.mxu0 %v1192_v3  ;;  %1160 = vmatpush3.bf16.msra.mxu1 %v1192_v3  ;;  %v1204_v15 = vld [vmem:[%s1292_s26 + $0x58] sm:$0xff]   ;;  %v1206_v17 = vld [vmem:[%s1292_s26 + $0x60] sm:$0xff]   ;;  %v1208_v19 = vld [vmem:[%s1292_s26 + $0x68] sm:$0xff]  }
  0x15   : > { %1109 = vmatprep.subr.bf16.mxu0 %v1193_v6  ;;  %1153 = vmatprep.subr.bf16.mxu1 %v1193_v6  ;;  %v1209_v20 = vld [vmem:[%s1292_s26 + $0x30] sm:$0xff]   ;;  %v1211_v22 = vld [vmem:[%s1292_s26 + $0x38] sm:$0xff]  }
  0x16   : > { %v1210_v21 = vld [vmem:[%s1292_s26 + $0x70] sm:$0xff]   ;;  %v1212_v23 = vld [vmem:[%s1292_s26 + $0x78] sm:$0xff]  }
  0x18   : > { %1110 = vmatpush3.bf16.msra.mxu0 %v1193_v6  ;;  %1161 = vmatpush3.bf16.msra.mxu1 %v1193_v6 }
  0x19   : > { %1111 = vmatprep.subr.bf16.mxu0 %v1194_v7  ;;  %1154 = vmatprep.subr.bf16.mxu1 %v1194_v7 }
  0x1c   : > { %1112 = vmatpush3.bf16.msra.mxu0 %v1194_v7  ;;  %1162 = vmatpush3.bf16.msra.mxu1 %v1194_v7 }
  0x1d   : > { %1113 = vmatprep.subr.bf16.mxu0 %v1195_v8  ;;  %1155 = vmatprep.subr.bf16.mxu1 %v1195_v8 }
  0x20   : > { %1114 = vmatpush3.bf16.msra.mxu0 %v1195_v8  ;;  %1163 = vmatpush3.bf16.msra.mxu1 %v1195_v8 }
  0x21   : > { %1115 = vmatprep.subr.bf16.mxu0 %v1196_v9  ;;  %1156 = vmatprep.subr.bf16.mxu1 %v1196_v9 }
  0x24   : > { %1116 = vmatpush3.bf16.msra.mxu0 %v1196_v9  ;;  %1164 = vmatpush3.bf16.msra.mxu1 %v1196_v9 }
  0x27   : > { %1118 = vmatmul.mubr.bf16.vlgmr.msra.gmra.mrb[0].mxu0 %v1199_v10  ;;  %1134 = vmatmul.mubr.bf16.vlgmr.msra.gmra.mrb[0].mxu1 %v1200_v11 }
  0x28   : > { %1121 = vmatprep.mubr.bf16.mxu0 %v1201_v12  ;;  %1137 = vmatprep.mubr.bf16.mxu1 %v1202_v13 }
  0x2f   : > { %1122 = vmatmul.mubr.bf16.gmra.mrb[4].mxu0 %v1203_v14  ;;  %1138 = vmatmul.mubr.bf16.gmra.mrb[4].mxu1 %v1204_v15 }
  0x30   : > { %1125 = vmatprep.mubr.bf16.mxu0 %v1205_v16  ;;  %1141 = vmatprep.mubr.bf16.mxu1 %v1206_v17 }
  0x37   : > { %1126 = vmatmul.mubr.bf16.gmra.mrb[8].mxu0 %v1207_v18  ;;  %1142 = vmatmul.mubr.bf16.gmra.mrb[8].mxu1 %v1208_v19 }
  0x38   : > { %1129 = vmatprep.mubr.bf16.mxu0 %v1209_v20  ;;  %1145 = vmatprep.mubr.bf16.mxu1 %v1210_v21 }
  0x3f   : > { %1130 = vmatmul.mubr.bf16.gmra.mrb[12].mxu0 %v1211_v22  ;;  %1146 = vmatmul.mubr.bf16.gmra.mrb[12].mxu1 %v1212_v23 }
  0xfa   : > { %v1119_v25 = vpop.f32.mrb[0].mxu0  ;;  %v1135_v26 = vpop.f32.mrb[0].mxu1 }
  0xfb   : > { %v468_v27 = vadd.f32 %v1119_v25, %v1328_v24  ;;  %v532_v28 = vadd.f32 %v1135_v26, %v1328_v24  ;;  %v459_v29 = vpop.f32.mrb[1].mxu0  ;;  %v523_v30 = vpop.f32.mrb[1].mxu1 }
  0xfc   : > { %v460_v31 = vadd.f32 %v1328_v24, %v459_v29  ;;  %v524_v32 = vadd.f32 %v1328_v24, %v523_v30  ;;  %v1120_v33 = vpop.f32.mrb[2].mxu0  ;;  %v1136_v34 = vpop.f32.mrb[2].mxu1 }
  0xfd   : > { %v471_v35 = vadd.f32 %v1120_v33, %v1328_v24  ;;  %v535_v36 = vadd.f32 %v1136_v34, %v1328_v24  ;;  %v462_v37 = vpop.f32.mrb[3].mxu0  ;;  %v526_v38 = vpop.f32.mrb[3].mxu1  ;;  %v588_v41 = vmax.f32 %v468_v27, 0.0  ;;  %v604_v42 = vmax.f32 %v532_v28, 0.0 }
  0xfe   : > { %v463_v39 = vadd.f32 %v1328_v24, %v462_v37  ;;  %v527_v40 = vadd.f32 %v1328_v24, %v526_v38  ;;  %v586_v45 = vmax.f32 %v460_v31, 0.0  ;;  %v602_v46 = vmax.f32 %v524_v32, 0.0 }
  0xff   : > { %v589_v43 = vmax.f32 %v471_v35, 0.0  ;;  %v605_v44 = vmax.f32 %v535_v36, 0.0 }
 0x100   : > { %v587_v47 = vmax.f32 %v463_v39, 0.0  ;;  %v603_v48 = vmax.f32 %v527_v40, 0.0 }
 0x101   : > { %v990_v49 = vpack.c.bf16 %v589_v43, %v588_v41  ;;  %v1030_v50 = vpack.c.bf16 %v605_v44, %v604_v42 }
 0x102   : > { %v985_v51 = vpack.c.bf16 %v587_v47, %v586_v45  ;;  %v1025_v52 = vpack.c.bf16 %v603_v48, %v602_v46  ;;  %v1123_v53 = vpop.f32.mrb[4].mxu0  ;;  %v1139_v54 = vpop.f32.mrb[4].mxu1 }
 0x103   : > { %1062 = vst [vmem:[%s1343_s17 + $0x8] sm:$0xff] %v990_v49   ;;  %1070 = vst [vmem:[%s1343_s17 + $0x48] sm:$0xff] %v1030_v50   ;;  %v484_v55 = vadd.f32 %v1123_v53, %v1328_v24  ;;  %v548_v56 = vadd.f32 %v1139_v54, %v1328_v24  ;;  %v475_v57 = vpop.f32.mrb[5].mxu0  ;;  %v539_v58 = vpop.f32.mrb[5].mxu1 }
 0x104   : > { %986 = vst [vmem:[%s1343_s17] sm:$0xff] %v985_v51   ;;  %1069 = vst [vmem:[%s1343_s17 + $0x40] sm:$0xff] %v1025_v52   ;;  %v476_v59 = vadd.f32 %v1328_v24, %v475_v57  ;;  %v540_v60 = vadd.f32 %v1328_v24, %v539_v58  ;;  %v1124_v61 = vpop.f32.mrb[6].mxu0  ;;  %v1140_v62 = vpop.f32.mrb[6].mxu1 }
 0x105   : > { %v487_v63 = vadd.f32 %v1124_v61, %v1328_v24  ;;  %v551_v0 = vadd.f32 %v1140_v62, %v1328_v24  ;;  %v478_v1 = vpop.f32.mrb[7].mxu0  ;;  %v542_v2 = vpop.f32.mrb[7].mxu1  ;;  %v592_v5 = vmax.f32 %v484_v55, 0.0  ;;  %v608_v6 = vmax.f32 %v548_v56, 0.0 }
 0x106   : > { %v479_v3 = vadd.f32 %v1328_v24, %v478_v1  ;;  %v543_v4 = vadd.f32 %v1328_v24, %v542_v2  ;;  %v590_v9 = vmax.f32 %v476_v59, 0.0  ;;  %v606_v10 = vmax.f32 %v540_v60, 0.0 }
 0x107   : > { %v593_v7 = vmax.f32 %v487_v63, 0.0  ;;  %v609_v8 = vmax.f32 %v551_v0, 0.0 }
 0x108   : > { %v591_v11 = vmax.f32 %v479_v3, 0.0  ;;  %v607_v12 = vmax.f32 %v543_v4, 0.0 }
 0x109   : > { %v1000_v13 = vpack.c.bf16 %v593_v7, %v592_v5  ;;  %v1040_v14 = vpack.c.bf16 %v609_v8, %v608_v6 }
 0x10a   : > { %v995_v15 = vpack.c.bf16 %v591_v11, %v590_v9  ;;  %v1035_v16 = vpack.c.bf16 %v607_v12, %v606_v10  ;;  %v1127_v17 = vpop.f32.mrb[8].mxu0  ;;  %v1143_v18 = vpop.f32.mrb[8].mxu1 }
 0x10b   : > { %1064 = vst [vmem:[%s1343_s17 + $0x18] sm:$0xff] %v1000_v13   ;;  %1072 = vst [vmem:[%s1343_s17 + $0x58] sm:$0xff] %v1040_v14   ;;  %v500_v19 = vadd.f32 %v1127_v17, %v1328_v24  ;;  %v564_v20 = vadd.f32 %v1143_v18, %v1328_v24  ;;  %v491_v21 = vpop.f32.mrb[9].mxu0  ;;  %v555_v22 = vpop.f32.mrb[9].mxu1 }
 0x10c   : > { %1063 = vst [vmem:[%s1343_s17 + $0x10] sm:$0xff] %v995_v15   ;;  %1071 = vst [vmem:[%s1343_s17 + $0x50] sm:$0xff] %v1035_v16   ;;  %v492_v23 = vadd.f32 %v1328_v24, %v491_v21  ;;  %v556_v25 = vadd.f32 %v1328_v24, %v555_v22  ;;  %v1128_v26 = vpop.f32.mrb[10].mxu0  ;;  %v1144_v27 = vpop.f32.mrb[10].mxu1 }
 0x10d   : > { %v503_v28 = vadd.f32 %v1128_v26, %v1328_v24  ;;  %v567_v29 = vadd.f32 %v1144_v27, %v1328_v24  ;;  %v494_v30 = vpop.f32.mrb[11].mxu0  ;;  %v558_v31 = vpop.f32.mrb[11].mxu1  ;;  %v596_v34 = vmax.f32 %v500_v19, 0.0  ;;  %v612_v35 = vmax.f32 %v564_v20, 0.0 }
 0x10e   : > { %v495_v32 = vadd.f32 %v1328_v24, %v494_v30  ;;  %v559_v33 = vadd.f32 %v1328_v24, %v558_v31  ;;  %v594_v38 = vmax.f32 %v492_v23, 0.0  ;;  %v610_v39 = vmax.f32 %v556_v25, 0.0 }
 0x10f   : > { %v597_v36 = vmax.f32 %v503_v28, 0.0  ;;  %v613_v37 = vmax.f32 %v567_v29, 0.0 }
 0x110   : > { %v595_v40 = vmax.f32 %v495_v32, 0.0  ;;  %v611_v41 = vmax.f32 %v559_v33, 0.0 }
 0x111   : > { %v1010_v42 = vpack.c.bf16 %v597_v36, %v596_v34  ;;  %v1050_v43 = vpack.c.bf16 %v613_v37, %v612_v35 }
 0x112   : > { %v1005_v44 = vpack.c.bf16 %v595_v40, %v594_v38  ;;  %v1045_v45 = vpack.c.bf16 %v611_v41, %v610_v39  ;;  %v1131_v46 = vpop.f32.mrb[12].mxu0  ;;  %v1147_v47 = vpop.f32.mrb[12].mxu1 }
 0x113   : > { %1066 = vst [vmem:[%s1343_s17 + $0x28] sm:$0xff] %v1010_v42   ;;  %1074 = vst [vmem:[%s1343_s17 + $0x68] sm:$0xff] %v1050_v43   ;;  %v516_v48 = vadd.f32 %v1131_v46, %v1328_v24  ;;  %v580_v49 = vadd.f32 %v1147_v47, %v1328_v24  ;;  %v507_v50 = vpop.f32.mrb[13].mxu0  ;;  %v571_v51 = vpop.f32.mrb[13].mxu1 }
 0x114   : > { %1065 = vst [vmem:[%s1343_s17 + $0x20] sm:$0xff] %v1005_v44   ;;  %1073 = vst [vmem:[%s1343_s17 + $0x60] sm:$0xff] %v1045_v45   ;;  %v508_v52 = vadd.f32 %v1328_v24, %v507_v50  ;;  %v572_v53 = vadd.f32 %v1328_v24, %v571_v51  ;;  %v1132_v54 = vpop.f32.mrb[14].mxu0  ;;  %v1148_v55 = vpop.f32.mrb[14].mxu1 }
 0x115   : > { %v519_v56 = vadd.f32 %v1132_v54, %v1328_v24  ;;  %v583_v57 = vadd.f32 %v1148_v55, %v1328_v24  ;;  %v510_v58 = vpop.f32.mrb[15].mxu0  ;;  %v574_v59 = vpop.f32.mrb[15].mxu1  ;;  %v600_v62 = vmax.f32 %v516_v48, 0.0  ;;  %v616_v63 = vmax.f32 %v580_v49, 0.0 }
 0x116   : > { %v511_v60 = vadd.f32 %v1328_v24, %v510_v58  ;;  %v575_v61 = vadd.f32 %v1328_v24, %v574_v59  ;;  %v598_v2 = vmax.f32 %v508_v52, 0.0  ;;  %v614_v3 = vmax.f32 %v572_v53, 0.0 }
 0x117   : > { %v601_v0 = vmax.f32 %v519_v56, 0.0  ;;  %v617_v1 = vmax.f32 %v583_v57, 0.0 }
 0x118   : > { %v599_v4 = vmax.f32 %v511_v60, 0.0  ;;  %v615_v5 = vmax.f32 %v575_v61, 0.0 }
 0x119   : > { %v1020_v6 = vpack.c.bf16 %v601_v0, %v600_v62  ;;  %v1060_v7 = vpack.c.bf16 %v617_v1, %v616_v63 }
 0x11a   : > { %v1015_v8 = vpack.c.bf16 %v599_v4, %v598_v2  ;;  %v1055_v9 = vpack.c.bf16 %v615_v5, %v614_v3 }
 0x11b   : > { %1068 = vst [vmem:[%s1343_s17 + $0x38] sm:$0xff] %v1020_v6   ;;  %1076 = vst [vmem:[%s1343_s17 + $0x78] sm:$0xff] %v1060_v7  }
 0x11c   : > { %1067 = vst [vmem:[%s1343_s17 + $0x30] sm:$0xff] %v1015_v8   ;;  %1075 = vst [vmem:[%s1343_s17 + $0x70] sm:$0xff] %v1055_v9  }
 0x11d PF: > { %s13_s14 = sadd.s32 1, %s1235_s14   ;;  %s1398_s12 = smov %s1231_s13 }
 0x11e   : > { %p10_p5 = scmp.ge.s32.totalorder %s13_s14, 4   ;;  %s1399_s13 = smov %s1401_s15 }
 0x120   :  { %12 = sbr.rel (!%p10_p5) target bundleno = 2 (0x2), region = 68 }

// kernel: unetpp_forward.47
= control target key start
LH: loop header
LB: loop body
LE: loop exit
PB: predicated region body
PF: predicated region fallthrough
CT: control target
= control target key end

     0   :  { %s1691_s15 = smov 0   ;;  %s1693_s16 = smov 0   ;;  %s2089_s0 = inlined_call_operand.vmem [shape: bf16[512,128], index: 0, kind: input, shape index: {}]   ;;  %s2090_s1 = inlined_call_operand.vmem [shape: bf16[128,128], index: 1, kind: input, shape index: {}]   ;;  %s2091_s2 = inlined_call_operand.vmem [shape: f32[1,128], index: 2, kind: input, shape index: {}]   ;;  %s2092_s3 = inlined_call_operand.vmem [shape: bf16[512,128], index: 3, kind: output, shape index: {0}]   ;;  %s2093_s4 = inlined_call_operand.vmem [shape: f32[16,128], index: 4, kind: output, shape index: {1}]  }
   0x1   :  { %s1695_s17 = smov 0  }
   0x2 LB: > { %s27_s18 = sadd.s32 1, %s1659_s16  ;;  %p1279_p0 = scmp.ge.s32.totalorder %s1663_s17, 1  ;;  %s1663_s17 = sphi %s1695_s17, %s15_s17   ;;  %s1659_s16 = sphi %s1693_s16, %s2095_s16   ;;  %s1655_s15 = sphi %s1691_s15, %s2094_s15  }
   0x3   : > { %p29_p1 = scmp.ge.s32.totalorder %s27_s18, 2  ;;  %p199_p2 = scmp.lt.s32.totalorder %s1663_s17, 3 }
   0x5   : > { %s2097_s18 = smov (%p29_p1, %s27_s18), 0  ;;  %p200_p3 = pnand %p1279_p0, %p199_p2 }
   0x6   : > { %v1617_v0 = vld [vmem:[%s2090_s1] sm:$0xff] (!%p200_p3)   ;;  %s1280_s21 = sshll.u32 (!%p200_p3), %s1655_s15, 5  ;;  %v1618_v1 = vld [vmem:[%s2090_s1 + $0x8] sm:$0xff] (!%p200_p3)   ;;  %v1619_v2 = vld [vmem:[%s2090_s1 + $0x10] sm:$0xff] (!%p200_p3)   ;;  %v824_v24 = vlaneseq (!%p200_p3)  ;;  %s1342_s14 = sshll.u32 (!%p200_p3), %s1655_s15, 8  ;;  %v1665_v49 = vmov (!%p200_p3), 0.0  }
   0x7   : > { %203 = sbr.rel (%p200_p3) target bundleno = 342 (0x156), region = 32  ;;  %p243_p4 = scmp.lt.s32.totalorder (!%p200_p3), %s1280_s21, 63  ;;  %1528 = vmatprep.subr.bf16.mxu0 (!%p200_p3), %v1617_v0  ;;  %1576 = vmatprep.subr.bf16.mxu1 (!%p200_p3), %v1617_v0  ;;  %v1620_v3 = vld [vmem:[%s2090_s1 + $0x18] sm:$0xff] (!%p200_p3)   ;;  %v1621_v5 = vld [vmem:[%s2090_s1 + $0x20] sm:$0xff] (!%p200_p3)   ;;  %v1622_v6 = vld [vmem:[%s2090_s1 + $0x28] sm:$0xff] (!%p200_p3)   ;;  %v1767_v28 = vstv (!%p200_p3), %s1342_s14 }
   0x8   : > { %1529 = vmatpush3.bf16.msra.mxu0 (!%p200_p3), %v1617_v0  ;;  %1584 = vmatpush3.bf16.msra.mxu1 (!%p200_p3), %v1617_v0  ;;  %v1623_v8 = vld [vmem:[%s2090_s1 + $0x30] sm:$0xff] (!%p200_p3)   ;;  %v1624_v9 = vld [vmem:[%s2090_s1 + $0x38] sm:$0xff] (!%p200_p3)   ;;  %v1762_v25 = vshrl.u32 (!%p200_p3), %v824_v24, 7  ;;  %v1814_v61 = vld [vmem:[%s2091_s2] ss:$0 sm:$0xff] (!%p200_p3)  ;;  %p264_p5 = scmp.lt.s32.totalorder (!%p200_p3), %s1655_s15, 1 }
   0x9   : > { %1530 = vmatprep.subr.bf16.mxu0 (!%p200_p3), %v1618_v1  ;;  %1577 = vmatprep.subr.bf16.mxu1 (!%p200_p3), %v1618_v1 }
   0xa   : > { %v827_v26 = vadd.s32 (!%p200_p3), 16, %v1762_v25  ;;  %v828_v27 = vadd.s32 (!%p200_p3), 24, %v1762_v25  ;;  %v826_v30 = vadd.s32 (!%p200_p3), 8, %v1762_v25  ;;  %v859_v32 = vadd.s32 (!%p200_p3), %v1767_v28, %v1762_v25 }
   0xb   : > { %v831_v33 = vadd.s32 (!%p200_p3), 48, %v1762_v25  ;;  %v832_v34 = vadd.s32 (!%p200_p3), 56, %v1762_v25  ;;  %v829_v35 = vadd.s32 (!%p200_p3), 32, %v1762_v25  ;;  %v830_v36 = vadd.s32 (!%p200_p3), 40, %v1762_v25 }
   0xc   : > { %1531 = vmatpush3.bf16.msra.mxu0 (!%p200_p3), %v1618_v1  ;;  %1585 = vmatpush3.bf16.msra.mxu1 (!%p200_p3), %v1618_v1  ;;  %v861_v29 = vadd.s32 (!%p200_p3), %v1767_v28, %v827_v26  ;;  %v862_v31 = vadd.s32 (!%p200_p3), %v1767_v28, %v828_v27  ;;  %v835_v37 = vadd.s32 (!%p200_p3), 80, %v1762_v25  ;;  %v836_v38 = vadd.s32 (!%p200_p3), 88, %v1762_v25 }
   0xd   : > { %1532 = vmatprep.subr.bf16.mxu0 (!%p200_p3), %v1619_v2  ;;  %1578 = vmatprep.subr.bf16.mxu1 (!%p200_p3), %v1619_v2  ;;  %v833_v39 = vadd.s32 (!%p200_p3), 64, %v1762_v25  ;;  %v860_v40 = vadd.s32 (!%p200_p3), %v1767_v28, %v826_v30  ;;  %vm891_vm2 = vcmp.lt.s32.totalorder (!%p200_p3), %v859_v32, 512  ;;  %v865_v41 = vadd.s32 (!%p200_p3), %v1767_v28, %v831_v33 }
   0xe   : > { %s2099_s21 = smov (!%p243_p4, %s1280_s21), 63  ;;  %vm893_vm0 = vcmp.lt.s32.totalorder %v861_v29, 512  ;;  %vm894_vm1 = vcmp.lt.s32.totalorder %v862_v31, 512  ;;  %v866_v42 = vadd.s32 %v1767_v28, %v832_v34  ;;  %v863_v43 = vadd.s32 %v1767_v28, %v829_v35  ;;  %s2101_s15 = smov (!%p264_p5, %s1655_s15), 1 }
   0xf   : > { %s1281_s26 = sshll.u32 %s2099_s21, 2  ;;  %v864_v44 = vadd.s32 %v1767_v28, %v830_v36  ;;  %v834_v45 = vadd.s32 72, %v1762_v25  ;;  %v869_v46 = vadd.s32 %v1767_v28, %v835_v37  ;;  %v870_v47 = vadd.s32 %v1767_v28, %v836_v38  ;;  %s1284_s21 = sshll.u32 %s2101_s15, 3 }
  0x10   : > { %s1729_s29 = scalar_lea.vmem %s2089_s0, %s1281_s26  ;;  %1533 = vmatpush3.bf16.msra.mxu0 %v1619_v2  ;;  %1586 = vmatpush3.bf16.msra.mxu1 %v1619_v2  ;;  %v867_v48 = vadd.s32 %v1767_v28, %v833_v39  ;;  %v1791_v50 = vsel %vm893_vm0, 1.0, %v1665_v49  ;;  %v1794_v51 = vsel %vm894_vm1, 1.0, %v1665_v49  ;;  %v839_v52 = vadd.s32 112, %v1762_v25  ;;  %s1851_s24 = scalar_lea.vmem %s2092_s3, %s1281_s26 }
  0x11   : > { %v1625_v4 = vld [vmem:[%s1729_s29] sm:$0xff]   ;;  %1534 = vmatprep.subr.bf16.mxu0 %v1620_v3  ;;  %1579 = vmatprep.subr.bf16.mxu1 %v1620_v3  ;;  %v1626_v10 = vld [vmem:[%s1729_s29 + $0x8] sm:$0xff]   ;;  %v1627_v12 = vld [vmem:[%s1729_s29 + $0x10] sm:$0xff]   ;;  %vm892_vm3 = vcmp.lt.s32.totalorder %v860_v40, 512  ;;  %v1798_v53 = vsel %vm891_vm2, 1.0, %v1665_v49  ;;  %vm897_vm4 = vcmp.lt.s32.totalorder %v865_v41, 512  ;;  %v868_v55 = vadd.s32 %v1767_v28, %v834_v45  ;;  %s270_s27 = scalar_lea.vmem %s2093_s4, %s1284_s21 }
  0x12   : > { %1544 = vmatprep.mubr.bf16.mxu0 %v1625_v4  ;;  %v1633_v7 = vld [vmem:[%s1729_s29 + $0x40] sm:$0xff]   ;;  %v1634_v11 = vld [vmem:[%s1729_s29 + $0x48] sm:$0xff]   ;;  %v1635_v13 = vld [vmem:[%s1729_s29 + $0x50] sm:$0xff]   ;;  %v840_v54 = vadd.s32 120, %v1762_v25  ;;  %vm898_vm5 = vcmp.lt.s32.totalorder %v866_v42, 512  ;;  %vm895_vm6 = vcmp.lt.s32.totalorder %v863_v43, 512  ;;  %v873_v59 = vadd.s32 %v1767_v28, %v839_v52 }
  0x13   : > { %1560 = vmatprep.mubr.bf16.mxu1 %v1633_v7  ;;  %v1628_v14 = vld [vmem:[%s1729_s29 + $0x18] sm:$0xff]   ;;  %v1629_v16 = vld [vmem:[%s1729_s29 + $0x20] sm:$0xff]   ;;  %v1630_v18 = vld [vmem:[%s1729_s29 + $0x28] sm:$0xff]   ;;  %vm896_vm7 = vcmp.lt.s32.totalorder %v864_v44, 512  ;;  %vm901_vm8 = vcmp.lt.s32.totalorder %v869_v46, 512  ;;  %vm902_vm9 = vcmp.lt.s32.totalorder %v870_v47, 512 }
  0x14   : > { %1535 = vmatpush3.bf16.msra.mxu0 %v1620_v3  ;;  %1587 = vmatpush3.bf16.msra.mxu1 %v1620_v3  ;;  %v1636_v15 = vld [vmem:[%s1729_s29 + $0x58] sm:$0xff]   ;;  %v1637_v17 = vld [vmem:[%s1729_s29 + $0x60] sm:$0xff]   ;;  %v1638_v19 = vld [vmem:[%s1729_s29 + $0x68] sm:$0xff]   ;;  %vm899_vm10 = vcmp.lt.s32.totalorder %v867_v48, 512  ;;  %v837_v56 = vadd.s32 96, %v1762_v25  ;;  %v1804_v57 = vsel %vm892_vm3, 1.0, %v1665_v49  ;;  %v874_v1 = vadd.s32 %v1767_v28, %v840_v54 }
  0x15   : > { %1536 = vmatprep.subr.bf16.mxu0 %v1621_v5  ;;  %1580 = vmatprep.subr.bf16.mxu1 %v1621_v5  ;;  %v1631_v20 = vld [vmem:[%s1729_s29 + $0x30] sm:$0xff]   ;;  %v1632_v22 = vld [vmem:[%s1729_s29 + $0x38] sm:$0xff]   ;;  %v1807_v58 = vsel %vm897_vm4, 1.0, %v1665_v49  ;;  %v838_v60 = vadd.s32 104, %v1762_v25  ;;  %v1817_v62 = vsel %vm898_vm5, 1.0, %v1665_v49  ;;  %v1820_v63 = vsel %vm895_vm6, 1.0, %v1665_v49 }
  0x16   : > { %v1639_v21 = vld [vmem:[%s1729_s29 + $0x70] sm:$0xff]   ;;  %v1640_v23 = vld [vmem:[%s1729_s29 + $0x78] sm:$0xff]   ;;  %v1823_v0 = vsel %vm896_vm7, 1.0, %v1665_v49  ;;  %v1827_v3 = vsel %vm901_vm8, 1.0, %v1665_v49  ;;  %v1830_v4 = vsel %vm902_vm9, 1.0, %v1665_v49  ;;  %vm900_vm11 = vcmp.lt.s32.totalorder %v868_v55, 512 }
  0x17   : > { %vm905_vm12 = vcmp.lt.s32.totalorder %v873_v59, 512  ;;  %vm906_vm13 = vcmp.lt.s32.totalorder %v874_v1, 512  ;;  %v842_v27 = vadd.s32 136, %v1762_v25  ;;  %v1866_v38 = vsel %vm900_vm11, 1.0, %v1665_v49 }
  0x18   : > { %1537 = vmatpush3.bf16.msra.mxu0 %v1621_v5  ;;  %1588 = vmatpush3.bf16.msra.mxu1 %v1621_v5  ;;  %v1833_v5 = vsel %vm899_vm10, 1.0, %v1665_v49  ;;  %v1870_v39 = vsel %vm905_vm12, 1.0, %v1665_v49  ;;  %v1877_v43 = vsel %vm906_vm13, 1.0, %v1665_v49 }
  0x19   : > { %1538 = vmatprep.subr.bf16.mxu0 %v1622_v6  ;;  %1581 = vmatprep.subr.bf16.mxu1 %v1622_v6  ;;  %v876_v47 = vadd.s32 %v1767_v28, %v842_v27 }
  0x1b   : > { %vm908_vm3 = vcmp.lt.s32.totalorder %v876_v47, 512 }
  0x1c   : > { %1539 = vmatpush3.bf16.msra.mxu0 %v1622_v6  ;;  %1589 = vmatpush3.bf16.msra.mxu1 %v1622_v6 }
  0x1d   : > { %1540 = vmatprep.subr.bf16.mxu0 %v1623_v8  ;;  %1582 = vmatprep.subr.bf16.mxu1 %v1623_v8 }
  0x20   : > { %1541 = vmatpush3.bf16.msra.mxu0 %v1623_v8  ;;  %1590 = vmatpush3.bf16.msra.mxu1 %v1623_v8  ;;  %v871_v8 = vadd.s32 %v1767_v28, %v837_v56 }
  0x21   : > { %1542 = vmatprep.subr.bf16.mxu0 %v1624_v9  ;;  %1583 = vmatprep.subr.bf16.mxu1 %v1624_v9 }
  0x22   : > { %vm903_vm14 = vcmp.lt.s32.totalorder %v871_v8, 512 }
  0x23   : > { %v1883_v46 = vsel %vm903_vm14, 1.0, %v1665_v49 }
  0x24   : > { %1543 = vmatpush3.bf16.msra.mxu0 %v1624_v9  ;;  %1591 = vmatpush3.bf16.msra.mxu1 %v1624_v9 }
  0x27   : > { %1545 = vmatmul.mubr.bf16.vlgmr.msra.gmra.mrb[0].mxu0 %v1626_v10  ;;  %1561 = vmatmul.mubr.bf16.vlgmr.msra.gmra.mrb[0].mxu1 %v1634_v11  ;;  %v843_v11 = vadd.s32 144, %v1762_v25 }
  0x28   : > { %1548 = vmatprep.mubr.bf16.mxu0 %v1627_v12  ;;  %1564 = vmatprep.mubr.bf16.mxu1 %v1635_v13  ;;  %v844_v12 = vadd.s32 152, %v1762_v25 }
  0x29   : > { %v877_v31 = vadd.s32 %v1767_v28, %v843_v11 }
  0x2a   : > { %v878_v32 = vadd.s32 %v1767_v28, %v844_v12 }
  0x2b   : > { %vm909_vm0 = vcmp.lt.s32.totalorder %v877_v31, 512  ;;  %v1920_v31 = vsel %vm908_vm3, 1.0, %v1665_v49 }
  0x2c   : > { %vm910_vm1 = vcmp.lt.s32.totalorder %v878_v32, 512  ;;  %v1904_v11 = vsel %vm909_vm0, 1.0, %v1665_v49  ;;  %vm1125_vm0 = vcmp.eq.s32.totalorder %v1762_v25, 0 }
  0x2f   : > { %1549 = vmatmul.mubr.bf16.gmra.mrb[4].mxu0 %v1628_v14  ;;  %1565 = vmatmul.mubr.bf16.gmra.mrb[4].mxu1 %v1636_v15  ;;  %v872_v14 = vadd.s32 %v1767_v28, %v838_v60 }
  0x30   : > { %1552 = vmatprep.mubr.bf16.mxu0 %v1629_v16  ;;  %1568 = vmatprep.mubr.bf16.mxu1 %v1637_v17  ;;  %v841_v17 = vadd.s32 128, %v1762_v25 }
  0x31   : > { %vm904_vm15 = vcmp.lt.s32.totalorder %v872_v14, 512 }
  0x32   : > { %v875_v35 = vadd.s32 %v1767_v28, %v841_v17 }
  0x34   : > { %vm907_vm2 = vcmp.lt.s32.totalorder %v875_v35, 512 }
  0x35   : > { %v1913_v14 = vsel %vm907_vm2, 1.0, %v1665_v49 }
  0x37   : > { %1553 = vmatmul.mubr.bf16.gmra.mrb[8].mxu0 %v1630_v18  ;;  %1569 = vmatmul.mubr.bf16.gmra.mrb[8].mxu1 %v1638_v19 }
  0x38   : > { %1556 = vmatprep.mubr.bf16.mxu0 %v1631_v20  ;;  %1572 = vmatprep.mubr.bf16.mxu1 %v1639_v21 }
  0x3f   : > { %1557 = vmatmul.mubr.bf16.gmra.mrb[12].mxu0 %v1632_v22  ;;  %1573 = vmatmul.mubr.bf16.gmra.mrb[12].mxu1 %v1640_v23 }
  0xfa   : > { %v1546_v2 = vpop.f32.mrb[0].mxu0  ;;  %v1562_v6 = vpop.f32.mrb[0].mxu1 }
  0xfb   : > { %v505_v7 = vpop.f32.mrb[1].mxu0  ;;  %v578_v9 = vadd.f32 %v1562_v6, %v1814_v61  ;;  %v569_v10 = vpop.f32.mrb[1].mxu1  ;;  %v514_v18 = vadd.f32 %v1546_v2, %v1814_v61 }
  0xfc   : > { %v1547_v13 = vpop.f32.mrb[2].mxu0  ;;  %v570_v15 = vadd.f32 %v1814_v61, %v569_v10  ;;  %v1563_v16 = vpop.f32.mrb[2].mxu1  ;;  %v506_v23 = vadd.f32 %v1814_v61, %v505_v7 }
  0xfd   : > { %v517_v19 = vadd.f32 %v1547_v13, %v1814_v61  ;;  %v508_v20 = vpop.f32.mrb[3].mxu0  ;;  %v581_v21 = vadd.f32 %v1563_v16, %v1814_v61  ;;  %v572_v22 = vpop.f32.mrb[3].mxu1 }
  0xfe   : > { %v509_v24 = vadd.f32 %v1814_v61, %v508_v20  ;;  %v573_v26 = vadd.f32 %v1814_v61, %v572_v22 }
  0xff   : > { %v633_v29 = vpack.c.bf16 %v517_v19, %v514_v18  ;;  %v1856_v30 = vpack.c.bf16 %v581_v21, %v578_v9  ;;  %v1909_v19 = vsel %vm910_vm1, 1.0, %v1665_v49  ;;  %vm1127_vm1 = vcmp.eq.s32.totalorder %v1762_v25, 1 }
 0x100   : > { %v632_v33 = vpack.c.bf16 %v509_v24, %v506_v23  ;;  %v1860_v34 = vpack.c.bf16 %v573_v26, %v570_v15 }
 0x101   : > { %1489 = vst [vmem:[%s1851_s24 + $0x8] sm:$0xff] %v633_v29   ;;  %v794_v36 = vunpack.c.l.bf16 %v633_v29  ;;  %v795_v37 = vunpack.c.h.bf16 %v633_v29  ;;  %1497 = vst [vmem:[%s1851_s24 + $0x48] sm:$0xff] %v1856_v30  }
 0x102   : > { %1413 = vst [vmem:[%s1851_s24] sm:$0xff] %v632_v33   ;;  %v792_v40 = vunpack.c.l.bf16 %v632_v33  ;;  %v793_v41 = vunpack.c.h.bf16 %v632_v33  ;;  %v1550_v42 = vpop.f32.mrb[4].mxu0  ;;  %1496 = vst [vmem:[%s1851_s24 + $0x40] sm:$0xff] %v1860_v34   ;;  %v1566_v44 = vpop.f32.mrb[4].mxu1  ;;  %v847_v33 = vadd.s32 176, %v1762_v25 }
 0x103   : > { %v521_v45 = vpop.f32.mrb[5].mxu0  ;;  %v1886_v48 = vpop.f32.mrb[5].mxu1  ;;  %v989_v52 = vmul.f32 %v1791_v50, %v794_v36  ;;  %v990_v60 = vmul.f32 %v1794_v51, %v795_v37  ;;  %v530_v1 = vadd.f32 %v1550_v42, %v1814_v61  ;;  %v1900_v51 = vsel %vm904_vm15, 1.0, %v1665_v49 }
 0x104   : > { %v987_v54 = vmul.f32 %v1798_v53, %v792_v40  ;;  %v988_v55 = vmul.f32 %v1804_v57, %v793_v41  ;;  %v1551_v56 = vpop.f32.mrb[6].mxu0  ;;  %v1567_v59 = vpop.f32.mrb[6].mxu1  ;;  %v522_v2 = vadd.f32 %v1814_v61, %v521_v45  ;;  %v594_v32 = vadd.f32 %v1566_v44, %v1814_v61 }
 0x105   : > { %v533_v6 = vadd.f32 %v1551_v56, %v1814_v61  ;;  %v524_v7 = vpop.f32.mrb[7].mxu0  ;;  %v1895_v8 = vpop.f32.mrb[7].mxu1  ;;  %v1058_v12 = vmul.f32 %v989_v52, %v989_v52  ;;  %v1059_v17 = vmul.f32 %v990_v60, %v990_v60  ;;  %v848_v42 = vadd.s32 184, %v1762_v25 }
 0x106   : > { %v1019_v50 = vadd.f32 %v988_v55, %v987_v54  ;;  %v1056_v9 = vmul.f32 %v987_v54, %v987_v54  ;;  %v1057_v53 = vmul.f32 %v988_v55, %v988_v55  ;;  %v525_v57 = vadd.f32 %v1814_v61, %v524_v7 }
 0x107   : > { %v635_v10 = vpack.c.bf16 %v533_v6, %v530_v1  ;;  %v597_v55 = vadd.f32 %v1567_v59, %v1814_v61  ;;  %v845_v7 = vadd.s32 160, %v1762_v25 }
 0x108   : > { %v1020_v13 = vadd.f32 %v1019_v50, %v989_v52  ;;  %v1088_v15 = vadd.f32 %v1057_v53, %v1056_v9  ;;  %v634_v16 = vpack.c.bf16 %v525_v57, %v522_v2 }
 0x109   : > { %1491 = vst [vmem:[%s1851_s24 + $0x18] sm:$0xff] %v635_v10   ;;  %v798_v18 = vunpack.c.l.bf16 %v635_v10  ;;  %v799_v27 = vunpack.c.h.bf16 %v635_v10  ;;  %v1940_v6 = vpack.c.bf16 %v597_v55, %v594_v32 }
 0x10a   : > { %v1089_v20 = vadd.f32 %v1088_v15, %v1058_v12  ;;  %1490 = vst [vmem:[%s1851_s24 + $0x10] sm:$0xff] %v634_v16   ;;  %v796_v21 = vunpack.c.l.bf16 %v634_v16  ;;  %v797_v22 = vunpack.c.h.bf16 %v634_v16  ;;  %v1021_v23 = vadd.f32 %v1020_v13, %v990_v60  ;;  %v1554_v24 = vpop.f32.mrb[8].mxu0  ;;  %v1916_v26 = vpop.f32.mrb[8].mxu1 }
 0x10b   : > { %v537_v29 = vpop.f32.mrb[9].mxu0  ;;  %v1924_v35 = vpop.f32.mrb[9].mxu1  ;;  %v993_v47 = vmul.f32 %v1807_v58, %v798_v18  ;;  %v546_v52 = vadd.f32 %v1554_v24, %v1814_v61  ;;  %v994_v2 = vmul.f32 %v1817_v62, %v799_v27  ;;  %1499 = vst [vmem:[%s1851_s24 + $0x58] sm:$0xff] %v1940_v6   ;;  %v881_v12 = vadd.s32 %v1767_v28, %v847_v33 }
 0x10c   : > { %v991_v36 = vmul.f32 %v1820_v63, %v796_v21  ;;  %v992_v37 = vmul.f32 %v1823_v0, %v797_v22  ;;  %v1090_v40 = vadd.f32 %v1089_v20, %v1059_v17  ;;  %v1555_v41 = vpop.f32.mrb[10].mxu0  ;;  %v1929_v45 = vpop.f32.mrb[10].mxu1  ;;  %v538_v60 = vadd.f32 %v1814_v61, %v537_v29 }
 0x10d   : > { %v549_v44 = vadd.f32 %v1555_v41, %v1814_v61  ;;  %v540_v54 = vpop.f32.mrb[11].mxu0  ;;  %v1935_v56 = vpop.f32.mrb[11].mxu1  ;;  %v1062_v57 = vmul.f32 %v993_v47, %v993_v47  ;;  %v846_v13 = vadd.s32 168, %v1762_v25  ;;  %v1063_v21 = vmul.f32 %v994_v2, %v994_v2 }
 0x10e   : > { %v1022_v63 = vadd.f32 %v1021_v23, %v991_v36  ;;  %v1060_v0 = vmul.f32 %v991_v36, %v991_v36  ;;  %v541_v1 = vadd.f32 %v1814_v61, %v540_v54  ;;  %v1061_v9 = vmul.f32 %v992_v37, %v992_v37 }
 0x10f   : > { %v637_v58 = vpack.c.bf16 %v549_v44, %v546_v52  ;;  %v586_v24 = vadd.f32 %v1814_v61, %v1886_v48  ;;  %v589_v27 = vadd.f32 %v1814_v61, %v1895_v8  ;;  %v1960_v48 = vadd.s32 %v1767_v28, %v848_v42 }
 0x110   : > { %v1023_v50 = vadd.f32 %v1022_v63, %v992_v37  ;;  %v1091_v59 = vadd.f32 %v1090_v40, %v1060_v0  ;;  %v636_v53 = vpack.c.bf16 %v541_v1, %v538_v60  ;;  %v1963_v8 = vadd.s32 %v1767_v28, %v845_v7 }
 0x111   : > { %1493 = vst [vmem:[%s1851_s24 + $0x28] sm:$0xff] %v637_v58   ;;  %v802_v10 = vunpack.c.l.bf16 %v637_v58  ;;  %v803_v22 = vunpack.c.h.bf16 %v637_v58  ;;  %v1969_v7 = vpack.c.bf16 %v589_v27, %v586_v24  ;;  %vm913_vm4 = vcmp.lt.s32.totalorder %v881_v12, 512 }
 0x112   : > { %v1024_v62 = vadd.f32 %v1023_v50, %v993_v47  ;;  %v1092_v15 = vadd.f32 %v1091_v59, %v1061_v9  ;;  %1492 = vst [vmem:[%s1851_s24 + $0x20] sm:$0xff] %v636_v53   ;;  %v800_v16 = vunpack.c.l.bf16 %v636_v53  ;;  %v801_v17 = vunpack.c.h.bf16 %v636_v53  ;;  %v1558_v18 = vpop.f32.mrb[12].mxu0  ;;  %v1949_v20 = vpop.f32.mrb[12].mxu1 }
 0x113   : > { %v553_v23 = vpop.f32.mrb[13].mxu0  ;;  %v617_v29 = vpop.f32.mrb[13].mxu1  ;;  %v562_v47 = vadd.f32 %v1558_v18, %v1814_v61  ;;  %v998_v0 = vmul.f32 %v1830_v4, %v803_v22  ;;  %v610_v4 = vadd.f32 %v1916_v26, %v1814_v61  ;;  %1498 = vst [vmem:[%s1851_s24 + $0x50] sm:$0xff] %v1969_v7   ;;  %vm914_vm5 = vcmp.lt.s32.totalorder %v1960_v48, 512 }
 0x114   : > { %v1093_v32 = vadd.f32 %v1092_v15, %v1062_v57  ;;  %v995_v33 = vmul.f32 %v1833_v5, %v800_v16  ;;  %v996_v36 = vmul.f32 %v1866_v38, %v801_v17  ;;  %v1025_v37 = vadd.f32 %v1024_v62, %v994_v2  ;;  %v1559_v40 = vpop.f32.mrb[14].mxu0  ;;  %v1575_v41 = vpop.f32.mrb[14].mxu1 }
 0x115   : > { %v565_v52 = vadd.f32 %v1559_v40, %v1814_v61  ;;  %v556_v44 = vpop.f32.mrb[15].mxu0  ;;  %v620_v54 = vpop.f32.mrb[15].mxu1  ;;  %v997_v5 = vmul.f32 %v1827_v3, %v802_v10  ;;  %v554_v60 = vadd.f32 %v1814_v61, %v553_v23  ;;  %v1973_v3 = vadd.s32 %v1767_v28, %v846_v13 }
 0x116   : > { %v1026_v55 = vadd.f32 %v1025_v37, %v995_v33  ;;  %v1064_v38 = vmul.f32 %v995_v33, %v995_v33  ;;  %v1094_v63 = vadd.f32 %v1093_v32, %v1063_v21  ;;  %v557_v2 = vadd.f32 %v1814_v61, %v556_v44 }
 0x117   : > { %v639_v1 = vpack.c.bf16 %v565_v52, %v562_v47  ;;  %v1065_v58 = vmul.f32 %v996_v36, %v996_v36  ;;  %v1066_v59 = vmul.f32 %v997_v5, %v997_v5  ;;  %v613_v10 = vadd.f32 %v1929_v45, %v1814_v61 }
 0x118   : > { %v1027_v42 = vadd.f32 %v1026_v55, %v996_v36  ;;  %v1095_v50 = vadd.f32 %v1094_v63, %v1064_v38  ;;  %v638_v9 = vpack.c.bf16 %v557_v2, %v554_v60  ;;  %v1067_v17 = vmul.f32 %v998_v0, %v998_v0 }
 0x119   : > { %1495 = vst [vmem:[%s1851_s24 + $0x38] sm:$0xff] %v639_v1   ;;  %v806_v62 = vunpack.c.l.bf16 %v639_v1  ;;  %v807_v18 = vunpack.c.h.bf16 %v639_v1  ;;  %v1987_v23 = vsel %vm913_vm4, 1.0, %v1665_v49  ;;  %vm911_vm6 = vcmp.lt.s32.totalorder %v1963_v8, 512 }
 0x11a   : > { %v1028_v53 = vadd.f32 %v1027_v42, %v997_v5  ;;  %v1096_v57 = vadd.f32 %v1095_v50, %v1065_v58  ;;  %1494 = vst [vmem:[%s1851_s24 + $0x30] sm:$0xff] %v638_v9   ;;  %v804_v15 = vunpack.c.l.bf16 %v638_v9  ;;  %v805_v16 = vunpack.c.h.bf16 %v638_v9 }
 0x11b   : > { %v602_v45 = vadd.f32 %v1814_v61, %v1924_v35  ;;  %v808_v27 = vunpack.c.l.bf16 %v1860_v34  ;;  %v809_v32 = vunpack.c.h.bf16 %v1860_v34  ;;  %v1994_v33 = vpack.c.bf16 %v613_v10, %v610_v4 }
 0x11c   : > { %v1097_v13 = vadd.f32 %v1096_v57, %v1066_v59  ;;  %v1029_v21 = vadd.f32 %v1028_v53, %v998_v0  ;;  %v999_v26 = vmul.f32 %v1883_v46, %v804_v15  ;;  %v1000_v22 = vmul.f32 %v1900_v51, %v805_v16 }
 0x11d   : > { %v1001_v46 = vmul.f32 %v1870_v39, %v806_v62  ;;  %vm912_vm7 = vcmp.lt.s32.totalorder %v1973_v3, 512  ;;  %v605_v12 = vadd.f32 %v1814_v61, %v1935_v56  ;;  %v1002_v37 = vmul.f32 %v1877_v43, %v807_v18  ;;  %1501 = vst [vmem:[%s1851_s24 + $0x68] sm:$0xff] %v1994_v33  }
 0x11e   : > { %v1098_v24 = vadd.f32 %v1097_v13, %v1067_v17  ;;  %v1030_v36 = vadd.f32 %v1029_v21, %v999_v26  ;;  %v1068_v51 = vmul.f32 %v999_v26, %v999_v26  ;;  %v1069_v40 = vmul.f32 %v1000_v22, %v1000_v22 }
 0x11f   : > { %v626_v34 = vadd.f32 %v1949_v20, %v1814_v61  ;;  %v618_v35 = vadd.f32 %v1814_v61, %v617_v29  ;;  %v2006_v52 = vpack.c.bf16 %v605_v12, %v602_v45  ;;  %v629_v44 = vadd.f32 %v1575_v41, %v1814_v61 }
 0x120   : > { %v1031_v47 = vadd.f32 %v1030_v36, %v1000_v22  ;;  %v1099_v39 = vadd.f32 %v1098_v24, %v1068_v51  ;;  %v810_v5 = vunpack.c.l.bf16 %v1856_v30  ;;  %v851_v56 = vadd.s32 208, %v1762_v25 }
 0x121   : > { %v852_v43 = vadd.s32 216, %v1762_v25  ;;  %v621_v55 = vadd.f32 %v1814_v61, %v620_v54  ;;  %v1070_v38 = vmul.f32 %v1001_v46, %v1001_v46  ;;  %v1003_v29 = vmul.f32 %v1913_v14, %v808_v27  ;;  %1500 = vst [vmem:[%s1851_s24 + $0x60] sm:$0xff] %v2006_v52  }
 0x122   : > { %v1032_v63 = vadd.f32 %v1031_v47, %v1001_v46  ;;  %v1100_v20 = vadd.f32 %v1099_v39, %v1069_v40  ;;  %v811_v0 = vunpack.c.h.bf16 %v1856_v30  ;;  %v849_v41 = vadd.s32 192, %v1762_v25 }
 0x123   : > { %v2018_v60 = vpack.c.bf16 %v629_v44, %v626_v34  ;;  %v2020_v1 = vpack.c.bf16 %v621_v55, %v618_v35  ;;  %v1071_v2 = vmul.f32 %v1002_v37, %v1002_v37  ;;  %v1004_v61 = vmul.f32 %v1920_v31, %v809_v32 }
 0x124   : > { %v1101_v42 = vadd.f32 %v1100_v20, %v1070_v38  ;;  %v1033_v54 = vadd.f32 %v1032_v63, %v1002_v37  ;;  %v1005_v58 = vmul.f32 %v1904_v11, %v810_v5  ;;  %v1366_v14 = vsel %vm914_vm5, 1.0, %v1665_v49 }
 0x125   : > { %v885_v50 = vadd.s32 %v1767_v28, %v851_v56  ;;  %v850_v30 = vadd.s32 200, %v1762_v25  ;;  %1503 = vst [vmem:[%s1851_s24 + $0x78] sm:$0xff] %v2018_v60   ;;  %1502 = vst [vmem:[%s1851_s24 + $0x70] sm:$0xff] %v2020_v1   ;;  %v1072_v4 = vmul.f32 %v1003_v29, %v1003_v29  ;;  %v812_v31 = vunpack.c.l.bf16 %v1969_v7 }
 0x126   : > { %v1034_v9 = vadd.f32 %v1033_v54, %v1003_v29  ;;  %v1102_v59 = vadd.f32 %v1101_v42, %v1071_v2  ;;  %v1006_v53 = vmul.f32 %v1909_v19, %v811_v0  ;;  %v1363_v11 = vsel %vm911_vm6, 1.0, %v1665_v49 }
 0x127   : > { %v886_v48 = vadd.s32 %v1767_v28, %v852_v43  ;;  %v883_v57 = vadd.s32 %v1767_v28, %v849_v41  ;;  %v1073_v62 = vmul.f32 %v1004_v61, %v1004_v61  ;;  %v813_v16 = vunpack.c.h.bf16 %v1969_v7 }
 0x128   : > { %v1035_v10 = vadd.f32 %v1034_v9, %v1004_v61  ;;  %v1103_v15 = vadd.f32 %v1102_v59, %v1072_v4  ;;  %v814_v17 = vunpack.c.l.bf16 %v1940_v6  ;;  %v1364_v13 = vsel %vm912_vm7, 1.0, %v1665_v49 }
 0x129   : > { %vm917_vm8 = vcmp.lt.s32.totalorder %v885_v50, 512  ;;  %v884_v19 = vadd.s32 %v1767_v28, %v850_v30  ;;  %v1074_v8 = vmul.f32 %v1005_v58, %v1005_v58  ;;  %v1007_v26 = vmul.f32 %v1363_v11, %v812_v31 }
 0x12a   : > { %v1036_v18 = vadd.f32 %v1035_v10, %v1005_v58  ;;  %v1104_v21 = vadd.f32 %v1103_v15, %v1073_v62  ;;  %v815_v22 = vunpack.c.h.bf16 %v1940_v6  ;;  %vm918_vm9 = vcmp.lt.s32.totalorder %v886_v48, 512 }
 0x12b   : > { %vm915_vm10 = vcmp.lt.s32.totalorder %v883_v57, 512  ;;  %v853_v45 = vadd.s32 224, %v1762_v25  ;;  %v1075_v7 = vmul.f32 %v1006_v53, %v1006_v53  ;;  %v1008_v27 = vmul.f32 %v1364_v13, %v813_v16 }
 0x12c   : > { %v1105_v24 = vadd.f32 %v1104_v21, %v1074_v8  ;;  %v1037_v32 = vadd.f32 %v1036_v18, %v1006_v53  ;;  %v1009_v3 = vmul.f32 %v1987_v23, %v814_v17  ;;  %v1369_v46 = vsel %vm917_vm8, 1.0, %v1665_v49 }
 0x12d   : > { %vm916_vm11 = vcmp.lt.s32.totalorder %v884_v19, 512  ;;  %v854_v36 = vadd.s32 232, %v1762_v25  ;;  %v1076_v12 = vmul.f32 %v1007_v26, %v1007_v26  ;;  %v816_v6 = vunpack.c.l.bf16 %v2006_v52 }
 0x12e   : > { %v1038_v51 = vadd.f32 %v1037_v32, %v1007_v26  ;;  %v1106_v37 = vadd.f32 %v1105_v24, %v1075_v7  ;;  %v1010_v40 = vmul.f32 %v1366_v14, %v815_v22  ;;  %v1367_v34 = vsel %vm915_vm10, 1.0, %v1665_v49 }
 0x12f   : > { %v855_v35 = vadd.s32 240, %v1762_v25  ;;  %v887_v47 = vadd.s32 %v1767_v28, %v853_v45  ;;  %v1077_v44 = vmul.f32 %v1008_v27, %v1008_v27  ;;  %v817_v5 = vunpack.c.h.bf16 %v2006_v52 }
 0x130   : > { %v1039_v39 = vadd.f32 %v1038_v51, %v1008_v27  ;;  %v1107_v23 = vadd.f32 %v1106_v37, %v1076_v12  ;;  %v818_v56 = vunpack.c.l.bf16 %v1994_v33  ;;  %v1368_v43 = vsel %vm916_vm11, 1.0, %v1665_v49 }
 0x131   : > { %v856_v55 = vadd.s32 248, %v1762_v25  ;;  %v888_v38 = vadd.s32 %v1767_v28, %v854_v36  ;;  %v1078_v63 = vmul.f32 %v1009_v3, %v1009_v3  ;;  %v1011_v0 = vmul.f32 %v1367_v34, %v816_v6 }
 0x132   : > { %v1040_v20 = vadd.f32 %v1039_v39, %v1009_v3  ;;  %v1108_v29 = vadd.f32 %v1107_v23, %v1077_v44  ;;  %v819_v41 = vunpack.c.h.bf16 %v1994_v33  ;;  %v1370_v2 = vsel %vm918_vm9, 1.0, %v1665_v49 }
 0x133   : > { %v889_v42 = vadd.s32 %v1767_v28, %v855_v35  ;;  %vm919_vm12 = vcmp.lt.s32.totalorder %v887_v47, 512  ;;  %v1079_v52 = vmul.f32 %v1010_v40, %v1010_v40  ;;  %v1012_v54 = vmul.f32 %v1368_v43, %v817_v5 }
 0x134   : > { %v1109_v61 = vadd.f32 %v1108_v29, %v1078_v63  ;;  %v1041_v58 = vadd.f32 %v1040_v20, %v1010_v40  ;;  %v1013_v14 = vmul.f32 %v1369_v46, %v818_v56  ;;  %v890_v50 = vadd.s32 %v1767_v28, %v856_v55 }
 0x135   : > { %vm920_vm13 = vcmp.lt.s32.totalorder %v888_v38, 512  ;;  %v1080_v9 = vmul.f32 %v1011_v0, %v1011_v0  ;;  %v820_v59 = vunpack.c.l.bf16 %v2020_v1  ;;  %v1014_v33 = vmul.f32 %v1370_v2, %v819_v41 }
 0x136   : > { %v1042_v30 = vadd.f32 %v1041_v58, %v1011_v0  ;;  %v1110_v4 = vadd.f32 %v1109_v61, %v1079_v52  ;;  %vm921_vm14 = vcmp.lt.s32.totalorder %v889_v42, 512  ;;  %v1371_v31 = vsel %vm919_vm12, 1.0, %v1665_v49 }
 0x137   : > { %v1081_v11 = vmul.f32 %v1012_v54, %v1012_v54  ;;  %v821_v57 = vunpack.c.h.bf16 %v2020_v1  ;;  %v1082_v10 = vmul.f32 %v1013_v14, %v1013_v14  ;;  %vm922_vm15 = vcmp.lt.s32.totalorder %v890_v50, 512 }
 0x138   : > { %v1043_v53 = vadd.f32 %v1042_v30, %v1012_v54  ;;  %v1111_v48 = vadd.f32 %v1110_v4, %v1080_v9  ;;  %v1372_v62 = vsel %vm920_vm13, 1.0, %v1665_v49  ;;  %v822_v16 = vunpack.c.l.bf16 %v2018_v60 }
 0x139   : > { %v1015_v17 = vmul.f32 %v1371_v31, %v820_v59  ;;  %v1083_v13 = vmul.f32 %v1014_v33, %v1014_v33  ;;  %v1373_v19 = vsel %vm921_vm14, 1.0, %v1665_v49  ;;  %v823_v18 = vunpack.c.h.bf16 %v2018_v60 }
 0x13a   : > { %v1044_v28 = vadd.f32 %v1043_v53, %v1013_v14  ;;  %v1112_v15 = vadd.f32 %v1111_v48, %v1081_v11  ;;  %v1016_v21 = vmul.f32 %v1372_v62, %v821_v57  ;;  %v1374_v22 = vsel %vm922_vm15, 1.0, %v1665_v49 }
 0x13b   : > { %v1017_v1 = vmul.f32 %v1373_v19, %v822_v16  ;;  %v1084_v7 = vmul.f32 %v1015_v17, %v1015_v17  ;;  %v1018_v27 = vmul.f32 %v1374_v22, %v823_v18 }
 0x13c   : > { %v1113_v8 = vadd.f32 %v1112_v15, %v1082_v10  ;;  %v1045_v26 = vadd.f32 %v1044_v28, %v1014_v33  ;;  %v1085_v3 = vmul.f32 %v1016_v21, %v1016_v21 }
 0x13d   : > { %v1086_v36 = vmul.f32 %v1017_v1, %v1017_v1  ;;  %v1087_v37 = vmul.f32 %v1018_v27, %v1018_v27 }
 0x13e   : > { %v1046_v45 = vadd.f32 %v1045_v26, %v1015_v17  ;;  %v1114_v24 = vadd.f32 %v1113_v8, %v1083_v13 }
 0x140   : > { %v1047_v32 = vadd.f32 %v1046_v45, %v1016_v21  ;;  %v1115_v46 = vadd.f32 %v1114_v24, %v1084_v7 }
 0x142   : > { %v1048_v51 = vadd.f32 %v1047_v32, %v1017_v1  ;;  %v1116_v12 = vadd.f32 %v1115_v46, %v1085_v3 }
 0x144   : > { %v1049_v6 = vadd.f32 %v1048_v51, %v1018_v27  ;;  %v1117_v60 = vadd.f32 %v1116_v12, %v1086_v36 }
 0x146   : > { %v1050_v40 = vrot.slane %v1049_v6, 4  ;;  %v1118_v34 = vadd.f32 %v1117_v60, %v1087_v37 }
 0x148   : > { %v1051_v49 = vadd.f32 %v1050_v40, %v1049_v6  ;;  %v1119_v35 = vrot.slane %v1118_v34, 4 }
 0x14a   : > { %v1052_v47 = vrot.slane %v1051_v49, 2  ;;  %v1120_v39 = vadd.f32 %v1119_v35, %v1118_v34 }
 0x14c   : > { %v1053_v44 = vadd.f32 %v1052_v47, %v1051_v49  ;;  %v1121_v23 = vrot.slane %v1120_v39, 2 }
 0x14e   : > { %v1054_v5 = vrot.slane %v1053_v44, 1  ;;  %v1122_v56 = vadd.f32 %v1121_v23, %v1120_v39 }
 0x150   : > { %v1055_v43 = vadd.f32 %v1054_v5, %v1053_v44  ;;  %v1123_v55 = vrot.slane %v1122_v56, 1 }
 0x152   : > { %v1124_v38 = vadd.f32 %v1123_v55, %v1122_v56  ;;  %v1126_v63 = vsel %vm1125_vm0, %v1055_v43, 0.0 }
 0x154   : > { %v1128_v20 = vsel %vm1127_vm1, %v1124_v38, %v1126_v63 }
 0x155   : > { %1129 = vst [vmem:[%s270_s27] sm:$0xff] %v1128_v20 }
 0x156 PF: > { %s15_s17 = sadd.s32 1, %s1663_s17   ;;  %s2094_s15 = smov %s1659_s16 }
 0x157   : > { %p12_p6 = scmp.ge.s32.totalorder %s15_s17, 4   ;;  %s2095_s16 = smov %s2097_s18 }
 0x159   :  { %14 = sbr.rel (!%p12_p6) target bundleno = 2 (0x2), region = 80 }

// kernel: unetpp_forward.48
= control target key start
LH: loop header
LB: loop body
LE: loop exit
PB: predicated region body
PF: predicated region fallthrough
CT: control target
= control target key end

     0   :  { %s1502_s0 = inlined_call_operand.vmem [shape: bf16[512,128], index: 0, kind: input, shape index: {}]   ;;  %s1503_s1 = inlined_call_operand.vmem [shape: f32[1,128], index: 1, kind: input, shape index: {}]   ;;  %s1504_s2 = inlined_call_operand.vmem [shape: f32[1,128], index: 2, kind: input, shape index: {}]   ;;  %s1505_s3 = inlined_call_operand.vmem [shape: bf16[512,128], index: 3, kind: output, shape index: {}]  }
   0x1   :  { %v803_v0 = vld [vmem:[%s1502_s0] sm:$0xff]   ;;  %v1090_v4 = vld [vmem:[%s1502_s0 + $0x8] sm:$0xff]   ;;  %v1091_v5 = vld [vmem:[%s1502_s0 + $0x10] sm:$0xff]  }
   0x2   :  { %v1178_v1 = vld [vmem:[%s1503_s1] ss:$0 sm:$0xff]  ;;  %v804_v2 = vunpack.c.l.bf16 %v803_v0  ;;  %v805_v3 = vunpack.c.h.bf16 %v803_v0  ;;  %v1092_v6 = vld [vmem:[%s1502_s0 + $0x18] sm:$0xff]   ;;  %v808_v8 = vunpack.c.l.bf16 %v1090_v4  ;;  %v809_v9 = vunpack.c.h.bf16 %v1090_v4  ;;  %v1094_v33 = vld [vmem:[%s1502_s0 + $0x28] sm:$0xff]  }
   0x3   :  { %v1192_v7 = vld [vmem:[%s1504_s2] ss:$0 sm:$0xff]  ;;  %v812_v10 = vunpack.c.l.bf16 %v1091_v5  ;;  %v813_v11 = vunpack.c.h.bf16 %v1091_v5  ;;  %v816_v14 = vunpack.c.l.bf16 %v1092_v6  ;;  %v817_v15 = vunpack.c.h.bf16 %v1092_v6  ;;  %v1095_v38 = vld [vmem:[%s1502_s0 + $0x30] sm:$0xff]   ;;  %v1096_v43 = vld [vmem:[%s1502_s0 + $0x38] sm:$0xff]  }
   0x4   :  { %v149_v12 = vmul.f32 %v804_v2, %v1178_v1  ;;  %v150_v13 = vmul.f32 %v805_v3, %v1178_v1  ;;  %v151_v16 = vmul.f32 %v808_v8, %v1178_v1  ;;  %v152_v17 = vmul.f32 %v809_v9, %v1178_v1  ;;  %v1093_v28 = vld [vmem:[%s1502_s0 + $0x20] sm:$0xff]  }
   0x5   :  { %v153_v18 = vmul.f32 %v812_v10, %v1178_v1  ;;  %v154_v19 = vmul.f32 %v813_v11, %v1178_v1  ;;  %v155_v22 = vmul.f32 %v816_v14, %v1178_v1  ;;  %v156_v23 = vmul.f32 %v817_v15, %v1178_v1  ;;  %v1097_v0 = vld [vmem:[%s1502_s0 + $0x40] sm:$0xff]   ;;  %v1098_v11 = vld [vmem:[%s1502_s0 + $0x48] sm:$0xff]  }
   0x6   :  { %v220_v20 = vadd.f32 %v1192_v7, %v149_v12  ;;  %v221_v21 = vadd.f32 %v1192_v7, %v150_v13  ;;  %v222_v24 = vadd.f32 %v1192_v7, %v151_v16  ;;  %v223_v25 = vadd.f32 %v1192_v7, %v152_v17  ;;  %v1099_v16 = vld [vmem:[%s1502_s0 + $0x50] sm:$0xff]  }
   0x7   :  { %v224_v26 = vadd.f32 %v1192_v7, %v153_v18  ;;  %v225_v27 = vadd.f32 %v1192_v7, %v154_v19  ;;  %v226_v31 = vadd.f32 %v1192_v7, %v155_v22  ;;  %v227_v32 = vadd.f32 %v1192_v7, %v156_v23 }
   0x8   :  { %v284_v29 = vmax.f32 %v220_v20, 0.0  ;;  %v285_v30 = vmax.f32 %v221_v21, 0.0  ;;  %v286_v34 = vmax.f32 %v222_v24, 0.0  ;;  %v287_v35 = vmax.f32 %v223_v25, 0.0  ;;  %v1100_v25 = vld [vmem:[%s1502_s0 + $0x58] sm:$0xff]  }
   0x9   :  { %v288_v36 = vmax.f32 %v224_v26, 0.0  ;;  %v289_v37 = vmax.f32 %v225_v27, 0.0  ;;  %v290_v40 = vmax.f32 %v226_v31, 0.0  ;;  %v291_v41 = vmax.f32 %v227_v32, 0.0 }
   0xa   :  { %v933_v39 = vpack.c.bf16 %v285_v30, %v284_v29  ;;  %v820_v42 = vunpack.c.l.bf16 %v1093_v28  ;;  %v938_v44 = vpack.c.bf16 %v287_v35, %v286_v34  ;;  %v821_v46 = vunpack.c.h.bf16 %v1093_v28 }
   0xb   :  { %v943_v45 = vpack.c.bf16 %v289_v37, %v288_v36  ;;  %v824_v47 = vunpack.c.l.bf16 %v1094_v33  ;;  %v948_v48 = vpack.c.bf16 %v291_v41, %v290_v40  ;;  %v825_v50 = vunpack.c.h.bf16 %v1094_v33 }
   0xc   :  { %934 = vst [vmem:[%s1505_s3] sm:$0xff] %v933_v39   ;;  %v157_v49 = vmul.f32 %v820_v42, %v1178_v1  ;;  %v828_v51 = vunpack.c.l.bf16 %v1095_v38  ;;  %1121 = vst [vmem:[%s1505_s3 + $0x8] sm:$0xff] %v938_v44   ;;  %v158_v52 = vmul.f32 %v821_v46, %v1178_v1  ;;  %v829_v54 = vunpack.c.h.bf16 %v1095_v38  ;;  %v1101_v38 = vld [vmem:[%s1502_s0 + $0x60] sm:$0xff]  }
   0xd   :  { %1122 = vst [vmem:[%s1505_s3 + $0x10] sm:$0xff] %v943_v45   ;;  %v159_v53 = vmul.f32 %v824_v47, %v1178_v1  ;;  %v832_v55 = vunpack.c.l.bf16 %v1096_v43  ;;  %1123 = vst [vmem:[%s1505_s3 + $0x18] sm:$0xff] %v948_v48   ;;  %v160_v57 = vmul.f32 %v825_v50, %v1178_v1  ;;  %v833_v59 = vunpack.c.h.bf16 %v1096_v43 }
   0xe   :  { %v228_v56 = vadd.f32 %v1192_v7, %v157_v49  ;;  %v161_v58 = vmul.f32 %v828_v51, %v1178_v1  ;;  %v229_v60 = vadd.f32 %v1192_v7, %v158_v52  ;;  %v162_v62 = vmul.f32 %v829_v54, %v1178_v1  ;;  %v1102_v51 = vld [vmem:[%s1502_s0 + $0x68] sm:$0xff]  }
   0xf   :  { %v230_v61 = vadd.f32 %v1192_v7, %v159_v53  ;;  %v163_v63 = vmul.f32 %v832_v55, %v1178_v1  ;;  %v231_v3 = vadd.f32 %v1192_v7, %v160_v57  ;;  %v164_v5 = vmul.f32 %v833_v59, %v1178_v1 }
  0x10   :  { %v292_v2 = vmax.f32 %v228_v56, 0.0  ;;  %v232_v4 = vadd.f32 %v1192_v7, %v161_v58  ;;  %v293_v6 = vmax.f32 %v229_v60, 0.0  ;;  %v233_v9 = vadd.f32 %v1192_v7, %v162_v62  ;;  %v1103_v60 = vld [vmem:[%s1502_s0 + $0x70] sm:$0xff]  }
  0x11   :  { %v294_v8 = vmax.f32 %v230_v61, 0.0  ;;  %v234_v10 = vadd.f32 %v1192_v7, %v163_v63  ;;  %v295_v12 = vmax.f32 %v231_v3, 0.0  ;;  %v235_v14 = vadd.f32 %v1192_v7, %v164_v5 }
  0x12   :  { %v296_v13 = vmax.f32 %v232_v4, 0.0  ;;  %v836_v15 = vunpack.c.l.bf16 %v1097_v0  ;;  %v953_v17 = vpack.c.bf16 %v293_v6, %v292_v2  ;;  %v297_v18 = vmax.f32 %v233_v9, 0.0  ;;  %v1104_v2 = vld [vmem:[%s1502_s0 + $0x78] sm:$0xff]  }
  0x13   :  { %v298_v19 = vmax.f32 %v234_v10, 0.0  ;;  %v837_v20 = vunpack.c.h.bf16 %v1097_v0  ;;  %v958_v21 = vpack.c.bf16 %v295_v12, %v294_v8  ;;  %v299_v22 = vmax.f32 %v235_v14, 0.0  ;;  %v1105_v12 = vld [vmem:[%s1502_s0 + $0x80] sm:$0xff]  }
  0x14   :  { %v165_v23 = vmul.f32 %v836_v15, %v1178_v1  ;;  %v840_v24 = vunpack.c.l.bf16 %v1098_v11  ;;  %1124 = vst [vmem:[%s1505_s3 + $0x20] sm:$0xff] %v953_v17   ;;  %v963_v26 = vpack.c.bf16 %v297_v18, %v296_v13  ;;  %v841_v28 = vunpack.c.h.bf16 %v1098_v11 }
  0x15   :  { %v166_v27 = vmul.f32 %v837_v20, %v1178_v1  ;;  %v844_v29 = vunpack.c.l.bf16 %v1099_v16  ;;  %1125 = vst [vmem:[%s1505_s3 + $0x28] sm:$0xff] %v958_v21   ;;  %v968_v30 = vpack.c.bf16 %v299_v22, %v298_v19  ;;  %v845_v33 = vunpack.c.h.bf16 %v1099_v16 }
  0x16   :  { %v236_v31 = vadd.f32 %v1192_v7, %v165_v23  ;;  %v167_v32 = vmul.f32 %v840_v24, %v1178_v1  ;;  %1126 = vst [vmem:[%s1505_s3 + $0x30] sm:$0xff] %v963_v26   ;;  %v168_v35 = vmul.f32 %v841_v28, %v1178_v1  ;;  %v848_v37 = vunpack.c.l.bf16 %v1100_v25 }
  0x17   :  { %v237_v34 = vadd.f32 %v1192_v7, %v166_v27  ;;  %v169_v36 = vmul.f32 %v844_v29, %v1178_v1  ;;  %1127 = vst [vmem:[%s1505_s3 + $0x38] sm:$0xff] %v968_v30   ;;  %v170_v41 = vmul.f32 %v845_v33, %v1178_v1  ;;  %v849_v42 = vunpack.c.h.bf16 %v1100_v25  ;;  %v1106_v29 = vld [vmem:[%s1502_s0 + $0x88] sm:$0xff]  }
  0x18   :  { %v300_v39 = vmax.f32 %v236_v31, 0.0  ;;  %v238_v40 = vadd.f32 %v1192_v7, %v167_v32  ;;  %v239_v44 = vadd.f32 %v1192_v7, %v168_v35  ;;  %v171_v46 = vmul.f32 %v848_v37, %v1178_v1 }
  0x19   :  { %v301_v43 = vmax.f32 %v237_v34, 0.0  ;;  %v240_v45 = vadd.f32 %v1192_v7, %v169_v36  ;;  %v241_v48 = vadd.f32 %v1192_v7, %v170_v41  ;;  %v172_v49 = vmul.f32 %v849_v42, %v1178_v1  ;;  %v1107_v34 = vld [vmem:[%s1502_s0 + $0x90] sm:$0xff]  }
  0x1a   :  { %v302_v47 = vmax.f32 %v238_v40, 0.0  ;;  %v852_v50 = vunpack.c.l.bf16 %v1101_v38  ;;  %v303_v53 = vmax.f32 %v239_v44, 0.0  ;;  %v242_v55 = vadd.f32 %v1192_v7, %v171_v46 }
  0x1b   :  { %v973_v52 = vpack.c.bf16 %v301_v43, %v300_v39  ;;  %v304_v54 = vmax.f32 %v240_v45, 0.0  ;;  %v305_v56 = vmax.f32 %v241_v48, 0.0  ;;  %v243_v57 = vadd.f32 %v1192_v7, %v172_v49  ;;  %v1108_v43 = vld [vmem:[%s1502_s0 + $0x98] sm:$0xff]  }
  0x1c   :  { %v853_v58 = vunpack.c.h.bf16 %v1101_v38  ;;  %v173_v59 = vmul.f32 %v852_v50, %v1178_v1  ;;  %v978_v61 = vpack.c.bf16 %v303_v53, %v302_v47  ;;  %v306_v62 = vmax.f32 %v242_v55, 0.0 }
  0x1d   :  { %1128 = vst [vmem:[%s1505_s3 + $0x40] sm:$0xff] %v973_v52   ;;  %v856_v63 = vunpack.c.l.bf16 %v1102_v51  ;;  %v857_v0 = vunpack.c.h.bf16 %v1102_v51  ;;  %v983_v3 = vpack.c.bf16 %v305_v56, %v304_v54  ;;  %v307_v4 = vmax.f32 %v243_v57, 0.0  ;;  %v1109_v56 = vld [vmem:[%s1502_s0 + $0xa0] sm:$0xff]  }
  0x1e   :  { %v174_v5 = vmul.f32 %v853_v58, %v1178_v1  ;;  %v244_v6 = vadd.f32 %v1192_v7, %v173_v59  ;;  %1129 = vst [vmem:[%s1505_s3 + $0x48] sm:$0xff] %v978_v61   ;;  %v860_v10 = vunpack.c.l.bf16 %v1103_v60  ;;  %v861_v11 = vunpack.c.h.bf16 %v1103_v60 }
  0x1f   :  { %v175_v8 = vmul.f32 %v856_v63, %v1178_v1  ;;  %v176_v9 = vmul.f32 %v857_v0, %v1178_v1  ;;  %1130 = vst [vmem:[%s1505_s3 + $0x50] sm:$0xff] %v983_v3   ;;  %v988_v13 = vpack.c.bf16 %v307_v4, %v306_v62  ;;  %v864_v16 = vunpack.c.l.bf16 %v1104_v2 }
  0x20   :  { %v245_v14 = vadd.f32 %v1192_v7, %v174_v5  ;;  %v308_v15 = vmax.f32 %v244_v6, 0.0  ;;  %v177_v19 = vmul.f32 %v860_v10, %v1178_v1  ;;  %v178_v20 = vmul.f32 %v861_v11, %v1178_v1 }
  0x21   :  { %v246_v17 = vadd.f32 %v1192_v7, %v175_v8  ;;  %v247_v18 = vadd.f32 %v1192_v7, %v176_v9  ;;  %1131 = vst [vmem:[%s1505_s3 + $0x58] sm:$0xff] %v988_v13   ;;  %v865_v22 = vunpack.c.h.bf16 %v1104_v2  ;;  %v179_v23 = vmul.f32 %v864_v16, %v1178_v1  ;;  %v1110_v2 = vld [vmem:[%s1502_s0 + $0xa8] sm:$0xff]   ;;  %v1111_v16 = vld [vmem:[%s1502_s0 + $0xb0] sm:$0xff]  }
  0x22   :  { %v309_v21 = vmax.f32 %v245_v14, 0.0  ;;  %v868_v24 = vunpack.c.l.bf16 %v1105_v12  ;;  %v248_v27 = vadd.f32 %v1192_v7, %v177_v19  ;;  %v249_v28 = vadd.f32 %v1192_v7, %v178_v20 }
  0x23   :  { %v310_v25 = vmax.f32 %v246_v17, 0.0  ;;  %v311_v26 = vmax.f32 %v247_v18, 0.0  ;;  %v180_v31 = vmul.f32 %v865_v22, %v1178_v1  ;;  %v250_v32 = vadd.f32 %v1192_v7, %v179_v23 }
  0x24   :  { %v993_v30 = vpack.c.bf16 %v309_v21, %v308_v15  ;;  %v869_v33 = vunpack.c.h.bf16 %v1105_v12  ;;  %v312_v36 = vmax.f32 %v248_v27, 0.0  ;;  %v313_v37 = vmax.f32 %v249_v28, 0.0  ;;  %v1112_v21 = vld [vmem:[%s1502_s0 + $0xb8] sm:$0xff]  }
  0x25   :  { %v998_v35 = vpack.c.bf16 %v311_v26, %v310_v25  ;;  %v181_v38 = vmul.f32 %v868_v24, %v1178_v1  ;;  %v251_v39 = vadd.f32 %v1192_v7, %v180_v31  ;;  %v314_v40 = vmax.f32 %v250_v32, 0.0 }
  0x26   :  { %1132 = vst [vmem:[%s1505_s3 + $0x60] sm:$0xff] %v993_v30   ;;  %v182_v41 = vmul.f32 %v869_v33, %v1178_v1  ;;  %v872_v42 = vunpack.c.l.bf16 %v1106_v29  ;;  %v1003_v44 = vpack.c.bf16 %v313_v37, %v312_v36  ;;  %v873_v46 = vunpack.c.h.bf16 %v1106_v29 }
  0x27   :  { %1133 = vst [vmem:[%s1505_s3 + $0x68] sm:$0xff] %v998_v35   ;;  %v252_v45 = vadd.f32 %v1192_v7, %v181_v38  ;;  %v876_v47 = vunpack.c.l.bf16 %v1107_v34  ;;  %v315_v48 = vmax.f32 %v251_v39, 0.0  ;;  %v877_v51 = vunpack.c.h.bf16 %v1107_v34  ;;  %v1113_v34 = vld [vmem:[%s1502_s0 + $0xc0] sm:$0xff]  }
  0x28   :  { %v253_v49 = vadd.f32 %v1192_v7, %v182_v41  ;;  %v183_v50 = vmul.f32 %v872_v42, %v1178_v1  ;;  %1134 = vst [vmem:[%s1505_s3 + $0x70] sm:$0xff] %v1003_v44   ;;  %v184_v53 = vmul.f32 %v873_v46, %v1178_v1  ;;  %v880_v55 = vunpack.c.l.bf16 %v1108_v43 }
  0x29   :  { %v316_v52 = vmax.f32 %v252_v45, 0.0  ;;  %v185_v54 = vmul.f32 %v876_v47, %v1178_v1  ;;  %v1008_v57 = vpack.c.bf16 %v315_v48, %v314_v40  ;;  %v186_v60 = vmul.f32 %v877_v51, %v1178_v1  ;;  %v1114_v47 = vld [vmem:[%s1502_s0 + $0xc8] sm:$0xff]  }
  0x2a   :  { %v317_v58 = vmax.f32 %v253_v49, 0.0  ;;  %v254_v59 = vadd.f32 %v1192_v7, %v183_v50  ;;  %v255_v61 = vadd.f32 %v1192_v7, %v184_v53  ;;  %v881_v63 = vunpack.c.h.bf16 %v1108_v43 }
  0x2b   :  { %v256_v62 = vadd.f32 %v1192_v7, %v185_v54  ;;  %v187_v0 = vmul.f32 %v880_v55, %v1178_v1  ;;  %1135 = vst [vmem:[%s1505_s3 + $0x78] sm:$0xff] %v1008_v57   ;;  %v257_v5 = vadd.f32 %v1192_v7, %v186_v60  ;;  %v884_v6 = vunpack.c.l.bf16 %v1109_v56 }
  0x2c   :  { %v1013_v3 = vpack.c.bf16 %v317_v58, %v316_v52  ;;  %v318_v4 = vmax.f32 %v254_v59, 0.0  ;;  %v319_v8 = vmax.f32 %v255_v61, 0.0  ;;  %v188_v10 = vmul.f32 %v881_v63, %v1178_v1  ;;  %v1115_v52 = vld [vmem:[%s1502_s0 + $0xd0] sm:$0xff]   ;;  %v1116_v61 = vld [vmem:[%s1502_s0 + $0xd8] sm:$0xff]  }
  0x2d   :  { %v320_v9 = vmax.f32 %v256_v62, 0.0  ;;  %v258_v11 = vadd.f32 %v1192_v7, %v187_v0  ;;  %v321_v12 = vmax.f32 %v257_v5, 0.0  ;;  %v885_v13 = vunpack.c.h.bf16 %v1109_v56 }
  0x2e   :  { %1136 = vst [vmem:[%s1505_s3 + $0x80] sm:$0xff] %v1013_v3   ;;  %v189_v14 = vmul.f32 %v884_v6, %v1178_v1  ;;  %v888_v15 = vunpack.c.l.bf16 %v1110_v2  ;;  %v1018_v17 = vpack.c.bf16 %v319_v8, %v318_v4  ;;  %v259_v18 = vadd.f32 %v1192_v7, %v188_v10 }
  0x2f   :  { %v322_v19 = vmax.f32 %v258_v11, 0.0  ;;  %v889_v20 = vunpack.c.h.bf16 %v1110_v2  ;;  %v1023_v22 = vpack.c.bf16 %v321_v12, %v320_v9  ;;  %v190_v23 = vmul.f32 %v885_v13, %v1178_v1  ;;  %v1117_v12 = vld [vmem:[%s1502_s0 + $0xe0] sm:$0xff]  }
  0x30   :  { %v260_v24 = vadd.f32 %v1192_v7, %v189_v14  ;;  %v191_v25 = vmul.f32 %v888_v15, %v1178_v1  ;;  %1137 = vst [vmem:[%s1505_s3 + $0x88] sm:$0xff] %v1018_v17   ;;  %v323_v26 = vmax.f32 %v259_v18, 0.0  ;;  %v892_v28 = vunpack.c.l.bf16 %v1111_v16 }
  0x31   :  { %v192_v27 = vmul.f32 %v889_v20, %v1178_v1  ;;  %v893_v29 = vunpack.c.h.bf16 %v1111_v16  ;;  %1138 = vst [vmem:[%s1505_s3 + $0x90] sm:$0xff] %v1023_v22   ;;  %v261_v30 = vadd.f32 %v1192_v7, %v190_v23  ;;  %v896_v33 = vunpack.c.l.bf16 %v1112_v21 }
  0x32   :  { %v324_v31 = vmax.f32 %v260_v24, 0.0  ;;  %v262_v32 = vadd.f32 %v1192_v7, %v191_v25  ;;  %v1028_v35 = vpack.c.bf16 %v323_v26, %v322_v19  ;;  %v193_v37 = vmul.f32 %v892_v28, %v1178_v1 }
  0x33   :  { %v263_v36 = vadd.f32 %v1192_v7, %v192_v27  ;;  %v194_v38 = vmul.f32 %v893_v29, %v1178_v1  ;;  %v325_v39 = vmax.f32 %v261_v30, 0.0  ;;  %v897_v41 = vunpack.c.h.bf16 %v1112_v21  ;;  %v1118_v21 = vld [vmem:[%s1502_s0 + $0xe8] sm:$0xff]  }
  0x34   :  { %v326_v40 = vmax.f32 %v262_v32, 0.0  ;;  %v195_v42 = vmul.f32 %v896_v33, %v1178_v1  ;;  %1139 = vst [vmem:[%s1505_s3 + $0x98] sm:$0xff] %v1028_v35   ;;  %v264_v44 = vadd.f32 %v1192_v7, %v193_v37  ;;  %v900_v46 = vunpack.c.l.bf16 %v1113_v34 }
  0x35   :  { %v327_v43 = vmax.f32 %v263_v36, 0.0  ;;  %v265_v45 = vadd.f32 %v1192_v7, %v194_v38  ;;  %v1033_v48 = vpack.c.bf16 %v325_v39, %v324_v31  ;;  %v196_v49 = vmul.f32 %v897_v41, %v1178_v1  ;;  %v1120_v39 = vld [vmem:[%s1502_s0 + $0xf8] sm:$0xff]  }
  0x36   :  { %v266_v50 = vadd.f32 %v1192_v7, %v195_v42  ;;  %v901_v51 = vunpack.c.h.bf16 %v1113_v34  ;;  %v328_v54 = vmax.f32 %v264_v44, 0.0  ;;  %v197_v56 = vmul.f32 %v900_v46, %v1178_v1  ;;  %v1119_v34 = vld [vmem:[%s1502_s0 + $0xf0] sm:$0xff]  }
  0x37   :  { %v1038_v53 = vpack.c.bf16 %v327_v43, %v326_v40  ;;  %v329_v55 = vmax.f32 %v265_v45, 0.0  ;;  %1140 = vst [vmem:[%s1505_s3 + $0xa0] sm:$0xff] %v1033_v48   ;;  %v267_v57 = vadd.f32 %v1192_v7, %v196_v49  ;;  %v904_v60 = vunpack.c.l.bf16 %v1114_v47 }
  0x38   :  { %v330_v58 = vmax.f32 %v266_v50, 0.0  ;;  %v198_v59 = vmul.f32 %v901_v51, %v1178_v1  ;;  %v268_v63 = vadd.f32 %v1192_v7, %v197_v56  ;;  %v905_v0 = vunpack.c.h.bf16 %v1114_v47 }
  0x39   :  { %1141 = vst [vmem:[%s1505_s3 + $0xa8] sm:$0xff] %v1038_v53   ;;  %v1043_v62 = vpack.c.bf16 %v329_v55, %v328_v54  ;;  %v908_v2 = vunpack.c.l.bf16 %v1115_v52  ;;  %v331_v3 = vmax.f32 %v267_v57, 0.0  ;;  %v199_v5 = vmul.f32 %v904_v60, %v1178_v1 }
  0x3a   :  { %v269_v4 = vadd.f32 %v1192_v7, %v198_v59  ;;  %v909_v6 = vunpack.c.h.bf16 %v1115_v52  ;;  %v332_v8 = vmax.f32 %v268_v63, 0.0  ;;  %v200_v9 = vmul.f32 %v905_v0, %v1178_v1 }
  0x3b   :  { %1142 = vst [vmem:[%s1505_s3 + $0xb0] sm:$0xff] %v1043_v62   ;;  %v201_v10 = vmul.f32 %v908_v2, %v1178_v1  ;;  %v912_v11 = vunpack.c.l.bf16 %v1116_v61  ;;  %v1048_v13 = vpack.c.bf16 %v331_v3, %v330_v58  ;;  %v270_v15 = vadd.f32 %v1192_v7, %v199_v5 }
  0x3c   :  { %v333_v14 = vmax.f32 %v269_v4, 0.0  ;;  %v202_v16 = vmul.f32 %v909_v6, %v1178_v1  ;;  %v271_v17 = vadd.f32 %v1192_v7, %v200_v9  ;;  %v913_v19 = vunpack.c.h.bf16 %v1116_v61 }
  0x3d   :  { %v272_v18 = vadd.f32 %v1192_v7, %v201_v10  ;;  %v203_v20 = vmul.f32 %v912_v11, %v1178_v1  ;;  %1143 = vst [vmem:[%s1505_s3 + $0xb8] sm:$0xff] %v1048_v13   ;;  %v334_v23 = vmax.f32 %v270_v15, 0.0  ;;  %v916_v25 = vunpack.c.l.bf16 %v1117_v12 }
  0x3e   :  { %v1053_v22 = vpack.c.bf16 %v333_v14, %v332_v8  ;;  %v273_v24 = vadd.f32 %v1192_v7, %v202_v16  ;;  %v335_v26 = vmax.f32 %v271_v17, 0.0  ;;  %v204_v28 = vmul.f32 %v913_v19, %v1178_v1 }
  0x3f   :  { %v336_v27 = vmax.f32 %v272_v18, 0.0  ;;  %v274_v29 = vadd.f32 %v1192_v7, %v203_v20  ;;  %v917_v31 = vunpack.c.h.bf16 %v1117_v12  ;;  %v205_v32 = vmul.f32 %v916_v25, %v1178_v1 }
  0x40   :  { %1144 = vst [vmem:[%s1505_s3 + $0xc0] sm:$0xff] %v1053_v22   ;;  %v337_v30 = vmax.f32 %v273_v24, 0.0  ;;  %v920_v33 = vunpack.c.l.bf16 %v1118_v21  ;;  %v1058_v35 = vpack.c.bf16 %v335_v26, %v334_v23  ;;  %v275_v36 = vadd.f32 %v1192_v7, %v204_v28 }
  0x41   :  { %v338_v37 = vmax.f32 %v274_v29, 0.0  ;;  %v921_v38 = vunpack.c.h.bf16 %v1118_v21  ;;  %v206_v41 = vmul.f32 %v917_v31, %v1178_v1  ;;  %v276_v42 = vadd.f32 %v1192_v7, %v205_v32 }
  0x42   :  { %v1063_v40 = vpack.c.bf16 %v337_v30, %v336_v27  ;;  %v207_v43 = vmul.f32 %v920_v33, %v1178_v1  ;;  %1145 = vst [vmem:[%s1505_s3 + $0xc8] sm:$0xff] %v1058_v35   ;;  %v339_v44 = vmax.f32 %v275_v36, 0.0  ;;  %v924_v46 = vunpack.c.l.bf16 %v1119_v34 }
  0x43   :  { %v208_v45 = vmul.f32 %v921_v38, %v1178_v1  ;;  %v925_v47 = vunpack.c.h.bf16 %v1119_v34  ;;  %v277_v48 = vadd.f32 %v1192_v7, %v206_v41  ;;  %v340_v49 = vmax.f32 %v276_v42, 0.0 }
  0x44   :  { %1146 = vst [vmem:[%s1505_s3 + $0xd0] sm:$0xff] %v1063_v40   ;;  %v278_v50 = vadd.f32 %v1192_v7, %v207_v43  ;;  %v928_v51 = vunpack.c.l.bf16 %v1120_v39  ;;  %v1068_v52 = vpack.c.bf16 %v339_v44, %v338_v37  ;;  %v209_v54 = vmul.f32 %v924_v46, %v1178_v1 }
  0x45   :  { %v279_v53 = vadd.f32 %v1192_v7, %v208_v45  ;;  %v210_v55 = vmul.f32 %v925_v47, %v1178_v1  ;;  %v341_v56 = vmax.f32 %v277_v48, 0.0  ;;  %v929_v58 = vunpack.c.h.bf16 %v1120_v39 }
  0x46   :  { %v342_v57 = vmax.f32 %v278_v50, 0.0  ;;  %v211_v59 = vmul.f32 %v928_v51, %v1178_v1  ;;  %1147 = vst [vmem:[%s1505_s3 + $0xd8] sm:$0xff] %v1068_v52   ;;  %v280_v61 = vadd.f32 %v1192_v7, %v209_v54 }
  0x47   :  { %v343_v60 = vmax.f32 %v279_v53, 0.0  ;;  %v281_v62 = vadd.f32 %v1192_v7, %v210_v55  ;;  %v1073_v63 = vpack.c.bf16 %v341_v56, %v340_v49  ;;  %v212_v0 = vmul.f32 %v929_v58, %v1178_v1 }
  0x48   :  { %v282_v2 = vadd.f32 %v1192_v7, %v211_v59  ;;  %v344_v4 = vmax.f32 %v280_v61, 0.0 }
  0x49   :  { %v1078_v3 = vpack.c.bf16 %v343_v60, %v342_v57  ;;  %v345_v5 = vmax.f32 %v281_v62, 0.0  ;;  %1148 = vst [vmem:[%s1505_s3 + $0xe0] sm:$0xff] %v1073_v63   ;;  %v283_v6 = vadd.f32 %v1192_v7, %v212_v0 }
  0x4a   :  { %v346_v8 = vmax.f32 %v282_v2, 0.0 }
  0x4b   :  { %1149 = vst [vmem:[%s1505_s3 + $0xe8] sm:$0xff] %v1078_v3   ;;  %v1083_v9 = vpack.c.bf16 %v345_v5, %v344_v4  ;;  %v347_v10 = vmax.f32 %v283_v6, 0.0 }
  0x4d   :  { %1150 = vst [vmem:[%s1505_s3 + $0xf0] sm:$0xff] %v1083_v9   ;;  %v1088_v1 = vpack.c.bf16 %v347_v10, %v346_v8 }
  0x4f   :  { %1151 = vst [vmem:[%s1505_s3 + $0xf8] sm:$0xff] %v1088_v1  }

// kernel: unetpp_forward.49
= control target key start
LH: loop header
LB: loop body
LE: loop exit
PB: predicated region body
PF: predicated region fallthrough
CT: control target
= control target key end

     0   :  { %s741_s12 = smov 0   ;;  %s743_s13 = smov 0   ;;  %s814_s0 = inlined_call_operand.vmem [shape: bf16[128,128], index: 0, kind: input, shape index: {}]   ;;  %s815_s1 = inlined_call_operand.vmem [shape: bf16[128,128], index: 1, kind: input, shape index: {}]   ;;  %s816_s2 = inlined_call_operand.vmem [shape: f32[1,128], index: 2, kind: input, shape index: {}]   ;;  %s817_s3 = inlined_call_operand.vmem [shape: bf16[128,128], index: 3, kind: output, shape index: {}]  }
   0x1   :  { %s745_s14 = smov 0  }
   0x2 LB: > { %s25_s15 = sadd.s32 1, %s715_s13  ;;  %p550_p0 = scmp.ge.s32.totalorder %s719_s14, 1  ;;  %s719_s14 = sphi %s745_s14, %s13_s14   ;;  %s715_s13 = sphi %s743_s13, %s819_s13   ;;  %s711_s12 = sphi %s741_s12, %s818_s12  }
   0x3   : > { %p27_p1 = scmp.ge.s32.totalorder %s25_s15, 2  ;;  %p169_p2 = scmp.lt.s32.totalorder %s719_s14, 3 }
   0x5   : > { %s821_s15 = smov (%p27_p1, %s25_s15), 0  ;;  %p170_p3 = pnand %p550_p0, %p169_p2 }
   0x6   : > { %v685_v0 = vld [vmem:[%s815_s1] sm:$0xff] (!%p170_p3)   ;;  %s551_s18 = sshll.u32 (!%p170_p3), %s711_s12, 3  ;;  %v686_v1 = vld [vmem:[%s815_s1 + $0x8] sm:$0xff] (!%p170_p3)   ;;  %v687_v2 = vld [vmem:[%s815_s1 + $0x10] sm:$0xff] (!%p170_p3)  }
   0x7   : > { %173 = sbr.rel (%p170_p3) target bundleno = 261 (0x105), region = 32  ;;  %p204_p4 = scmp.lt.s32.totalorder (!%p170_p3), %s551_s18, 15  ;;  %621 = vmatprep.subr.bf16.mxu0 (!%p170_p3), %v685_v0  ;;  %645 = vmatprep.subr.bf16.mxu1 (!%p170_p3), %v685_v0  ;;  %v688_v3 = vld [vmem:[%s815_s1 + $0x18] sm:$0xff] (!%p170_p3)   ;;  %v689_v6 = vld [vmem:[%s815_s1 + $0x20] sm:$0xff] (!%p170_p3)   ;;  %v690_v7 = vld [vmem:[%s815_s1 + $0x28] sm:$0xff] (!%p170_p3)  }
   0x8   : > { %622 = vmatpush3.bf16.msra.mxu0 (!%p170_p3), %v685_v0  ;;  %653 = vmatpush3.bf16.msra.mxu1 (!%p170_p3), %v685_v0  ;;  %v691_v8 = vld [vmem:[%s815_s1 + $0x30] sm:$0xff] (!%p170_p3)   ;;  %v692_v9 = vld [vmem:[%s815_s1 + $0x38] sm:$0xff] (!%p170_p3)   ;;  %v555_v12 = vld [vmem:[%s816_s2] ss:$0 sm:$0xff] (!%p170_p3) }
   0x9   : > { %623 = vmatprep.subr.bf16.mxu0 (!%p170_p3), %v686_v1  ;;  %646 = vmatprep.subr.bf16.mxu1 (!%p170_p3), %v686_v1 }
   0xc   : > { %624 = vmatpush3.bf16.msra.mxu0 (!%p170_p3), %v686_v1  ;;  %654 = vmatpush3.bf16.msra.mxu1 (!%p170_p3), %v686_v1 }
   0xd   : > { %625 = vmatprep.subr.bf16.mxu0 (!%p170_p3), %v687_v2  ;;  %647 = vmatprep.subr.bf16.mxu1 (!%p170_p3), %v687_v2 }
   0xe   : > { %s823_s18 = smov (!%p204_p4, %s551_s18), 15 }
   0xf   : > { %s552_s23 = sshll.u32 %s823_s18, 2 }
  0x10   : > { %s776_s26 = scalar_lea.vmem %s814_s0, %s552_s23  ;;  %626 = vmatpush3.bf16.msra.mxu0 %v687_v2  ;;  %655 = vmatpush3.bf16.msra.mxu1 %v687_v2  ;;  %s223_s17 = scalar_lea.vmem %s817_s3, %s552_s23 }
  0x11   : > { %v693_v4 = vld [vmem:[%s776_s26] sm:$0xff]   ;;  %v694_v5 = vld [vmem:[%s776_s26 + $0x10] sm:$0xff]   ;;  %627 = vmatprep.subr.bf16.mxu0 %v688_v3  ;;  %648 = vmatprep.subr.bf16.mxu1 %v688_v3  ;;  %v695_v10 = vld [vmem:[%s776_s26 + $0x8] sm:$0xff]  }
  0x12   : > { %637 = vmatprep.mubr.bf16.mxu0 %v693_v4  ;;  %641 = vmatprep.mubr.bf16.mxu1 %v694_v5  ;;  %v696_v11 = vld [vmem:[%s776_s26 + $0x18] sm:$0xff]  }
  0x14   : > { %628 = vmatpush3.bf16.msra.mxu0 %v688_v3  ;;  %656 = vmatpush3.bf16.msra.mxu1 %v688_v3 }
  0x15   : > { %629 = vmatprep.subr.bf16.mxu0 %v689_v6  ;;  %649 = vmatprep.subr.bf16.mxu1 %v689_v6 }
  0x18   : > { %630 = vmatpush3.bf16.msra.mxu0 %v689_v6  ;;  %657 = vmatpush3.bf16.msra.mxu1 %v689_v6 }
  0x19   : > { %631 = vmatprep.subr.bf16.mxu0 %v690_v7  ;;  %650 = vmatprep.subr.bf16.mxu1 %v690_v7 }
  0x1c   : > { %632 = vmatpush3.bf16.msra.mxu0 %v690_v7  ;;  %658 = vmatpush3.bf16.msra.mxu1 %v690_v7 }
  0x1d   : > { %633 = vmatprep.subr.bf16.mxu0 %v691_v8  ;;  %651 = vmatprep.subr.bf16.mxu1 %v691_v8 }
  0x20   : > { %634 = vmatpush3.bf16.msra.mxu0 %v691_v8  ;;  %659 = vmatpush3.bf16.msra.mxu1 %v691_v8 }
  0x21   : > { %635 = vmatprep.subr.bf16.mxu0 %v692_v9  ;;  %652 = vmatprep.subr.bf16.mxu1 %v692_v9 }
  0x24   : > { %636 = vmatpush3.bf16.msra.mxu0 %v692_v9  ;;  %660 = vmatpush3.bf16.msra.mxu1 %v692_v9 }
  0x27   : > { %638 = vmatmul.mubr.bf16.vlgmr.msra.gmra.mrb[0].mxu0 %v695_v10  ;;  %642 = vmatmul.mubr.bf16.vlgmr.msra.gmra.mrb[0].mxu1 %v696_v11 }
  0xfa   : > { %v639_v13 = vpop.f32.mrb[0].mxu0  ;;  %v643_v14 = vpop.f32.mrb[0].mxu1 }
  0xfb   : > { %v372_v15 = vadd.f32 %v639_v13, %v555_v12  ;;  %v388_v16 = vadd.f32 %v643_v14, %v555_v12  ;;  %v363_v17 = vpop.f32.mrb[1].mxu0  ;;  %v379_v18 = vpop.f32.mrb[1].mxu1 }
  0xfc   : > { %v364_v19 = vadd.f32 %v555_v12, %v363_v17  ;;  %v380_v20 = vadd.f32 %v555_v12, %v379_v18  ;;  %v640_v21 = vpop.f32.mrb[2].mxu0  ;;  %v644_v22 = vpop.f32.mrb[2].mxu1 }
  0xfd   : > { %v375_v23 = vadd.f32 %v640_v21, %v555_v12  ;;  %v391_v24 = vadd.f32 %v644_v22, %v555_v12  ;;  %v366_v25 = vpop.f32.mrb[3].mxu0  ;;  %v382_v26 = vpop.f32.mrb[3].mxu1  ;;  %v396_v29 = vmax.f32 %v372_v15, 0.0  ;;  %v400_v30 = vmax.f32 %v388_v16, 0.0 }
  0xfe   : > { %v367_v27 = vadd.f32 %v555_v12, %v366_v25  ;;  %v383_v28 = vadd.f32 %v555_v12, %v382_v26  ;;  %v394_v33 = vmax.f32 %v364_v19, 0.0  ;;  %v398_v34 = vmax.f32 %v380_v20, 0.0 }
  0xff   : > { %v397_v31 = vmax.f32 %v375_v23, 0.0  ;;  %v401_v32 = vmax.f32 %v391_v24, 0.0 }
 0x100   : > { %v395_v35 = vmax.f32 %v367_v27, 0.0  ;;  %v399_v36 = vmax.f32 %v383_v28, 0.0 }
 0x101   : > { %v594_v37 = vpack.c.bf16 %v397_v31, %v396_v29  ;;  %v604_v38 = vpack.c.bf16 %v401_v32, %v400_v30 }
 0x102   : > { %v589_v39 = vpack.c.bf16 %v395_v35, %v394_v33  ;;  %v599_v40 = vpack.c.bf16 %v399_v36, %v398_v34 }
 0x103   : > { %606 = vst [vmem:[%s223_s17 + $0x8] sm:$0xff] %v594_v37   ;;  %608 = vst [vmem:[%s223_s17 + $0x18] sm:$0xff] %v604_v38  }
 0x104   : > { %590 = vst [vmem:[%s223_s17] sm:$0xff] %v589_v39   ;;  %607 = vst [vmem:[%s223_s17 + $0x10] sm:$0xff] %v599_v40  }
 0x105 PF: > { %s13_s14 = sadd.s32 1, %s719_s14   ;;  %s818_s12 = smov %s715_s13 }
 0x106   : > { %p10_p5 = scmp.ge.s32.totalorder %s13_s14, 4   ;;  %s819_s13 = smov %s821_s15 }
 0x108   :  { %12 = sbr.rel (!%p10_p5) target bundleno = 2 (0x2), region = 68 }

// kernel: unetpp_forward.51
= control target key start
LH: loop header
LB: loop body
LE: loop exit
PB: predicated region body
PF: predicated region fallthrough
CT: control target
= control target key end

     0   :  { %s422_s0 = inlined_call_operand.vmem [shape: bf16[128,128], index: 0, kind: input, shape index: {}]   ;;  %s423_s1 = inlined_call_operand.vmem [shape: f32[1,128], index: 1, kind: input, shape index: {}]   ;;  %s424_s2 = inlined_call_operand.vmem [shape: f32[1,128], index: 2, kind: input, shape index: {}]   ;;  %s425_s3 = inlined_call_operand.vmem [shape: bf16[128,128], index: 3, kind: output, shape index: {}]  }
   0x1   :  { %v227_v0 = vld [vmem:[%s422_s0] sm:$0xff]   ;;  %v298_v4 = vld [vmem:[%s422_s0 + $0x8] sm:$0xff]   ;;  %v299_v5 = vld [vmem:[%s422_s0 + $0x10] sm:$0xff]  }
   0x2   :  { %v338_v1 = vld [vmem:[%s423_s1] ss:$0 sm:$0xff]  ;;  %v228_v2 = vunpack.c.l.bf16 %v227_v0  ;;  %v229_v3 = vunpack.c.h.bf16 %v227_v0  ;;  %v300_v6 = vld [vmem:[%s422_s0 + $0x18] sm:$0xff]   ;;  %v232_v8 = vunpack.c.l.bf16 %v298_v4  ;;  %v233_v9 = vunpack.c.h.bf16 %v298_v4  ;;  %v302_v33 = vld [vmem:[%s422_s0 + $0x28] sm:$0xff]  }
   0x3   :  { %v352_v7 = vld [vmem:[%s424_s2] ss:$0 sm:$0xff]  ;;  %v236_v10 = vunpack.c.l.bf16 %v299_v5  ;;  %v237_v11 = vunpack.c.h.bf16 %v299_v5  ;;  %v240_v14 = vunpack.c.l.bf16 %v300_v6  ;;  %v241_v15 = vunpack.c.h.bf16 %v300_v6  ;;  %v303_v38 = vld [vmem:[%s422_s0 + $0x30] sm:$0xff]   ;;  %v304_v43 = vld [vmem:[%s422_s0 + $0x38] sm:$0xff]  }
   0x4   :  { %v53_v12 = vmul.f32 %v228_v2, %v338_v1  ;;  %v54_v13 = vmul.f32 %v229_v3, %v338_v1  ;;  %v55_v16 = vmul.f32 %v232_v8, %v338_v1  ;;  %v56_v17 = vmul.f32 %v233_v9, %v338_v1  ;;  %v301_v28 = vld [vmem:[%s422_s0 + $0x20] sm:$0xff]  }
   0x5   :  { %v57_v18 = vmul.f32 %v236_v10, %v338_v1  ;;  %v58_v19 = vmul.f32 %v237_v11, %v338_v1  ;;  %v59_v22 = vmul.f32 %v240_v14, %v338_v1  ;;  %v60_v23 = vmul.f32 %v241_v15, %v338_v1 }
   0x6   :  { %v76_v20 = vadd.f32 %v352_v7, %v53_v12  ;;  %v77_v21 = vadd.f32 %v352_v7, %v54_v13  ;;  %v78_v24 = vadd.f32 %v352_v7, %v55_v16  ;;  %v79_v25 = vadd.f32 %v352_v7, %v56_v17 }
   0x7   :  { %v80_v26 = vadd.f32 %v352_v7, %v57_v18  ;;  %v81_v27 = vadd.f32 %v352_v7, %v58_v19  ;;  %v82_v31 = vadd.f32 %v352_v7, %v59_v22  ;;  %v83_v32 = vadd.f32 %v352_v7, %v60_v23 }
   0x8   :  { %v92_v29 = vmax.f32 %v76_v20, 0.0  ;;  %v93_v30 = vmax.f32 %v77_v21, 0.0  ;;  %v94_v34 = vmax.f32 %v78_v24, 0.0  ;;  %v95_v35 = vmax.f32 %v79_v25, 0.0 }
   0x9   :  { %v96_v36 = vmax.f32 %v80_v26, 0.0  ;;  %v97_v37 = vmax.f32 %v81_v27, 0.0  ;;  %v98_v40 = vmax.f32 %v82_v31, 0.0  ;;  %v99_v41 = vmax.f32 %v83_v32, 0.0 }
   0xa   :  { %v261_v39 = vpack.c.bf16 %v93_v30, %v92_v29  ;;  %v244_v42 = vunpack.c.l.bf16 %v301_v28  ;;  %v266_v44 = vpack.c.bf16 %v95_v35, %v94_v34  ;;  %v245_v46 = vunpack.c.h.bf16 %v301_v28 }
   0xb   :  { %v271_v45 = vpack.c.bf16 %v97_v37, %v96_v36  ;;  %v248_v47 = vunpack.c.l.bf16 %v302_v33  ;;  %v276_v48 = vpack.c.bf16 %v99_v41, %v98_v40  ;;  %v249_v50 = vunpack.c.h.bf16 %v302_v33 }
   0xc   :  { %262 = vst [vmem:[%s425_s3] sm:$0xff] %v261_v39   ;;  %v61_v49 = vmul.f32 %v244_v42, %v338_v1  ;;  %v252_v51 = vunpack.c.l.bf16 %v303_v38  ;;  %305 = vst [vmem:[%s425_s3 + $0x8] sm:$0xff] %v266_v44   ;;  %v62_v52 = vmul.f32 %v245_v46, %v338_v1  ;;  %v253_v54 = vunpack.c.h.bf16 %v303_v38 }
   0xd   :  { %306 = vst [vmem:[%s425_s3 + $0x10] sm:$0xff] %v271_v45   ;;  %v63_v53 = vmul.f32 %v248_v47, %v338_v1  ;;  %v256_v55 = vunpack.c.l.bf16 %v304_v43  ;;  %307 = vst [vmem:[%s425_s3 + $0x18] sm:$0xff] %v276_v48   ;;  %v64_v57 = vmul.f32 %v249_v50, %v338_v1  ;;  %v257_v59 = vunpack.c.h.bf16 %v304_v43 }
   0xe   :  { %v84_v56 = vadd.f32 %v352_v7, %v61_v49  ;;  %v65_v58 = vmul.f32 %v252_v51, %v338_v1  ;;  %v85_v60 = vadd.f32 %v352_v7, %v62_v52  ;;  %v66_v62 = vmul.f32 %v253_v54, %v338_v1 }
   0xf   :  { %v86_v61 = vadd.f32 %v352_v7, %v63_v53  ;;  %v67_v63 = vmul.f32 %v256_v55, %v338_v1  ;;  %v87_v2 = vadd.f32 %v352_v7, %v64_v57  ;;  %v68_v4 = vmul.f32 %v257_v59, %v338_v1 }
  0x10   :  { %v100_v0 = vmax.f32 %v84_v56, 0.0  ;;  %v88_v3 = vadd.f32 %v352_v7, %v65_v58  ;;  %v101_v5 = vmax.f32 %v85_v60, 0.0  ;;  %v89_v8 = vadd.f32 %v352_v7, %v66_v62 }
  0x11   :  { %v102_v6 = vmax.f32 %v86_v61, 0.0  ;;  %v90_v9 = vadd.f32 %v352_v7, %v67_v63  ;;  %v103_v10 = vmax.f32 %v87_v2, 0.0  ;;  %v91_v12 = vadd.f32 %v352_v7, %v68_v4 }
  0x12   :  { %v104_v11 = vmax.f32 %v88_v3, 0.0  ;;  %v281_v13 = vpack.c.bf16 %v101_v5, %v100_v0  ;;  %v105_v14 = vmax.f32 %v89_v8, 0.0 }
  0x13   :  { %v106_v15 = vmax.f32 %v90_v9, 0.0  ;;  %v286_v16 = vpack.c.bf16 %v103_v10, %v102_v6  ;;  %v107_v17 = vmax.f32 %v91_v12, 0.0 }
  0x14   :  { %308 = vst [vmem:[%s425_s3 + $0x20] sm:$0xff] %v281_v13   ;;  %v291_v1 = vpack.c.bf16 %v105_v14, %v104_v11 }
  0x15   :  { %309 = vst [vmem:[%s425_s3 + $0x28] sm:$0xff] %v286_v16   ;;  %v296_v18 = vpack.c.bf16 %v107_v17, %v106_v15 }
  0x16   :  { %310 = vst [vmem:[%s425_s3 + $0x30] sm:$0xff] %v291_v1  }
  0x17   :  { %311 = vst [vmem:[%s425_s3 + $0x38] sm:$0xff] %v296_v18  }

// kernel: unetpp_forward.50
= control target key start
LH: loop header
LB: loop body
LE: loop exit
PB: predicated region body
PF: predicated region fallthrough
CT: control target
= control target key end

     0   :  { %s1052_s15 = smov 0   ;;  %s1054_s16 = smov 0   ;;  %s1195_s0 = inlined_call_operand.vmem [shape: bf16[128,256], index: 0, kind: input, shape index: {}]   ;;  %s1196_s1 = inlined_call_operand.vmem [shape: bf16[256,128], index: 1, kind: input, shape index: {}]   ;;  %s1197_s2 = inlined_call_operand.vmem [shape: f32[1,128], index: 2, kind: input, shape index: {}]   ;;  %s1198_s3 = inlined_call_operand.vmem [shape: bf16[128,128], index: 3, kind: output, shape index: {0}]   ;;  %s1199_s4 = inlined_call_operand.vmem [shape: f32[16,128], index: 4, kind: output, shape index: {1}]  }
   0x1   :  { %s1056_s17 = smov 0  }
   0x2 LB: > { %s27_s18 = sadd.s32 1, %s1020_s16  ;;  %p810_p0 = scmp.ge.s32.totalorder %s1024_s17, 1  ;;  %s1024_s17 = sphi %s1056_s17, %s15_s17   ;;  %s1020_s16 = sphi %s1054_s16, %s1201_s16   ;;  %s1016_s15 = sphi %s1052_s15, %s1200_s15  }
   0x3   : > { %p29_p1 = scmp.ge.s32.totalorder %s27_s18, 2  ;;  %p200_p2 = scmp.lt.s32.totalorder %s1024_s17, 3 }
   0x5   : > { %s1203_s18 = smov (%p29_p1, %s27_s18), 0  ;;  %p201_p3 = pnand %p810_p0, %p200_p2 }
   0x6   : > { %v974_v0 = vld [vmem:[%s1196_s1 + $0x40] sm:$0xff] (!%p201_p3)   ;;  %s811_s21 = sshll.u32 (!%p201_p3), %s1016_s15, 3  ;;  %v976_v2 = vld [vmem:[%s1196_s1 + $0x48] sm:$0xff] (!%p201_p3)   ;;  %v978_v4 = vld [vmem:[%s1196_s1 + $0x50] sm:$0xff] (!%p201_p3)   ;;  %v571_v24 = vlaneseq (!%p201_p3)  ;;  %s850_s9 = sshll.u32 (!%p201_p3), %s1016_s15, 6 }
   0x7   : > { %204 = sbr.rel (%p201_p3) target bundleno = 300 (0x12c), region = 32  ;;  %v975_v1 = vld [vmem:[%s1196_s1] sm:$0xff] (!%p201_p3)   ;;  %893 = vmatprep.subr.bf16.mxu0 (!%p201_p3), %v974_v0  ;;  %933 = vmatprep.subr.bf16.mxu1 (!%p201_p3), %v974_v0  ;;  %v977_v3 = vld [vmem:[%s1196_s1 + $0x8] sm:$0xff] (!%p201_p3)   ;;  %p245_p4 = scmp.lt.s32.totalorder (!%p201_p3), %s811_s21, 15  ;;  %v979_v5 = vld [vmem:[%s1196_s1 + $0x10] sm:$0xff] (!%p201_p3)   ;;  %v1140_v27 = vstv (!%p201_p3), %s850_s9  ;;  %v1026_v0 = vmov (!%p201_p3), 0.0  }
   0x8   : > { %894 = vmatpush3.bf16.msra.mxu0 (!%p201_p3), %v975_v1  ;;  %941 = vmatpush3.bf16.msra.mxu1 (!%p201_p3), %v975_v1  ;;  %v980_v6 = vld [vmem:[%s1196_s1 + $0x58] sm:$0xff] (!%p201_p3)   ;;  %v982_v8 = vld [vmem:[%s1196_s1 + $0x60] sm:$0xff] (!%p201_p3)   ;;  %v984_v10 = vld [vmem:[%s1196_s1 + $0x68] sm:$0xff] (!%p201_p3)   ;;  %v1137_v25 = vshrl.u32 (!%p201_p3), %v571_v24, 7  ;;  %p267_p5 = scmp.lt.s32.totalorder (!%p201_p3), %s1016_s15, 1 }
   0x9   : > { %895 = vmatprep.subr.bf16.mxu0 (!%p201_p3), %v976_v2  ;;  %934 = vmatprep.subr.bf16.mxu1 (!%p201_p3), %v976_v2  ;;  %v981_v7 = vld [vmem:[%s1196_s1 + $0x18] sm:$0xff] (!%p201_p3)   ;;  %v983_v9 = vld [vmem:[%s1196_s1 + $0x20] sm:$0xff] (!%p201_p3)   ;;  %v985_v13 = vld [vmem:[%s1196_s1 + $0x28] sm:$0xff] (!%p201_p3)  }
   0xa   : > { %v986_v14 = vld [vmem:[%s1196_s1 + $0x70] sm:$0xff] (!%p201_p3)   ;;  %v988_v16 = vld [vmem:[%s1196_s1 + $0x78] sm:$0xff] (!%p201_p3)   ;;  %v573_v30 = vadd.s32 (!%p201_p3), 8, %v1137_v25  ;;  %v817_v36 = vld [vmem:[%s1197_s2] ss:$0 sm:$0xff] (!%p201_p3)  ;;  %v582_v38 = vadd.s32 (!%p201_p3), %v1140_v27, %v1137_v25  ;;  %v576_v43 = vadd.s32 (!%p201_p3), 32, %v1137_v25 }
   0xb   : > { %v987_v15 = vld [vmem:[%s1196_s1 + $0x30] sm:$0xff] (!%p201_p3)   ;;  %v989_v17 = vld [vmem:[%s1196_s1 + $0x38] sm:$0xff] (!%p201_p3)   ;;  %v574_v45 = vadd.s32 (!%p201_p3), 16, %v1137_v25  ;;  %v575_v49 = vadd.s32 (!%p201_p3), 24, %v1137_v25  ;;  %v577_v53 = vadd.s32 (!%p201_p3), 40, %v1137_v25  ;;  %vm656_vm8 = vcmp.eq.s32.totalorder (!%p201_p3), %v1137_v25, 0 }
   0xc   : > { %896 = vmatpush3.bf16.msra.mxu0 (!%p201_p3), %v977_v3  ;;  %942 = vmatpush3.bf16.msra.mxu1 (!%p201_p3), %v977_v3  ;;  %v583_v44 = vadd.s32 (!%p201_p3), %v1140_v27, %v573_v30  ;;  %vm590_vm0 = vcmp.lt.s32.totalorder (!%p201_p3), %v582_v38, 128  ;;  %v586_v54 = vadd.s32 (!%p201_p3), %v1140_v27, %v576_v43  ;;  %vm658_vm9 = vcmp.eq.s32.totalorder (!%p201_p3), %v1137_v25, 1 }
   0xd   : > { %897 = vmatprep.subr.bf16.mxu0 (!%p201_p3), %v978_v4  ;;  %935 = vmatprep.subr.bf16.mxu1 (!%p201_p3), %v978_v4  ;;  %v584_v60 = vadd.s32 (!%p201_p3), %v1140_v27, %v574_v45  ;;  %v585_v61 = vadd.s32 (!%p201_p3), %v1140_v27, %v575_v49  ;;  %v851_v1 = vsel (!%p201_p3), %vm590_vm0, 1.0, %v1026_v0 }
   0xe   : > { %s1205_s21 = smov (!%p245_p4, %s811_s21), 15  ;;  %vm591_vm1 = vcmp.lt.s32.totalorder %v583_v44, 128  ;;  %vm594_vm2 = vcmp.lt.s32.totalorder %v586_v54, 128  ;;  %s1207_s15 = smov (!%p267_p5, %s1016_s15), 1 }
   0xf   : > { %s861_s10 = sshll.u32 %s1205_s21, 3  ;;  %s815_s12 = sshll.u32 %s1205_s21, 2  ;;  %vm592_vm3 = vcmp.lt.s32.totalorder %v584_v60, 128  ;;  %vm593_vm4 = vcmp.lt.s32.totalorder %v585_v61, 128 }
  0x10   : > { %898 = vmatpush3.bf16.msra.mxu0 %v979_v5  ;;  %943 = vmatpush3.bf16.msra.mxu1 %v979_v5  ;;  %s1106_s19 = scalar_lea.vmem %s1195_s0, %s861_s10  ;;  %v854_v24 = vsel %vm593_vm4, 1.0, %v1026_v0  ;;  %s816_s21 = sshll.u32 %s1207_s15, 3 }
  0x11   : > { %899 = vmatprep.subr.bf16.mxu0 %v980_v6  ;;  %936 = vmatprep.subr.bf16.mxu1 %v980_v6  ;;  %v992_v11 = vld [vmem:[%s1106_s19 + $0x4] ss:$8 sps:$4 sm:$0xff]   ;;  %v990_v18 = vld [vmem:[%s1106_s19] ss:$8 sps:$4 sm:$0xff]   ;;  %v996_v20 = vld [vmem:[%s1106_s19 + $0x14] ss:$8 sps:$4 sm:$0xff]   ;;  %s273_s23 = scalar_lea.vmem %s1199_s4, %s816_s21 }
  0x12   : > { %v995_v12 = vld [vmem:[%s1106_s19 + $0x24] ss:$8 sps:$4 sm:$0xff]   ;;  %490 = vmatprep.mubr.bf16.mxu0 %v992_v11  ;;  %v993_v19 = vld [vmem:[%s1106_s19 + $0x20] ss:$8 sps:$4 sm:$0xff]   ;;  %v999_v21 = vld [vmem:[%s1106_s19 + $0x34] ss:$8 sps:$4 sm:$0xff]  }
  0x13   : > { %506 = vmatprep.mubr.bf16.mxu1 %v995_v12  ;;  %v998_v22 = vld [vmem:[%s1106_s19 + $0x10] ss:$8 sps:$4 sm:$0xff]   ;;  %v852_v6 = vsel %vm591_vm1, 1.0, %v1026_v0  ;;  %v578_v11 = vadd.s32 48, %v1137_v25 }
  0x14   : > { %900 = vmatpush3.bf16.msra.mxu0 %v981_v7  ;;  %944 = vmatpush3.bf16.msra.mxu1 %v981_v7  ;;  %v1001_v23 = vld [vmem:[%s1106_s19 + $0x30] ss:$8 sps:$4 sm:$0xff]   ;;  %s1156_s19 = scalar_lea.vmem %s1198_s3, %s815_s12  ;;  %v587_v7 = vadd.s32 %v1140_v27, %v577_v53 }
  0x15   : > { %901 = vmatprep.subr.bf16.mxu0 %v982_v8  ;;  %937 = vmatprep.subr.bf16.mxu1 %v982_v8 }
  0x16   : > { %vm595_vm5 = vcmp.lt.s32.totalorder %v587_v7, 128 }
  0x18   : > { %902 = vmatpush3.bf16.msra.mxu0 %v983_v9  ;;  %945 = vmatpush3.bf16.msra.mxu1 %v983_v9 }
  0x19   : > { %903 = vmatprep.subr.bf16.mxu0 %v984_v10  ;;  %938 = vmatprep.subr.bf16.mxu1 %v984_v10 }
  0x1c   : > { %904 = vmatpush3.bf16.msra.mxu0 %v985_v13  ;;  %946 = vmatpush3.bf16.msra.mxu1 %v985_v13  ;;  %v579_v13 = vadd.s32 56, %v1137_v25 }
  0x1d   : > { %905 = vmatprep.subr.bf16.mxu0 %v986_v14  ;;  %939 = vmatprep.subr.bf16.mxu1 %v986_v14 }
  0x20   : > { %906 = vmatpush3.bf16.msra.mxu0 %v987_v15  ;;  %947 = vmatpush3.bf16.msra.mxu1 %v987_v15 }
  0x21   : > { %907 = vmatprep.subr.bf16.mxu0 %v988_v16  ;;  %940 = vmatprep.subr.bf16.mxu1 %v988_v16 }
  0x24   : > { %908 = vmatpush3.bf16.msra.mxu0 %v989_v17  ;;  %948 = vmatpush3.bf16.msra.mxu1 %v989_v17 }
  0x27   : > { %491 = vmatmul.mubr.bf16.vlgmr.msra.gmra.mrb[0].mxu0 %v990_v18  ;;  %507 = vmatmul.mubr.bf16.vlgmr.msra.gmra.mrb[0].mxu1 %v993_v19  ;;  %v855_v18 = vsel %vm594_vm2, 1.0, %v1026_v0 }
  0x28   : > { %498 = vmatprep.mubr.bf16.mxu0 %v996_v20  ;;  %514 = vmatprep.mubr.bf16.mxu1 %v999_v21  ;;  %v588_v21 = vadd.s32 %v1140_v27, %v578_v11 }
  0x2a   : > { %vm596_vm6 = vcmp.lt.s32.totalorder %v588_v21, 128 }
  0x2f   : > { %499 = vmatmul.mubr.bf16.gmra.mrb[4].mxu0 %v998_v22  ;;  %515 = vmatmul.mubr.bf16.gmra.mrb[4].mxu1 %v1001_v23  ;;  %v853_v23 = vsel %vm592_vm3, 1.0, %v1026_v0 }
  0xfa   : > { %v909_v26 = vpop.f32.mrb[0].mxu0  ;;  %v921_v28 = vpop.f32.mrb[0].mxu1 }
  0xfb   : > { %v910_v29 = vpop.f32.mrb[1].mxu0  ;;  %v922_v31 = vpop.f32.mrb[1].mxu1 }
  0xfc   : > { %v911_v32 = vadd.f32 %v910_v29, %v909_v26  ;;  %v912_v33 = vpop.f32.mrb[2].mxu0  ;;  %v923_v34 = vadd.f32 %v922_v31, %v921_v28  ;;  %v924_v35 = vpop.f32.mrb[2].mxu1  ;;  %v589_v26 = vadd.s32 %v1140_v27, %v579_v13 }
  0xfd   : > { %v913_v37 = vpop.f32.mrb[3].mxu0  ;;  %v925_v39 = vpop.f32.mrb[3].mxu1 }
  0xfe   : > { %v914_v40 = vadd.f32 %v913_v37, %v912_v33  ;;  %v509_v41 = vadd.f32 %v923_v34, %v817_v36  ;;  %v926_v42 = vadd.f32 %v925_v39, %v924_v35  ;;  %v493_v46 = vadd.f32 %v911_v32, %v817_v36 }
  0xff   : > { %v856_v33 = vsel %vm595_vm5, 1.0, %v1026_v0  ;;  %vm597_vm7 = vcmp.lt.s32.totalorder %v589_v26, 128 }
 0x100   : > { %v496_v47 = vadd.f32 %v914_v40, %v817_v36  ;;  %v512_v48 = vadd.f32 %v926_v42, %v817_v36  ;;  %v857_v42 = vsel %vm596_vm6, 1.0, %v1026_v0 }
 0x102   : > { %v523_v50 = vpack.c.bf16 %v496_v47, %v493_v46  ;;  %v915_v51 = vpop.f32.mrb[4].mxu0  ;;  %v1158_v52 = vpack.c.bf16 %v512_v48, %v509_v41  ;;  %v927_v55 = vpop.f32.mrb[4].mxu1  ;;  %v858_v47 = vsel %vm597_vm7, 1.0, %v1026_v0 }
 0x103   : > { %v916_v56 = vpop.f32.mrb[5].mxu0  ;;  %v928_v57 = vpop.f32.mrb[5].mxu1 }
 0x104   : > { %874 = vst [vmem:[%s1156_s19] sm:$0xff] %v523_v50   ;;  %v563_v58 = vunpack.c.l.bf16 %v523_v50  ;;  %891 = vst [vmem:[%s1156_s19 + $0x10] sm:$0xff] %v1158_v52   ;;  %v918_v59 = vpop.f32.mrb[6].mxu0  ;;  %v930_v62 = vpop.f32.mrb[6].mxu1  ;;  %v564_v63 = vunpack.c.h.bf16 %v523_v50  ;;  %v917_v2 = vadd.f32 %v916_v56, %v915_v51  ;;  %v929_v4 = vadd.f32 %v928_v57, %v927_v55 }
 0x105   : > { %v919_v3 = vpop.f32.mrb[7].mxu0  ;;  %v931_v5 = vpop.f32.mrb[7].mxu1  ;;  %v567_v22 = vunpack.c.l.bf16 %v1158_v52  ;;  %v568_v32 = vunpack.c.h.bf16 %v1158_v52 }
 0x106   : > { %v920_v8 = vadd.f32 %v919_v3, %v918_v59  ;;  %v517_v9 = vadd.f32 %v929_v4, %v817_v36  ;;  %v932_v10 = vadd.f32 %v931_v5, %v930_v62  ;;  %v614_v12 = vmul.f32 %v851_v1, %v563_v58 }
 0x107   : > { %v615_v14 = vmul.f32 %v852_v6, %v564_v63  ;;  %v501_v15 = vadd.f32 %v917_v2, %v817_v36  ;;  %v618_v37 = vmul.f32 %v855_v18, %v567_v22  ;;  %v619_v41 = vmul.f32 %v856_v33, %v568_v32 }
 0x108   : > { %v504_v16 = vadd.f32 %v920_v8, %v817_v36  ;;  %v520_v17 = vadd.f32 %v932_v10, %v817_v36  ;;  %v635_v28 = vmul.f32 %v614_v12, %v614_v12 }
 0x109   : > { %v636_v29 = vmul.f32 %v615_v14, %v615_v14  ;;  %v622_v34 = vadd.f32 %v615_v14, %v614_v12  ;;  %v639_v48 = vmul.f32 %v618_v37, %v618_v37  ;;  %v640_v52 = vmul.f32 %v619_v41, %v619_v41 }
 0x10a   : > { %v524_v19 = vpack.c.bf16 %v504_v16, %v501_v15  ;;  %v526_v20 = vpack.c.bf16 %v520_v17, %v517_v9 }
 0x10b   : > { %v643_v38 = vadd.f32 %v636_v29, %v635_v28 }
 0x10c   : > { %890 = vst [vmem:[%s1156_s19 + $0x8] sm:$0xff] %v524_v19   ;;  %v565_v30 = vunpack.c.l.bf16 %v524_v19  ;;  %v566_v31 = vunpack.c.h.bf16 %v524_v19  ;;  %892 = vst [vmem:[%s1156_s19 + $0x18] sm:$0xff] %v526_v20   ;;  %v569_v27 = vunpack.c.l.bf16 %v526_v20  ;;  %v570_v46 = vunpack.c.h.bf16 %v526_v20 }
 0x10e   : > { %v616_v35 = vmul.f32 %v853_v23, %v565_v30  ;;  %v617_v36 = vmul.f32 %v854_v24, %v566_v31  ;;  %v620_v51 = vmul.f32 %v857_v42, %v569_v27  ;;  %v621_v54 = vmul.f32 %v858_v47, %v570_v46 }
 0x110   : > { %v623_v39 = vadd.f32 %v622_v34, %v616_v35  ;;  %v637_v40 = vmul.f32 %v616_v35, %v616_v35  ;;  %v638_v44 = vmul.f32 %v617_v36, %v617_v36  ;;  %v641_v57 = vmul.f32 %v620_v51, %v620_v51 }
 0x111   : > { %v642_v60 = vmul.f32 %v621_v54, %v621_v54 }
 0x112   : > { %v624_v43 = vadd.f32 %v623_v39, %v617_v36  ;;  %v644_v45 = vadd.f32 %v643_v38, %v637_v40 }
 0x114   : > { %v625_v49 = vadd.f32 %v624_v43, %v618_v37  ;;  %v645_v50 = vadd.f32 %v644_v45, %v638_v44 }
 0x116   : > { %v646_v53 = vadd.f32 %v645_v50, %v639_v48  ;;  %v626_v55 = vadd.f32 %v625_v49, %v619_v41 }
 0x118   : > { %v627_v56 = vadd.f32 %v626_v55, %v620_v51  ;;  %v647_v58 = vadd.f32 %v646_v53, %v640_v52 }
 0x11a   : > { %v628_v59 = vadd.f32 %v627_v56, %v621_v54  ;;  %v648_v61 = vadd.f32 %v647_v58, %v641_v57 }
 0x11c   : > { %v629_v62 = vrot.slane %v628_v59, 4  ;;  %v649_v63 = vadd.f32 %v648_v61, %v642_v60 }
 0x11e   : > { %v630_v0 = vadd.f32 %v629_v62, %v628_v59  ;;  %v650_v1 = vrot.slane %v649_v63, 4 }
 0x120   : > { %v631_v2 = vrot.slane %v630_v0, 2  ;;  %v651_v3 = vadd.f32 %v650_v1, %v649_v63 }
 0x122   : > { %v632_v4 = vadd.f32 %v631_v2, %v630_v0  ;;  %v652_v5 = vrot.slane %v651_v3, 2 }
 0x124   : > { %v633_v6 = vrot.slane %v632_v4, 1  ;;  %v653_v7 = vadd.f32 %v652_v5, %v651_v3 }
 0x126   : > { %v634_v8 = vadd.f32 %v633_v6, %v632_v4  ;;  %v654_v9 = vrot.slane %v653_v7, 1 }
 0x128   : > { %v655_v10 = vadd.f32 %v654_v9, %v653_v7  ;;  %v657_v11 = vsel %vm656_vm8, %v634_v8, 0.0 }
 0x12a   : > { %v659_v12 = vsel %vm658_vm9, %v655_v10, %v657_v11 }
 0x12b   : > { %660 = vst [vmem:[%s273_s23] sm:$0xff] %v659_v12 }
 0x12c PF: > { %s15_s17 = sadd.s32 1, %s1024_s17   ;;  %s1200_s15 = smov %s1020_s16 }
 0x12d   : > { %p12_p6 = scmp.ge.s32.totalorder %s15_s17, 4   ;;  %s1201_s16 = smov %s1203_s18 }
 0x12f   :  { %14 = sbr.rel (!%p12_p6) target bundleno = 2 (0x2), region = 80 }

// kernel: unetpp_forward.52
= control target key start
LH: loop header
LB: loop body
LE: loop exit
PB: predicated region body
PF: predicated region fallthrough
CT: control target
= control target key end

     0   :  { %s446_s1 = inlined_call_operand.vmem [shape: bf16[256,128], index: 1, kind: input, shape index: {}]   ;;  %s447_s0 = inlined_call_operand.vmem [shape: bf16[32,256], index: 0, kind: input, shape index: {}]   ;;  %s448_s2 = inlined_call_operand.vmem [shape: f32[1,128], index: 2, kind: input, shape index: {}]   ;;  %s449_s3 = inlined_call_operand.vmem [shape: bf16[32,128], index: 3, kind: output, shape index: {}]  }
   0x1   :  { %v335_v0 = vld [vmem:[%s446_s1 + $0x40] sm:$0xff]   ;;  %v337_v2 = vld [vmem:[%s446_s1 + $0x48] sm:$0xff]   ;;  %v339_v4 = vld [vmem:[%s446_s1 + $0x50] sm:$0xff]  }
   0x2   :  { %v336_v1 = vld [vmem:[%s446_s1] sm:$0xff]   ;;  %291 = vmatprep.subr.bf16.mxu0 %v335_v0  ;;  %319 = vmatprep.subr.bf16.mxu1 %v335_v0  ;;  %v338_v3 = vld [vmem:[%s446_s1 + $0x8] sm:$0xff]   ;;  %v340_v5 = vld [vmem:[%s446_s1 + $0x10] sm:$0xff]  }
   0x3   :  { %292 = vmatpush3.bf16.msra.mxu0 %v336_v1  ;;  %327 = vmatpush3.bf16.msra.mxu1 %v336_v1  ;;  %v341_v6 = vld [vmem:[%s446_s1 + $0x58] sm:$0xff]   ;;  %v343_v8 = vld [vmem:[%s446_s1 + $0x60] sm:$0xff]   ;;  %v345_v10 = vld [vmem:[%s446_s1 + $0x68] sm:$0xff]  }
   0x4   :  { %293 = vmatprep.subr.bf16.mxu0 %v337_v2  ;;  %320 = vmatprep.subr.bf16.mxu1 %v337_v2  ;;  %v342_v7 = vld [vmem:[%s446_s1 + $0x18] sm:$0xff]   ;;  %v344_v9 = vld [vmem:[%s446_s1 + $0x20] sm:$0xff]   ;;  %v346_v13 = vld [vmem:[%s446_s1 + $0x28] sm:$0xff]  }
   0x5   :  { %v353_v11 = vld [vmem:[%s447_s0 + $0x4] ss:$8 sps:$4 sm:$0xff]   ;;  %v356_v12 = vld [vmem:[%s447_s0 + $0x14] ss:$8 sps:$4 sm:$0xff]   ;;  %v351_v18 = vld [vmem:[%s447_s0] ss:$8 sps:$4 sm:$0xff]  }
   0x6   :  { %v347_v14 = vld [vmem:[%s446_s1 + $0x70] sm:$0xff]   ;;  %206 = vmatprep.mubr.bf16.mxu0 %v353_v11  ;;  %214 = vmatprep.mubr.bf16.mxu1 %v356_v12  ;;  %v349_v16 = vld [vmem:[%s446_s1 + $0x78] sm:$0xff]   ;;  %v251_v22 = vld [vmem:[%s448_s2] ss:$0 sm:$0xff] }
   0x7   :  { %294 = vmatpush3.bf16.msra.mxu0 %v338_v3  ;;  %328 = vmatpush3.bf16.msra.mxu1 %v338_v3  ;;  %v348_v15 = vld [vmem:[%s446_s1 + $0x30] sm:$0xff]   ;;  %v350_v17 = vld [vmem:[%s446_s1 + $0x38] sm:$0xff]  }
   0x8   :  { %295 = vmatprep.subr.bf16.mxu0 %v339_v4  ;;  %321 = vmatprep.subr.bf16.mxu1 %v339_v4  ;;  %v354_v19 = vld [vmem:[%s447_s0 + $0x10] ss:$8 sps:$4 sm:$0xff]  }
   0xb   :  { %296 = vmatpush3.bf16.msra.mxu0 %v340_v5  ;;  %329 = vmatpush3.bf16.msra.mxu1 %v340_v5 }
   0xc   :  { %297 = vmatprep.subr.bf16.mxu0 %v341_v6  ;;  %322 = vmatprep.subr.bf16.mxu1 %v341_v6 }
   0xf   :  { %298 = vmatpush3.bf16.msra.mxu0 %v342_v7  ;;  %330 = vmatpush3.bf16.msra.mxu1 %v342_v7 }
  0x10   :  { %299 = vmatprep.subr.bf16.mxu0 %v343_v8  ;;  %323 = vmatprep.subr.bf16.mxu1 %v343_v8 }
  0x13   :  { %300 = vmatpush3.bf16.msra.mxu0 %v344_v9  ;;  %331 = vmatpush3.bf16.msra.mxu1 %v344_v9 }
  0x14   :  { %301 = vmatprep.subr.bf16.mxu0 %v345_v10  ;;  %324 = vmatprep.subr.bf16.mxu1 %v345_v10 }
  0x17   :  { %302 = vmatpush3.bf16.msra.mxu0 %v346_v13  ;;  %332 = vmatpush3.bf16.msra.mxu1 %v346_v13 }
  0x18   :  { %303 = vmatprep.subr.bf16.mxu0 %v347_v14  ;;  %325 = vmatprep.subr.bf16.mxu1 %v347_v14 }
  0x1b   :  { %304 = vmatpush3.bf16.msra.mxu0 %v348_v15  ;;  %333 = vmatpush3.bf16.msra.mxu1 %v348_v15 }
  0x1c   :  { %305 = vmatprep.subr.bf16.mxu0 %v349_v16  ;;  %326 = vmatprep.subr.bf16.mxu1 %v349_v16 }
  0x1f   :  { %306 = vmatpush3.bf16.msra.mxu0 %v350_v17  ;;  %334 = vmatpush3.bf16.msra.mxu1 %v350_v17 }
  0x22   :  { %207 = vmatmul.mubr.bf16.vlgmr.msra.gmra.mrb[0].mxu0 %v351_v18  ;;  %215 = vmatmul.mubr.bf16.vlgmr.msra.gmra.mrb[0].mxu1 %v354_v19 }
  0xf5   :  { %v307_v20 = vpop.f32.mrb[0].mxu0  ;;  %v313_v21 = vpop.f32.mrb[0].mxu1 }
  0xf6   :  { %v308_v23 = vpop.f32.mrb[1].mxu0  ;;  %v314_v24 = vpop.f32.mrb[1].mxu1 }
  0xf7   :  { %v309_v25 = vadd.f32 %v308_v23, %v307_v20  ;;  %v315_v26 = vadd.f32 %v314_v24, %v313_v21  ;;  %v310_v27 = vpop.f32.mrb[2].mxu0  ;;  %v316_v28 = vpop.f32.mrb[2].mxu1 }
  0xf8   :  { %v311_v29 = vpop.f32.mrb[3].mxu0  ;;  %v317_v30 = vpop.f32.mrb[3].mxu1 }
  0xf9   :  { %v209_v31 = vadd.f32 %v309_v25, %v251_v22  ;;  %v217_v32 = vadd.f32 %v315_v26, %v251_v22  ;;  %v312_v33 = vadd.f32 %v311_v29, %v310_v27  ;;  %v318_v34 = vadd.f32 %v317_v30, %v316_v28 }
  0xfb   :  { %v212_v35 = vadd.f32 %v312_v33, %v251_v22  ;;  %v220_v36 = vadd.f32 %v318_v34, %v251_v22  ;;  %v223_v37 = vmax.f32 %v209_v31, 0.0  ;;  %v225_v38 = vmax.f32 %v217_v32, 0.0 }
  0xfd   :  { %v224_v39 = vmax.f32 %v212_v35, 0.0  ;;  %v226_v40 = vmax.f32 %v220_v36, 0.0 }
  0xff   :  { %v283_v41 = vpack.c.bf16 %v224_v39, %v223_v37  ;;  %v288_v42 = vpack.c.bf16 %v226_v40, %v225_v38 }
 0x101   :  { %284 = vst [vmem:[%s449_s3] sm:$0xff] %v283_v41   ;;  %290 = vst [vmem:[%s449_s3 + $0x8] sm:$0xff] %v288_v42  }

// kernel: unetpp_forward.54
= control target key start
LH: loop header
LB: loop body
LE: loop exit
PB: predicated region body
PF: predicated region fallthrough
CT: control target
= control target key end

     0   :  { %s140_s0 = inlined_call_operand.vmem [shape: bf16[32,128], index: 0, kind: input, shape index: {}]   ;;  %s141_s1 = inlined_call_operand.vmem [shape: f32[1,128], index: 1, kind: input, shape index: {}]   ;;  %s142_s2 = inlined_call_operand.vmem [shape: f32[1,128], index: 2, kind: input, shape index: {}]   ;;  %s143_s3 = inlined_call_operand.vmem [shape: bf16[32,128], index: 3, kind: output, shape index: {}]  }
   0x1   :  { %v83_v0 = vld [vmem:[%s140_s0] sm:$0xff]   ;;  %v100_v4 = vld [vmem:[%s140_s0 + $0x8] sm:$0xff]  }
   0x2   :  { %v72_v1 = vld [vmem:[%s141_s1] ss:$0 sm:$0xff]  ;;  %v84_v2 = vunpack.c.l.bf16 %v83_v0  ;;  %v85_v3 = vunpack.c.h.bf16 %v83_v0  ;;  %v88_v6 = vunpack.c.l.bf16 %v100_v4  ;;  %v89_v7 = vunpack.c.h.bf16 %v100_v4 }
   0x3   :  { %v73_v5 = vld [vmem:[%s142_s2] ss:$0 sm:$0xff] }
   0x4   :  { %v29_v8 = vmul.f32 %v84_v2, %v72_v1  ;;  %v30_v9 = vmul.f32 %v85_v3, %v72_v1  ;;  %v31_v10 = vmul.f32 %v88_v6, %v72_v1  ;;  %v32_v11 = vmul.f32 %v89_v7, %v72_v1 }
   0x6   :  { %v40_v12 = vadd.f32 %v73_v5, %v29_v8  ;;  %v41_v13 = vadd.f32 %v73_v5, %v30_v9  ;;  %v42_v14 = vadd.f32 %v73_v5, %v31_v10  ;;  %v43_v15 = vadd.f32 %v73_v5, %v32_v11 }
   0x8   :  { %v44_v16 = vmax.f32 %v40_v12, 0.0  ;;  %v45_v17 = vmax.f32 %v41_v13, 0.0  ;;  %v46_v18 = vmax.f32 %v42_v14, 0.0  ;;  %v47_v19 = vmax.f32 %v43_v15, 0.0 }
   0xa   :  { %v93_v20 = vpack.c.bf16 %v45_v17, %v44_v16  ;;  %v98_v21 = vpack.c.bf16 %v47_v19, %v46_v18 }
   0xc   :  { %94 = vst [vmem:[%s143_s3] sm:$0xff] %v93_v20   ;;  %101 = vst [vmem:[%s143_s3 + $0x8] sm:$0xff] %v98_v21  }

// kernel: unetpp_forward.53
= control target key start
LH: loop header
LB: loop body
LE: loop exit
PB: predicated region body
PF: predicated region fallthrough
CT: control target
= control target key end

     0   :  { %s707_s1 = inlined_call_operand.vmem [shape: bf16[384,128], index: 1, kind: input, shape index: {}]   ;;  %s708_s0 = inlined_call_operand.vmem [shape: bf16[32,384], index: 0, kind: input, shape index: {}]   ;;  %s709_s2 = inlined_call_operand.vmem [shape: f32[1,128], index: 2, kind: input, shape index: {}]   ;;  %s710_s3 = inlined_call_operand.vmem [shape: bf16[32,128], index: 3, kind: output, shape index: {0}]   ;;  %s711_s4 = inlined_call_operand.vmem [shape: f32[8,128], index: 4, kind: output, shape index: {1}]  }
   0x1   :  { %v548_v0 = vld [vmem:[%s707_s1 + $0x40] sm:$0xff]   ;;  %v550_v2 = vld [vmem:[%s707_s1 + $0x48] sm:$0xff]   ;;  %v553_v5 = vld [vmem:[%s707_s1 + $0x50] sm:$0xff]  }
   0x2   :  { %v549_v1 = vld [vmem:[%s707_s1] sm:$0xff]   ;;  %490 = vmatprep.subr.bf16.mxu0 %v548_v0  ;;  %v552_v4 = vld [vmem:[%s707_s1 + $0x8] sm:$0xff]   ;;  %v555_v7 = vld [vmem:[%s707_s1 + $0x10] sm:$0xff]  }
   0x3   :  { %491 = vmatpush3.bf16.msra.mxu0 %v549_v1  ;;  %v551_v3 = vld [vmem:[%s707_s1 + $0x80] sm:$0xff]   ;;  %v554_v6 = vld [vmem:[%s707_s1 + $0x88] sm:$0xff]   ;;  %v556_v8 = vld [vmem:[%s707_s1 + $0x58] sm:$0xff]  }
   0x4   :  { %492 = vmatprep.subr.bf16.mxu0 %v550_v2  ;;  %528 = vmatprep.subr.bf16.mxu1 %v551_v3  ;;  %v557_v9 = vld [vmem:[%s707_s1 + $0x90] sm:$0xff]   ;;  %v558_v10 = vld [vmem:[%s707_s1 + $0x18] sm:$0xff]   ;;  %v559_v11 = vld [vmem:[%s707_s1 + $0x60] sm:$0xff]  }
   0x5   :  { %529 = vmatpush3.bf16.msra.mxu1 %v551_v3  ;;  %v560_v12 = vld [vmem:[%s707_s1 + $0x98] sm:$0xff]   ;;  %v561_v13 = vld [vmem:[%s707_s1 + $0x20] sm:$0xff]   ;;  %v562_v15 = vld [vmem:[%s707_s1 + $0x68] sm:$0xff]  }
   0x6   :  { %530 = vmatprep.subr.bf16.mxu1 %v554_v6  ;;  %v563_v14 = vld [vmem:[%s707_s1 + $0xa0] sm:$0xff]   ;;  %v564_v16 = vld [vmem:[%s707_s1 + $0x28] sm:$0xff]   ;;  %v565_v18 = vld [vmem:[%s707_s1 + $0x70] sm:$0xff]  }
   0x7   :  { %493 = vmatpush3.bf16.msra.mxu0 %v552_v4  ;;  %v566_v17 = vld [vmem:[%s707_s1 + $0xa8] sm:$0xff]   ;;  %v567_v19 = vld [vmem:[%s707_s1 + $0x30] sm:$0xff]   ;;  %v568_v20 = vld [vmem:[%s707_s1 + $0x78] sm:$0xff]  }
   0x8   :  { %494 = vmatprep.subr.bf16.mxu0 %v553_v5  ;;  %v569_v21 = vld [vmem:[%s707_s1 + $0xb0] sm:$0xff]   ;;  %v570_v23 = vld [vmem:[%s707_s1 + $0x38] sm:$0xff]   ;;  %v571_v26 = vld [vmem:[%s708_s0] ss:$12 sps:$4 sm:$0xff]  }
   0x9   :  { %531 = vmatpush3.bf16.msra.mxu1 %v554_v6  ;;  %v573_v22 = vld [vmem:[%s708_s0 + $0x4] ss:$12 sps:$4 sm:$0xff]   ;;  %v575_v24 = vld [vmem:[%s708_s0 + $0x8] ss:$12 sps:$4 sm:$0xff]   ;;  %v574_v25 = vld [vmem:[%s707_s1 + $0xb8] sm:$0xff]  }
   0xa   :  { %532 = vmatprep.subr.bf16.mxu1 %v557_v9  ;;  %288 = vmatprep.mubr.bf16.mxu0 %v573_v22  ;;  %v577_v27 = vld [vmem:[%s708_s0 + $0x1c] ss:$12 sps:$4 sm:$0xff]   ;;  %v576_v28 = vld [vmem:[%s708_s0 + $0x20] ss:$12 sps:$4 sm:$0xff]   ;;  %v579_v29 = vld [vmem:[%s708_s0 + $0x18] ss:$12 sps:$4 sm:$0xff]  }
   0xb   :  { %495 = vmatpush3.bf16.msra.mxu0 %v555_v7  ;;  %544 = vmatprep.mubr.bf16.mxu1 %v575_v24  ;;  %v440_v32 = vld [vmem:[%s709_s2] ss:$0 sm:$0xff] }
   0xc   :  { %496 = vmatprep.subr.bf16.mxu0 %v556_v8  ;;  %v378_v8 = vlaneseq }
   0xd   :  { %533 = vmatpush3.bf16.msra.mxu1 %v557_v9 }
   0xe   :  { %534 = vmatprep.subr.bf16.mxu1 %v560_v12 }
   0xf   :  { %497 = vmatpush3.bf16.msra.mxu0 %v558_v10 }
  0x10   :  { %498 = vmatprep.subr.bf16.mxu0 %v559_v11 }
  0x11   :  { %535 = vmatpush3.bf16.msra.mxu1 %v560_v12 }
  0x12   :  { %536 = vmatprep.subr.bf16.mxu1 %v563_v14 }
  0x13   :  { %499 = vmatpush3.bf16.msra.mxu0 %v561_v13  ;;  %v379_v13 = vshrl.u32 %v378_v8, 7 }
  0x14   :  { %500 = vmatprep.subr.bf16.mxu0 %v562_v15 }
  0x15   :  { %537 = vmatpush3.bf16.msra.mxu1 %v563_v14  ;;  %vm427_vm0 = vcmp.eq.s32.totalorder %v379_v13, 0  ;;  %vm429_vm1 = vcmp.eq.s32.totalorder %v379_v13, 1 }
  0x16   :  { %538 = vmatprep.subr.bf16.mxu1 %v566_v17 }
  0x17   :  { %501 = vmatpush3.bf16.msra.mxu0 %v564_v16 }
  0x18   :  { %502 = vmatprep.subr.bf16.mxu0 %v565_v18 }
  0x19   :  { %539 = vmatpush3.bf16.msra.mxu1 %v566_v17 }
  0x1a   :  { %540 = vmatprep.subr.bf16.mxu1 %v569_v21 }
  0x1b   :  { %503 = vmatpush3.bf16.msra.mxu0 %v567_v19 }
  0x1c   :  { %504 = vmatprep.subr.bf16.mxu0 %v568_v20 }
  0x1d   :  { %541 = vmatpush3.bf16.msra.mxu1 %v569_v21 }
  0x1e   :  { %542 = vmatprep.subr.bf16.mxu1 %v574_v25 }
  0x1f   :  { %505 = vmatpush3.bf16.msra.mxu0 %v570_v23 }
  0x21   :  { %543 = vmatpush3.bf16.msra.mxu1 %v574_v25 }
  0x22   :  { %289 = vmatmul.mubr.bf16.vlgmr.msra.gmra.mrb[0].mxu0 %v571_v26 }
  0x23   :  { %296 = vmatprep.mubr.bf16.mxu0 %v577_v27 }
  0x24   :  { %545 = vmatmul.mubr.bf16.vlgmr.msra.gmra.mrb[0].mxu1 %v576_v28 }
  0x2a   :  { %297 = vmatmul.mubr.bf16.gmra.mrb[4].mxu0 %v579_v29 }
  0xf5   :  { %v506_v30 = vpop.f32.mrb[0].mxu0 }
  0xf6   :  { %v507_v31 = vpop.f32.mrb[1].mxu0 }
  0xf7   :  { %v508_v33 = vadd.f32 %v507_v31, %v506_v30  ;;  %v509_v34 = vpop.f32.mrb[2].mxu0  ;;  %v546_v36 = vpop.f32.mrb[0].mxu1 }
  0xf8   :  { %v510_v35 = vpop.f32.mrb[3].mxu0  ;;  %v339_v39 = vpop.f32.mrb[1].mxu1 }
  0xf9   :  { %v511_v37 = vadd.f32 %v510_v35, %v509_v34  ;;  %v291_v38 = vadd.f32 %v508_v33, %v440_v32  ;;  %v547_v40 = vpop.f32.mrb[2].mxu1 }
  0xfa   :  { %v342_v43 = vpop.f32.mrb[3].mxu1 }
  0xfb   :  { %v340_v41 = vadd.f32 %v339_v39, %v291_v38  ;;  %v294_v42 = vadd.f32 %v511_v37, %v440_v32 }
  0xfd   :  { %v343_v44 = vadd.f32 %v342_v43, %v294_v42  ;;  %v512_v45 = vpop.f32.mrb[4].mxu0 }
  0xfe   :  { %v513_v46 = vpop.f32.mrb[5].mxu0 }
  0xff   :  { %v354_v47 = vpack.c.bf16 %v343_v44, %v340_v41  ;;  %v514_v48 = vadd.f32 %v513_v46, %v512_v45  ;;  %v515_v49 = vpop.f32.mrb[6].mxu0 }
 0x100   :  { %v516_v50 = vpop.f32.mrb[7].mxu0 }
 0x101   :  { %483 = vst [vmem:[%s710_s3] sm:$0xff] %v354_v47   ;;  %v299_v51 = vadd.f32 %v514_v48, %v440_v32  ;;  %v517_v52 = vadd.f32 %v516_v50, %v515_v49  ;;  %v374_v54 = vunpack.c.l.bf16 %v354_v47  ;;  %v375_v55 = vunpack.c.h.bf16 %v354_v47 }
 0x103   :  { %v348_v53 = vadd.f32 %v546_v36, %v299_v51  ;;  %v302_v56 = vadd.f32 %v517_v52, %v440_v32  ;;  %v414_v58 = vmul.f32 %v374_v54, %v374_v54  ;;  %v415_v59 = vmul.f32 %v375_v55, %v375_v55 }
 0x104   :  { %v405_v61 = vadd.f32 %v375_v55, %v374_v54 }
 0x105   :  { %v351_v57 = vadd.f32 %v547_v40, %v302_v56  ;;  %v418_v0 = vadd.f32 %v415_v59, %v414_v58 }
 0x107   :  { %v355_v60 = vpack.c.bf16 %v351_v57, %v348_v53 }
 0x109   :  { %489 = vst [vmem:[%s710_s3 + $0x8] sm:$0xff] %v355_v60   ;;  %v376_v62 = vunpack.c.l.bf16 %v355_v60  ;;  %v377_v63 = vunpack.c.h.bf16 %v355_v60 }
 0x10b   :  { %v406_v1 = vadd.f32 %v405_v61, %v376_v62  ;;  %v416_v2 = vmul.f32 %v376_v62, %v376_v62  ;;  %v417_v4 = vmul.f32 %v377_v63, %v377_v63 }
 0x10d   :  { %v407_v3 = vadd.f32 %v406_v1, %v377_v63  ;;  %v419_v5 = vadd.f32 %v418_v0, %v416_v2 }
 0x10f   :  { %v408_v6 = vrot.slane %v407_v3, 4  ;;  %v420_v7 = vadd.f32 %v419_v5, %v417_v4 }
 0x111   :  { %v409_v9 = vadd.f32 %v408_v6, %v407_v3  ;;  %v421_v10 = vrot.slane %v420_v7, 4 }
 0x113   :  { %v410_v11 = vrot.slane %v409_v9, 2  ;;  %v422_v12 = vadd.f32 %v421_v10, %v420_v7 }
 0x115   :  { %v411_v14 = vadd.f32 %v410_v11, %v409_v9  ;;  %v423_v15 = vrot.slane %v422_v12, 2 }
 0x117   :  { %v412_v16 = vrot.slane %v411_v14, 1  ;;  %v424_v17 = vadd.f32 %v423_v15, %v422_v12 }
 0x119   :  { %v413_v18 = vadd.f32 %v412_v16, %v411_v14  ;;  %v425_v19 = vrot.slane %v424_v17, 1 }
 0x11b   :  { %v426_v20 = vadd.f32 %v425_v19, %v424_v17  ;;  %v428_v21 = vsel %vm427_vm0, %v413_v18, 0.0 }
 0x11d   :  { %v430_v22 = vsel %vm429_vm1, %v426_v20, %v428_v21 }
 0x11e   :  { %431 = vst [vmem:[%s711_s4] sm:$0xff] %v430_v22 }

// kernel: unetpp_forward.55
= control target key start
LH: loop header
LB: loop body
LE: loop exit
PB: predicated region body
PF: predicated region fallthrough
CT: control target
= control target key end

     0   :  { %s639_s1 = inlined_call_operand.vmem [shape: bf16[384,128], index: 1, kind: input, shape index: {}]   ;;  %s640_s0 = inlined_call_operand.vmem [shape: bf16[32,384], index: 0, kind: input, shape index: {}]   ;;  %s641_s2 = inlined_call_operand.vmem [shape: f32[1,128], index: 2, kind: input, shape index: {}]   ;;  %s642_s3 = inlined_call_operand.vmem [shape: bf16[32,128], index: 3, kind: output, shape index: {}]  }
   0x1   :  { %v488_v0 = vld [vmem:[%s639_s1 + $0x40] sm:$0xff]   ;;  %v490_v2 = vld [vmem:[%s639_s1 + $0x48] sm:$0xff]   ;;  %v493_v5 = vld [vmem:[%s639_s1 + $0x50] sm:$0xff]  }
   0x2   :  { %v489_v1 = vld [vmem:[%s639_s1] sm:$0xff]   ;;  %430 = vmatprep.subr.bf16.mxu0 %v488_v0  ;;  %v492_v4 = vld [vmem:[%s639_s1 + $0x8] sm:$0xff]   ;;  %v495_v7 = vld [vmem:[%s639_s1 + $0x10] sm:$0xff]  }
   0x3   :  { %431 = vmatpush3.bf16.msra.mxu0 %v489_v1  ;;  %v491_v3 = vld [vmem:[%s639_s1 + $0x80] sm:$0xff]   ;;  %v494_v6 = vld [vmem:[%s639_s1 + $0x88] sm:$0xff]   ;;  %v496_v8 = vld [vmem:[%s639_s1 + $0x58] sm:$0xff]  }
   0x4   :  { %432 = vmatprep.subr.bf16.mxu0 %v490_v2  ;;  %468 = vmatprep.subr.bf16.mxu1 %v491_v3  ;;  %v497_v9 = vld [vmem:[%s639_s1 + $0x90] sm:$0xff]   ;;  %v498_v10 = vld [vmem:[%s639_s1 + $0x18] sm:$0xff]   ;;  %v499_v11 = vld [vmem:[%s639_s1 + $0x60] sm:$0xff]  }
   0x5   :  { %469 = vmatpush3.bf16.msra.mxu1 %v491_v3  ;;  %v500_v12 = vld [vmem:[%s639_s1 + $0x98] sm:$0xff]   ;;  %v501_v13 = vld [vmem:[%s639_s1 + $0x20] sm:$0xff]   ;;  %v502_v15 = vld [vmem:[%s639_s1 + $0x68] sm:$0xff]  }
   0x6   :  { %470 = vmatprep.subr.bf16.mxu1 %v494_v6  ;;  %v503_v14 = vld [vmem:[%s639_s1 + $0xa0] sm:$0xff]   ;;  %v504_v16 = vld [vmem:[%s639_s1 + $0x28] sm:$0xff]   ;;  %v505_v18 = vld [vmem:[%s639_s1 + $0x70] sm:$0xff]  }
   0x7   :  { %433 = vmatpush3.bf16.msra.mxu0 %v492_v4  ;;  %v506_v17 = vld [vmem:[%s639_s1 + $0xa8] sm:$0xff]   ;;  %v507_v19 = vld [vmem:[%s639_s1 + $0x30] sm:$0xff]   ;;  %v508_v20 = vld [vmem:[%s639_s1 + $0x78] sm:$0xff]  }
   0x8   :  { %434 = vmatprep.subr.bf16.mxu0 %v493_v5  ;;  %v509_v21 = vld [vmem:[%s639_s1 + $0xb0] sm:$0xff]   ;;  %v510_v23 = vld [vmem:[%s639_s1 + $0x38] sm:$0xff]   ;;  %v511_v26 = vld [vmem:[%s640_s0] ss:$12 sps:$4 sm:$0xff]  }
   0x9   :  { %471 = vmatpush3.bf16.msra.mxu1 %v494_v6  ;;  %v513_v22 = vld [vmem:[%s640_s0 + $0x4] ss:$12 sps:$4 sm:$0xff]   ;;  %v515_v24 = vld [vmem:[%s640_s0 + $0x8] ss:$12 sps:$4 sm:$0xff]   ;;  %v514_v25 = vld [vmem:[%s639_s1 + $0xb8] sm:$0xff]  }
   0xa   :  { %472 = vmatprep.subr.bf16.mxu1 %v497_v9  ;;  %286 = vmatprep.mubr.bf16.mxu0 %v513_v22  ;;  %v517_v27 = vld [vmem:[%s640_s0 + $0x1c] ss:$12 sps:$4 sm:$0xff]   ;;  %v516_v28 = vld [vmem:[%s640_s0 + $0x20] ss:$12 sps:$4 sm:$0xff]   ;;  %v519_v29 = vld [vmem:[%s640_s0 + $0x18] ss:$12 sps:$4 sm:$0xff]  }
   0xb   :  { %435 = vmatpush3.bf16.msra.mxu0 %v495_v7  ;;  %484 = vmatprep.mubr.bf16.mxu1 %v515_v24  ;;  %v380_v32 = vld [vmem:[%s641_s2] ss:$0 sm:$0xff] }
   0xc   :  { %436 = vmatprep.subr.bf16.mxu0 %v496_v8 }
   0xd   :  { %473 = vmatpush3.bf16.msra.mxu1 %v497_v9 }
   0xe   :  { %474 = vmatprep.subr.bf16.mxu1 %v500_v12 }
   0xf   :  { %437 = vmatpush3.bf16.msra.mxu0 %v498_v10 }
  0x10   :  { %438 = vmatprep.subr.bf16.mxu0 %v499_v11 }
  0x11   :  { %475 = vmatpush3.bf16.msra.mxu1 %v500_v12 }
  0x12   :  { %476 = vmatprep.subr.bf16.mxu1 %v503_v14 }
  0x13   :  { %439 = vmatpush3.bf16.msra.mxu0 %v501_v13 }
  0x14   :  { %440 = vmatprep.subr.bf16.mxu0 %v502_v15 }
  0x15   :  { %477 = vmatpush3.bf16.msra.mxu1 %v503_v14 }
  0x16   :  { %478 = vmatprep.subr.bf16.mxu1 %v506_v17 }
  0x17   :  { %441 = vmatpush3.bf16.msra.mxu0 %v504_v16 }
  0x18   :  { %442 = vmatprep.subr.bf16.mxu0 %v505_v18 }
  0x19   :  { %479 = vmatpush3.bf16.msra.mxu1 %v506_v17 }
  0x1a   :  { %480 = vmatprep.subr.bf16.mxu1 %v509_v21 }
  0x1b   :  { %443 = vmatpush3.bf16.msra.mxu0 %v507_v19 }
  0x1c   :  { %444 = vmatprep.subr.bf16.mxu0 %v508_v20 }
  0x1d   :  { %481 = vmatpush3.bf16.msra.mxu1 %v509_v21 }
  0x1e   :  { %482 = vmatprep.subr.bf16.mxu1 %v514_v25 }
  0x1f   :  { %445 = vmatpush3.bf16.msra.mxu0 %v510_v23 }
  0x21   :  { %483 = vmatpush3.bf16.msra.mxu1 %v514_v25 }
  0x22   :  { %287 = vmatmul.mubr.bf16.vlgmr.msra.gmra.mrb[0].mxu0 %v511_v26 }
  0x23   :  { %294 = vmatprep.mubr.bf16.mxu0 %v517_v27 }
  0x24   :  { %485 = vmatmul.mubr.bf16.vlgmr.msra.gmra.mrb[0].mxu1 %v516_v28 }
  0x2a   :  { %295 = vmatmul.mubr.bf16.gmra.mrb[4].mxu0 %v519_v29 }
  0xf5   :  { %v446_v30 = vpop.f32.mrb[0].mxu0 }
  0xf6   :  { %v447_v31 = vpop.f32.mrb[1].mxu0 }
  0xf7   :  { %v448_v33 = vadd.f32 %v447_v31, %v446_v30  ;;  %v449_v34 = vpop.f32.mrb[2].mxu0  ;;  %v486_v36 = vpop.f32.mrb[0].mxu1 }
  0xf8   :  { %v450_v35 = vpop.f32.mrb[3].mxu0  ;;  %v337_v39 = vpop.f32.mrb[1].mxu1 }
  0xf9   :  { %v451_v37 = vadd.f32 %v450_v35, %v449_v34  ;;  %v289_v38 = vadd.f32 %v448_v33, %v380_v32  ;;  %v487_v40 = vpop.f32.mrb[2].mxu1 }
  0xfa   :  { %v340_v43 = vpop.f32.mrb[3].mxu1 }
  0xfb   :  { %v338_v41 = vadd.f32 %v337_v39, %v289_v38  ;;  %v292_v42 = vadd.f32 %v451_v37, %v380_v32 }
  0xfd   :  { %v341_v44 = vadd.f32 %v340_v43, %v292_v42  ;;  %v452_v45 = vpop.f32.mrb[4].mxu0  ;;  %v352_v47 = vmax.f32 %v338_v41, 0.0 }
  0xfe   :  { %v453_v46 = vpop.f32.mrb[5].mxu0 }
  0xff   :  { %v353_v48 = vmax.f32 %v341_v44, 0.0  ;;  %v454_v49 = vadd.f32 %v453_v46, %v452_v45  ;;  %v455_v50 = vpop.f32.mrb[6].mxu0 }
 0x100   :  { %v456_v51 = vpop.f32.mrb[7].mxu0 }
 0x101   :  { %v422_v52 = vpack.c.bf16 %v353_v48, %v352_v47  ;;  %v297_v53 = vadd.f32 %v454_v49, %v380_v32  ;;  %v457_v54 = vadd.f32 %v456_v51, %v455_v50 }
 0x103   :  { %423 = vst [vmem:[%s642_s3] sm:$0xff] %v422_v52   ;;  %v346_v55 = vadd.f32 %v486_v36, %v297_v53  ;;  %v300_v56 = vadd.f32 %v457_v54, %v380_v32 }
 0x105   :  { %v349_v57 = vadd.f32 %v487_v40, %v300_v56  ;;  %v354_v58 = vmax.f32 %v346_v55, 0.0 }
 0x107   :  { %v355_v59 = vmax.f32 %v349_v57, 0.0 }
 0x109   :  { %v427_v60 = vpack.c.bf16 %v355_v59, %v354_v58 }
 0x10b   :  { %429 = vst [vmem:[%s642_s3 + $0x8] sm:$0xff] %v427_v60  }

// kernel: unetpp_forward.56
= control target key start
LH: loop header
LB: loop body
LE: loop exit
PB: predicated region body
PF: predicated region fallthrough
CT: control target
= control target key end

     0   :  { %s1038_s1 = inlined_call_operand.vmem [shape: bf16[640,128], index: 1, kind: input, shape index: {}]   ;;  %s1039_s0 = inlined_call_operand.vmem [shape: bf16[32,640], index: 0, kind: input, shape index: {}]   ;;  %s1040_s2 = inlined_call_operand.vmem [shape: f32[1,128], index: 2, kind: input, shape index: {}]   ;;  %s1041_s3 = inlined_call_operand.vmem [shape: bf16[32,128], index: 3, kind: output, shape index: {0}]   ;;  %s1042_s4 = inlined_call_operand.vmem [shape: f32[8,128], index: 4, kind: output, shape index: {1}]  }
   0x1   :  { %v797_v0 = vld [vmem:[%s1038_s1 + $0x40] sm:$0xff]   ;;  %v801_v4 = vld [vmem:[%s1038_s1 + $0x48] sm:$0xff]   ;;  %v805_v8 = vld [vmem:[%s1038_s1 + $0x50] sm:$0xff]  }
   0x2   :  { %v798_v1 = vld [vmem:[%s1038_s1] sm:$0xff]   ;;  %711 = vmatprep.subr.bf16.mxu0 %v797_v0  ;;  %v802_v5 = vld [vmem:[%s1038_s1 + $0x8] sm:$0xff]   ;;  %v806_v9 = vld [vmem:[%s1038_s1 + $0x10] sm:$0xff]  }
   0x3   :  { %v799_v2 = vld [vmem:[%s1038_s1 + $0xc0] sm:$0xff]   ;;  %712 = vmatpush3.bf16.msra.mxu0 %v798_v1  ;;  %v803_v6 = vld [vmem:[%s1038_s1 + $0xc8] sm:$0xff]   ;;  %v807_v10 = vld [vmem:[%s1038_s1 + $0xd0] sm:$0xff]  }
   0x4   :  { %v800_v3 = vld [vmem:[%s1038_s1 + $0x80] sm:$0xff]   ;;  %739 = vmatprep.subr.bf16.mxu1 %v799_v2  ;;  %713 = vmatprep.subr.bf16.mxu0 %v801_v4  ;;  %v804_v7 = vld [vmem:[%s1038_s1 + $0x88] sm:$0xff]   ;;  %v808_v11 = vld [vmem:[%s1038_s1 + $0x90] sm:$0xff]  }
   0x5   :  { %740 = vmatpush3.bf16.msra.mxu1 %v800_v3  ;;  %v809_v12 = vld [vmem:[%s1038_s1 + $0x58] sm:$0xff]   ;;  %v813_v16 = vld [vmem:[%s1038_s1 + $0x60] sm:$0xff]   ;;  %v817_v20 = vld [vmem:[%s1038_s1 + $0x68] sm:$0xff]  }
   0x6   :  { %741 = vmatprep.subr.bf16.mxu1 %v803_v6  ;;  %v810_v13 = vld [vmem:[%s1038_s1 + $0x18] sm:$0xff]   ;;  %v814_v17 = vld [vmem:[%s1038_s1 + $0x20] sm:$0xff]   ;;  %v818_v21 = vld [vmem:[%s1038_s1 + $0x28] sm:$0xff]  }
   0x7   :  { %714 = vmatpush3.bf16.msra.mxu0 %v802_v5  ;;  %v811_v14 = vld [vmem:[%s1038_s1 + $0xd8] sm:$0xff]   ;;  %v815_v18 = vld [vmem:[%s1038_s1 + $0xe0] sm:$0xff]   ;;  %v819_v22 = vld [vmem:[%s1038_s1 + $0xe8] sm:$0xff]  }
   0x8   :  { %715 = vmatprep.subr.bf16.mxu0 %v805_v8  ;;  %v812_v15 = vld [vmem:[%s1038_s1 + $0x98] sm:$0xff]   ;;  %v816_v19 = vld [vmem:[%s1038_s1 + $0xa0] sm:$0xff]   ;;  %v820_v23 = vld [vmem:[%s1038_s1 + $0xa8] sm:$0xff]  }
   0x9   :  { %742 = vmatpush3.bf16.msra.mxu1 %v804_v7  ;;  %v821_v24 = vld [vmem:[%s1038_s1 + $0x70] sm:$0xff]   ;;  %v825_v28 = vld [vmem:[%s1038_s1 + $0x78] sm:$0xff]   ;;  %v832_v34 = vld [vmem:[%s1038_s1 + $0x100] sm:$0xff]  }
   0xa   :  { %743 = vmatprep.subr.bf16.mxu1 %v807_v10  ;;  %v822_v25 = vld [vmem:[%s1038_s1 + $0x30] sm:$0xff]   ;;  %v826_v29 = vld [vmem:[%s1038_s1 + $0x38] sm:$0xff]   ;;  %v835_v36 = vld [vmem:[%s1039_s0 + $0xc] ss:$20 sps:$4 sm:$0xff]  }
   0xb   :  { %716 = vmatpush3.bf16.msra.mxu0 %v806_v9  ;;  %v823_v26 = vld [vmem:[%s1038_s1 + $0xf0] sm:$0xff]   ;;  %v827_v30 = vld [vmem:[%s1038_s1 + $0xf8] sm:$0xff]   ;;  %v836_v37 = vld [vmem:[%s1038_s1 + $0x108] sm:$0xff]   ;;  %489 = vmatprep.mubr.bf16.mxu1 %v835_v36 }
   0xc   :  { %717 = vmatprep.subr.bf16.mxu0 %v809_v12  ;;  %v824_v27 = vld [vmem:[%s1038_s1 + $0xb0] sm:$0xff]   ;;  %v830_v32 = vld [vmem:[%s1039_s0 + $0x4] ss:$20 sps:$4 sm:$0xff]   ;;  %v833_v35 = vld [vmem:[%s1039_s0 + $0x8] ss:$20 sps:$4 sm:$0xff]  }
   0xd   :  { %744 = vmatpush3.bf16.msra.mxu1 %v808_v11  ;;  %v828_v31 = vld [vmem:[%s1039_s0] ss:$20 sps:$4 sm:$0xff]   ;;  %v831_v33 = vld [vmem:[%s1038_s1 + $0xb8] sm:$0xff]   ;;  %440 = vmatprep.mubr.bf16.mxu0 %v830_v32  ;;  %v846_v43 = vld [vmem:[%s1039_s0 + $0x30] ss:$20 sps:$4 sm:$0xff]  }
   0xe   :  { %745 = vmatprep.subr.bf16.mxu1 %v811_v14  ;;  %v837_v38 = vld [vmem:[%s1038_s1 + $0x110] sm:$0xff]   ;;  %v840_v39 = vld [vmem:[%s1039_s0 + $0x2c] ss:$20 sps:$4 sm:$0xff]   ;;  %v838_v40 = vld [vmem:[%s1038_s1 + $0x118] sm:$0xff]  }
   0xf   :  { %718 = vmatpush3.bf16.msra.mxu0 %v810_v13  ;;  %v843_v41 = vld [vmem:[%s1039_s0 + $0x28] ss:$20 sps:$4 sm:$0xff]   ;;  %v839_v44 = vld [vmem:[%s1038_s1 + $0x120] sm:$0xff]   ;;  %v847_v47 = vld [vmem:[%s1038_s1 + $0x130] sm:$0xff]  }
  0x10   :  { %719 = vmatprep.subr.bf16.mxu0 %v813_v16  ;;  %v844_v42 = vld [vmem:[%s1039_s0 + $0x34] ss:$20 sps:$4 sm:$0xff]   ;;  %v849_v45 = vld [vmem:[%s1039_s0 + $0x10] ss:$20 sps:$4 sm:$0xff]   ;;  %v848_v48 = vld [vmem:[%s1038_s1 + $0x138] sm:$0xff]  }
  0x11   :  { %746 = vmatpush3.bf16.msra.mxu1 %v812_v15  ;;  %v842_v46 = vld [vmem:[%s1038_s1 + $0x128] sm:$0xff]   ;;  %v641_v51 = vld [vmem:[%s1040_s2] ss:$0 sm:$0xff] }
  0x12   :  { %747 = vmatprep.subr.bf16.mxu1 %v815_v18  ;;  %v850_v49 = vld [vmem:[%s1039_s0 + $0x38] ss:$20 sps:$4 sm:$0xff]  }
  0x13   :  { %720 = vmatpush3.bf16.msra.mxu0 %v814_v17 }
  0x14   :  { %721 = vmatprep.subr.bf16.mxu0 %v817_v20 }
  0x15   :  { %748 = vmatpush3.bf16.msra.mxu1 %v816_v19 }
  0x16   :  { %749 = vmatprep.subr.bf16.mxu1 %v819_v22 }
  0x17   :  { %722 = vmatpush3.bf16.msra.mxu0 %v818_v21 }
  0x18   :  { %723 = vmatprep.subr.bf16.mxu0 %v821_v24 }
  0x19   :  { %750 = vmatpush3.bf16.msra.mxu1 %v820_v23 }
  0x1a   :  { %751 = vmatprep.subr.bf16.mxu1 %v823_v26 }
  0x1b   :  { %724 = vmatpush3.bf16.msra.mxu0 %v822_v25 }
  0x1c   :  { %725 = vmatprep.subr.bf16.mxu0 %v825_v28 }
  0x1d   :  { %752 = vmatpush3.bf16.msra.mxu1 %v824_v27 }
  0x1e   :  { %753 = vmatprep.subr.bf16.mxu1 %v827_v30 }
  0x1f   :  { %726 = vmatpush3.bf16.msra.mxu0 %v826_v29 }
  0x20   :  { %777 = vmatprep.subr.bf16.mxu0 %v832_v34 }
  0x21   :  { %754 = vmatpush3.bf16.msra.mxu1 %v831_v33 }
  0x22   :  { %441 = vmatmul.mubr.bf16.vlgmr.msra.gmra.mrb[0].mxu0 %v828_v31 }
  0x23   :  { %778 = vmatpush3.bf16.msra.mxu0 %v832_v34  ;;  %448 = vmatprep.mubr.bf16.mxu0 %v840_v39 }
  0x24   :  { %490 = vmatmul.mubr.bf16.vlgmr.msra.gmra.mrb[0].mxu1 %v833_v35  ;;  %779 = vmatprep.subr.bf16.mxu0 %v836_v37 }
  0x25   :  { %497 = vmatprep.mubr.bf16.mxu1 %v844_v42 }
  0x27   :  { %780 = vmatpush3.bf16.msra.mxu0 %v836_v37 }
  0x28   :  { %781 = vmatprep.subr.bf16.mxu0 %v837_v38 }
  0x2a   :  { %449 = vmatmul.mubr.bf16.gmra.mrb[4].mxu0 %v843_v41 }
  0x2b   :  { %782 = vmatpush3.bf16.msra.mxu0 %v837_v38  ;;  %793 = vmatprep.mubr.bf16.mxu0 %v849_v45 }
  0x2c   :  { %783 = vmatprep.subr.bf16.mxu0 %v838_v40  ;;  %498 = vmatmul.mubr.bf16.gmra.mrb[4].mxu1 %v846_v43 }
  0x2f   :  { %784 = vmatpush3.bf16.msra.mxu0 %v838_v40 }
  0x30   :  { %785 = vmatprep.subr.bf16.mxu0 %v839_v44 }
  0x33   :  { %786 = vmatpush3.bf16.msra.mxu0 %v839_v44 }
  0x34   :  { %787 = vmatprep.subr.bf16.mxu0 %v842_v46 }
  0x37   :  { %788 = vmatpush3.bf16.msra.mxu0 %v842_v46 }
  0x38   :  { %789 = vmatprep.subr.bf16.mxu0 %v847_v47 }
  0x3b   :  { %790 = vmatpush3.bf16.msra.mxu0 %v847_v47  ;;  %v579_v47 = vlaneseq }
  0x3c   :  { %791 = vmatprep.subr.bf16.mxu0 %v848_v48 }
  0x3f   :  { %792 = vmatpush3.bf16.msra.mxu0 %v848_v48 }
  0x42   :  { %794 = vmatmul.mubr.bf16.vlgmr.msra.gmra.mrb[8].mxu0 %v850_v49 }
  0xf5   :  { %v727_v50 = vpop.f32.mrb[0].mxu0 }
  0xf6   :  { %v728_v52 = vpop.f32.mrb[1].mxu0 }
  0xf7   :  { %v729_v53 = vadd.f32 %v728_v52, %v727_v50  ;;  %v730_v54 = vpop.f32.mrb[2].mxu0  ;;  %v755_v55 = vpop.f32.mrb[0].mxu1  ;;  %v580_v52 = vshrl.u32 %v579_v47, 7 }
  0xf8   :  { %v731_v56 = vpop.f32.mrb[3].mxu0  ;;  %v756_v59 = vpop.f32.mrb[1].mxu1 }
  0xf9   :  { %v443_v57 = vadd.f32 %v729_v53, %v641_v51  ;;  %v732_v58 = vadd.f32 %v731_v56, %v730_v54  ;;  %v757_v60 = vadd.f32 %v756_v59, %v755_v55  ;;  %v758_v61 = vpop.f32.mrb[2].mxu1  ;;  %vm628_vm0 = vcmp.eq.s32.totalorder %v580_v52, 0 }
  0xfa   :  { %v759_v63 = vpop.f32.mrb[3].mxu1  ;;  %vm630_vm1 = vcmp.eq.s32.totalorder %v580_v52, 1 }
  0xfb   :  { %v446_v62 = vadd.f32 %v732_v58, %v641_v51  ;;  %v760_v0 = vadd.f32 %v759_v63, %v758_v61  ;;  %v492_v1 = vadd.f32 %v757_v60, %v443_v57 }
  0xfd   :  { %v733_v2 = vpop.f32.mrb[4].mxu0  ;;  %v495_v4 = vadd.f32 %v760_v0, %v446_v62 }
  0xfe   :  { %v734_v3 = vpop.f32.mrb[5].mxu0 }
  0xff   :  { %v735_v5 = vadd.f32 %v734_v3, %v733_v2  ;;  %v736_v6 = vpop.f32.mrb[6].mxu0  ;;  %v761_v7 = vpop.f32.mrb[4].mxu1 }
 0x100   :  { %v737_v8 = vpop.f32.mrb[7].mxu0  ;;  %v762_v11 = vpop.f32.mrb[5].mxu1 }
 0x101   :  { %v451_v9 = vadd.f32 %v735_v5, %v641_v51  ;;  %v738_v10 = vadd.f32 %v737_v8, %v736_v6  ;;  %v763_v12 = vadd.f32 %v762_v11, %v761_v7  ;;  %v764_v13 = vpop.f32.mrb[6].mxu1 }
 0x102   :  { %v765_v15 = vpop.f32.mrb[7].mxu1 }
 0x103   :  { %v454_v14 = vadd.f32 %v738_v10, %v641_v51  ;;  %v766_v16 = vadd.f32 %v765_v15, %v764_v13  ;;  %v500_v17 = vadd.f32 %v763_v12, %v451_v9 }
 0x105   :  { %v503_v18 = vadd.f32 %v766_v16, %v454_v14 }
 0x115   :  { %v795_v19 = vpop.f32.mrb[8].mxu0 }
 0x116   :  { %v549_v20 = vadd.f32 %v795_v19, %v500_v17  ;;  %v540_v21 = vpop.f32.mrb[9].mxu0 }
 0x117   :  { %v541_v22 = vadd.f32 %v540_v21, %v492_v1  ;;  %v796_v23 = vpop.f32.mrb[10].mxu0 }
 0x118   :  { %v552_v24 = vadd.f32 %v796_v23, %v503_v18  ;;  %v543_v25 = vpop.f32.mrb[11].mxu0 }
 0x119   :  { %v544_v26 = vadd.f32 %v543_v25, %v495_v4 }
 0x11a   :  { %v556_v27 = vpack.c.bf16 %v552_v24, %v549_v20 }
 0x11b   :  { %v555_v28 = vpack.c.bf16 %v544_v26, %v541_v22 }
 0x11c   :  { %710 = vst [vmem:[%s1041_s3 + $0x8] sm:$0xff] %v556_v27   ;;  %v577_v29 = vunpack.c.l.bf16 %v556_v27  ;;  %v578_v30 = vunpack.c.h.bf16 %v556_v27 }
 0x11d   :  { %704 = vst [vmem:[%s1041_s3] sm:$0xff] %v555_v28   ;;  %v575_v31 = vunpack.c.l.bf16 %v555_v28  ;;  %v576_v32 = vunpack.c.h.bf16 %v555_v28 }
 0x11e   :  { %v604_v33 = vmul.f32 0.0, %v577_v29  ;;  %v605_v35 = vmul.f32 0.0, %v578_v30 }
 0x11f   :  { %v603_v34 = vmul.f32 0.0, %v576_v32  ;;  %v615_v37 = vmul.f32 %v575_v31, %v575_v31 }
 0x120   :  { %v617_v39 = vmul.f32 %v604_v33, %v604_v33  ;;  %v618_v42 = vmul.f32 %v605_v35, %v605_v35 }
 0x121   :  { %v606_v36 = vadd.f32 %v603_v34, %v575_v31  ;;  %v616_v38 = vmul.f32 %v603_v34, %v603_v34 }
 0x123   :  { %v607_v40 = vadd.f32 %v606_v36, %v604_v33  ;;  %v619_v41 = vadd.f32 %v616_v38, %v615_v37 }
 0x125   :  { %v608_v43 = vadd.f32 %v607_v40, %v605_v35  ;;  %v620_v44 = vadd.f32 %v619_v41, %v617_v39 }
 0x127   :  { %v609_v45 = vrot.slane %v608_v43, 4  ;;  %v621_v46 = vadd.f32 %v620_v44, %v618_v42 }
 0x129   :  { %v610_v48 = vadd.f32 %v609_v45, %v608_v43  ;;  %v622_v49 = vrot.slane %v621_v46, 4 }
 0x12b   :  { %v611_v50 = vrot.slane %v610_v48, 2  ;;  %v623_v51 = vadd.f32 %v622_v49, %v621_v46 }
 0x12d   :  { %v612_v53 = vadd.f32 %v611_v50, %v610_v48  ;;  %v624_v54 = vrot.slane %v623_v51, 2 }
 0x12f   :  { %v613_v55 = vrot.slane %v612_v53, 1  ;;  %v625_v56 = vadd.f32 %v624_v54, %v623_v51 }
 0x131   :  { %v614_v57 = vadd.f32 %v613_v55, %v612_v53  ;;  %v626_v58 = vrot.slane %v625_v56, 1 }
 0x133   :  { %v627_v59 = vadd.f32 %v626_v58, %v625_v56  ;;  %v629_v60 = vsel %vm628_vm0, %v614_v57, 0.0 }
 0x135   :  { %v631_v61 = vsel %vm630_vm1, %v627_v59, %v629_v60 }
 0x136   :  { %632 = vst [vmem:[%s1042_s4] sm:$0xff] %v631_v61 }

// kernel: unetpp_forward.58
= control target key start
LH: loop header
LB: loop body
LE: loop exit
PB: predicated region body
PF: predicated region fallthrough
CT: control target
= control target key end

     0   :  { %s970_s1 = inlined_call_operand.vmem [shape: bf16[640,128], index: 1, kind: input, shape index: {}]   ;;  %s971_s0 = inlined_call_operand.vmem [shape: bf16[32,640], index: 0, kind: input, shape index: {}]   ;;  %s972_s2 = inlined_call_operand.vmem [shape: f32[1,128], index: 2, kind: input, shape index: {}]   ;;  %s973_s3 = inlined_call_operand.vmem [shape: bf16[32,128], index: 3, kind: output, shape index: {}]  }
   0x1   :  { %v737_v0 = vld [vmem:[%s970_s1 + $0x40] sm:$0xff]   ;;  %v741_v4 = vld [vmem:[%s970_s1 + $0x48] sm:$0xff]   ;;  %v745_v8 = vld [vmem:[%s970_s1 + $0x50] sm:$0xff]  }
   0x2   :  { %v738_v1 = vld [vmem:[%s970_s1] sm:$0xff]   ;;  %651 = vmatprep.subr.bf16.mxu0 %v737_v0  ;;  %v742_v5 = vld [vmem:[%s970_s1 + $0x8] sm:$0xff]   ;;  %v746_v9 = vld [vmem:[%s970_s1 + $0x10] sm:$0xff]  }
   0x3   :  { %v739_v2 = vld [vmem:[%s970_s1 + $0xc0] sm:$0xff]   ;;  %652 = vmatpush3.bf16.msra.mxu0 %v738_v1  ;;  %v743_v6 = vld [vmem:[%s970_s1 + $0xc8] sm:$0xff]   ;;  %v747_v10 = vld [vmem:[%s970_s1 + $0xd0] sm:$0xff]  }
   0x4   :  { %v740_v3 = vld [vmem:[%s970_s1 + $0x80] sm:$0xff]   ;;  %679 = vmatprep.subr.bf16.mxu1 %v739_v2  ;;  %653 = vmatprep.subr.bf16.mxu0 %v741_v4  ;;  %v744_v7 = vld [vmem:[%s970_s1 + $0x88] sm:$0xff]   ;;  %v748_v11 = vld [vmem:[%s970_s1 + $0x90] sm:$0xff]  }
   0x5   :  { %680 = vmatpush3.bf16.msra.mxu1 %v740_v3  ;;  %v749_v12 = vld [vmem:[%s970_s1 + $0x58] sm:$0xff]   ;;  %v753_v16 = vld [vmem:[%s970_s1 + $0x60] sm:$0xff]   ;;  %v757_v20 = vld [vmem:[%s970_s1 + $0x68] sm:$0xff]  }
   0x6   :  { %681 = vmatprep.subr.bf16.mxu1 %v743_v6  ;;  %v750_v13 = vld [vmem:[%s970_s1 + $0x18] sm:$0xff]   ;;  %v754_v17 = vld [vmem:[%s970_s1 + $0x20] sm:$0xff]   ;;  %v758_v21 = vld [vmem:[%s970_s1 + $0x28] sm:$0xff]  }
   0x7   :  { %654 = vmatpush3.bf16.msra.mxu0 %v742_v5  ;;  %v751_v14 = vld [vmem:[%s970_s1 + $0xd8] sm:$0xff]   ;;  %v755_v18 = vld [vmem:[%s970_s1 + $0xe0] sm:$0xff]   ;;  %v759_v22 = vld [vmem:[%s970_s1 + $0xe8] sm:$0xff]  }
   0x8   :  { %655 = vmatprep.subr.bf16.mxu0 %v745_v8  ;;  %v752_v15 = vld [vmem:[%s970_s1 + $0x98] sm:$0xff]   ;;  %v756_v19 = vld [vmem:[%s970_s1 + $0xa0] sm:$0xff]   ;;  %v760_v23 = vld [vmem:[%s970_s1 + $0xa8] sm:$0xff]  }
   0x9   :  { %682 = vmatpush3.bf16.msra.mxu1 %v744_v7  ;;  %v761_v24 = vld [vmem:[%s970_s1 + $0x70] sm:$0xff]   ;;  %v765_v28 = vld [vmem:[%s970_s1 + $0x78] sm:$0xff]   ;;  %v772_v34 = vld [vmem:[%s970_s1 + $0x100] sm:$0xff]  }
   0xa   :  { %683 = vmatprep.subr.bf16.mxu1 %v747_v10  ;;  %v762_v25 = vld [vmem:[%s970_s1 + $0x30] sm:$0xff]   ;;  %v766_v29 = vld [vmem:[%s970_s1 + $0x38] sm:$0xff]   ;;  %v775_v36 = vld [vmem:[%s971_s0 + $0xc] ss:$20 sps:$4 sm:$0xff]  }
   0xb   :  { %656 = vmatpush3.bf16.msra.mxu0 %v746_v9  ;;  %v763_v26 = vld [vmem:[%s970_s1 + $0xf0] sm:$0xff]   ;;  %v767_v30 = vld [vmem:[%s970_s1 + $0xf8] sm:$0xff]   ;;  %v776_v37 = vld [vmem:[%s970_s1 + $0x108] sm:$0xff]   ;;  %487 = vmatprep.mubr.bf16.mxu1 %v775_v36 }
   0xc   :  { %657 = vmatprep.subr.bf16.mxu0 %v749_v12  ;;  %v764_v27 = vld [vmem:[%s970_s1 + $0xb0] sm:$0xff]   ;;  %v770_v32 = vld [vmem:[%s971_s0 + $0x4] ss:$20 sps:$4 sm:$0xff]   ;;  %v773_v35 = vld [vmem:[%s971_s0 + $0x8] ss:$20 sps:$4 sm:$0xff]  }
   0xd   :  { %684 = vmatpush3.bf16.msra.mxu1 %v748_v11  ;;  %v768_v31 = vld [vmem:[%s971_s0] ss:$20 sps:$4 sm:$0xff]   ;;  %v771_v33 = vld [vmem:[%s970_s1 + $0xb8] sm:$0xff]   ;;  %438 = vmatprep.mubr.bf16.mxu0 %v770_v32  ;;  %v786_v43 = vld [vmem:[%s971_s0 + $0x30] ss:$20 sps:$4 sm:$0xff]  }
   0xe   :  { %685 = vmatprep.subr.bf16.mxu1 %v751_v14  ;;  %v777_v38 = vld [vmem:[%s970_s1 + $0x110] sm:$0xff]   ;;  %v780_v39 = vld [vmem:[%s971_s0 + $0x2c] ss:$20 sps:$4 sm:$0xff]   ;;  %v778_v40 = vld [vmem:[%s970_s1 + $0x118] sm:$0xff]  }
   0xf   :  { %658 = vmatpush3.bf16.msra.mxu0 %v750_v13  ;;  %v783_v41 = vld [vmem:[%s971_s0 + $0x28] ss:$20 sps:$4 sm:$0xff]   ;;  %v779_v44 = vld [vmem:[%s970_s1 + $0x120] sm:$0xff]   ;;  %v787_v47 = vld [vmem:[%s970_s1 + $0x130] sm:$0xff]  }
  0x10   :  { %659 = vmatprep.subr.bf16.mxu0 %v753_v16  ;;  %v784_v42 = vld [vmem:[%s971_s0 + $0x34] ss:$20 sps:$4 sm:$0xff]   ;;  %v789_v45 = vld [vmem:[%s971_s0 + $0x10] ss:$20 sps:$4 sm:$0xff]   ;;  %v788_v48 = vld [vmem:[%s970_s1 + $0x138] sm:$0xff]  }
  0x11   :  { %686 = vmatpush3.bf16.msra.mxu1 %v752_v15  ;;  %v782_v46 = vld [vmem:[%s970_s1 + $0x128] sm:$0xff]   ;;  %v581_v51 = vld [vmem:[%s972_s2] ss:$0 sm:$0xff] }
  0x12   :  { %687 = vmatprep.subr.bf16.mxu1 %v755_v18  ;;  %v790_v49 = vld [vmem:[%s971_s0 + $0x38] ss:$20 sps:$4 sm:$0xff]  }
  0x13   :  { %660 = vmatpush3.bf16.msra.mxu0 %v754_v17 }
  0x14   :  { %661 = vmatprep.subr.bf16.mxu0 %v757_v20 }
  0x15   :  { %688 = vmatpush3.bf16.msra.mxu1 %v756_v19 }
  0x16   :  { %689 = vmatprep.subr.bf16.mxu1 %v759_v22 }
  0x17   :  { %662 = vmatpush3.bf16.msra.mxu0 %v758_v21 }
  0x18   :  { %663 = vmatprep.subr.bf16.mxu0 %v761_v24 }
  0x19   :  { %690 = vmatpush3.bf16.msra.mxu1 %v760_v23 }
  0x1a   :  { %691 = vmatprep.subr.bf16.mxu1 %v763_v26 }
  0x1b   :  { %664 = vmatpush3.bf16.msra.mxu0 %v762_v25 }
  0x1c   :  { %665 = vmatprep.subr.bf16.mxu0 %v765_v28 }
  0x1d   :  { %692 = vmatpush3.bf16.msra.mxu1 %v764_v27 }
  0x1e   :  { %693 = vmatprep.subr.bf16.mxu1 %v767_v30 }
  0x1f   :  { %666 = vmatpush3.bf16.msra.mxu0 %v766_v29 }
  0x20   :  { %717 = vmatprep.subr.bf16.mxu0 %v772_v34 }
  0x21   :  { %694 = vmatpush3.bf16.msra.mxu1 %v771_v33 }
  0x22   :  { %439 = vmatmul.mubr.bf16.vlgmr.msra.gmra.mrb[0].mxu0 %v768_v31 }
  0x23   :  { %718 = vmatpush3.bf16.msra.mxu0 %v772_v34  ;;  %446 = vmatprep.mubr.bf16.mxu0 %v780_v39 }
  0x24   :  { %488 = vmatmul.mubr.bf16.vlgmr.msra.gmra.mrb[0].mxu1 %v773_v35  ;;  %719 = vmatprep.subr.bf16.mxu0 %v776_v37 }
  0x25   :  { %495 = vmatprep.mubr.bf16.mxu1 %v784_v42 }
  0x27   :  { %720 = vmatpush3.bf16.msra.mxu0 %v776_v37 }
  0x28   :  { %721 = vmatprep.subr.bf16.mxu0 %v777_v38 }
  0x2a   :  { %447 = vmatmul.mubr.bf16.gmra.mrb[4].mxu0 %v783_v41 }
  0x2b   :  { %722 = vmatpush3.bf16.msra.mxu0 %v777_v38  ;;  %733 = vmatprep.mubr.bf16.mxu0 %v789_v45 }
  0x2c   :  { %723 = vmatprep.subr.bf16.mxu0 %v778_v40  ;;  %496 = vmatmul.mubr.bf16.gmra.mrb[4].mxu1 %v786_v43 }
  0x2f   :  { %724 = vmatpush3.bf16.msra.mxu0 %v778_v40 }
  0x30   :  { %725 = vmatprep.subr.bf16.mxu0 %v779_v44 }
  0x33   :  { %726 = vmatpush3.bf16.msra.mxu0 %v779_v44 }
  0x34   :  { %727 = vmatprep.subr.bf16.mxu0 %v782_v46 }
  0x37   :  { %728 = vmatpush3.bf16.msra.mxu0 %v782_v46 }
  0x38   :  { %729 = vmatprep.subr.bf16.mxu0 %v787_v47 }
  0x3b   :  { %730 = vmatpush3.bf16.msra.mxu0 %v787_v47 }
  0x3c   :  { %731 = vmatprep.subr.bf16.mxu0 %v788_v48 }
  0x3f   :  { %732 = vmatpush3.bf16.msra.mxu0 %v788_v48 }
  0x42   :  { %734 = vmatmul.mubr.bf16.vlgmr.msra.gmra.mrb[8].mxu0 %v790_v49 }
  0xf5   :  { %v667_v50 = vpop.f32.mrb[0].mxu0 }
  0xf6   :  { %v668_v52 = vpop.f32.mrb[1].mxu0 }
  0xf7   :  { %v669_v53 = vadd.f32 %v668_v52, %v667_v50  ;;  %v670_v54 = vpop.f32.mrb[2].mxu0  ;;  %v695_v55 = vpop.f32.mrb[0].mxu1 }
  0xf8   :  { %v671_v56 = vpop.f32.mrb[3].mxu0  ;;  %v696_v59 = vpop.f32.mrb[1].mxu1 }
  0xf9   :  { %v441_v57 = vadd.f32 %v669_v53, %v581_v51  ;;  %v672_v58 = vadd.f32 %v671_v56, %v670_v54  ;;  %v697_v60 = vadd.f32 %v696_v59, %v695_v55  ;;  %v698_v61 = vpop.f32.mrb[2].mxu1 }
  0xfa   :  { %v699_v63 = vpop.f32.mrb[3].mxu1 }
  0xfb   :  { %v444_v62 = vadd.f32 %v672_v58, %v581_v51  ;;  %v700_v0 = vadd.f32 %v699_v63, %v698_v61  ;;  %v490_v1 = vadd.f32 %v697_v60, %v441_v57 }
  0xfd   :  { %v673_v2 = vpop.f32.mrb[4].mxu0  ;;  %v493_v4 = vadd.f32 %v700_v0, %v444_v62 }
  0xfe   :  { %v674_v3 = vpop.f32.mrb[5].mxu0 }
  0xff   :  { %v675_v5 = vadd.f32 %v674_v3, %v673_v2  ;;  %v676_v6 = vpop.f32.mrb[6].mxu0  ;;  %v701_v7 = vpop.f32.mrb[4].mxu1 }
 0x100   :  { %v677_v8 = vpop.f32.mrb[7].mxu0  ;;  %v702_v11 = vpop.f32.mrb[5].mxu1 }
 0x101   :  { %v449_v9 = vadd.f32 %v675_v5, %v581_v51  ;;  %v678_v10 = vadd.f32 %v677_v8, %v676_v6  ;;  %v703_v12 = vadd.f32 %v702_v11, %v701_v7  ;;  %v704_v13 = vpop.f32.mrb[6].mxu1 }
 0x102   :  { %v705_v15 = vpop.f32.mrb[7].mxu1 }
 0x103   :  { %v452_v14 = vadd.f32 %v678_v10, %v581_v51  ;;  %v706_v16 = vadd.f32 %v705_v15, %v704_v13  ;;  %v498_v17 = vadd.f32 %v703_v12, %v449_v9 }
 0x105   :  { %v501_v18 = vadd.f32 %v706_v16, %v452_v14 }
 0x115   :  { %v735_v19 = vpop.f32.mrb[8].mxu0 }
 0x116   :  { %v547_v20 = vadd.f32 %v735_v19, %v498_v17  ;;  %v538_v21 = vpop.f32.mrb[9].mxu0 }
 0x117   :  { %v539_v22 = vadd.f32 %v538_v21, %v490_v1  ;;  %v736_v23 = vpop.f32.mrb[10].mxu0 }
 0x118   :  { %v550_v24 = vadd.f32 %v736_v23, %v501_v18  ;;  %v541_v25 = vpop.f32.mrb[11].mxu0  ;;  %v555_v27 = vmax.f32 %v547_v20, 0.0 }
 0x119   :  { %v542_v26 = vadd.f32 %v541_v25, %v493_v4  ;;  %v553_v29 = vmax.f32 %v539_v22, 0.0 }
 0x11a   :  { %v556_v28 = vmax.f32 %v550_v24, 0.0 }
 0x11b   :  { %v554_v30 = vmax.f32 %v542_v26, 0.0 }
 0x11c   :  { %v648_v31 = vpack.c.bf16 %v556_v28, %v555_v27 }
 0x11d   :  { %v643_v32 = vpack.c.bf16 %v554_v30, %v553_v29 }
 0x11e   :  { %650 = vst [vmem:[%s973_s3 + $0x8] sm:$0xff] %v648_v31  }
 0x11f   :  { %644 = vst [vmem:[%s973_s3] sm:$0xff] %v643_v32  }

// kernel: unetpp_forward.59
= control target key start
LH: loop header
LB: loop body
LE: loop exit
PB: predicated region body
PF: predicated region fallthrough
CT: control target
= control target key end

     0   :  { %s1703_s1 = inlined_call_operand.vmem [shape: bf16[1152,128], index: 1, kind: input, shape index: {}]   ;;  %s1704_s0 = inlined_call_operand.vmem [shape: bf16[32,1152], index: 0, kind: input, shape index: {}]   ;;  %s1705_s2 = inlined_call_operand.vmem [shape: f32[1,128], index: 2, kind: input, shape index: {}]   ;;  %s1706_s3 = inlined_call_operand.vmem [shape: bf16[32,128], index: 3, kind: output, shape index: {0}]   ;;  %s1707_s4 = inlined_call_operand.vmem [shape: f32[8,128], index: 4, kind: output, shape index: {1}]  }
   0x1   :  { %v1297_v0 = vld [vmem:[%s1703_s1 + $0x40] sm:$0xff]   ;;  %v1301_v4 = vld [vmem:[%s1703_s1 + $0x48] sm:$0xff]   ;;  %v1305_v8 = vld [vmem:[%s1703_s1 + $0x50] sm:$0xff]  }
   0x2   :  { %v1298_v1 = vld [vmem:[%s1703_s1] sm:$0xff]   ;;  %1154 = vmatprep.subr.bf16.mxu0 %v1297_v0  ;;  %v1302_v5 = vld [vmem:[%s1703_s1 + $0x8] sm:$0xff]   ;;  %v1306_v9 = vld [vmem:[%s1703_s1 + $0x10] sm:$0xff]  }
   0x3   :  { %v1299_v2 = vld [vmem:[%s1703_s1 + $0xc0] sm:$0xff]   ;;  %1155 = vmatpush3.bf16.msra.mxu0 %v1298_v1  ;;  %v1303_v6 = vld [vmem:[%s1703_s1 + $0xc8] sm:$0xff]   ;;  %v1307_v10 = vld [vmem:[%s1703_s1 + $0xd0] sm:$0xff]  }
   0x4   :  { %v1300_v3 = vld [vmem:[%s1703_s1 + $0x80] sm:$0xff]   ;;  %1182 = vmatprep.subr.bf16.mxu1 %v1299_v2  ;;  %1156 = vmatprep.subr.bf16.mxu0 %v1301_v4  ;;  %v1304_v7 = vld [vmem:[%s1703_s1 + $0x88] sm:$0xff]   ;;  %v1308_v11 = vld [vmem:[%s1703_s1 + $0x90] sm:$0xff]  }
   0x5   :  { %1183 = vmatpush3.bf16.msra.mxu1 %v1300_v3  ;;  %v1309_v12 = vld [vmem:[%s1703_s1 + $0x58] sm:$0xff]   ;;  %v1313_v16 = vld [vmem:[%s1703_s1 + $0x60] sm:$0xff]   ;;  %v1317_v20 = vld [vmem:[%s1703_s1 + $0x68] sm:$0xff]  }
   0x6   :  { %1184 = vmatprep.subr.bf16.mxu1 %v1303_v6  ;;  %v1310_v13 = vld [vmem:[%s1703_s1 + $0x18] sm:$0xff]   ;;  %v1314_v17 = vld [vmem:[%s1703_s1 + $0x20] sm:$0xff]   ;;  %v1318_v21 = vld [vmem:[%s1703_s1 + $0x28] sm:$0xff]  }
   0x7   :  { %1157 = vmatpush3.bf16.msra.mxu0 %v1302_v5  ;;  %v1311_v14 = vld [vmem:[%s1703_s1 + $0xd8] sm:$0xff]   ;;  %v1315_v18 = vld [vmem:[%s1703_s1 + $0xe0] sm:$0xff]   ;;  %v1319_v22 = vld [vmem:[%s1703_s1 + $0xe8] sm:$0xff]  }
   0x8   :  { %1158 = vmatprep.subr.bf16.mxu0 %v1305_v8  ;;  %v1312_v15 = vld [vmem:[%s1703_s1 + $0x98] sm:$0xff]   ;;  %v1316_v19 = vld [vmem:[%s1703_s1 + $0xa0] sm:$0xff]   ;;  %v1320_v23 = vld [vmem:[%s1703_s1 + $0xa8] sm:$0xff]  }
   0x9   :  { %1185 = vmatpush3.bf16.msra.mxu1 %v1304_v7  ;;  %v1321_v24 = vld [vmem:[%s1703_s1 + $0x70] sm:$0xff]   ;;  %v1325_v28 = vld [vmem:[%s1703_s1 + $0x78] sm:$0xff]   ;;  %v1328_v31 = vld [vmem:[%s1704_s0] ss:$36 sps:$4 sm:$0xff]  }
   0xa   :  { %1186 = vmatprep.subr.bf16.mxu1 %v1307_v10  ;;  %v1322_v25 = vld [vmem:[%s1703_s1 + $0x30] sm:$0xff]   ;;  %v1326_v29 = vld [vmem:[%s1703_s1 + $0x38] sm:$0xff]   ;;  %v1330_v32 = vld [vmem:[%s1704_s0 + $0x4] ss:$36 sps:$4 sm:$0xff]  }
   0xb   :  { %1159 = vmatpush3.bf16.msra.mxu0 %v1306_v9  ;;  %v1323_v26 = vld [vmem:[%s1703_s1 + $0xf0] sm:$0xff]   ;;  %v1327_v30 = vld [vmem:[%s1703_s1 + $0xf8] sm:$0xff]   ;;  %744 = vmatprep.mubr.bf16.mxu0 %v1330_v32  ;;  %v1332_v34 = vld [vmem:[%s1703_s1 + $0x140] sm:$0xff]  }
   0xc   :  { %1160 = vmatprep.subr.bf16.mxu0 %v1309_v12  ;;  %v1324_v27 = vld [vmem:[%s1703_s1 + $0xb0] sm:$0xff]   ;;  %v1331_v33 = vld [vmem:[%s1703_s1 + $0xb8] sm:$0xff]   ;;  %v1333_v35 = vld [vmem:[%s1704_s0 + $0x8] ss:$36 sps:$4 sm:$0xff]  }
   0xd   :  { %1187 = vmatpush3.bf16.msra.mxu1 %v1308_v11  ;;  %v1335_v36 = vld [vmem:[%s1704_s0 + $0xc] ss:$36 sps:$4 sm:$0xff]   ;;  %v1336_v37 = vld [vmem:[%s1703_s1 + $0x100] sm:$0xff]   ;;  %v1347_v48 = vld [vmem:[%s1703_s1 + $0x158] sm:$0xff]  }
   0xe   :  { %1188 = vmatprep.subr.bf16.mxu1 %v1311_v14  ;;  %793 = vmatprep.mubr.bf16.mxu1 %v1335_v36  ;;  %v1337_v38 = vld [vmem:[%s1703_s1 + $0x1c0] sm:$0xff]   ;;  %v1339_v40 = vld [vmem:[%s1703_s1 + $0x148] sm:$0xff]   ;;  %v1343_v44 = vld [vmem:[%s1703_s1 + $0x150] sm:$0xff]  }
   0xf   :  { %1161 = vmatpush3.bf16.msra.mxu0 %v1310_v13  ;;  %v1338_v39 = vld [vmem:[%s1703_s1 + $0x180] sm:$0xff]   ;;  %v1340_v41 = vld [vmem:[%s1703_s1 + $0x108] sm:$0xff]   ;;  %v1344_v45 = vld [vmem:[%s1703_s1 + $0x110] sm:$0xff]  }
  0x10   :  { %1162 = vmatprep.subr.bf16.mxu0 %v1313_v16  ;;  %v1341_v42 = vld [vmem:[%s1703_s1 + $0x1c8] sm:$0xff]   ;;  %v1345_v46 = vld [vmem:[%s1703_s1 + $0x1d0] sm:$0xff]   ;;  %v1348_v49 = vld [vmem:[%s1703_s1 + $0x118] sm:$0xff]  }
  0x11   :  { %1189 = vmatpush3.bf16.msra.mxu1 %v1312_v15  ;;  %v1342_v43 = vld [vmem:[%s1703_s1 + $0x188] sm:$0xff]   ;;  %v1346_v47 = vld [vmem:[%s1703_s1 + $0x190] sm:$0xff]   ;;  %v1349_v50 = vld [vmem:[%s1703_s1 + $0x1d8] sm:$0xff]  }
  0x12   :  { %1190 = vmatprep.subr.bf16.mxu1 %v1315_v18  ;;  %v1350_v51 = vld [vmem:[%s1703_s1 + $0x198] sm:$0xff]   ;;  %v1351_v52 = vld [vmem:[%s1703_s1 + $0x160] sm:$0xff]   ;;  %v1355_v56 = vld [vmem:[%s1703_s1 + $0x168] sm:$0xff]  }
  0x13   :  { %1163 = vmatpush3.bf16.msra.mxu0 %v1314_v17  ;;  %v1352_v53 = vld [vmem:[%s1703_s1 + $0x120] sm:$0xff]   ;;  %v1356_v57 = vld [vmem:[%s1704_s0 + $0x4c] ss:$36 sps:$4 sm:$0xff]   ;;  %v1361_v61 = vld [vmem:[%s1704_s0 + $0x54] ss:$36 sps:$4 sm:$0xff]  }
  0x14   :  { %1164 = vmatprep.subr.bf16.mxu0 %v1317_v20  ;;  %v1353_v54 = vld [vmem:[%s1703_s1 + $0x1e0] sm:$0xff]   ;;  %v1358_v58 = vld [vmem:[%s1703_s1 + $0x128] sm:$0xff]   ;;  %v1364_v63 = vld [vmem:[%s1704_s0 + $0x50] ss:$36 sps:$4 sm:$0xff]  }
  0x15   :  { %1191 = vmatpush3.bf16.msra.mxu1 %v1316_v19  ;;  %v1354_v55 = vld [vmem:[%s1703_s1 + $0x1a0] sm:$0xff]   ;;  %v1359_v59 = vld [vmem:[%s1704_s0 + $0x48] ss:$36 sps:$4 sm:$0xff]   ;;  %v1365_v0 = vld [vmem:[%s1703_s1 + $0x170] sm:$0xff]  }
  0x16   :  { %1192 = vmatprep.subr.bf16.mxu1 %v1319_v22  ;;  %v1360_v60 = vld [vmem:[%s1703_s1 + $0x1e8] sm:$0xff]   ;;  %v1366_v1 = vld [vmem:[%s1703_s1 + $0x130] sm:$0xff]   ;;  %v1369_v4 = vld [vmem:[%s1703_s1 + $0x178] sm:$0xff]  }
  0x17   :  { %1165 = vmatpush3.bf16.msra.mxu0 %v1318_v21  ;;  %v1363_v62 = vld [vmem:[%s1703_s1 + $0x1a8] sm:$0xff]   ;;  %v1367_v2 = vld [vmem:[%s1703_s1 + $0x1f0] sm:$0xff]   ;;  %v1370_v5 = vld [vmem:[%s1703_s1 + $0x138] sm:$0xff]  }
  0x18   :  { %1166 = vmatprep.subr.bf16.mxu0 %v1321_v24  ;;  %v1368_v3 = vld [vmem:[%s1703_s1 + $0x1b0] sm:$0xff]   ;;  %v1371_v6 = vld [vmem:[%s1703_s1 + $0x1f8] sm:$0xff]   ;;  %v1376_v10 = vld [vmem:[%s1703_s1 + $0x200] sm:$0xff]  }
  0x19   :  { %1193 = vmatpush3.bf16.msra.mxu1 %v1320_v23  ;;  %v1372_v7 = vld [vmem:[%s1704_s0 + $0x10] ss:$36 sps:$4 sm:$0xff]   ;;  %v1375_v9 = vld [vmem:[%s1703_s1 + $0x1b8] sm:$0xff]   ;;  %v1380_v13 = vld [vmem:[%s1703_s1 + $0x208] sm:$0xff]  }
  0x1a   :  { %1194 = vmatprep.subr.bf16.mxu1 %v1323_v26  ;;  %v1374_v8 = vld [vmem:[%s1704_s0 + $0x14] ss:$36 sps:$4 sm:$0xff]   ;;  %v1379_v12 = vld [vmem:[%s1704_s0 + $0x1c] ss:$36 sps:$4 sm:$0xff]   ;;  %v1385_v17 = vld [vmem:[%s1704_s0 + $0x64] ss:$36 sps:$4 sm:$0xff]  }
  0x1b   :  { %1167 = vmatpush3.bf16.msra.mxu0 %v1322_v25  ;;  %v1377_v11 = vld [vmem:[%s1704_s0 + $0x18] ss:$36 sps:$4 sm:$0xff]   ;;  %v1384_v16 = vld [vmem:[%s1703_s1 + $0x210] sm:$0xff]   ;;  %v1387_v18 = vld [vmem:[%s1704_s0 + $0x60] ss:$36 sps:$4 sm:$0xff]  }
  0x1c   :  { %1168 = vmatprep.subr.bf16.mxu0 %v1325_v28  ;;  %v1381_v14 = vld [vmem:[%s1704_s0 + $0x5c] ss:$36 sps:$4 sm:$0xff]   ;;  %v1390_v22 = vld [vmem:[%s1703_s1 + $0x228] sm:$0xff]   ;;  %v1391_v23 = vld [vmem:[%s1703_s1 + $0x230] sm:$0xff]  }
  0x1d   :  { %1195 = vmatpush3.bf16.msra.mxu1 %v1324_v27  ;;  %v1383_v15 = vld [vmem:[%s1704_s0 + $0x58] ss:$36 sps:$4 sm:$0xff]   ;;  %v1389_v20 = vld [vmem:[%s1703_s1 + $0x220] sm:$0xff]   ;;  %v1394_v25 = vld [vmem:[%s1704_s0 + $0x68] ss:$36 sps:$4 sm:$0xff]  }
  0x1e   :  { %1196 = vmatprep.subr.bf16.mxu1 %v1327_v30  ;;  %v1388_v19 = vld [vmem:[%s1703_s1 + $0x218] sm:$0xff]   ;;  %v1393_v21 = vld [vmem:[%s1704_s0 + $0x20] ss:$36 sps:$4 sm:$0xff]  }
  0x1f   :  { %1169 = vmatpush3.bf16.msra.mxu0 %v1326_v29  ;;  %v1392_v24 = vld [vmem:[%s1703_s1 + $0x238] sm:$0xff]   ;;  %v1043_v27 = vld [vmem:[%s1705_s2] ss:$0 sm:$0xff] }
  0x20   :  { %1210 = vmatprep.subr.bf16.mxu0 %v1332_v34 }
  0x21   :  { %1197 = vmatpush3.bf16.msra.mxu1 %v1331_v33 }
  0x22   :  { %745 = vmatmul.mubr.bf16.vlgmr.msra.gmra.mrb[0].mxu0 %v1328_v31  ;;  %1238 = vmatprep.subr.bf16.mxu1 %v1337_v38 }
  0x23   :  { %1211 = vmatpush3.bf16.msra.mxu0 %v1336_v37  ;;  %752 = vmatprep.mubr.bf16.mxu0 %v1356_v57 }
  0x24   :  { %794 = vmatmul.mubr.bf16.vlgmr.msra.gmra.mrb[0].mxu1 %v1333_v35  ;;  %1212 = vmatprep.subr.bf16.mxu0 %v1339_v40 }
  0x25   :  { %1239 = vmatpush3.bf16.msra.mxu1 %v1338_v39  ;;  %801 = vmatprep.mubr.bf16.mxu1 %v1361_v61 }
  0x26   :  { %1240 = vmatprep.subr.bf16.mxu1 %v1341_v42 }
  0x27   :  { %1213 = vmatpush3.bf16.msra.mxu0 %v1340_v41 }
  0x28   :  { %1214 = vmatprep.subr.bf16.mxu0 %v1343_v44 }
  0x29   :  { %1241 = vmatpush3.bf16.msra.mxu1 %v1342_v43 }
  0x2a   :  { %1242 = vmatprep.subr.bf16.mxu1 %v1345_v46  ;;  %753 = vmatmul.mubr.bf16.gmra.mrb[4].mxu0 %v1359_v59 }
  0x2b   :  { %1215 = vmatpush3.bf16.msra.mxu0 %v1344_v45  ;;  %842 = vmatprep.mubr.bf16.mxu0 %v1374_v8 }
  0x2c   :  { %1216 = vmatprep.subr.bf16.mxu0 %v1347_v48  ;;  %802 = vmatmul.mubr.bf16.gmra.mrb[4].mxu1 %v1364_v63 }
  0x2d   :  { %1243 = vmatpush3.bf16.msra.mxu1 %v1346_v47  ;;  %891 = vmatprep.mubr.bf16.mxu1 %v1379_v12 }
  0x2e   :  { %1244 = vmatprep.subr.bf16.mxu1 %v1349_v50 }
  0x2f   :  { %1217 = vmatpush3.bf16.msra.mxu0 %v1348_v49 }
  0x30   :  { %1218 = vmatprep.subr.bf16.mxu0 %v1351_v52 }
  0x31   :  { %1245 = vmatpush3.bf16.msra.mxu1 %v1350_v51 }
  0x32   :  { %1246 = vmatprep.subr.bf16.mxu1 %v1353_v54 }
  0x33   :  { %1219 = vmatpush3.bf16.msra.mxu0 %v1352_v53 }
  0x34   :  { %1220 = vmatprep.subr.bf16.mxu0 %v1355_v56 }
  0x35   :  { %1247 = vmatpush3.bf16.msra.mxu1 %v1354_v55 }
  0x36   :  { %1248 = vmatprep.subr.bf16.mxu1 %v1360_v60 }
  0x37   :  { %1221 = vmatpush3.bf16.msra.mxu0 %v1358_v58 }
  0x38   :  { %1222 = vmatprep.subr.bf16.mxu0 %v1365_v0 }
  0x39   :  { %1249 = vmatpush3.bf16.msra.mxu1 %v1363_v62 }
  0x3a   :  { %1250 = vmatprep.subr.bf16.mxu1 %v1367_v2 }
  0x3b   :  { %1223 = vmatpush3.bf16.msra.mxu0 %v1366_v1 }
  0x3c   :  { %1224 = vmatprep.subr.bf16.mxu0 %v1369_v4 }
  0x3d   :  { %1251 = vmatpush3.bf16.msra.mxu1 %v1368_v3 }
  0x3e   :  { %1252 = vmatprep.subr.bf16.mxu1 %v1371_v6 }
  0x3f   :  { %1225 = vmatpush3.bf16.msra.mxu0 %v1370_v5 }
  0x40   :  { %1276 = vmatprep.subr.bf16.mxu0 %v1376_v10 }
  0x41   :  { %1253 = vmatpush3.bf16.msra.mxu1 %v1375_v9 }
  0x42   :  { %843 = vmatmul.mubr.bf16.vlgmr.msra.gmra.mrb[8].mxu0 %v1372_v7 }
  0x43   :  { %1277 = vmatpush3.bf16.msra.mxu0 %v1376_v10  ;;  %850 = vmatprep.mubr.bf16.mxu0 %v1381_v14 }
  0x44   :  { %892 = vmatmul.mubr.bf16.vlgmr.msra.gmra.mrb[8].mxu1 %v1377_v11  ;;  %1278 = vmatprep.subr.bf16.mxu0 %v1380_v13 }
  0x45   :  { %899 = vmatprep.mubr.bf16.mxu1 %v1385_v17 }
  0x47   :  { %1279 = vmatpush3.bf16.msra.mxu0 %v1380_v13 }
  0x48   :  { %1280 = vmatprep.subr.bf16.mxu0 %v1384_v16 }
  0x4a   :  { %851 = vmatmul.mubr.bf16.gmra.mrb[12].mxu0 %v1383_v15 }
  0x4b   :  { %1281 = vmatpush3.bf16.msra.mxu0 %v1384_v16  ;;  %1292 = vmatprep.mubr.bf16.mxu0 %v1393_v21 }
  0x4c   :  { %900 = vmatmul.mubr.bf16.gmra.mrb[12].mxu1 %v1387_v18  ;;  %1282 = vmatprep.subr.bf16.mxu0 %v1388_v19 }
  0x4f   :  { %1283 = vmatpush3.bf16.msra.mxu0 %v1388_v19 }
  0x50   :  { %1284 = vmatprep.subr.bf16.mxu0 %v1389_v20 }
  0x53   :  { %1285 = vmatpush3.bf16.msra.mxu0 %v1389_v20 }
  0x54   :  { %1286 = vmatprep.subr.bf16.mxu0 %v1390_v22 }
  0x57   :  { %1287 = vmatpush3.bf16.msra.mxu0 %v1390_v22 }
  0x58   :  { %1288 = vmatprep.subr.bf16.mxu0 %v1391_v23 }
  0x5b   :  { %1289 = vmatpush3.bf16.msra.mxu0 %v1391_v23 }
  0x5c   :  { %1290 = vmatprep.subr.bf16.mxu0 %v1392_v24 }
  0x5f   :  { %1291 = vmatpush3.bf16.msra.mxu0 %v1392_v24 }
  0x62   :  { %1293 = vmatmul.mubr.bf16.vlgmr.msra.gmra.mrb[16].mxu0 %v1394_v25 }
  0xf5   :  { %v1170_v26 = vpop.f32.mrb[0].mxu0 }
  0xf6   :  { %v1171_v28 = vpop.f32.mrb[1].mxu0 }
  0xf7   :  { %v1172_v29 = vadd.f32 %v1171_v28, %v1170_v26  ;;  %v1173_v30 = vpop.f32.mrb[2].mxu0  ;;  %v1198_v31 = vpop.f32.mrb[0].mxu1 }
  0xf8   :  { %v1174_v32 = vpop.f32.mrb[3].mxu0  ;;  %v1199_v35 = vpop.f32.mrb[1].mxu1 }
  0xf9   :  { %v747_v33 = vadd.f32 %v1172_v29, %v1043_v27  ;;  %v1175_v34 = vadd.f32 %v1174_v32, %v1173_v30  ;;  %v1200_v36 = vadd.f32 %v1199_v35, %v1198_v31  ;;  %v1201_v37 = vpop.f32.mrb[2].mxu1 }
  0xfa   :  { %v1202_v39 = vpop.f32.mrb[3].mxu1 }
  0xfb   :  { %v750_v38 = vadd.f32 %v1175_v34, %v1043_v27  ;;  %v796_v40 = vadd.f32 %v1200_v36, %v747_v33  ;;  %v1203_v41 = vadd.f32 %v1202_v39, %v1201_v37 }
  0xfd   :  { %v799_v42 = vadd.f32 %v1203_v41, %v750_v38  ;;  %v1176_v43 = vpop.f32.mrb[4].mxu0 }
  0xfe   :  { %v1177_v44 = vpop.f32.mrb[5].mxu0 }
  0xff   :  { %v1178_v45 = vadd.f32 %v1177_v44, %v1176_v43  ;;  %v1179_v46 = vpop.f32.mrb[6].mxu0  ;;  %v1204_v47 = vpop.f32.mrb[4].mxu1 }
 0x100   :  { %v1180_v48 = vpop.f32.mrb[7].mxu0  ;;  %v1205_v51 = vpop.f32.mrb[5].mxu1 }
 0x101   :  { %v755_v49 = vadd.f32 %v1178_v45, %v1043_v27  ;;  %v1181_v50 = vadd.f32 %v1180_v48, %v1179_v46  ;;  %v1206_v52 = vadd.f32 %v1205_v51, %v1204_v47  ;;  %v1207_v53 = vpop.f32.mrb[6].mxu1 }
 0x102   :  { %v1208_v55 = vpop.f32.mrb[7].mxu1 }
 0x103   :  { %v758_v54 = vadd.f32 %v1181_v50, %v1043_v27  ;;  %v804_v56 = vadd.f32 %v1206_v52, %v755_v49  ;;  %v1209_v57 = vadd.f32 %v1208_v55, %v1207_v53  ;;  %v981_v27 = vlaneseq }
 0x105   :  { %v807_v58 = vadd.f32 %v1209_v57, %v758_v54  ;;  %v982_v29 = vshrl.u32 %v981_v27, 7 }
 0x107   :  { %vm992_vm0 = vcmp.lt.s32.totalorder %v982_v29, 2  ;;  %vm1030_vm1 = vcmp.eq.s32.totalorder %v982_v29, 0  ;;  %vm1032_vm2 = vcmp.eq.s32.totalorder %v982_v29, 1 }
 0x115   :  { %v1226_v59 = vpop.f32.mrb[8].mxu0 }
 0x116   :  { %v1227_v60 = vpop.f32.mrb[9].mxu0 }
 0x117   :  { %v1228_v61 = vadd.f32 %v1227_v60, %v1226_v59  ;;  %v1229_v62 = vpop.f32.mrb[10].mxu0  ;;  %v1254_v63 = vpop.f32.mrb[8].mxu1 }
 0x118   :  { %v1230_v0 = vpop.f32.mrb[11].mxu0  ;;  %v1255_v3 = vpop.f32.mrb[9].mxu1 }
 0x119   :  { %v845_v1 = vadd.f32 %v1228_v61, %v796_v40  ;;  %v1231_v2 = vadd.f32 %v1230_v0, %v1229_v62  ;;  %v1256_v4 = vadd.f32 %v1255_v3, %v1254_v63  ;;  %v1257_v5 = vpop.f32.mrb[10].mxu1  ;;  %v1395_v40 = vmov 0.0  }
 0x11a   :  { %v1258_v7 = vpop.f32.mrb[11].mxu1  ;;  %v1138_v41 = vsel %vm992_vm0, 1.0, %v1395_v40 }
 0x11b   :  { %v848_v6 = vadd.f32 %v1231_v2, %v799_v42  ;;  %v1259_v8 = vadd.f32 %v1258_v7, %v1257_v5  ;;  %v894_v9 = vadd.f32 %v1256_v4, %v845_v1 }
 0x11d   :  { %v1232_v10 = vpop.f32.mrb[12].mxu0  ;;  %v897_v12 = vadd.f32 %v1259_v8, %v848_v6 }
 0x11e   :  { %v1233_v11 = vpop.f32.mrb[13].mxu0 }
 0x11f   :  { %v1234_v13 = vadd.f32 %v1233_v11, %v1232_v10  ;;  %v1235_v14 = vpop.f32.mrb[14].mxu0  ;;  %v1260_v15 = vpop.f32.mrb[12].mxu1 }
 0x120   :  { %v1236_v16 = vpop.f32.mrb[15].mxu0  ;;  %v1261_v19 = vpop.f32.mrb[13].mxu1 }
 0x121   :  { %v853_v17 = vadd.f32 %v1234_v13, %v804_v56  ;;  %v1237_v18 = vadd.f32 %v1236_v16, %v1235_v14  ;;  %v1262_v20 = vadd.f32 %v1261_v19, %v1260_v15  ;;  %v1263_v21 = vpop.f32.mrb[14].mxu1 }
 0x122   :  { %v1264_v23 = vpop.f32.mrb[15].mxu1 }
 0x123   :  { %v856_v22 = vadd.f32 %v1237_v18, %v807_v58  ;;  %v1265_v24 = vadd.f32 %v1264_v23, %v1263_v21  ;;  %v902_v25 = vadd.f32 %v1262_v20, %v853_v17 }
 0x125   :  { %v905_v26 = vadd.f32 %v1265_v24, %v856_v22 }
 0x135   :  { %v1294_v28 = vpop.f32.mrb[16].mxu0 }
 0x136   :  { %v951_v30 = vadd.f32 %v1294_v28, %v902_v25  ;;  %v942_v31 = vpop.f32.mrb[17].mxu0 }
 0x137   :  { %v943_v32 = vadd.f32 %v942_v31, %v894_v9  ;;  %v1295_v33 = vpop.f32.mrb[18].mxu0 }
 0x138   :  { %v954_v34 = vadd.f32 %v1295_v33, %v905_v26  ;;  %v945_v35 = vpop.f32.mrb[19].mxu0 }
 0x139   :  { %v946_v36 = vadd.f32 %v945_v35, %v897_v12 }
 0x13a   :  { %v958_v37 = vpack.c.bf16 %v954_v34, %v951_v30 }
 0x13b   :  { %v957_v38 = vpack.c.bf16 %v946_v36, %v943_v32 }
 0x13c   :  { %1153 = vst [vmem:[%s1706_s3 + $0x8] sm:$0xff] %v958_v37   ;;  %v979_v39 = vunpack.c.l.bf16 %v958_v37  ;;  %v980_v42 = vunpack.c.h.bf16 %v958_v37 }
 0x13d   :  { %1147 = vst [vmem:[%s1706_s3] sm:$0xff] %v957_v38   ;;  %v977_v43 = vunpack.c.l.bf16 %v957_v38  ;;  %v978_v44 = vunpack.c.h.bf16 %v957_v38 }
 0x13e   :  { %v1006_v45 = vmul.f32 0.0, %v979_v39  ;;  %v1007_v48 = vmul.f32 0.0, %v980_v42 }
 0x13f   :  { %v1004_v46 = vmul.f32 %v1138_v41, %v977_v43  ;;  %v1005_v47 = vmul.f32 0.0, %v978_v44 }
 0x140   :  { %v1019_v52 = vmul.f32 %v1006_v45, %v1006_v45  ;;  %v1020_v55 = vmul.f32 %v1007_v48, %v1007_v48 }
 0x141   :  { %v1008_v49 = vadd.f32 %v1005_v47, %v1004_v46  ;;  %v1017_v50 = vmul.f32 %v1004_v46, %v1004_v46  ;;  %v1018_v51 = vmul.f32 %v1005_v47, %v1005_v47 }
 0x143   :  { %v1009_v53 = vadd.f32 %v1008_v49, %v1006_v45  ;;  %v1021_v54 = vadd.f32 %v1018_v51, %v1017_v50 }
 0x145   :  { %v1010_v56 = vadd.f32 %v1009_v53, %v1007_v48  ;;  %v1022_v57 = vadd.f32 %v1021_v54, %v1019_v52 }
 0x147   :  { %v1011_v58 = vrot.slane %v1010_v56, 4  ;;  %v1023_v59 = vadd.f32 %v1022_v57, %v1020_v55 }
 0x149   :  { %v1012_v60 = vadd.f32 %v1011_v58, %v1010_v56  ;;  %v1024_v61 = vrot.slane %v1023_v59, 4 }
 0x14b   :  { %v1013_v62 = vrot.slane %v1012_v60, 2  ;;  %v1025_v63 = vadd.f32 %v1024_v61, %v1023_v59 }
 0x14d   :  { %v1014_v0 = vadd.f32 %v1013_v62, %v1012_v60  ;;  %v1026_v1 = vrot.slane %v1025_v63, 2 }
 0x14f   :  { %v1015_v2 = vrot.slane %v1014_v0, 1  ;;  %v1027_v3 = vadd.f32 %v1026_v1, %v1025_v63 }
 0x151   :  { %v1016_v4 = vadd.f32 %v1015_v2, %v1014_v0  ;;  %v1028_v5 = vrot.slane %v1027_v3, 1 }
 0x153   :  { %v1029_v6 = vadd.f32 %v1028_v5, %v1027_v3  ;;  %v1031_v7 = vsel %vm1030_vm1, %v1016_v4, 0.0 }
 0x155   :  { %v1033_v8 = vsel %vm1032_vm2, %v1029_v6, %v1031_v7 }
 0x156   :  { %1034 = vst [vmem:[%s1707_s4] sm:$0xff] %v1033_v8 }

// kernel: unetpp_forward.70
= control target key start
LH: loop header
LB: loop body
LE: loop exit
PB: predicated region body
PF: predicated region fallthrough
CT: control target
= control target key end

     0   :  { %s2432_s1 = inlined_call_operand.vmem [shape: bf16[1792,128], index: 1, kind: input, shape index: {}]   ;;  %s2433_s0 = inlined_call_operand.vmem [shape: bf16[32,1792], index: 0, kind: input, shape index: {}]   ;;  %s2434_s2 = inlined_call_operand.vmem [shape: f32[1,128], index: 2, kind: input, shape index: {}]   ;;  %s2435_s3 = inlined_call_operand.vmem [shape: bf16[32,128], index: 3, kind: output, shape index: {}]  }
   0x1   :  { %v1829_v0 = vld [vmem:[%s2432_s1 + $0x40] sm:$0xff]   ;;  %v1833_v4 = vld [vmem:[%s2432_s1 + $0x48] sm:$0xff]   ;;  %v1837_v8 = vld [vmem:[%s2432_s1 + $0x50] sm:$0xff]  }
   0x2   :  { %v1830_v1 = vld [vmem:[%s2432_s1 + $0xc0] sm:$0xff]   ;;  %1617 = vmatprep.subr.bf16.mxu0 %v1829_v0  ;;  %v1834_v5 = vld [vmem:[%s2432_s1 + $0xc8] sm:$0xff]   ;;  %v1838_v9 = vld [vmem:[%s2432_s1 + $0xd0] sm:$0xff]  }
   0x3   :  { %v1831_v2 = vld [vmem:[%s2432_s1] sm:$0xff]   ;;  %1645 = vmatprep.subr.bf16.mxu1 %v1830_v1  ;;  %v1835_v6 = vld [vmem:[%s2432_s1 + $0x8] sm:$0xff]   ;;  %v1839_v10 = vld [vmem:[%s2432_s1 + $0x10] sm:$0xff]  }
   0x4   :  { %v1832_v3 = vld [vmem:[%s2432_s1 + $0x80] sm:$0xff]   ;;  %1618 = vmatpush3.bf16.msra.mxu0 %v1831_v2  ;;  %v1836_v7 = vld [vmem:[%s2432_s1 + $0x88] sm:$0xff]   ;;  %v1840_v11 = vld [vmem:[%s2432_s1 + $0x90] sm:$0xff]  }
   0x5   :  { %1646 = vmatpush3.bf16.msra.mxu1 %v1832_v3  ;;  %1619 = vmatprep.subr.bf16.mxu0 %v1833_v4  ;;  %v1841_v12 = vld [vmem:[%s2432_s1 + $0x58] sm:$0xff]   ;;  %v1845_v16 = vld [vmem:[%s2432_s1 + $0x60] sm:$0xff]   ;;  %v1849_v20 = vld [vmem:[%s2432_s1 + $0x68] sm:$0xff]  }
   0x6   :  { %1647 = vmatprep.subr.bf16.mxu1 %v1834_v5  ;;  %v1842_v13 = vld [vmem:[%s2432_s1 + $0xd8] sm:$0xff]   ;;  %v1846_v17 = vld [vmem:[%s2432_s1 + $0xe0] sm:$0xff]   ;;  %v1850_v21 = vld [vmem:[%s2432_s1 + $0xe8] sm:$0xff]  }
   0x7   :  { %v1843_v14 = vld [vmem:[%s2432_s1 + $0x18] sm:$0xff]   ;;  %v1847_v18 = vld [vmem:[%s2432_s1 + $0x20] sm:$0xff]   ;;  %v1851_v22 = vld [vmem:[%s2432_s1 + $0x28] sm:$0xff]  }
   0x8   :  { %1620 = vmatpush3.bf16.msra.mxu0 %v1835_v6  ;;  %v1844_v15 = vld [vmem:[%s2432_s1 + $0x98] sm:$0xff]   ;;  %v1848_v19 = vld [vmem:[%s2432_s1 + $0xa0] sm:$0xff]   ;;  %v1852_v23 = vld [vmem:[%s2432_s1 + $0xa8] sm:$0xff]  }
   0x9   :  { %1648 = vmatpush3.bf16.msra.mxu1 %v1836_v7  ;;  %1621 = vmatprep.subr.bf16.mxu0 %v1837_v8  ;;  %v1853_v24 = vld [vmem:[%s2432_s1 + $0x70] sm:$0xff]   ;;  %v1857_v28 = vld [vmem:[%s2432_s1 + $0x78] sm:$0xff]   ;;  %v1864_v34 = vld [vmem:[%s2433_s0 + $0x8] ss:$56 sps:$4 sm:$0xff]  }
   0xa   :  { %1649 = vmatprep.subr.bf16.mxu1 %v1838_v9  ;;  %v1854_v25 = vld [vmem:[%s2432_s1 + $0xf0] sm:$0xff]   ;;  %v1858_v29 = vld [vmem:[%s2432_s1 + $0xf8] sm:$0xff]   ;;  %v1866_v35 = vld [vmem:[%s2433_s0 + $0xc] ss:$56 sps:$4 sm:$0xff]  }
   0xb   :  { %v1855_v26 = vld [vmem:[%s2432_s1 + $0x30] sm:$0xff]   ;;  %v1859_v30 = vld [vmem:[%s2432_s1 + $0x38] sm:$0xff]   ;;  %v1867_v36 = vld [vmem:[%s2432_s1 + $0x140] sm:$0xff]   ;;  %1167 = vmatprep.mubr.bf16.mxu1 %v1866_v35 }
   0xc   :  { %1622 = vmatpush3.bf16.msra.mxu0 %v1839_v10  ;;  %v1856_v27 = vld [vmem:[%s2432_s1 + $0xb0] sm:$0xff]   ;;  %v1860_v31 = vld [vmem:[%s2432_s1 + $0xb8] sm:$0xff]   ;;  %v1868_v37 = vld [vmem:[%s2432_s1 + $0x1c0] sm:$0xff]  }
   0xd   :  { %1650 = vmatpush3.bf16.msra.mxu1 %v1840_v11  ;;  %1623 = vmatprep.subr.bf16.mxu0 %v1841_v12  ;;  %v1861_v32 = vld [vmem:[%s2433_s0] ss:$56 sps:$4 sm:$0xff]   ;;  %v1863_v33 = vld [vmem:[%s2433_s0 + $0x4] ss:$56 sps:$4 sm:$0xff]   ;;  %v1871_v40 = vld [vmem:[%s2432_s1 + $0x148] sm:$0xff]  }
   0xe   :  { %1651 = vmatprep.subr.bf16.mxu1 %v1842_v13  ;;  %1118 = vmatprep.mubr.bf16.mxu0 %v1863_v33  ;;  %v1869_v38 = vld [vmem:[%s2432_s1 + $0x100] sm:$0xff]   ;;  %v1872_v41 = vld [vmem:[%s2432_s1 + $0x1c8] sm:$0xff]   ;;  %v1875_v44 = vld [vmem:[%s2432_s1 + $0x150] sm:$0xff]  }
   0xf   :  { %v1870_v39 = vld [vmem:[%s2432_s1 + $0x180] sm:$0xff]   ;;  %v1873_v42 = vld [vmem:[%s2432_s1 + $0x108] sm:$0xff]   ;;  %v1876_v45 = vld [vmem:[%s2432_s1 + $0x1d0] sm:$0xff]  }
  0x10   :  { %1624 = vmatpush3.bf16.msra.mxu0 %v1843_v14  ;;  %v1874_v43 = vld [vmem:[%s2432_s1 + $0x188] sm:$0xff]   ;;  %v1877_v46 = vld [vmem:[%s2432_s1 + $0x110] sm:$0xff]   ;;  %v1879_v48 = vld [vmem:[%s2432_s1 + $0x158] sm:$0xff]  }
  0x11   :  { %1652 = vmatpush3.bf16.msra.mxu1 %v1844_v15  ;;  %1625 = vmatprep.subr.bf16.mxu0 %v1845_v16  ;;  %v1878_v47 = vld [vmem:[%s2432_s1 + $0x190] sm:$0xff]   ;;  %v1880_v49 = vld [vmem:[%s2432_s1 + $0x1d8] sm:$0xff]   ;;  %v1883_v52 = vld [vmem:[%s2432_s1 + $0x160] sm:$0xff]  }
  0x12   :  { %1653 = vmatprep.subr.bf16.mxu1 %v1846_v17  ;;  %v1881_v50 = vld [vmem:[%s2432_s1 + $0x118] sm:$0xff]   ;;  %v1884_v53 = vld [vmem:[%s2432_s1 + $0x1e0] sm:$0xff]   ;;  %v1887_v56 = vld [vmem:[%s2433_s0 + $0x74] ss:$56 sps:$4 sm:$0xff]  }
  0x13   :  { %v1882_v51 = vld [vmem:[%s2432_s1 + $0x198] sm:$0xff]   ;;  %v1885_v54 = vld [vmem:[%s2432_s1 + $0x120] sm:$0xff]   ;;  %v1889_v57 = vld [vmem:[%s2433_s0 + $0x70] ss:$56 sps:$4 sm:$0xff]  }
  0x14   :  { %1626 = vmatpush3.bf16.msra.mxu0 %v1847_v18  ;;  %v1886_v55 = vld [vmem:[%s2432_s1 + $0x1a0] sm:$0xff]   ;;  %v1890_v58 = vld [vmem:[%s2432_s1 + $0x168] sm:$0xff]   ;;  %v1892_v60 = vld [vmem:[%s2433_s0 + $0x7c] ss:$56 sps:$4 sm:$0xff]  }
  0x15   :  { %1654 = vmatpush3.bf16.msra.mxu1 %v1848_v19  ;;  %1627 = vmatprep.subr.bf16.mxu0 %v1849_v20  ;;  %v1891_v59 = vld [vmem:[%s2432_s1 + $0x1e8] sm:$0xff]   ;;  %v1896_v63 = vld [vmem:[%s2433_s0 + $0x78] ss:$56 sps:$4 sm:$0xff]   ;;  %v1910_v11 = vld [vmem:[%s2433_s0 + $0x1c] ss:$56 sps:$4 sm:$0xff]  }
  0x16   :  { %1655 = vmatprep.subr.bf16.mxu1 %v1850_v21  ;;  %v1894_v61 = vld [vmem:[%s2432_s1 + $0x128] sm:$0xff]   ;;  %v1897_v0 = vld [vmem:[%s2432_s1 + $0x170] sm:$0xff]   ;;  %v1901_v4 = vld [vmem:[%s2432_s1 + $0x178] sm:$0xff]  }
  0x17   :  { %v1895_v62 = vld [vmem:[%s2432_s1 + $0x1a8] sm:$0xff]   ;;  %v1898_v1 = vld [vmem:[%s2432_s1 + $0x1f0] sm:$0xff]   ;;  %v1902_v5 = vld [vmem:[%s2432_s1 + $0x1f8] sm:$0xff]  }
  0x18   :  { %1628 = vmatpush3.bf16.msra.mxu0 %v1851_v22  ;;  %v1899_v2 = vld [vmem:[%s2432_s1 + $0x130] sm:$0xff]   ;;  %v1903_v6 = vld [vmem:[%s2432_s1 + $0x138] sm:$0xff]   ;;  %v1911_v12 = vld [vmem:[%s2432_s1 + $0x240] sm:$0xff]  }
  0x19   :  { %1656 = vmatpush3.bf16.msra.mxu1 %v1852_v23  ;;  %1629 = vmatprep.subr.bf16.mxu0 %v1853_v24  ;;  %v1900_v3 = vld [vmem:[%s2432_s1 + $0x1b0] sm:$0xff]   ;;  %v1904_v7 = vld [vmem:[%s2432_s1 + $0x1b8] sm:$0xff]   ;;  %v1912_v13 = vld [vmem:[%s2432_s1 + $0x2c0] sm:$0xff]  }
  0x1a   :  { %1657 = vmatprep.subr.bf16.mxu1 %v1854_v25  ;;  %v1905_v8 = vld [vmem:[%s2433_s0 + $0x10] ss:$56 sps:$4 sm:$0xff]   ;;  %v1907_v9 = vld [vmem:[%s2433_s0 + $0x14] ss:$56 sps:$4 sm:$0xff]   ;;  %v1913_v14 = vld [vmem:[%s2432_s1 + $0x200] sm:$0xff]  }
  0x1b   :  { %v1908_v10 = vld [vmem:[%s2433_s0 + $0x18] ss:$56 sps:$4 sm:$0xff]   ;;  %v1914_v15 = vld [vmem:[%s2432_s1 + $0x280] sm:$0xff]   ;;  %v1915_v16 = vld [vmem:[%s2432_s1 + $0x248] sm:$0xff]  }
  0x1c   :  { %1630 = vmatpush3.bf16.msra.mxu0 %v1855_v26  ;;  %v1916_v17 = vld [vmem:[%s2432_s1 + $0x2c8] sm:$0xff]   ;;  %v1919_v20 = vld [vmem:[%s2433_s0 + $0x84] ss:$56 sps:$4 sm:$0xff]   ;;  %v1921_v21 = vld [vmem:[%s2433_s0 + $0x80] ss:$56 sps:$4 sm:$0xff]  }
  0x1d   :  { %1658 = vmatpush3.bf16.msra.mxu1 %v1856_v27  ;;  %1631 = vmatprep.subr.bf16.mxu0 %v1857_v28  ;;  %v1917_v18 = vld [vmem:[%s2432_s1 + $0x208] sm:$0xff]   ;;  %v1922_v22 = vld [vmem:[%s2432_s1 + $0x250] sm:$0xff]   ;;  %v1929_v28 = vld [vmem:[%s2432_s1 + $0x258] sm:$0xff]  }
  0x1e   :  { %1659 = vmatprep.subr.bf16.mxu1 %v1858_v29  ;;  %v1918_v19 = vld [vmem:[%s2432_s1 + $0x288] sm:$0xff]   ;;  %v1923_v23 = vld [vmem:[%s2432_s1 + $0x2d0] sm:$0xff]   ;;  %v1930_v29 = vld [vmem:[%s2432_s1 + $0x2d8] sm:$0xff]  }
  0x1f   :  { %v1924_v24 = vld [vmem:[%s2433_s0 + $0x8c] ss:$56 sps:$4 sm:$0xff]   ;;  %v1926_v25 = vld [vmem:[%s2432_s1 + $0x210] sm:$0xff]   ;;  %v1928_v27 = vld [vmem:[%s2433_s0 + $0x88] ss:$56 sps:$4 sm:$0xff]  }
  0x20   :  { %1632 = vmatpush3.bf16.msra.mxu0 %v1859_v30  ;;  %v1927_v26 = vld [vmem:[%s2432_s1 + $0x290] sm:$0xff]   ;;  %v1931_v30 = vld [vmem:[%s2432_s1 + $0x218] sm:$0xff]   ;;  %v1934_v33 = vld [vmem:[%s2432_s1 + $0x2e0] sm:$0xff]  }
  0x21   :  { %1660 = vmatpush3.bf16.msra.mxu1 %v1860_v31  ;;  %1673 = vmatprep.subr.bf16.mxu0 %v1867_v36  ;;  %v1932_v31 = vld [vmem:[%s2432_s1 + $0x298] sm:$0xff]   ;;  %v1936_v35 = vld [vmem:[%s2432_s1 + $0x2a0] sm:$0xff]   ;;  %v1937_v36 = vld [vmem:[%s2432_s1 + $0x268] sm:$0xff]  }
  0x22   :  { %1701 = vmatprep.subr.bf16.mxu1 %v1868_v37  ;;  %v1938_v37 = vld [vmem:[%s2432_s1 + $0x2e8] sm:$0xff]  }
  0x23   :  { %1119 = vmatmul.mubr.bf16.vlgmr.msra.gmra.mrb[0].mxu0 %v1861_v32  ;;  %v1933_v32 = vld [vmem:[%s2432_s1 + $0x260] sm:$0xff]  }
  0x24   :  { %1168 = vmatmul.mubr.bf16.vlgmr.msra.gmra.mrb[0].mxu1 %v1864_v34  ;;  %1674 = vmatpush3.bf16.msra.mxu0 %v1869_v38  ;;  %v1935_v34 = vld [vmem:[%s2432_s1 + $0x220] sm:$0xff]   ;;  %v1939_v38 = vld [vmem:[%s2432_s1 + $0x228] sm:$0xff]  }
  0x25   :  { %1702 = vmatpush3.bf16.msra.mxu1 %v1870_v39  ;;  %1675 = vmatprep.subr.bf16.mxu0 %v1871_v40  ;;  %v1940_v39 = vld [vmem:[%s2432_s1 + $0x2a8] sm:$0xff]   ;;  %v1941_v40 = vld [vmem:[%s2432_s1 + $0x270] sm:$0xff]  }
  0x26   :  { %1703 = vmatprep.subr.bf16.mxu1 %v1872_v41  ;;  %1126 = vmatprep.mubr.bf16.mxu0 %v1887_v56  ;;  %v1942_v41 = vld [vmem:[%s2432_s1 + $0x2f0] sm:$0xff]  }
  0x27   :  { %1175 = vmatprep.mubr.bf16.mxu1 %v1892_v60  ;;  %v1959_v56 = vld [vmem:[%s2433_s0 + $0x94] ss:$56 sps:$4 sm:$0xff]  }
  0x28   :  { %1676 = vmatpush3.bf16.msra.mxu0 %v1873_v42  ;;  %v1943_v42 = vld [vmem:[%s2432_s1 + $0x230] sm:$0xff]  }
  0x29   :  { %1704 = vmatpush3.bf16.msra.mxu1 %v1874_v43  ;;  %1677 = vmatprep.subr.bf16.mxu0 %v1875_v44  ;;  %v1944_v43 = vld [vmem:[%s2432_s1 + $0x2b0] sm:$0xff]   ;;  %v1945_v44 = vld [vmem:[%s2432_s1 + $0x278] sm:$0xff]  }
  0x2a   :  { %1705 = vmatprep.subr.bf16.mxu1 %v1876_v45  ;;  %v1946_v45 = vld [vmem:[%s2432_s1 + $0x2f8] sm:$0xff]   ;;  %v1965_v60 = vld [vmem:[%s2432_s1 + $0x310] sm:$0xff]  }
  0x2b   :  { %1127 = vmatmul.mubr.bf16.gmra.mrb[4].mxu0 %v1889_v57  ;;  %v1961_v57 = vld [vmem:[%s2433_s0 + $0x90] ss:$56 sps:$4 sm:$0xff]  }
  0x2c   :  { %1678 = vmatpush3.bf16.msra.mxu0 %v1877_v46  ;;  %1176 = vmatmul.mubr.bf16.gmra.mrb[4].mxu1 %v1896_v63  ;;  %v1947_v46 = vld [vmem:[%s2432_s1 + $0x238] sm:$0xff]  }
  0x2d   :  { %1706 = vmatpush3.bf16.msra.mxu1 %v1878_v47  ;;  %1679 = vmatprep.subr.bf16.mxu0 %v1879_v48  ;;  %v1948_v47 = vld [vmem:[%s2432_s1 + $0x2b8] sm:$0xff]  }
  0x2e   :  { %1707 = vmatprep.subr.bf16.mxu1 %v1880_v49  ;;  %1216 = vmatprep.mubr.bf16.mxu0 %v1907_v9  ;;  %v1949_v48 = vld [vmem:[%s2433_s0 + $0x20] ss:$56 sps:$4 sm:$0xff]   ;;  %v1951_v49 = vld [vmem:[%s2433_s0 + $0x24] ss:$56 sps:$4 sm:$0xff]  }
  0x2f   :  { %1265 = vmatprep.mubr.bf16.mxu1 %v1910_v11  ;;  %v1968_v63 = vld [vmem:[%s2432_s1 + $0x318] sm:$0xff]  }
  0x30   :  { %1680 = vmatpush3.bf16.msra.mxu0 %v1881_v50  ;;  %v1952_v50 = vld [vmem:[%s2433_s0 + $0x28] ss:$56 sps:$4 sm:$0xff]   ;;  %v1976_v9 = vld [vmem:[%s2432_s1 + $0x338] sm:$0xff]  }
  0x31   :  { %1708 = vmatpush3.bf16.msra.mxu1 %v1882_v51  ;;  %1681 = vmatprep.subr.bf16.mxu0 %v1883_v52  ;;  %v1954_v51 = vld [vmem:[%s2433_s0 + $0x2c] ss:$56 sps:$4 sm:$0xff]   ;;  %v1980_v11 = vld [vmem:[%s2433_s0 + $0xa0] ss:$56 sps:$4 sm:$0xff]  }
  0x32   :  { %1709 = vmatprep.subr.bf16.mxu1 %v1884_v53  ;;  %v1955_v52 = vld [vmem:[%s2432_s1 + $0x340] sm:$0xff]  }
  0x33   :  { %v1956_v53 = vld [vmem:[%s2432_s1 + $0x300] sm:$0xff]  }
  0x34   :  { %1682 = vmatpush3.bf16.msra.mxu0 %v1885_v54  ;;  %v1957_v54 = vld [vmem:[%s2432_s1 + $0x348] sm:$0xff]  }
  0x35   :  { %1710 = vmatpush3.bf16.msra.mxu1 %v1886_v55  ;;  %1683 = vmatprep.subr.bf16.mxu0 %v1890_v58  ;;  %v1958_v55 = vld [vmem:[%s2432_s1 + $0x308] sm:$0xff]   ;;  %v1962_v58 = vld [vmem:[%s2432_s1 + $0x350] sm:$0xff]  }
  0x36   :  { %1711 = vmatprep.subr.bf16.mxu1 %v1891_v59  ;;  %v1963_v59 = vld [vmem:[%s2433_s0 + $0x9c] ss:$56 sps:$4 sm:$0xff]  }
  0x38   :  { %1684 = vmatpush3.bf16.msra.mxu0 %v1894_v61  ;;  %v1966_v61 = vld [vmem:[%s2433_s0 + $0x98] ss:$56 sps:$4 sm:$0xff]  }
  0x39   :  { %1712 = vmatpush3.bf16.msra.mxu1 %v1895_v62  ;;  %1685 = vmatprep.subr.bf16.mxu0 %v1897_v0  ;;  %v1967_v62 = vld [vmem:[%s2432_s1 + $0x358] sm:$0xff]   ;;  %v1969_v0 = vld [vmem:[%s2432_s1 + $0x360] sm:$0xff]  }
  0x3a   :  { %1713 = vmatprep.subr.bf16.mxu1 %v1898_v1  ;;  %v1970_v1 = vld [vmem:[%s2432_s1 + $0x320] sm:$0xff]  }
  0x3c   :  { %1686 = vmatpush3.bf16.msra.mxu0 %v1899_v2  ;;  %v1971_v2 = vld [vmem:[%s2432_s1 + $0x368] sm:$0xff]  }
  0x3d   :  { %1714 = vmatpush3.bf16.msra.mxu1 %v1900_v3  ;;  %1687 = vmatprep.subr.bf16.mxu0 %v1901_v4  ;;  %v1972_v3 = vld [vmem:[%s2432_s1 + $0x328] sm:$0xff]  }
  0x3e   :  { %1715 = vmatprep.subr.bf16.mxu1 %v1902_v5  ;;  %v1979_v4 = vld [vmem:[%s2433_s0 + $0x34] ss:$56 sps:$4 sm:$0xff]  }
  0x3f   :  { %v1973_v5 = vld [vmem:[%s2432_s1 + $0x370] sm:$0xff]  }
  0x40   :  { %1688 = vmatpush3.bf16.msra.mxu0 %v1903_v6  ;;  %v1982_v6 = vld [vmem:[%s2433_s0 + $0xa4] ss:$56 sps:$4 sm:$0xff]  }
  0x41   :  { %1716 = vmatpush3.bf16.msra.mxu1 %v1904_v7  ;;  %1729 = vmatprep.subr.bf16.mxu0 %v1911_v12  ;;  %v1974_v7 = vld [vmem:[%s2432_s1 + $0x330] sm:$0xff]  }
  0x42   :  { %1757 = vmatprep.subr.bf16.mxu1 %v1912_v13 }
  0x43   :  { %1217 = vmatmul.mubr.bf16.vlgmr.msra.gmra.mrb[8].mxu0 %v1905_v8  ;;  %v1975_v8 = vld [vmem:[%s2432_s1 + $0x378] sm:$0xff]  }
  0x44   :  { %1266 = vmatmul.mubr.bf16.vlgmr.msra.gmra.mrb[8].mxu1 %v1908_v10  ;;  %1730 = vmatpush3.bf16.msra.mxu0 %v1913_v14  ;;  %v1977_v10 = vld [vmem:[%s2433_s0 + $0x30] ss:$56 sps:$4 sm:$0xff]   ;;  %v1457_v14 = vld [vmem:[%s2434_s2] ss:$0 sm:$0xff] }
  0x45   :  { %1758 = vmatpush3.bf16.msra.mxu1 %v1914_v15  ;;  %1731 = vmatprep.subr.bf16.mxu0 %v1915_v16 }
  0x46   :  { %1759 = vmatprep.subr.bf16.mxu1 %v1916_v17  ;;  %1224 = vmatprep.mubr.bf16.mxu0 %v1919_v20 }
  0x47   :  { %1273 = vmatprep.mubr.bf16.mxu1 %v1924_v24 }
  0x48   :  { %1732 = vmatpush3.bf16.msra.mxu0 %v1917_v18 }
  0x49   :  { %1760 = vmatpush3.bf16.msra.mxu1 %v1918_v19  ;;  %1733 = vmatprep.subr.bf16.mxu0 %v1922_v22 }
  0x4a   :  { %1761 = vmatprep.subr.bf16.mxu1 %v1923_v23 }
  0x4b   :  { %1225 = vmatmul.mubr.bf16.gmra.mrb[12].mxu0 %v1921_v21 }
  0x4c   :  { %1734 = vmatpush3.bf16.msra.mxu0 %v1926_v25  ;;  %1274 = vmatmul.mubr.bf16.gmra.mrb[12].mxu1 %v1928_v27 }
  0x4d   :  { %1762 = vmatpush3.bf16.msra.mxu1 %v1927_v26  ;;  %1735 = vmatprep.subr.bf16.mxu0 %v1929_v28 }
  0x4e   :  { %1763 = vmatprep.subr.bf16.mxu1 %v1930_v29  ;;  %1314 = vmatprep.mubr.bf16.mxu0 %v1951_v49 }
  0x4f   :  { %1363 = vmatprep.mubr.bf16.mxu1 %v1954_v51 }
  0x50   :  { %1736 = vmatpush3.bf16.msra.mxu0 %v1931_v30 }
  0x51   :  { %1764 = vmatpush3.bf16.msra.mxu1 %v1932_v31  ;;  %1737 = vmatprep.subr.bf16.mxu0 %v1933_v32 }
  0x52   :  { %1765 = vmatprep.subr.bf16.mxu1 %v1934_v33 }
  0x54   :  { %1738 = vmatpush3.bf16.msra.mxu0 %v1935_v34 }
  0x55   :  { %1766 = vmatpush3.bf16.msra.mxu1 %v1936_v35  ;;  %1739 = vmatprep.subr.bf16.mxu0 %v1937_v36 }
  0x56   :  { %1767 = vmatprep.subr.bf16.mxu1 %v1938_v37 }
  0x58   :  { %1740 = vmatpush3.bf16.msra.mxu0 %v1939_v38 }
  0x59   :  { %1768 = vmatpush3.bf16.msra.mxu1 %v1940_v39  ;;  %1741 = vmatprep.subr.bf16.mxu0 %v1941_v40 }
  0x5a   :  { %1769 = vmatprep.subr.bf16.mxu1 %v1942_v41 }
  0x5c   :  { %1742 = vmatpush3.bf16.msra.mxu0 %v1943_v42 }
  0x5d   :  { %1770 = vmatpush3.bf16.msra.mxu1 %v1944_v43  ;;  %1743 = vmatprep.subr.bf16.mxu0 %v1945_v44 }
  0x5e   :  { %1771 = vmatprep.subr.bf16.mxu1 %v1946_v45 }
  0x60   :  { %1744 = vmatpush3.bf16.msra.mxu0 %v1947_v46 }
  0x61   :  { %1772 = vmatpush3.bf16.msra.mxu1 %v1948_v47  ;;  %1785 = vmatprep.subr.bf16.mxu0 %v1955_v52 }
  0x62   :  { %1813 = vmatprep.subr.bf16.mxu1 %v1955_v52 }
  0x63   :  { %1315 = vmatmul.mubr.bf16.vlgmr.msra.gmra.mrb[16].mxu0 %v1949_v48 }
  0x64   :  { %1364 = vmatmul.mubr.bf16.vlgmr.msra.gmra.mrb[16].mxu1 %v1952_v50  ;;  %1786 = vmatpush3.bf16.msra.mxu0 %v1956_v53 }
  0x65   :  { %1821 = vmatpush3.bf16.msra.mxu1 %v1956_v53  ;;  %1787 = vmatprep.subr.bf16.mxu0 %v1957_v54 }
  0x66   :  { %1814 = vmatprep.subr.bf16.mxu1 %v1957_v54  ;;  %1322 = vmatprep.mubr.bf16.mxu0 %v1959_v56 }
  0x67   :  { %1371 = vmatprep.mubr.bf16.mxu1 %v1963_v59 }
  0x68   :  { %1788 = vmatpush3.bf16.msra.mxu0 %v1958_v55 }
  0x69   :  { %1822 = vmatpush3.bf16.msra.mxu1 %v1958_v55  ;;  %1789 = vmatprep.subr.bf16.mxu0 %v1962_v58 }
  0x6a   :  { %1815 = vmatprep.subr.bf16.mxu1 %v1962_v58 }
  0x6b   :  { %1323 = vmatmul.mubr.bf16.gmra.mrb[20].mxu0 %v1961_v57 }
  0x6c   :  { %1790 = vmatpush3.bf16.msra.mxu0 %v1965_v60  ;;  %1372 = vmatmul.mubr.bf16.gmra.mrb[20].mxu1 %v1966_v61 }
  0x6d   :  { %1823 = vmatpush3.bf16.msra.mxu1 %v1965_v60  ;;  %1791 = vmatprep.subr.bf16.mxu0 %v1967_v62 }
  0x6e   :  { %1816 = vmatprep.subr.bf16.mxu1 %v1967_v62  ;;  %1412 = vmatprep.mubr.bf16.mxu0 %v1979_v4 }
  0x6f   :  { %1420 = vmatprep.mubr.bf16.mxu1 %v1982_v6 }
  0x70   :  { %1792 = vmatpush3.bf16.msra.mxu0 %v1968_v63 }
  0x71   :  { %1824 = vmatpush3.bf16.msra.mxu1 %v1968_v63  ;;  %1793 = vmatprep.subr.bf16.mxu0 %v1969_v0 }
  0x72   :  { %1817 = vmatprep.subr.bf16.mxu1 %v1969_v0 }
  0x74   :  { %1794 = vmatpush3.bf16.msra.mxu0 %v1970_v1 }
  0x75   :  { %1825 = vmatpush3.bf16.msra.mxu1 %v1970_v1  ;;  %1795 = vmatprep.subr.bf16.mxu0 %v1971_v2 }
  0x76   :  { %1818 = vmatprep.subr.bf16.mxu1 %v1971_v2 }
  0x78   :  { %1796 = vmatpush3.bf16.msra.mxu0 %v1972_v3 }
  0x79   :  { %1826 = vmatpush3.bf16.msra.mxu1 %v1972_v3  ;;  %1797 = vmatprep.subr.bf16.mxu0 %v1973_v5 }
  0x7a   :  { %1819 = vmatprep.subr.bf16.mxu1 %v1973_v5 }
  0x7c   :  { %1798 = vmatpush3.bf16.msra.mxu0 %v1974_v7 }
  0x7d   :  { %1827 = vmatpush3.bf16.msra.mxu1 %v1974_v7  ;;  %1799 = vmatprep.subr.bf16.mxu0 %v1975_v8 }
  0x7e   :  { %1820 = vmatprep.subr.bf16.mxu1 %v1975_v8 }
  0x80   :  { %1800 = vmatpush3.bf16.msra.mxu0 %v1976_v9 }
  0x81   :  { %1828 = vmatpush3.bf16.msra.mxu1 %v1976_v9 }
  0x83   :  { %1413 = vmatmul.mubr.bf16.vlgmr.msra.gmra.mrb[24].mxu0 %v1977_v10 }
  0x84   :  { %1421 = vmatmul.mubr.bf16.vlgmr.msra.gmra.mrb[24].mxu1 %v1980_v11 }
  0xf6   :  { %v1633_v12 = vpop.f32.mrb[0].mxu0 }
  0xf7   :  { %v1661_v13 = vpop.f32.mrb[0].mxu1  ;;  %v1634_v15 = vpop.f32.mrb[1].mxu0 }
  0xf8   :  { %v1635_v16 = vadd.f32 %v1634_v15, %v1633_v12  ;;  %v1662_v17 = vpop.f32.mrb[1].mxu1  ;;  %v1636_v18 = vpop.f32.mrb[2].mxu0 }
  0xf9   :  { %v1663_v19 = vadd.f32 %v1662_v17, %v1661_v13  ;;  %v1664_v20 = vpop.f32.mrb[2].mxu1  ;;  %v1637_v21 = vpop.f32.mrb[3].mxu0 }
  0xfa   :  { %v1121_v22 = vadd.f32 %v1635_v16, %v1457_v14  ;;  %v1638_v23 = vadd.f32 %v1637_v21, %v1636_v18  ;;  %v1665_v24 = vpop.f32.mrb[3].mxu1 }
  0xfb   :  { %v1666_v25 = vadd.f32 %v1665_v24, %v1664_v20 }
  0xfc   :  { %v1170_v26 = vadd.f32 %v1663_v19, %v1121_v22  ;;  %v1124_v27 = vadd.f32 %v1638_v23, %v1457_v14 }
  0xfe   :  { %v1173_v28 = vadd.f32 %v1666_v25, %v1124_v27  ;;  %v1639_v29 = vpop.f32.mrb[4].mxu0 }
  0xff   :  { %v1640_v30 = vpop.f32.mrb[5].mxu0  ;;  %v1667_v36 = vpop.f32.mrb[4].mxu1 }
 0x100   :  { %v1641_v31 = vadd.f32 %v1640_v30, %v1639_v29  ;;  %v1642_v32 = vpop.f32.mrb[6].mxu0  ;;  %v1668_v37 = vpop.f32.mrb[5].mxu1 }
 0x101   :  { %v1643_v33 = vpop.f32.mrb[7].mxu0  ;;  %v1669_v39 = vadd.f32 %v1668_v37, %v1667_v36  ;;  %v1670_v40 = vpop.f32.mrb[6].mxu1 }
 0x102   :  { %v1644_v34 = vadd.f32 %v1643_v33, %v1642_v32  ;;  %v1129_v35 = vadd.f32 %v1641_v31, %v1457_v14  ;;  %v1671_v41 = vpop.f32.mrb[7].mxu1 }
 0x103   :  { %v1672_v43 = vadd.f32 %v1671_v41, %v1670_v40 }
 0x104   :  { %v1132_v38 = vadd.f32 %v1644_v34, %v1457_v14  ;;  %v1178_v42 = vadd.f32 %v1669_v39, %v1129_v35 }
 0x106   :  { %v1181_v44 = vadd.f32 %v1672_v43, %v1132_v38 }
 0x116   :  { %v1689_v45 = vpop.f32.mrb[8].mxu0 }
 0x117   :  { %v1717_v46 = vpop.f32.mrb[8].mxu1  ;;  %v1690_v47 = vpop.f32.mrb[9].mxu0 }
 0x118   :  { %v1691_v48 = vadd.f32 %v1690_v47, %v1689_v45  ;;  %v1718_v49 = vpop.f32.mrb[9].mxu1  ;;  %v1692_v50 = vpop.f32.mrb[10].mxu0 }
 0x119   :  { %v1719_v51 = vadd.f32 %v1718_v49, %v1717_v46  ;;  %v1720_v52 = vpop.f32.mrb[10].mxu1  ;;  %v1693_v53 = vpop.f32.mrb[11].mxu0 }
 0x11a   :  { %v1219_v54 = vadd.f32 %v1691_v48, %v1170_v26  ;;  %v1694_v55 = vadd.f32 %v1693_v53, %v1692_v50  ;;  %v1721_v56 = vpop.f32.mrb[11].mxu1 }
 0x11b   :  { %v1722_v57 = vadd.f32 %v1721_v56, %v1720_v52 }
 0x11c   :  { %v1268_v58 = vadd.f32 %v1719_v51, %v1219_v54  ;;  %v1222_v59 = vadd.f32 %v1694_v55, %v1173_v28 }
 0x11e   :  { %v1271_v60 = vadd.f32 %v1722_v57, %v1222_v59  ;;  %v1695_v61 = vpop.f32.mrb[12].mxu0 }
 0x11f   :  { %v1696_v62 = vpop.f32.mrb[13].mxu0  ;;  %v1723_v4 = vpop.f32.mrb[12].mxu1 }
 0x120   :  { %v1697_v63 = vadd.f32 %v1696_v62, %v1695_v61  ;;  %v1698_v0 = vpop.f32.mrb[14].mxu0  ;;  %v1724_v6 = vpop.f32.mrb[13].mxu1 }
 0x121   :  { %v1699_v1 = vpop.f32.mrb[15].mxu0  ;;  %v1725_v7 = vadd.f32 %v1724_v6, %v1723_v4  ;;  %v1726_v8 = vpop.f32.mrb[14].mxu1 }
 0x122   :  { %v1227_v2 = vadd.f32 %v1697_v63, %v1178_v42  ;;  %v1700_v3 = vadd.f32 %v1699_v1, %v1698_v0  ;;  %v1727_v9 = vpop.f32.mrb[15].mxu1 }
 0x123   :  { %v1728_v11 = vadd.f32 %v1727_v9, %v1726_v8 }
 0x124   :  { %v1230_v5 = vadd.f32 %v1700_v3, %v1181_v44  ;;  %v1276_v10 = vadd.f32 %v1725_v7, %v1227_v2 }
 0x126   :  { %v1279_v12 = vadd.f32 %v1728_v11, %v1230_v5 }
 0x136   :  { %v1745_v13 = vpop.f32.mrb[16].mxu0 }
 0x137   :  { %v1746_v14 = vpop.f32.mrb[17].mxu0  ;;  %v1773_v15 = vpop.f32.mrb[16].mxu1 }
 0x138   :  { %v1747_v16 = vadd.f32 %v1746_v14, %v1745_v13  ;;  %v1748_v17 = vpop.f32.mrb[18].mxu0  ;;  %v1774_v18 = vpop.f32.mrb[17].mxu1 }
 0x139   :  { %v1749_v19 = vpop.f32.mrb[19].mxu0  ;;  %v1775_v21 = vadd.f32 %v1774_v18, %v1773_v15  ;;  %v1776_v22 = vpop.f32.mrb[18].mxu1 }
 0x13a   :  { %v1317_v20 = vadd.f32 %v1747_v16, %v1268_v58  ;;  %v1750_v23 = vadd.f32 %v1749_v19, %v1748_v17  ;;  %v1777_v24 = vpop.f32.mrb[19].mxu1 }
 0x13b   :  { %v1778_v27 = vadd.f32 %v1777_v24, %v1776_v22 }
 0x13c   :  { %v1366_v25 = vadd.f32 %v1775_v21, %v1317_v20  ;;  %v1320_v26 = vadd.f32 %v1750_v23, %v1271_v60 }
 0x13e   :  { %v1369_v28 = vadd.f32 %v1778_v27, %v1320_v26  ;;  %v1751_v29 = vpop.f32.mrb[20].mxu0 }
 0x13f   :  { %v1752_v30 = vpop.f32.mrb[21].mxu0  ;;  %v1779_v33 = vpop.f32.mrb[20].mxu1 }
 0x140   :  { %v1753_v31 = vadd.f32 %v1752_v30, %v1751_v29  ;;  %v1754_v32 = vpop.f32.mrb[22].mxu0  ;;  %v1780_v37 = vpop.f32.mrb[21].mxu1 }
 0x141   :  { %v1755_v34 = vpop.f32.mrb[23].mxu0  ;;  %v1781_v38 = vadd.f32 %v1780_v37, %v1779_v33  ;;  %v1782_v39 = vpop.f32.mrb[22].mxu1 }
 0x142   :  { %v1325_v35 = vadd.f32 %v1753_v31, %v1276_v10  ;;  %v1756_v36 = vadd.f32 %v1755_v34, %v1754_v32  ;;  %v1783_v41 = vpop.f32.mrb[23].mxu1 }
 0x143   :  { %v1784_v43 = vadd.f32 %v1783_v41, %v1782_v39 }
 0x144   :  { %v1328_v40 = vadd.f32 %v1756_v36, %v1279_v12  ;;  %v1374_v42 = vadd.f32 %v1781_v38, %v1325_v35 }
 0x146   :  { %v1377_v44 = vadd.f32 %v1784_v43, %v1328_v40 }
 0x156   :  { %v1801_v45 = vpop.f32.mrb[24].mxu0 }
 0x157   :  { %v1807_v46 = vpop.f32.mrb[24].mxu1  ;;  %v1802_v47 = vpop.f32.mrb[25].mxu0 }
 0x158   :  { %v1803_v48 = vadd.f32 %v1802_v47, %v1801_v45  ;;  %v1808_v49 = vpop.f32.mrb[25].mxu1  ;;  %v1804_v50 = vpop.f32.mrb[26].mxu0 }
 0x159   :  { %v1809_v51 = vadd.f32 %v1808_v49, %v1807_v46  ;;  %v1810_v52 = vpop.f32.mrb[26].mxu1  ;;  %v1805_v53 = vpop.f32.mrb[27].mxu0 }
 0x15a   :  { %v1415_v54 = vadd.f32 %v1803_v48, %v1366_v25  ;;  %v1806_v55 = vadd.f32 %v1805_v53, %v1804_v50  ;;  %v1811_v56 = vpop.f32.mrb[27].mxu1 }
 0x15b   :  { %v1423_v57 = vadd.f32 %v1809_v51, %v1374_v42  ;;  %v1812_v58 = vadd.f32 %v1811_v56, %v1810_v52 }
 0x15c   :  { %v1418_v59 = vadd.f32 %v1806_v55, %v1369_v28  ;;  %v1429_v61 = vmax.f32 %v1415_v54, 0.0 }
 0x15d   :  { %v1426_v60 = vadd.f32 %v1812_v58, %v1377_v44  ;;  %v1431_v63 = vmax.f32 %v1423_v57, 0.0 }
 0x15e   :  { %v1430_v62 = vmax.f32 %v1418_v59, 0.0 }
 0x15f   :  { %v1432_v0 = vmax.f32 %v1426_v60, 0.0 }
 0x160   :  { %v1609_v1 = vpack.c.bf16 %v1430_v62, %v1429_v61 }
 0x161   :  { %v1614_v2 = vpack.c.bf16 %v1432_v0, %v1431_v63 }
 0x162   :  { %1610 = vst [vmem:[%s2435_s3] sm:$0xff] %v1609_v1  }
 0x163   :  { %1616 = vst [vmem:[%s2435_s3 + $0x8] sm:$0xff] %v1614_v2  }

// kernel: unetpp_forward.67
= control target key start
LH: loop header
LB: loop body
LE: loop exit
PB: predicated region body
PF: predicated region fallthrough
CT: control target
= control target key end

     0   :  { %s1301_s1 = inlined_call_operand.vmem [shape: bf16[896,128], index: 1, kind: input, shape index: {}]   ;;  %s1302_s0 = inlined_call_operand.vmem [shape: bf16[32,896], index: 0, kind: input, shape index: {}]   ;;  %s1303_s2 = inlined_call_operand.vmem [shape: f32[1,128], index: 2, kind: input, shape index: {}]   ;;  %s1304_s3 = inlined_call_operand.vmem [shape: bf16[32,128], index: 3, kind: output, shape index: {}]  }
   0x1   :  { %v986_v0 = vld [vmem:[%s1301_s1 + $0x40] sm:$0xff]   ;;  %v990_v4 = vld [vmem:[%s1301_s1 + $0x48] sm:$0xff]   ;;  %v994_v8 = vld [vmem:[%s1301_s1 + $0x50] sm:$0xff]  }
   0x2   :  { %v987_v1 = vld [vmem:[%s1301_s1] sm:$0xff]   ;;  %872 = vmatprep.subr.bf16.mxu0 %v986_v0  ;;  %v991_v5 = vld [vmem:[%s1301_s1 + $0x8] sm:$0xff]   ;;  %v995_v9 = vld [vmem:[%s1301_s1 + $0x10] sm:$0xff]  }
   0x3   :  { %v988_v2 = vld [vmem:[%s1301_s1 + $0xc0] sm:$0xff]   ;;  %873 = vmatpush3.bf16.msra.mxu0 %v987_v1  ;;  %v992_v6 = vld [vmem:[%s1301_s1 + $0xc8] sm:$0xff]   ;;  %v996_v10 = vld [vmem:[%s1301_s1 + $0xd0] sm:$0xff]  }
   0x4   :  { %v989_v3 = vld [vmem:[%s1301_s1 + $0x80] sm:$0xff]   ;;  %900 = vmatprep.subr.bf16.mxu1 %v988_v2  ;;  %874 = vmatprep.subr.bf16.mxu0 %v990_v4  ;;  %v993_v7 = vld [vmem:[%s1301_s1 + $0x88] sm:$0xff]   ;;  %v997_v11 = vld [vmem:[%s1301_s1 + $0x90] sm:$0xff]  }
   0x5   :  { %901 = vmatpush3.bf16.msra.mxu1 %v989_v3  ;;  %v998_v12 = vld [vmem:[%s1301_s1 + $0x58] sm:$0xff]   ;;  %v1002_v16 = vld [vmem:[%s1301_s1 + $0x60] sm:$0xff]   ;;  %v1006_v20 = vld [vmem:[%s1301_s1 + $0x68] sm:$0xff]  }
   0x6   :  { %902 = vmatprep.subr.bf16.mxu1 %v992_v6  ;;  %v999_v13 = vld [vmem:[%s1301_s1 + $0x18] sm:$0xff]   ;;  %v1003_v17 = vld [vmem:[%s1301_s1 + $0x20] sm:$0xff]   ;;  %v1007_v21 = vld [vmem:[%s1301_s1 + $0x28] sm:$0xff]  }
   0x7   :  { %875 = vmatpush3.bf16.msra.mxu0 %v991_v5  ;;  %v1000_v14 = vld [vmem:[%s1301_s1 + $0xd8] sm:$0xff]   ;;  %v1004_v18 = vld [vmem:[%s1301_s1 + $0xe0] sm:$0xff]   ;;  %v1008_v22 = vld [vmem:[%s1301_s1 + $0xe8] sm:$0xff]  }
   0x8   :  { %876 = vmatprep.subr.bf16.mxu0 %v994_v8  ;;  %v1001_v15 = vld [vmem:[%s1301_s1 + $0x98] sm:$0xff]   ;;  %v1005_v19 = vld [vmem:[%s1301_s1 + $0xa0] sm:$0xff]   ;;  %v1009_v23 = vld [vmem:[%s1301_s1 + $0xa8] sm:$0xff]  }
   0x9   :  { %903 = vmatpush3.bf16.msra.mxu1 %v993_v7  ;;  %v1010_v24 = vld [vmem:[%s1301_s1 + $0x70] sm:$0xff]   ;;  %v1014_v28 = vld [vmem:[%s1301_s1 + $0x78] sm:$0xff]   ;;  %v1019_v32 = vld [vmem:[%s1302_s0 + $0x4] ss:$28 sps:$4 sm:$0xff]  }
   0xa   :  { %904 = vmatprep.subr.bf16.mxu1 %v996_v10  ;;  %v1011_v25 = vld [vmem:[%s1301_s1 + $0x30] sm:$0xff]   ;;  %v1015_v29 = vld [vmem:[%s1301_s1 + $0x38] sm:$0xff]   ;;  %590 = vmatprep.mubr.bf16.mxu0 %v1019_v32  ;;  %v1021_v34 = vld [vmem:[%s1301_s1 + $0x140] sm:$0xff]  }
   0xb   :  { %877 = vmatpush3.bf16.msra.mxu0 %v995_v9  ;;  %v1012_v26 = vld [vmem:[%s1301_s1 + $0xf0] sm:$0xff]   ;;  %v1016_v30 = vld [vmem:[%s1301_s1 + $0xf8] sm:$0xff]   ;;  %v1022_v35 = vld [vmem:[%s1302_s0 + $0x8] ss:$28 sps:$4 sm:$0xff]  }
   0xc   :  { %878 = vmatprep.subr.bf16.mxu0 %v998_v12  ;;  %v1013_v27 = vld [vmem:[%s1301_s1 + $0xb0] sm:$0xff]   ;;  %v1017_v31 = vld [vmem:[%s1302_s0] ss:$28 sps:$4 sm:$0xff]   ;;  %v1024_v36 = vld [vmem:[%s1302_s0 + $0xc] ss:$28 sps:$4 sm:$0xff]  }
   0xd   :  { %905 = vmatpush3.bf16.msra.mxu1 %v997_v11  ;;  %v1020_v33 = vld [vmem:[%s1301_s1 + $0xb8] sm:$0xff]   ;;  %v1025_v37 = vld [vmem:[%s1301_s1 + $0x100] sm:$0xff]   ;;  %639 = vmatprep.mubr.bf16.mxu1 %v1024_v36  ;;  %v1026_v38 = vld [vmem:[%s1301_s1 + $0x148] sm:$0xff]  }
   0xe   :  { %906 = vmatprep.subr.bf16.mxu1 %v1000_v14  ;;  %v1027_v39 = vld [vmem:[%s1301_s1 + $0x180] sm:$0xff]   ;;  %v1028_v40 = vld [vmem:[%s1301_s1 + $0x108] sm:$0xff]   ;;  %v1029_v41 = vld [vmem:[%s1301_s1 + $0x150] sm:$0xff]  }
   0xf   :  { %879 = vmatpush3.bf16.msra.mxu0 %v999_v13  ;;  %v1030_v42 = vld [vmem:[%s1301_s1 + $0x188] sm:$0xff]   ;;  %v1031_v43 = vld [vmem:[%s1301_s1 + $0x110] sm:$0xff]   ;;  %v1032_v44 = vld [vmem:[%s1301_s1 + $0x158] sm:$0xff]  }
  0x10   :  { %880 = vmatprep.subr.bf16.mxu0 %v1002_v16  ;;  %v1033_v45 = vld [vmem:[%s1301_s1 + $0x190] sm:$0xff]   ;;  %v1034_v46 = vld [vmem:[%s1301_s1 + $0x118] sm:$0xff]   ;;  %v1035_v47 = vld [vmem:[%s1301_s1 + $0x160] sm:$0xff]  }
  0x11   :  { %907 = vmatpush3.bf16.msra.mxu1 %v1001_v15  ;;  %v1036_v48 = vld [vmem:[%s1301_s1 + $0x198] sm:$0xff]   ;;  %v1037_v49 = vld [vmem:[%s1301_s1 + $0x120] sm:$0xff]   ;;  %v1040_v51 = vld [vmem:[%s1301_s1 + $0x168] sm:$0xff]  }
  0x12   :  { %908 = vmatprep.subr.bf16.mxu1 %v1004_v18  ;;  %v1038_v50 = vld [vmem:[%s1302_s0 + $0x3c] ss:$28 sps:$4 sm:$0xff]   ;;  %v1041_v52 = vld [vmem:[%s1301_s1 + $0x1a0] sm:$0xff]   ;;  %v1043_v54 = vld [vmem:[%s1301_s1 + $0x128] sm:$0xff]  }
  0x13   :  { %881 = vmatpush3.bf16.msra.mxu0 %v1003_v17  ;;  %v1042_v53 = vld [vmem:[%s1302_s0 + $0x38] ss:$28 sps:$4 sm:$0xff]   ;;  %v1044_v55 = vld [vmem:[%s1302_s0 + $0x44] ss:$28 sps:$4 sm:$0xff]   ;;  %v1048_v58 = vld [vmem:[%s1301_s1 + $0x1a8] sm:$0xff]  }
  0x14   :  { %882 = vmatprep.subr.bf16.mxu0 %v1006_v20  ;;  %v1046_v56 = vld [vmem:[%s1302_s0 + $0x40] ss:$28 sps:$4 sm:$0xff]   ;;  %v1047_v57 = vld [vmem:[%s1301_s1 + $0x170] sm:$0xff]   ;;  %v1059_v3 = vld [vmem:[%s1302_s0 + $0x4c] ss:$28 sps:$4 sm:$0xff]  }
  0x15   :  { %909 = vmatpush3.bf16.msra.mxu1 %v1005_v19  ;;  %v1049_v59 = vld [vmem:[%s1301_s1 + $0x130] sm:$0xff]   ;;  %v1050_v60 = vld [vmem:[%s1301_s1 + $0x178] sm:$0xff]   ;;  %v1061_v5 = vld [vmem:[%s1302_s0 + $0x48] ss:$28 sps:$4 sm:$0xff]  }
  0x16   :  { %910 = vmatprep.subr.bf16.mxu1 %v1008_v22  ;;  %v1051_v61 = vld [vmem:[%s1301_s1 + $0x1b0] sm:$0xff]   ;;  %v1052_v62 = vld [vmem:[%s1301_s1 + $0x138] sm:$0xff]   ;;  %v782_v7 = vld [vmem:[%s1303_s2] ss:$0 sm:$0xff] }
  0x17   :  { %883 = vmatpush3.bf16.msra.mxu0 %v1007_v21  ;;  %v1055_v63 = vld [vmem:[%s1302_s0 + $0x14] ss:$28 sps:$4 sm:$0xff]   ;;  %v1056_v0 = vld [vmem:[%s1301_s1 + $0x1b8] sm:$0xff]  }
  0x18   :  { %884 = vmatprep.subr.bf16.mxu0 %v1010_v24  ;;  %v1057_v1 = vld [vmem:[%s1302_s0 + $0x18] ss:$28 sps:$4 sm:$0xff]   ;;  %v1053_v2 = vld [vmem:[%s1302_s0 + $0x10] ss:$28 sps:$4 sm:$0xff]  }
  0x19   :  { %911 = vmatpush3.bf16.msra.mxu1 %v1009_v23  ;;  %v1058_v4 = vld [vmem:[%s1302_s0 + $0x50] ss:$28 sps:$4 sm:$0xff]  }
  0x1a   :  { %912 = vmatprep.subr.bf16.mxu1 %v1012_v26 }
  0x1b   :  { %885 = vmatpush3.bf16.msra.mxu0 %v1011_v25 }
  0x1c   :  { %886 = vmatprep.subr.bf16.mxu0 %v1014_v28 }
  0x1d   :  { %913 = vmatpush3.bf16.msra.mxu1 %v1013_v27 }
  0x1e   :  { %914 = vmatprep.subr.bf16.mxu1 %v1016_v30 }
  0x1f   :  { %887 = vmatpush3.bf16.msra.mxu0 %v1015_v29 }
  0x20   :  { %928 = vmatprep.subr.bf16.mxu0 %v1021_v34 }
  0x21   :  { %915 = vmatpush3.bf16.msra.mxu1 %v1020_v33 }
  0x22   :  { %591 = vmatmul.mubr.bf16.vlgmr.msra.gmra.mrb[0].mxu0 %v1017_v31  ;;  %966 = vmatprep.subr.bf16.mxu1 %v1027_v39 }
  0x23   :  { %929 = vmatpush3.bf16.msra.mxu0 %v1025_v37  ;;  %598 = vmatprep.mubr.bf16.mxu0 %v1038_v50 }
  0x24   :  { %640 = vmatmul.mubr.bf16.vlgmr.msra.gmra.mrb[0].mxu1 %v1022_v35  ;;  %930 = vmatprep.subr.bf16.mxu0 %v1026_v38 }
  0x25   :  { %967 = vmatpush3.bf16.msra.mxu1 %v1027_v39  ;;  %647 = vmatprep.mubr.bf16.mxu1 %v1044_v55 }
  0x26   :  { %968 = vmatprep.subr.bf16.mxu1 %v1030_v42 }
  0x27   :  { %931 = vmatpush3.bf16.msra.mxu0 %v1028_v40 }
  0x28   :  { %932 = vmatprep.subr.bf16.mxu0 %v1029_v41 }
  0x29   :  { %969 = vmatpush3.bf16.msra.mxu1 %v1030_v42 }
  0x2a   :  { %970 = vmatprep.subr.bf16.mxu1 %v1033_v45  ;;  %599 = vmatmul.mubr.bf16.gmra.mrb[4].mxu0 %v1042_v53 }
  0x2b   :  { %933 = vmatpush3.bf16.msra.mxu0 %v1031_v43  ;;  %688 = vmatprep.mubr.bf16.mxu0 %v1055_v63 }
  0x2c   :  { %934 = vmatprep.subr.bf16.mxu0 %v1032_v44  ;;  %648 = vmatmul.mubr.bf16.gmra.mrb[4].mxu1 %v1046_v56 }
  0x2d   :  { %971 = vmatpush3.bf16.msra.mxu1 %v1033_v45  ;;  %982 = vmatprep.mubr.bf16.mxu1 %v1057_v1 }
  0x2e   :  { %972 = vmatprep.subr.bf16.mxu1 %v1036_v48 }
  0x2f   :  { %935 = vmatpush3.bf16.msra.mxu0 %v1034_v46 }
  0x30   :  { %936 = vmatprep.subr.bf16.mxu0 %v1035_v47 }
  0x31   :  { %973 = vmatpush3.bf16.msra.mxu1 %v1036_v48 }
  0x32   :  { %974 = vmatprep.subr.bf16.mxu1 %v1041_v52 }
  0x33   :  { %937 = vmatpush3.bf16.msra.mxu0 %v1037_v49 }
  0x34   :  { %938 = vmatprep.subr.bf16.mxu0 %v1040_v51 }
  0x35   :  { %975 = vmatpush3.bf16.msra.mxu1 %v1041_v52 }
  0x36   :  { %976 = vmatprep.subr.bf16.mxu1 %v1048_v58 }
  0x37   :  { %939 = vmatpush3.bf16.msra.mxu0 %v1043_v54 }
  0x38   :  { %940 = vmatprep.subr.bf16.mxu0 %v1047_v57 }
  0x39   :  { %977 = vmatpush3.bf16.msra.mxu1 %v1048_v58 }
  0x3a   :  { %978 = vmatprep.subr.bf16.mxu1 %v1051_v61 }
  0x3b   :  { %941 = vmatpush3.bf16.msra.mxu0 %v1049_v59 }
  0x3c   :  { %942 = vmatprep.subr.bf16.mxu0 %v1050_v60 }
  0x3d   :  { %979 = vmatpush3.bf16.msra.mxu1 %v1051_v61 }
  0x3e   :  { %980 = vmatprep.subr.bf16.mxu1 %v1056_v0 }
  0x3f   :  { %943 = vmatpush3.bf16.msra.mxu0 %v1052_v62 }
  0x41   :  { %981 = vmatpush3.bf16.msra.mxu1 %v1056_v0 }
  0x42   :  { %689 = vmatmul.mubr.bf16.vlgmr.msra.gmra.mrb[8].mxu0 %v1053_v2 }
  0x43   :  { %696 = vmatprep.mubr.bf16.mxu0 %v1059_v3 }
  0x44   :  { %983 = vmatmul.mubr.bf16.vlgmr.msra.gmra.mrb[8].mxu1 %v1058_v4 }
  0x4a   :  { %697 = vmatmul.mubr.bf16.gmra.mrb[12].mxu0 %v1061_v5 }
  0xf5   :  { %v888_v6 = vpop.f32.mrb[0].mxu0 }
  0xf6   :  { %v889_v8 = vpop.f32.mrb[1].mxu0 }
  0xf7   :  { %v890_v9 = vadd.f32 %v889_v8, %v888_v6  ;;  %v891_v10 = vpop.f32.mrb[2].mxu0  ;;  %v916_v11 = vpop.f32.mrb[0].mxu1 }
  0xf8   :  { %v892_v12 = vpop.f32.mrb[3].mxu0  ;;  %v917_v15 = vpop.f32.mrb[1].mxu1 }
  0xf9   :  { %v593_v13 = vadd.f32 %v890_v9, %v782_v7  ;;  %v893_v14 = vadd.f32 %v892_v12, %v891_v10  ;;  %v918_v16 = vadd.f32 %v917_v15, %v916_v11  ;;  %v919_v17 = vpop.f32.mrb[2].mxu1 }
  0xfa   :  { %v920_v19 = vpop.f32.mrb[3].mxu1 }
  0xfb   :  { %v596_v18 = vadd.f32 %v893_v14, %v782_v7  ;;  %v642_v20 = vadd.f32 %v918_v16, %v593_v13  ;;  %v921_v21 = vadd.f32 %v920_v19, %v919_v17 }
  0xfd   :  { %v645_v22 = vadd.f32 %v921_v21, %v596_v18  ;;  %v894_v23 = vpop.f32.mrb[4].mxu0 }
  0xfe   :  { %v895_v24 = vpop.f32.mrb[5].mxu0 }
  0xff   :  { %v896_v25 = vadd.f32 %v895_v24, %v894_v23  ;;  %v897_v26 = vpop.f32.mrb[6].mxu0  ;;  %v922_v27 = vpop.f32.mrb[4].mxu1 }
 0x100   :  { %v898_v28 = vpop.f32.mrb[7].mxu0  ;;  %v923_v31 = vpop.f32.mrb[5].mxu1 }
 0x101   :  { %v601_v29 = vadd.f32 %v896_v25, %v782_v7  ;;  %v899_v30 = vadd.f32 %v898_v28, %v897_v26  ;;  %v924_v32 = vadd.f32 %v923_v31, %v922_v27  ;;  %v925_v33 = vpop.f32.mrb[6].mxu1 }
 0x102   :  { %v926_v35 = vpop.f32.mrb[7].mxu1 }
 0x103   :  { %v604_v34 = vadd.f32 %v899_v30, %v782_v7  ;;  %v650_v36 = vadd.f32 %v924_v32, %v601_v29  ;;  %v927_v37 = vadd.f32 %v926_v35, %v925_v33 }
 0x105   :  { %v653_v38 = vadd.f32 %v927_v37, %v604_v34 }
 0x115   :  { %v944_v39 = vpop.f32.mrb[8].mxu0 }
 0x116   :  { %v945_v40 = vpop.f32.mrb[9].mxu0 }
 0x117   :  { %v946_v41 = vadd.f32 %v945_v40, %v944_v39  ;;  %v947_v42 = vpop.f32.mrb[10].mxu0  ;;  %v984_v44 = vpop.f32.mrb[8].mxu1 }
 0x118   :  { %v948_v43 = vpop.f32.mrb[11].mxu0  ;;  %v739_v47 = vpop.f32.mrb[9].mxu1 }
 0x119   :  { %v949_v45 = vadd.f32 %v948_v43, %v947_v42  ;;  %v691_v46 = vadd.f32 %v946_v41, %v642_v20  ;;  %v985_v48 = vpop.f32.mrb[10].mxu1 }
 0x11a   :  { %v742_v51 = vpop.f32.mrb[11].mxu1 }
 0x11b   :  { %v740_v49 = vadd.f32 %v739_v47, %v691_v46  ;;  %v694_v50 = vadd.f32 %v949_v45, %v645_v22 }
 0x11d   :  { %v743_v52 = vadd.f32 %v742_v51, %v694_v50  ;;  %v950_v53 = vpop.f32.mrb[12].mxu0  ;;  %v754_v55 = vmax.f32 %v740_v49, 0.0 }
 0x11e   :  { %v951_v54 = vpop.f32.mrb[13].mxu0 }
 0x11f   :  { %v755_v56 = vmax.f32 %v743_v52, 0.0  ;;  %v952_v57 = vadd.f32 %v951_v54, %v950_v53  ;;  %v953_v58 = vpop.f32.mrb[14].mxu0 }
 0x120   :  { %v954_v59 = vpop.f32.mrb[15].mxu0 }
 0x121   :  { %v864_v60 = vpack.c.bf16 %v755_v56, %v754_v55  ;;  %v699_v61 = vadd.f32 %v952_v57, %v650_v36  ;;  %v955_v62 = vadd.f32 %v954_v59, %v953_v58 }
 0x123   :  { %865 = vst [vmem:[%s1304_s3] sm:$0xff] %v864_v60   ;;  %v748_v63 = vadd.f32 %v984_v44, %v699_v61  ;;  %v702_v0 = vadd.f32 %v955_v62, %v653_v38 }
 0x125   :  { %v751_v1 = vadd.f32 %v985_v48, %v702_v0  ;;  %v756_v2 = vmax.f32 %v748_v63, 0.0 }
 0x127   :  { %v757_v3 = vmax.f32 %v751_v1, 0.0 }
 0x129   :  { %v869_v4 = vpack.c.bf16 %v757_v3, %v756_v2 }
 0x12b   :  { %871 = vst [vmem:[%s1304_s3 + $0x8] sm:$0xff] %v869_v4  }

// kernel: unetpp_forward.79
= control target key start
LH: loop header
LB: loop body
LE: loop exit
PB: predicated region body
PF: predicated region fallthrough
CT: control target
= control target key end

     0   :  { %s1632_s1 = inlined_call_operand.vmem [shape: bf16[1152,128], index: 1, kind: input, shape index: {}]   ;;  %s1633_s0 = inlined_call_operand.vmem [shape: bf16[32,1152], index: 0, kind: input, shape index: {}]   ;;  %s1634_s2 = inlined_call_operand.vmem [shape: f32[1,128], index: 2, kind: input, shape index: {}]   ;;  %s1635_s3 = inlined_call_operand.vmem [shape: bf16[32,128], index: 3, kind: output, shape index: {}]  }
   0x1   :  { %v1235_v0 = vld [vmem:[%s1632_s1 + $0x40] sm:$0xff]   ;;  %v1239_v4 = vld [vmem:[%s1632_s1 + $0x48] sm:$0xff]   ;;  %v1243_v8 = vld [vmem:[%s1632_s1 + $0x50] sm:$0xff]  }
   0x2   :  { %v1236_v1 = vld [vmem:[%s1632_s1] sm:$0xff]   ;;  %1093 = vmatprep.subr.bf16.mxu0 %v1235_v0  ;;  %v1240_v5 = vld [vmem:[%s1632_s1 + $0x8] sm:$0xff]   ;;  %v1244_v9 = vld [vmem:[%s1632_s1 + $0x10] sm:$0xff]  }
   0x3   :  { %v1237_v2 = vld [vmem:[%s1632_s1 + $0xc0] sm:$0xff]   ;;  %1094 = vmatpush3.bf16.msra.mxu0 %v1236_v1  ;;  %v1241_v6 = vld [vmem:[%s1632_s1 + $0xc8] sm:$0xff]   ;;  %v1245_v10 = vld [vmem:[%s1632_s1 + $0xd0] sm:$0xff]  }
   0x4   :  { %v1238_v3 = vld [vmem:[%s1632_s1 + $0x80] sm:$0xff]   ;;  %1121 = vmatprep.subr.bf16.mxu1 %v1237_v2  ;;  %1095 = vmatprep.subr.bf16.mxu0 %v1239_v4  ;;  %v1242_v7 = vld [vmem:[%s1632_s1 + $0x88] sm:$0xff]   ;;  %v1246_v11 = vld [vmem:[%s1632_s1 + $0x90] sm:$0xff]  }
   0x5   :  { %1122 = vmatpush3.bf16.msra.mxu1 %v1238_v3  ;;  %v1247_v12 = vld [vmem:[%s1632_s1 + $0x58] sm:$0xff]   ;;  %v1251_v16 = vld [vmem:[%s1632_s1 + $0x60] sm:$0xff]   ;;  %v1255_v20 = vld [vmem:[%s1632_s1 + $0x68] sm:$0xff]  }
   0x6   :  { %1123 = vmatprep.subr.bf16.mxu1 %v1241_v6  ;;  %v1248_v13 = vld [vmem:[%s1632_s1 + $0x18] sm:$0xff]   ;;  %v1252_v17 = vld [vmem:[%s1632_s1 + $0x20] sm:$0xff]   ;;  %v1256_v21 = vld [vmem:[%s1632_s1 + $0x28] sm:$0xff]  }
   0x7   :  { %1096 = vmatpush3.bf16.msra.mxu0 %v1240_v5  ;;  %v1249_v14 = vld [vmem:[%s1632_s1 + $0xd8] sm:$0xff]   ;;  %v1253_v18 = vld [vmem:[%s1632_s1 + $0xe0] sm:$0xff]   ;;  %v1257_v22 = vld [vmem:[%s1632_s1 + $0xe8] sm:$0xff]  }
   0x8   :  { %1097 = vmatprep.subr.bf16.mxu0 %v1243_v8  ;;  %v1250_v15 = vld [vmem:[%s1632_s1 + $0x98] sm:$0xff]   ;;  %v1254_v19 = vld [vmem:[%s1632_s1 + $0xa0] sm:$0xff]   ;;  %v1258_v23 = vld [vmem:[%s1632_s1 + $0xa8] sm:$0xff]  }
   0x9   :  { %1124 = vmatpush3.bf16.msra.mxu1 %v1242_v7  ;;  %v1259_v24 = vld [vmem:[%s1632_s1 + $0x70] sm:$0xff]   ;;  %v1263_v28 = vld [vmem:[%s1632_s1 + $0x78] sm:$0xff]   ;;  %v1266_v31 = vld [vmem:[%s1633_s0] ss:$36 sps:$4 sm:$0xff]  }
   0xa   :  { %1125 = vmatprep.subr.bf16.mxu1 %v1245_v10  ;;  %v1260_v25 = vld [vmem:[%s1632_s1 + $0x30] sm:$0xff]   ;;  %v1264_v29 = vld [vmem:[%s1632_s1 + $0x38] sm:$0xff]   ;;  %v1268_v32 = vld [vmem:[%s1633_s0 + $0x4] ss:$36 sps:$4 sm:$0xff]  }
   0xb   :  { %1098 = vmatpush3.bf16.msra.mxu0 %v1244_v9  ;;  %v1261_v26 = vld [vmem:[%s1632_s1 + $0xf0] sm:$0xff]   ;;  %v1265_v30 = vld [vmem:[%s1632_s1 + $0xf8] sm:$0xff]   ;;  %742 = vmatprep.mubr.bf16.mxu0 %v1268_v32  ;;  %v1270_v34 = vld [vmem:[%s1632_s1 + $0x140] sm:$0xff]  }
   0xc   :  { %1099 = vmatprep.subr.bf16.mxu0 %v1247_v12  ;;  %v1262_v27 = vld [vmem:[%s1632_s1 + $0xb0] sm:$0xff]   ;;  %v1269_v33 = vld [vmem:[%s1632_s1 + $0xb8] sm:$0xff]   ;;  %v1271_v35 = vld [vmem:[%s1633_s0 + $0x8] ss:$36 sps:$4 sm:$0xff]  }
   0xd   :  { %1126 = vmatpush3.bf16.msra.mxu1 %v1246_v11  ;;  %v1273_v36 = vld [vmem:[%s1633_s0 + $0xc] ss:$36 sps:$4 sm:$0xff]   ;;  %v1274_v37 = vld [vmem:[%s1632_s1 + $0x100] sm:$0xff]   ;;  %v1285_v48 = vld [vmem:[%s1632_s1 + $0x158] sm:$0xff]  }
   0xe   :  { %1127 = vmatprep.subr.bf16.mxu1 %v1249_v14  ;;  %791 = vmatprep.mubr.bf16.mxu1 %v1273_v36  ;;  %v1275_v38 = vld [vmem:[%s1632_s1 + $0x1c0] sm:$0xff]   ;;  %v1277_v40 = vld [vmem:[%s1632_s1 + $0x148] sm:$0xff]   ;;  %v1281_v44 = vld [vmem:[%s1632_s1 + $0x150] sm:$0xff]  }
   0xf   :  { %1100 = vmatpush3.bf16.msra.mxu0 %v1248_v13  ;;  %v1276_v39 = vld [vmem:[%s1632_s1 + $0x180] sm:$0xff]   ;;  %v1278_v41 = vld [vmem:[%s1632_s1 + $0x108] sm:$0xff]   ;;  %v1282_v45 = vld [vmem:[%s1632_s1 + $0x110] sm:$0xff]  }
  0x10   :  { %1101 = vmatprep.subr.bf16.mxu0 %v1251_v16  ;;  %v1279_v42 = vld [vmem:[%s1632_s1 + $0x1c8] sm:$0xff]   ;;  %v1283_v46 = vld [vmem:[%s1632_s1 + $0x1d0] sm:$0xff]   ;;  %v1286_v49 = vld [vmem:[%s1632_s1 + $0x118] sm:$0xff]  }
  0x11   :  { %1128 = vmatpush3.bf16.msra.mxu1 %v1250_v15  ;;  %v1280_v43 = vld [vmem:[%s1632_s1 + $0x188] sm:$0xff]   ;;  %v1284_v47 = vld [vmem:[%s1632_s1 + $0x190] sm:$0xff]   ;;  %v1287_v50 = vld [vmem:[%s1632_s1 + $0x1d8] sm:$0xff]  }
  0x12   :  { %1129 = vmatprep.subr.bf16.mxu1 %v1253_v18  ;;  %v1288_v51 = vld [vmem:[%s1632_s1 + $0x198] sm:$0xff]   ;;  %v1289_v52 = vld [vmem:[%s1632_s1 + $0x160] sm:$0xff]   ;;  %v1293_v56 = vld [vmem:[%s1632_s1 + $0x168] sm:$0xff]  }
  0x13   :  { %1102 = vmatpush3.bf16.msra.mxu0 %v1252_v17  ;;  %v1290_v53 = vld [vmem:[%s1632_s1 + $0x120] sm:$0xff]   ;;  %v1294_v57 = vld [vmem:[%s1633_s0 + $0x4c] ss:$36 sps:$4 sm:$0xff]   ;;  %v1299_v61 = vld [vmem:[%s1633_s0 + $0x54] ss:$36 sps:$4 sm:$0xff]  }
  0x14   :  { %1103 = vmatprep.subr.bf16.mxu0 %v1255_v20  ;;  %v1291_v54 = vld [vmem:[%s1632_s1 + $0x1e0] sm:$0xff]   ;;  %v1296_v58 = vld [vmem:[%s1632_s1 + $0x128] sm:$0xff]   ;;  %v1302_v63 = vld [vmem:[%s1633_s0 + $0x50] ss:$36 sps:$4 sm:$0xff]  }
  0x15   :  { %1130 = vmatpush3.bf16.msra.mxu1 %v1254_v19  ;;  %v1292_v55 = vld [vmem:[%s1632_s1 + $0x1a0] sm:$0xff]   ;;  %v1297_v59 = vld [vmem:[%s1633_s0 + $0x48] ss:$36 sps:$4 sm:$0xff]   ;;  %v1303_v0 = vld [vmem:[%s1632_s1 + $0x170] sm:$0xff]  }
  0x16   :  { %1131 = vmatprep.subr.bf16.mxu1 %v1257_v22  ;;  %v1298_v60 = vld [vmem:[%s1632_s1 + $0x1e8] sm:$0xff]   ;;  %v1304_v1 = vld [vmem:[%s1632_s1 + $0x130] sm:$0xff]   ;;  %v1307_v4 = vld [vmem:[%s1632_s1 + $0x178] sm:$0xff]  }
  0x17   :  { %1104 = vmatpush3.bf16.msra.mxu0 %v1256_v21  ;;  %v1301_v62 = vld [vmem:[%s1632_s1 + $0x1a8] sm:$0xff]   ;;  %v1305_v2 = vld [vmem:[%s1632_s1 + $0x1f0] sm:$0xff]   ;;  %v1308_v5 = vld [vmem:[%s1632_s1 + $0x138] sm:$0xff]  }
  0x18   :  { %1105 = vmatprep.subr.bf16.mxu0 %v1259_v24  ;;  %v1306_v3 = vld [vmem:[%s1632_s1 + $0x1b0] sm:$0xff]   ;;  %v1309_v6 = vld [vmem:[%s1632_s1 + $0x1f8] sm:$0xff]   ;;  %v1314_v10 = vld [vmem:[%s1632_s1 + $0x200] sm:$0xff]  }
  0x19   :  { %1132 = vmatpush3.bf16.msra.mxu1 %v1258_v23  ;;  %v1310_v7 = vld [vmem:[%s1633_s0 + $0x10] ss:$36 sps:$4 sm:$0xff]   ;;  %v1313_v9 = vld [vmem:[%s1632_s1 + $0x1b8] sm:$0xff]   ;;  %v1318_v13 = vld [vmem:[%s1632_s1 + $0x208] sm:$0xff]  }
  0x1a   :  { %1133 = vmatprep.subr.bf16.mxu1 %v1261_v26  ;;  %v1312_v8 = vld [vmem:[%s1633_s0 + $0x14] ss:$36 sps:$4 sm:$0xff]   ;;  %v1317_v12 = vld [vmem:[%s1633_s0 + $0x1c] ss:$36 sps:$4 sm:$0xff]   ;;  %v1323_v17 = vld [vmem:[%s1633_s0 + $0x64] ss:$36 sps:$4 sm:$0xff]  }
  0x1b   :  { %1106 = vmatpush3.bf16.msra.mxu0 %v1260_v25  ;;  %v1315_v11 = vld [vmem:[%s1633_s0 + $0x18] ss:$36 sps:$4 sm:$0xff]   ;;  %v1322_v16 = vld [vmem:[%s1632_s1 + $0x210] sm:$0xff]   ;;  %v1325_v18 = vld [vmem:[%s1633_s0 + $0x60] ss:$36 sps:$4 sm:$0xff]  }
  0x1c   :  { %1107 = vmatprep.subr.bf16.mxu0 %v1263_v28  ;;  %v1319_v14 = vld [vmem:[%s1633_s0 + $0x5c] ss:$36 sps:$4 sm:$0xff]   ;;  %v1328_v22 = vld [vmem:[%s1632_s1 + $0x228] sm:$0xff]   ;;  %v1329_v23 = vld [vmem:[%s1632_s1 + $0x230] sm:$0xff]  }
  0x1d   :  { %1134 = vmatpush3.bf16.msra.mxu1 %v1262_v27  ;;  %v1321_v15 = vld [vmem:[%s1633_s0 + $0x58] ss:$36 sps:$4 sm:$0xff]   ;;  %v1327_v20 = vld [vmem:[%s1632_s1 + $0x220] sm:$0xff]   ;;  %v1332_v25 = vld [vmem:[%s1633_s0 + $0x68] ss:$36 sps:$4 sm:$0xff]  }
  0x1e   :  { %1135 = vmatprep.subr.bf16.mxu1 %v1265_v30  ;;  %v1326_v19 = vld [vmem:[%s1632_s1 + $0x218] sm:$0xff]   ;;  %v1331_v21 = vld [vmem:[%s1633_s0 + $0x20] ss:$36 sps:$4 sm:$0xff]  }
  0x1f   :  { %1108 = vmatpush3.bf16.msra.mxu0 %v1264_v29  ;;  %v1330_v24 = vld [vmem:[%s1632_s1 + $0x238] sm:$0xff]   ;;  %v983_v27 = vld [vmem:[%s1634_s2] ss:$0 sm:$0xff] }
  0x20   :  { %1149 = vmatprep.subr.bf16.mxu0 %v1270_v34 }
  0x21   :  { %1136 = vmatpush3.bf16.msra.mxu1 %v1269_v33 }
  0x22   :  { %743 = vmatmul.mubr.bf16.vlgmr.msra.gmra.mrb[0].mxu0 %v1266_v31  ;;  %1177 = vmatprep.subr.bf16.mxu1 %v1275_v38 }
  0x23   :  { %1150 = vmatpush3.bf16.msra.mxu0 %v1274_v37  ;;  %750 = vmatprep.mubr.bf16.mxu0 %v1294_v57 }
  0x24   :  { %792 = vmatmul.mubr.bf16.vlgmr.msra.gmra.mrb[0].mxu1 %v1271_v35  ;;  %1151 = vmatprep.subr.bf16.mxu0 %v1277_v40 }
  0x25   :  { %1178 = vmatpush3.bf16.msra.mxu1 %v1276_v39  ;;  %799 = vmatprep.mubr.bf16.mxu1 %v1299_v61 }
  0x26   :  { %1179 = vmatprep.subr.bf16.mxu1 %v1279_v42 }
  0x27   :  { %1152 = vmatpush3.bf16.msra.mxu0 %v1278_v41 }
  0x28   :  { %1153 = vmatprep.subr.bf16.mxu0 %v1281_v44 }
  0x29   :  { %1180 = vmatpush3.bf16.msra.mxu1 %v1280_v43 }
  0x2a   :  { %1181 = vmatprep.subr.bf16.mxu1 %v1283_v46  ;;  %751 = vmatmul.mubr.bf16.gmra.mrb[4].mxu0 %v1297_v59 }
  0x2b   :  { %1154 = vmatpush3.bf16.msra.mxu0 %v1282_v45  ;;  %840 = vmatprep.mubr.bf16.mxu0 %v1312_v8 }
  0x2c   :  { %1155 = vmatprep.subr.bf16.mxu0 %v1285_v48  ;;  %800 = vmatmul.mubr.bf16.gmra.mrb[4].mxu1 %v1302_v63 }
  0x2d   :  { %1182 = vmatpush3.bf16.msra.mxu1 %v1284_v47  ;;  %889 = vmatprep.mubr.bf16.mxu1 %v1317_v12 }
  0x2e   :  { %1183 = vmatprep.subr.bf16.mxu1 %v1287_v50 }
  0x2f   :  { %1156 = vmatpush3.bf16.msra.mxu0 %v1286_v49 }
  0x30   :  { %1157 = vmatprep.subr.bf16.mxu0 %v1289_v52 }
  0x31   :  { %1184 = vmatpush3.bf16.msra.mxu1 %v1288_v51 }
  0x32   :  { %1185 = vmatprep.subr.bf16.mxu1 %v1291_v54 }
  0x33   :  { %1158 = vmatpush3.bf16.msra.mxu0 %v1290_v53 }
  0x34   :  { %1159 = vmatprep.subr.bf16.mxu0 %v1293_v56 }
  0x35   :  { %1186 = vmatpush3.bf16.msra.mxu1 %v1292_v55 }
  0x36   :  { %1187 = vmatprep.subr.bf16.mxu1 %v1298_v60 }
  0x37   :  { %1160 = vmatpush3.bf16.msra.mxu0 %v1296_v58 }
  0x38   :  { %1161 = vmatprep.subr.bf16.mxu0 %v1303_v0 }
  0x39   :  { %1188 = vmatpush3.bf16.msra.mxu1 %v1301_v62 }
  0x3a   :  { %1189 = vmatprep.subr.bf16.mxu1 %v1305_v2 }
  0x3b   :  { %1162 = vmatpush3.bf16.msra.mxu0 %v1304_v1 }
  0x3c   :  { %1163 = vmatprep.subr.bf16.mxu0 %v1307_v4 }
  0x3d   :  { %1190 = vmatpush3.bf16.msra.mxu1 %v1306_v3 }
  0x3e   :  { %1191 = vmatprep.subr.bf16.mxu1 %v1309_v6 }
  0x3f   :  { %1164 = vmatpush3.bf16.msra.mxu0 %v1308_v5 }
  0x40   :  { %1215 = vmatprep.subr.bf16.mxu0 %v1314_v10 }
  0x41   :  { %1192 = vmatpush3.bf16.msra.mxu1 %v1313_v9 }
  0x42   :  { %841 = vmatmul.mubr.bf16.vlgmr.msra.gmra.mrb[8].mxu0 %v1310_v7 }
  0x43   :  { %1216 = vmatpush3.bf16.msra.mxu0 %v1314_v10  ;;  %848 = vmatprep.mubr.bf16.mxu0 %v1319_v14 }
  0x44   :  { %890 = vmatmul.mubr.bf16.vlgmr.msra.gmra.mrb[8].mxu1 %v1315_v11  ;;  %1217 = vmatprep.subr.bf16.mxu0 %v1318_v13 }
  0x45   :  { %897 = vmatprep.mubr.bf16.mxu1 %v1323_v17 }
  0x47   :  { %1218 = vmatpush3.bf16.msra.mxu0 %v1318_v13 }
  0x48   :  { %1219 = vmatprep.subr.bf16.mxu0 %v1322_v16 }
  0x4a   :  { %849 = vmatmul.mubr.bf16.gmra.mrb[12].mxu0 %v1321_v15 }
  0x4b   :  { %1220 = vmatpush3.bf16.msra.mxu0 %v1322_v16  ;;  %1231 = vmatprep.mubr.bf16.mxu0 %v1331_v21 }
  0x4c   :  { %898 = vmatmul.mubr.bf16.gmra.mrb[12].mxu1 %v1325_v18  ;;  %1221 = vmatprep.subr.bf16.mxu0 %v1326_v19 }
  0x4f   :  { %1222 = vmatpush3.bf16.msra.mxu0 %v1326_v19 }
  0x50   :  { %1223 = vmatprep.subr.bf16.mxu0 %v1327_v20 }
  0x53   :  { %1224 = vmatpush3.bf16.msra.mxu0 %v1327_v20 }
  0x54   :  { %1225 = vmatprep.subr.bf16.mxu0 %v1328_v22 }
  0x57   :  { %1226 = vmatpush3.bf16.msra.mxu0 %v1328_v22 }
  0x58   :  { %1227 = vmatprep.subr.bf16.mxu0 %v1329_v23 }
  0x5b   :  { %1228 = vmatpush3.bf16.msra.mxu0 %v1329_v23 }
  0x5c   :  { %1229 = vmatprep.subr.bf16.mxu0 %v1330_v24 }
  0x5f   :  { %1230 = vmatpush3.bf16.msra.mxu0 %v1330_v24 }
  0x62   :  { %1232 = vmatmul.mubr.bf16.vlgmr.msra.gmra.mrb[16].mxu0 %v1332_v25 }
  0xf5   :  { %v1109_v26 = vpop.f32.mrb[0].mxu0 }
  0xf6   :  { %v1110_v28 = vpop.f32.mrb[1].mxu0 }
  0xf7   :  { %v1111_v29 = vadd.f32 %v1110_v28, %v1109_v26  ;;  %v1112_v30 = vpop.f32.mrb[2].mxu0  ;;  %v1137_v31 = vpop.f32.mrb[0].mxu1 }
  0xf8   :  { %v1113_v32 = vpop.f32.mrb[3].mxu0  ;;  %v1138_v35 = vpop.f32.mrb[1].mxu1 }
  0xf9   :  { %v745_v33 = vadd.f32 %v1111_v29, %v983_v27  ;;  %v1114_v34 = vadd.f32 %v1113_v32, %v1112_v30  ;;  %v1139_v36 = vadd.f32 %v1138_v35, %v1137_v31  ;;  %v1140_v37 = vpop.f32.mrb[2].mxu1 }
  0xfa   :  { %v1141_v39 = vpop.f32.mrb[3].mxu1 }
  0xfb   :  { %v748_v38 = vadd.f32 %v1114_v34, %v983_v27  ;;  %v794_v40 = vadd.f32 %v1139_v36, %v745_v33  ;;  %v1142_v41 = vadd.f32 %v1141_v39, %v1140_v37 }
  0xfd   :  { %v797_v42 = vadd.f32 %v1142_v41, %v748_v38  ;;  %v1115_v43 = vpop.f32.mrb[4].mxu0 }
  0xfe   :  { %v1116_v44 = vpop.f32.mrb[5].mxu0 }
  0xff   :  { %v1117_v45 = vadd.f32 %v1116_v44, %v1115_v43  ;;  %v1118_v46 = vpop.f32.mrb[6].mxu0  ;;  %v1143_v47 = vpop.f32.mrb[4].mxu1 }
 0x100   :  { %v1119_v48 = vpop.f32.mrb[7].mxu0  ;;  %v1144_v51 = vpop.f32.mrb[5].mxu1 }
 0x101   :  { %v753_v49 = vadd.f32 %v1117_v45, %v983_v27  ;;  %v1120_v50 = vadd.f32 %v1119_v48, %v1118_v46  ;;  %v1145_v52 = vadd.f32 %v1144_v51, %v1143_v47  ;;  %v1146_v53 = vpop.f32.mrb[6].mxu1 }
 0x102   :  { %v1147_v55 = vpop.f32.mrb[7].mxu1 }
 0x103   :  { %v756_v54 = vadd.f32 %v1120_v50, %v983_v27  ;;  %v802_v56 = vadd.f32 %v1145_v52, %v753_v49  ;;  %v1148_v57 = vadd.f32 %v1147_v55, %v1146_v53 }
 0x105   :  { %v805_v58 = vadd.f32 %v1148_v57, %v756_v54 }
 0x115   :  { %v1165_v59 = vpop.f32.mrb[8].mxu0 }
 0x116   :  { %v1166_v60 = vpop.f32.mrb[9].mxu0 }
 0x117   :  { %v1167_v61 = vadd.f32 %v1166_v60, %v1165_v59  ;;  %v1168_v62 = vpop.f32.mrb[10].mxu0  ;;  %v1193_v63 = vpop.f32.mrb[8].mxu1 }
 0x118   :  { %v1169_v0 = vpop.f32.mrb[11].mxu0  ;;  %v1194_v3 = vpop.f32.mrb[9].mxu1 }
 0x119   :  { %v843_v1 = vadd.f32 %v1167_v61, %v794_v40  ;;  %v1170_v2 = vadd.f32 %v1169_v0, %v1168_v62  ;;  %v1195_v4 = vadd.f32 %v1194_v3, %v1193_v63  ;;  %v1196_v5 = vpop.f32.mrb[10].mxu1 }
 0x11a   :  { %v1197_v7 = vpop.f32.mrb[11].mxu1 }
 0x11b   :  { %v846_v6 = vadd.f32 %v1170_v2, %v797_v42  ;;  %v1198_v8 = vadd.f32 %v1197_v7, %v1196_v5  ;;  %v892_v9 = vadd.f32 %v1195_v4, %v843_v1 }
 0x11d   :  { %v1171_v10 = vpop.f32.mrb[12].mxu0  ;;  %v895_v12 = vadd.f32 %v1198_v8, %v846_v6 }
 0x11e   :  { %v1172_v11 = vpop.f32.mrb[13].mxu0 }
 0x11f   :  { %v1173_v13 = vadd.f32 %v1172_v11, %v1171_v10  ;;  %v1174_v14 = vpop.f32.mrb[14].mxu0  ;;  %v1199_v15 = vpop.f32.mrb[12].mxu1 }
 0x120   :  { %v1175_v16 = vpop.f32.mrb[15].mxu0  ;;  %v1200_v19 = vpop.f32.mrb[13].mxu1 }
 0x121   :  { %v851_v17 = vadd.f32 %v1173_v13, %v802_v56  ;;  %v1176_v18 = vadd.f32 %v1175_v16, %v1174_v14  ;;  %v1201_v20 = vadd.f32 %v1200_v19, %v1199_v15  ;;  %v1202_v21 = vpop.f32.mrb[14].mxu1 }
 0x122   :  { %v1203_v23 = vpop.f32.mrb[15].mxu1 }
 0x123   :  { %v854_v22 = vadd.f32 %v1176_v18, %v805_v58  ;;  %v1204_v24 = vadd.f32 %v1203_v23, %v1202_v21  ;;  %v900_v25 = vadd.f32 %v1201_v20, %v851_v17 }
 0x125   :  { %v903_v26 = vadd.f32 %v1204_v24, %v854_v22 }
 0x135   :  { %v1233_v27 = vpop.f32.mrb[16].mxu0 }
 0x136   :  { %v949_v28 = vadd.f32 %v1233_v27, %v900_v25  ;;  %v940_v29 = vpop.f32.mrb[17].mxu0 }
 0x137   :  { %v941_v30 = vadd.f32 %v940_v29, %v892_v9  ;;  %v1234_v31 = vpop.f32.mrb[18].mxu0 }
 0x138   :  { %v952_v32 = vadd.f32 %v1234_v31, %v903_v26  ;;  %v943_v33 = vpop.f32.mrb[19].mxu0  ;;  %v957_v35 = vmax.f32 %v949_v28, 0.0 }
 0x139   :  { %v944_v34 = vadd.f32 %v943_v33, %v895_v12  ;;  %v955_v37 = vmax.f32 %v941_v30, 0.0 }
 0x13a   :  { %v958_v36 = vmax.f32 %v952_v32, 0.0 }
 0x13b   :  { %v956_v38 = vmax.f32 %v944_v34, 0.0 }
 0x13c   :  { %v1090_v39 = vpack.c.bf16 %v958_v36, %v957_v35 }
 0x13d   :  { %v1085_v40 = vpack.c.bf16 %v956_v38, %v955_v37 }
 0x13e   :  { %1092 = vst [vmem:[%s1635_s3 + $0x8] sm:$0xff] %v1090_v39  }
 0x13f   :  { %1086 = vst [vmem:[%s1635_s3] sm:$0xff] %v1085_v40  }

// kernel: unetpp_forward.64
= control target key start
LH: loop header
LB: loop body
LE: loop exit
PB: predicated region body
PF: predicated region fallthrough
CT: control target
= control target key end

     0   :  { %s1175_s12 = smov 0   ;;  %s1177_s13 = smov 0   ;;  %s1348_s0 = inlined_call_operand.vmem [shape: bf16[128,512], index: 0, kind: input, shape index: {}]   ;;  %s1349_s1 = inlined_call_operand.vmem [shape: bf16[512,128], index: 1, kind: input, shape index: {}]   ;;  %s1350_s2 = inlined_call_operand.vmem [shape: f32[1,128], index: 2, kind: input, shape index: {}]   ;;  %s1351_s3 = inlined_call_operand.vmem [shape: bf16[128,128], index: 3, kind: output, shape index: {}]  }
   0x1   :  { %s1179_s14 = smov 0  }
   0x2 LB: > { %s25_s15 = sadd.s32 1, %s1149_s13  ;;  %p874_p0 = scmp.ge.s32.totalorder %s1153_s14, 1  ;;  %s1153_s14 = sphi %s1179_s14, %s13_s14   ;;  %s1149_s13 = sphi %s1177_s13, %s1353_s13   ;;  %s1145_s12 = sphi %s1175_s12, %s1352_s12  }
   0x3   : > { %p27_p1 = scmp.ge.s32.totalorder %s25_s15, 2  ;;  %p170_p2 = scmp.lt.s32.totalorder %s1153_s14, 3 }
   0x5   : > { %s1355_s15 = smov (%p27_p1, %s25_s15), 0  ;;  %p171_p3 = pnand %p874_p0, %p170_p2 }
   0x6   : > { %v1075_v0 = vld [vmem:[%s1349_s1 + $0x40] sm:$0xff] (!%p171_p3)   ;;  %v1079_v4 = vld [vmem:[%s1349_s1 + $0x48] sm:$0xff] (!%p171_p3)   ;;  %v1083_v8 = vld [vmem:[%s1349_s1 + $0x50] sm:$0xff] (!%p171_p3)   ;;  %s875_s25 = sshll.u32 (!%p171_p3), %s1145_s12, 3 }
   0x7   : > { %174 = sbr.rel (%p171_p3) target bundleno = 290 (0x122), region = 32  ;;  %v1076_v1 = vld [vmem:[%s1349_s1 + $0xc0] sm:$0xff] (!%p171_p3)   ;;  %971 = vmatprep.subr.bf16.mxu0 (!%p171_p3), %v1075_v0  ;;  %v1080_v5 = vld [vmem:[%s1349_s1 + $0xc8] sm:$0xff] (!%p171_p3)   ;;  %v1084_v9 = vld [vmem:[%s1349_s1 + $0xd0] sm:$0xff] (!%p171_p3)   ;;  %p206_p4 = scmp.lt.s32.totalorder (!%p171_p3), %s875_s25, 15 }
   0x8   : > { %v1077_v2 = vld [vmem:[%s1349_s1] sm:$0xff] (!%p171_p3)   ;;  %1011 = vmatprep.subr.bf16.mxu1 (!%p171_p3), %v1076_v1  ;;  %v1081_v6 = vld [vmem:[%s1349_s1 + $0x8] sm:$0xff] (!%p171_p3)   ;;  %v1085_v10 = vld [vmem:[%s1349_s1 + $0x10] sm:$0xff] (!%p171_p3)  }
   0x9   : > { %v1078_v3 = vld [vmem:[%s1349_s1 + $0x80] sm:$0xff] (!%p171_p3)   ;;  %972 = vmatpush3.bf16.msra.mxu0 (!%p171_p3), %v1077_v2  ;;  %v1082_v7 = vld [vmem:[%s1349_s1 + $0x88] sm:$0xff] (!%p171_p3)   ;;  %v1086_v11 = vld [vmem:[%s1349_s1 + $0x90] sm:$0xff] (!%p171_p3)  }
   0xa   : > { %1012 = vmatpush3.bf16.msra.mxu1 (!%p171_p3), %v1078_v3  ;;  %973 = vmatprep.subr.bf16.mxu0 (!%p171_p3), %v1079_v4  ;;  %v1087_v12 = vld [vmem:[%s1349_s1 + $0x58] sm:$0xff] (!%p171_p3)   ;;  %v1091_v16 = vld [vmem:[%s1349_s1 + $0x60] sm:$0xff] (!%p171_p3)   ;;  %v1095_v20 = vld [vmem:[%s1349_s1 + $0x68] sm:$0xff] (!%p171_p3)  }
   0xb   : > { %1013 = vmatprep.subr.bf16.mxu1 (!%p171_p3), %v1080_v5  ;;  %v1088_v13 = vld [vmem:[%s1349_s1 + $0xd8] sm:$0xff] (!%p171_p3)   ;;  %v1092_v17 = vld [vmem:[%s1349_s1 + $0xe0] sm:$0xff] (!%p171_p3)   ;;  %v1096_v21 = vld [vmem:[%s1349_s1 + $0xe8] sm:$0xff] (!%p171_p3)  }
   0xc   : > { %v1089_v14 = vld [vmem:[%s1349_s1 + $0x18] sm:$0xff] (!%p171_p3)   ;;  %v1093_v18 = vld [vmem:[%s1349_s1 + $0x20] sm:$0xff] (!%p171_p3)   ;;  %v1097_v22 = vld [vmem:[%s1349_s1 + $0x28] sm:$0xff] (!%p171_p3)  }
   0xd   : > { %974 = vmatpush3.bf16.msra.mxu0 (!%p171_p3), %v1081_v6  ;;  %v1090_v15 = vld [vmem:[%s1349_s1 + $0x98] sm:$0xff] (!%p171_p3)   ;;  %v1094_v19 = vld [vmem:[%s1349_s1 + $0xa0] sm:$0xff] (!%p171_p3)   ;;  %v1098_v23 = vld [vmem:[%s1349_s1 + $0xa8] sm:$0xff] (!%p171_p3)  }
   0xe   : > { %1014 = vmatpush3.bf16.msra.mxu1 %v1082_v7  ;;  %975 = vmatprep.subr.bf16.mxu0 %v1083_v8  ;;  %s1357_s25 = smov (!%p206_p4, %s875_s25), 15  ;;  %v1099_v24 = vld [vmem:[%s1349_s1 + $0x70] sm:$0xff]   ;;  %v1103_v28 = vld [vmem:[%s1349_s1 + $0x78] sm:$0xff]   ;;  %v1319_v50 = vld [vmem:[%s1350_s2] ss:$0 sm:$0xff] }
   0xf   : > { %1015 = vmatprep.subr.bf16.mxu1 %v1084_v9  ;;  %v1100_v25 = vld [vmem:[%s1349_s1 + $0xf0] sm:$0xff]   ;;  %s939_s24 = sshll.u32 %s1357_s25, 4  ;;  %v1104_v29 = vld [vmem:[%s1349_s1 + $0xf8] sm:$0xff]   ;;  %s879_s17 = sshll.u32 %s1357_s25, 2 }
  0x10   : > { %v1101_v26 = vld [vmem:[%s1349_s1 + $0x30] sm:$0xff]   ;;  %s1292_s12 = scalar_lea.vmem %s1348_s0, %s939_s24  ;;  %v1105_v30 = vld [vmem:[%s1349_s1 + $0x38] sm:$0xff]   ;;  %s1327_s20 = scalar_lea.vmem %s1351_s3, %s879_s17 }
  0x11   : > { %976 = vmatpush3.bf16.msra.mxu0 %v1085_v10  ;;  %v1102_v27 = vld [vmem:[%s1349_s1 + $0xb0] sm:$0xff]   ;;  %v1106_v31 = vld [vmem:[%s1349_s1 + $0xb8] sm:$0xff]  }
  0x12   : > { %1016 = vmatpush3.bf16.msra.mxu1 %v1086_v11  ;;  %977 = vmatprep.subr.bf16.mxu0 %v1087_v12  ;;  %v1107_v32 = vld [vmem:[%s1292_s12] ss:$16 sps:$4 sm:$0xff]   ;;  %v1109_v33 = vld [vmem:[%s1292_s12 + $0x4] ss:$16 sps:$4 sm:$0xff]   ;;  %v1110_v34 = vld [vmem:[%s1292_s12 + $0x8] ss:$16 sps:$4 sm:$0xff]  }
  0x13   : > { %1017 = vmatprep.subr.bf16.mxu1 %v1088_v13  ;;  %v1112_v35 = vld [vmem:[%s1292_s12 + $0xc] ss:$16 sps:$4 sm:$0xff]   ;;  %620 = vmatprep.mubr.bf16.mxu0 %v1109_v33  ;;  %v1113_v36 = vld [vmem:[%s1292_s12 + $0x24] ss:$16 sps:$4 sm:$0xff]   ;;  %v1117_v38 = vld [vmem:[%s1292_s12 + $0x20] ss:$16 sps:$4 sm:$0xff]  }
  0x14   : > { %685 = vmatprep.mubr.bf16.mxu1 %v1112_v35  ;;  %v1115_v37 = vld [vmem:[%s1292_s12 + $0x2c] ss:$16 sps:$4 sm:$0xff]   ;;  %v1118_v39 = vld [vmem:[%s1292_s12 + $0x28] ss:$16 sps:$4 sm:$0xff]   ;;  %v1119_v40 = vld [vmem:[%s1292_s12 + $0x44] ss:$16 sps:$4 sm:$0xff]  }
  0x15   : > { %978 = vmatpush3.bf16.msra.mxu0 %v1089_v14  ;;  %v1121_v41 = vld [vmem:[%s1292_s12 + $0x4c] ss:$16 sps:$4 sm:$0xff]   ;;  %v1123_v42 = vld [vmem:[%s1292_s12 + $0x40] ss:$16 sps:$4 sm:$0xff]   ;;  %v1124_v43 = vld [vmem:[%s1292_s12 + $0x48] ss:$16 sps:$4 sm:$0xff]  }
  0x16   : > { %1018 = vmatpush3.bf16.msra.mxu1 %v1090_v15  ;;  %979 = vmatprep.subr.bf16.mxu0 %v1091_v16  ;;  %v1125_v44 = vld [vmem:[%s1292_s12 + $0x64] ss:$16 sps:$4 sm:$0xff]   ;;  %v1127_v45 = vld [vmem:[%s1292_s12 + $0x6c] ss:$16 sps:$4 sm:$0xff]   ;;  %v1129_v46 = vld [vmem:[%s1292_s12 + $0x60] ss:$16 sps:$4 sm:$0xff]  }
  0x17   : > { %1019 = vmatprep.subr.bf16.mxu1 %v1092_v17  ;;  %v1130_v47 = vld [vmem:[%s1292_s12 + $0x68] ss:$16 sps:$4 sm:$0xff]  }
  0x19   : > { %980 = vmatpush3.bf16.msra.mxu0 %v1093_v18 }
  0x1a   : > { %1020 = vmatpush3.bf16.msra.mxu1 %v1094_v19  ;;  %981 = vmatprep.subr.bf16.mxu0 %v1095_v20 }
  0x1b   : > { %1021 = vmatprep.subr.bf16.mxu1 %v1096_v21 }
  0x1d   : > { %982 = vmatpush3.bf16.msra.mxu0 %v1097_v22 }
  0x1e   : > { %1022 = vmatpush3.bf16.msra.mxu1 %v1098_v23  ;;  %983 = vmatprep.subr.bf16.mxu0 %v1099_v24 }
  0x1f   : > { %1023 = vmatprep.subr.bf16.mxu1 %v1100_v25 }
  0x21   : > { %984 = vmatpush3.bf16.msra.mxu0 %v1101_v26 }
  0x22   : > { %1024 = vmatpush3.bf16.msra.mxu1 %v1102_v27  ;;  %985 = vmatprep.subr.bf16.mxu0 %v1103_v28 }
  0x23   : > { %1025 = vmatprep.subr.bf16.mxu1 %v1104_v29 }
  0x25   : > { %986 = vmatpush3.bf16.msra.mxu0 %v1105_v30 }
  0x26   : > { %1026 = vmatpush3.bf16.msra.mxu1 %v1106_v31 }
  0x28   : > { %621 = vmatmul.mubr.bf16.vlgmr.msra.gmra.mrb[0].mxu0 %v1107_v32 }
  0x29   : > { %686 = vmatmul.mubr.bf16.vlgmr.msra.gmra.mrb[0].mxu1 %v1110_v34  ;;  %628 = vmatprep.mubr.bf16.mxu0 %v1113_v36 }
  0x2a   : > { %693 = vmatprep.mubr.bf16.mxu1 %v1115_v37 }
  0x30   : > { %629 = vmatmul.mubr.bf16.gmra.mrb[4].mxu0 %v1117_v38 }
  0x31   : > { %694 = vmatmul.mubr.bf16.gmra.mrb[4].mxu1 %v1118_v39  ;;  %636 = vmatprep.mubr.bf16.mxu0 %v1119_v40 }
  0x32   : > { %701 = vmatprep.mubr.bf16.mxu1 %v1121_v41 }
  0x38   : > { %637 = vmatmul.mubr.bf16.gmra.mrb[8].mxu0 %v1123_v42 }
  0x39   : > { %702 = vmatmul.mubr.bf16.gmra.mrb[8].mxu1 %v1124_v43  ;;  %644 = vmatprep.mubr.bf16.mxu0 %v1125_v44 }
  0x3a   : > { %709 = vmatprep.mubr.bf16.mxu1 %v1127_v45 }
  0x40   : > { %645 = vmatmul.mubr.bf16.gmra.mrb[12].mxu0 %v1129_v46 }
  0x41   : > { %710 = vmatmul.mubr.bf16.gmra.mrb[12].mxu1 %v1130_v47 }
  0xfb   : > { %v987_v48 = vpop.f32.mrb[0].mxu0 }
  0xfc   : > { %v1027_v49 = vpop.f32.mrb[0].mxu1  ;;  %v988_v51 = vpop.f32.mrb[1].mxu0 }
  0xfd   : > { %v989_v52 = vadd.f32 %v988_v51, %v987_v48  ;;  %v1028_v53 = vpop.f32.mrb[1].mxu1  ;;  %v990_v54 = vpop.f32.mrb[2].mxu0 }
  0xfe   : > { %v1029_v55 = vadd.f32 %v1028_v53, %v1027_v49  ;;  %v1030_v56 = vpop.f32.mrb[2].mxu1  ;;  %v991_v57 = vpop.f32.mrb[3].mxu0 }
  0xff   : > { %v623_v58 = vadd.f32 %v989_v52, %v1319_v50  ;;  %v992_v59 = vadd.f32 %v991_v57, %v990_v54  ;;  %v1031_v60 = vpop.f32.mrb[3].mxu1 }
 0x100   : > { %v1032_v61 = vadd.f32 %v1031_v60, %v1030_v56 }
 0x101   : > { %v688_v62 = vadd.f32 %v1029_v55, %v623_v58  ;;  %v626_v63 = vadd.f32 %v992_v59, %v1319_v50 }
 0x103   : > { %v691_v0 = vadd.f32 %v1032_v61, %v626_v63  ;;  %v993_v1 = vpop.f32.mrb[4].mxu0  ;;  %v718_v4 = vmax.f32 %v688_v62, 0.0 }
 0x104   : > { %v1033_v2 = vpop.f32.mrb[4].mxu1  ;;  %v994_v3 = vpop.f32.mrb[5].mxu0 }
 0x105   : > { %v719_v5 = vmax.f32 %v691_v0, 0.0  ;;  %v995_v6 = vadd.f32 %v994_v3, %v993_v1  ;;  %v1034_v7 = vpop.f32.mrb[5].mxu1  ;;  %v996_v8 = vpop.f32.mrb[6].mxu0 }
 0x106   : > { %v1035_v9 = vadd.f32 %v1034_v7, %v1033_v2  ;;  %v1036_v10 = vpop.f32.mrb[6].mxu1  ;;  %v997_v11 = vpop.f32.mrb[7].mxu0 }
 0x107   : > { %v951_v12 = vpack.c.bf16 %v719_v5, %v718_v4  ;;  %v631_v13 = vadd.f32 %v995_v6, %v1319_v50  ;;  %v998_v14 = vadd.f32 %v997_v11, %v996_v8  ;;  %v1037_v15 = vpop.f32.mrb[7].mxu1 }
 0x108   : > { %v1038_v16 = vadd.f32 %v1037_v15, %v1036_v10 }
 0x109   : > { %952 = vst [vmem:[%s1327_s20] sm:$0xff] %v951_v12   ;;  %v696_v17 = vadd.f32 %v1035_v9, %v631_v13  ;;  %v634_v18 = vadd.f32 %v998_v14, %v1319_v50 }
 0x10b   : > { %v699_v19 = vadd.f32 %v1038_v16, %v634_v18  ;;  %v999_v20 = vpop.f32.mrb[8].mxu0  ;;  %v720_v23 = vmax.f32 %v696_v17, 0.0 }
 0x10c   : > { %v1039_v21 = vpop.f32.mrb[8].mxu1  ;;  %v1000_v22 = vpop.f32.mrb[9].mxu0 }
 0x10d   : > { %v721_v24 = vmax.f32 %v699_v19, 0.0  ;;  %v1001_v25 = vadd.f32 %v1000_v22, %v999_v20  ;;  %v1040_v26 = vpop.f32.mrb[9].mxu1  ;;  %v1002_v27 = vpop.f32.mrb[10].mxu0 }
 0x10e   : > { %v1041_v28 = vadd.f32 %v1040_v26, %v1039_v21  ;;  %v1042_v29 = vpop.f32.mrb[10].mxu1  ;;  %v1003_v30 = vpop.f32.mrb[11].mxu0 }
 0x10f   : > { %v956_v31 = vpack.c.bf16 %v721_v24, %v720_v23  ;;  %v639_v32 = vadd.f32 %v1001_v25, %v1319_v50  ;;  %v1004_v33 = vadd.f32 %v1003_v30, %v1002_v27  ;;  %v1043_v34 = vpop.f32.mrb[11].mxu1 }
 0x110   : > { %v1044_v35 = vadd.f32 %v1043_v34, %v1042_v29 }
 0x111   : > { %968 = vst [vmem:[%s1327_s20 + $0x8] sm:$0xff] %v956_v31   ;;  %v704_v36 = vadd.f32 %v1041_v28, %v639_v32  ;;  %v642_v37 = vadd.f32 %v1004_v33, %v1319_v50 }
 0x113   : > { %v707_v38 = vadd.f32 %v1044_v35, %v642_v37  ;;  %v1005_v39 = vpop.f32.mrb[12].mxu0  ;;  %v722_v42 = vmax.f32 %v704_v36, 0.0 }
 0x114   : > { %v1045_v40 = vpop.f32.mrb[12].mxu1  ;;  %v1006_v41 = vpop.f32.mrb[13].mxu0 }
 0x115   : > { %v723_v43 = vmax.f32 %v707_v38, 0.0  ;;  %v1007_v44 = vadd.f32 %v1006_v41, %v1005_v39  ;;  %v1046_v45 = vpop.f32.mrb[13].mxu1  ;;  %v1008_v46 = vpop.f32.mrb[14].mxu0 }
 0x116   : > { %v1047_v47 = vadd.f32 %v1046_v45, %v1045_v40  ;;  %v1048_v48 = vpop.f32.mrb[14].mxu1  ;;  %v1009_v49 = vpop.f32.mrb[15].mxu0 }
 0x117   : > { %v961_v51 = vpack.c.bf16 %v723_v43, %v722_v42  ;;  %v647_v52 = vadd.f32 %v1007_v44, %v1319_v50  ;;  %v1010_v53 = vadd.f32 %v1009_v49, %v1008_v46  ;;  %v1049_v54 = vpop.f32.mrb[15].mxu1 }
 0x118   : > { %v1050_v55 = vadd.f32 %v1049_v54, %v1048_v48 }
 0x119   : > { %969 = vst [vmem:[%s1327_s20 + $0x10] sm:$0xff] %v961_v51   ;;  %v712_v56 = vadd.f32 %v1047_v47, %v647_v52  ;;  %v650_v57 = vadd.f32 %v1010_v53, %v1319_v50 }
 0x11b   : > { %v715_v58 = vadd.f32 %v1050_v55, %v650_v57  ;;  %v724_v59 = vmax.f32 %v712_v56, 0.0 }
 0x11d   : > { %v725_v60 = vmax.f32 %v715_v58, 0.0 }
 0x11f   : > { %v966_v61 = vpack.c.bf16 %v725_v60, %v724_v59 }
 0x121   : > { %970 = vst [vmem:[%s1327_s20 + $0x18] sm:$0xff] %v966_v61  }
 0x122 PF: > { %s13_s14 = sadd.s32 1, %s1153_s14   ;;  %s1352_s12 = smov %s1149_s13 }
 0x123   : > { %p10_p5 = scmp.ge.s32.totalorder %s13_s14, 4   ;;  %s1353_s13 = smov %s1355_s15 }
 0x125   :  { %12 = sbr.rel (!%p10_p5) target bundleno = 2 (0x2), region = 68 }

// kernel: unetpp_forward.76
= control target key start
LH: loop header
LB: loop body
LE: loop exit
PB: predicated region body
PF: predicated region fallthrough
CT: control target
= control target key end

     0   :  { %s1411_s12 = smov 0   ;;  %s1413_s13 = smov 0   ;;  %s1596_s0 = inlined_call_operand.vmem [shape: bf16[128,640], index: 0, kind: input, shape index: {}]   ;;  %s1597_s1 = inlined_call_operand.vmem [shape: bf16[640,128], index: 1, kind: input, shape index: {}]   ;;  %s1598_s2 = inlined_call_operand.vmem [shape: f32[1,128], index: 2, kind: input, shape index: {}]   ;;  %s1599_s3 = inlined_call_operand.vmem [shape: bf16[128,128], index: 3, kind: output, shape index: {}]  }
   0x1   :  { %s1415_s14 = smov 0  }
   0x2 LB: > { %s25_s15 = sadd.s32 1, %s1385_s13  ;;  %p1035_p0 = scmp.ge.s32.totalorder %s1389_s14, 1  ;;  %s1389_s14 = sphi %s1415_s14, %s13_s14   ;;  %s1385_s13 = sphi %s1413_s13, %s1601_s13   ;;  %s1381_s12 = sphi %s1411_s12, %s1600_s12  }
   0x3   : > { %p27_p1 = scmp.ge.s32.totalorder %s25_s15, 2  ;;  %p170_p2 = scmp.lt.s32.totalorder %s1389_s14, 3 }
   0x5   : > { %s1603_s15 = smov (%p27_p1, %s25_s15), 0  ;;  %p171_p3 = pnand %p1035_p0, %p170_p2 }
   0x6   : > { %v1299_v0 = vld [vmem:[%s1597_s1 + $0x40] sm:$0xff] (!%p171_p3)   ;;  %v1303_v4 = vld [vmem:[%s1597_s1 + $0x48] sm:$0xff] (!%p171_p3)   ;;  %v1307_v8 = vld [vmem:[%s1597_s1 + $0x50] sm:$0xff] (!%p171_p3)   ;;  %s1036_s23 = sshll.u32 (!%p171_p3), %s1381_s12, 3 }
   0x7   : > { %174 = sbr.rel (%p171_p3) target bundleno = 296 (0x128), region = 32  ;;  %v1300_v1 = vld [vmem:[%s1597_s1 + $0xc0] sm:$0xff] (!%p171_p3)   ;;  %1142 = vmatprep.subr.bf16.mxu0 (!%p171_p3), %v1299_v0  ;;  %v1304_v5 = vld [vmem:[%s1597_s1 + $0xc8] sm:$0xff] (!%p171_p3)   ;;  %v1308_v9 = vld [vmem:[%s1597_s1 + $0xd0] sm:$0xff] (!%p171_p3)   ;;  %p206_p4 = scmp.lt.s32.totalorder (!%p171_p3), %s1036_s23, 15 }
   0x8   : > { %v1301_v2 = vld [vmem:[%s1597_s1] sm:$0xff] (!%p171_p3)   ;;  %1182 = vmatprep.subr.bf16.mxu1 (!%p171_p3), %v1300_v1  ;;  %v1305_v6 = vld [vmem:[%s1597_s1 + $0x8] sm:$0xff] (!%p171_p3)   ;;  %v1309_v10 = vld [vmem:[%s1597_s1 + $0x10] sm:$0xff] (!%p171_p3)  }
   0x9   : > { %v1302_v3 = vld [vmem:[%s1597_s1 + $0x80] sm:$0xff] (!%p171_p3)   ;;  %1143 = vmatpush3.bf16.msra.mxu0 (!%p171_p3), %v1301_v2  ;;  %v1306_v7 = vld [vmem:[%s1597_s1 + $0x88] sm:$0xff] (!%p171_p3)   ;;  %v1310_v11 = vld [vmem:[%s1597_s1 + $0x90] sm:$0xff] (!%p171_p3)  }
   0xa   : > { %1183 = vmatpush3.bf16.msra.mxu1 (!%p171_p3), %v1302_v3  ;;  %1144 = vmatprep.subr.bf16.mxu0 (!%p171_p3), %v1303_v4  ;;  %v1311_v12 = vld [vmem:[%s1597_s1 + $0x58] sm:$0xff] (!%p171_p3)   ;;  %v1315_v16 = vld [vmem:[%s1597_s1 + $0x60] sm:$0xff] (!%p171_p3)   ;;  %v1319_v20 = vld [vmem:[%s1597_s1 + $0x68] sm:$0xff] (!%p171_p3)  }
   0xb   : > { %1184 = vmatprep.subr.bf16.mxu1 (!%p171_p3), %v1304_v5  ;;  %v1312_v13 = vld [vmem:[%s1597_s1 + $0xd8] sm:$0xff] (!%p171_p3)   ;;  %v1316_v17 = vld [vmem:[%s1597_s1 + $0xe0] sm:$0xff] (!%p171_p3)   ;;  %v1320_v21 = vld [vmem:[%s1597_s1 + $0xe8] sm:$0xff] (!%p171_p3)  }
   0xc   : > { %v1313_v14 = vld [vmem:[%s1597_s1 + $0x18] sm:$0xff] (!%p171_p3)   ;;  %v1317_v18 = vld [vmem:[%s1597_s1 + $0x20] sm:$0xff] (!%p171_p3)   ;;  %v1321_v22 = vld [vmem:[%s1597_s1 + $0x28] sm:$0xff] (!%p171_p3)  }
   0xd   : > { %1145 = vmatpush3.bf16.msra.mxu0 (!%p171_p3), %v1305_v6  ;;  %v1314_v15 = vld [vmem:[%s1597_s1 + $0x98] sm:$0xff] (!%p171_p3)   ;;  %v1318_v19 = vld [vmem:[%s1597_s1 + $0xa0] sm:$0xff] (!%p171_p3)   ;;  %v1322_v23 = vld [vmem:[%s1597_s1 + $0xa8] sm:$0xff] (!%p171_p3)  }
   0xe   : > { %1185 = vmatpush3.bf16.msra.mxu1 %v1306_v7  ;;  %1146 = vmatprep.subr.bf16.mxu0 %v1307_v8  ;;  %s1605_s23 = smov (!%p206_p4, %s1036_s23), 15  ;;  %v1323_v24 = vld [vmem:[%s1597_s1 + $0x70] sm:$0xff]   ;;  %v1327_v28 = vld [vmem:[%s1597_s1 + $0x78] sm:$0xff]   ;;  %v1337_v36 = vld [vmem:[%s1597_s1 + $0x100] sm:$0xff]  }
   0xf   : > { %1186 = vmatprep.subr.bf16.mxu1 %v1308_v9  ;;  %v1324_v25 = vld [vmem:[%s1597_s1 + $0xf0] sm:$0xff]   ;;  %s1274_s22 = smul.u32 20, %s1605_s23  ;;  %v1328_v29 = vld [vmem:[%s1597_s1 + $0xf8] sm:$0xff]   ;;  %v1338_v37 = vld [vmem:[%s1597_s1 + $0x108] sm:$0xff]  }
  0x10   : > { %v1325_v26 = vld [vmem:[%s1597_s1 + $0x30] sm:$0xff]   ;;  %v1329_v30 = vld [vmem:[%s1597_s1 + $0x38] sm:$0xff]   ;;  %v1353_v46 = vld [vmem:[%s1597_s1 + $0x120] sm:$0xff]  }
  0x11   : > { %1147 = vmatpush3.bf16.msra.mxu0 %v1309_v10  ;;  %v1326_v27 = vld [vmem:[%s1597_s1 + $0xb0] sm:$0xff]   ;;  %s1528_s6 = scalar_lea.vmem %s1596_s0, %s1274_s22  ;;  %v1330_v31 = vld [vmem:[%s1597_s1 + $0xb8] sm:$0xff]   ;;  %v1354_v51 = vld [vmem:[%s1597_s1 + $0x128] sm:$0xff]  }
  0x12   : > { %1187 = vmatpush3.bf16.msra.mxu1 %v1310_v11  ;;  %1148 = vmatprep.subr.bf16.mxu0 %v1311_v12  ;;  %v1331_v32 = vld [vmem:[%s1528_s6] ss:$20 sps:$4 sm:$0xff]   ;;  %v1333_v33 = vld [vmem:[%s1528_s6 + $0x4] ss:$20 sps:$4 sm:$0xff]   ;;  %v1334_v34 = vld [vmem:[%s1528_s6 + $0x8] ss:$20 sps:$4 sm:$0xff]  }
  0x13   : > { %1188 = vmatprep.subr.bf16.mxu1 %v1312_v13  ;;  %v1336_v35 = vld [vmem:[%s1528_s6 + $0xc] ss:$20 sps:$4 sm:$0xff]   ;;  %716 = vmatprep.mubr.bf16.mxu0 %v1333_v33  ;;  %v1341_v39 = vld [vmem:[%s1528_s6 + $0x34] ss:$20 sps:$4 sm:$0xff]   ;;  %v1344_v42 = vld [vmem:[%s1528_s6 + $0x30] ss:$20 sps:$4 sm:$0xff]  }
  0x14   : > { %781 = vmatprep.mubr.bf16.mxu1 %v1336_v35  ;;  %v1339_v38 = vld [vmem:[%s1528_s6 + $0x2c] ss:$20 sps:$4 sm:$0xff]   ;;  %v1343_v40 = vld [vmem:[%s1528_s6 + $0x28] ss:$20 sps:$4 sm:$0xff]   ;;  %v1345_v41 = vld [vmem:[%s1597_s1 + $0x110] sm:$0xff]  }
  0x15   : > { %1149 = vmatpush3.bf16.msra.mxu0 %v1313_v14  ;;  %v1347_v43 = vld [vmem:[%s1528_s6 + $0x54] ss:$20 sps:$4 sm:$0xff]   ;;  %v1346_v44 = vld [vmem:[%s1597_s1 + $0x118] sm:$0xff]   ;;  %v1351_v47 = vld [vmem:[%s1528_s6 + $0x50] ss:$20 sps:$4 sm:$0xff]  }
  0x16   : > { %1189 = vmatpush3.bf16.msra.mxu1 %v1314_v15  ;;  %1150 = vmatprep.subr.bf16.mxu0 %v1315_v16  ;;  %v1349_v45 = vld [vmem:[%s1528_s6 + $0x5c] ss:$20 sps:$4 sm:$0xff]   ;;  %v1352_v48 = vld [vmem:[%s1528_s6 + $0x58] ss:$20 sps:$4 sm:$0xff]   ;;  %v1360_v54 = vld [vmem:[%s1528_s6 + $0x80] ss:$20 sps:$4 sm:$0xff]  }
  0x17   : > { %1190 = vmatprep.subr.bf16.mxu1 %v1316_v17  ;;  %v1355_v49 = vld [vmem:[%s1528_s6 + $0x7c] ss:$20 sps:$4 sm:$0xff]   ;;  %v1357_v50 = vld [vmem:[%s1528_s6 + $0x84] ss:$20 sps:$4 sm:$0xff]   ;;  %v1364_v56 = vld [vmem:[%s1528_s6 + $0x60] ss:$20 sps:$4 sm:$0xff]  }
  0x18   : > { %v1361_v52 = vld [vmem:[%s1597_s1 + $0x130] sm:$0xff]   ;;  %v1359_v53 = vld [vmem:[%s1528_s6 + $0x78] ss:$20 sps:$4 sm:$0xff]   ;;  %v1366_v59 = vld [vmem:[%s1528_s6 + $0x88] ss:$20 sps:$4 sm:$0xff]  }
  0x19   : > { %1151 = vmatpush3.bf16.msra.mxu0 %v1317_v18  ;;  %v1363_v55 = vld [vmem:[%s1528_s6 + $0x10] ss:$20 sps:$4 sm:$0xff]   ;;  %v1362_v57 = vld [vmem:[%s1597_s1 + $0x138] sm:$0xff]   ;;  %v1040_v62 = vld [vmem:[%s1598_s2] ss:$0 sm:$0xff] }
  0x1a   : > { %1191 = vmatpush3.bf16.msra.mxu1 %v1318_v19  ;;  %1152 = vmatprep.subr.bf16.mxu0 %v1319_v20  ;;  %v1365_v58 = vld [vmem:[%s1528_s6 + $0x38] ss:$20 sps:$4 sm:$0xff]   ;;  %s1039_s6 = sshll.u32 %s1605_s23, 2 }
  0x1b   : > { %1192 = vmatprep.subr.bf16.mxu1 %v1320_v21  ;;  %s226_s9 = scalar_lea.vmem %s1599_s3, %s1039_s6 }
  0x1d   : > { %1153 = vmatpush3.bf16.msra.mxu0 %v1321_v22 }
  0x1e   : > { %1193 = vmatpush3.bf16.msra.mxu1 %v1322_v23  ;;  %1154 = vmatprep.subr.bf16.mxu0 %v1323_v24 }
  0x1f   : > { %1194 = vmatprep.subr.bf16.mxu1 %v1324_v25 }
  0x21   : > { %1155 = vmatpush3.bf16.msra.mxu0 %v1325_v26 }
  0x22   : > { %1195 = vmatpush3.bf16.msra.mxu1 %v1326_v27  ;;  %1156 = vmatprep.subr.bf16.mxu0 %v1327_v28 }
  0x23   : > { %1196 = vmatprep.subr.bf16.mxu1 %v1328_v29 }
  0x25   : > { %1157 = vmatpush3.bf16.msra.mxu0 %v1329_v30 }
  0x26   : > { %1197 = vmatpush3.bf16.msra.mxu1 %v1330_v31  ;;  %1234 = vmatprep.subr.bf16.mxu0 %v1337_v36 }
  0x27   : > { %1258 = vmatprep.subr.bf16.mxu1 %v1337_v36 }
  0x28   : > { %717 = vmatmul.mubr.bf16.vlgmr.msra.gmra.mrb[0].mxu0 %v1331_v32 }
  0x29   : > { %782 = vmatmul.mubr.bf16.vlgmr.msra.gmra.mrb[0].mxu1 %v1334_v34  ;;  %1235 = vmatpush3.bf16.msra.mxu0 %v1337_v36 }
  0x2a   : > { %1266 = vmatpush3.bf16.msra.mxu1 %v1337_v36  ;;  %1236 = vmatprep.subr.bf16.mxu0 %v1338_v37 }
  0x2b   : > { %1259 = vmatprep.subr.bf16.mxu1 %v1338_v37  ;;  %724 = vmatprep.mubr.bf16.mxu0 %v1339_v38 }
  0x2c   : > { %789 = vmatprep.mubr.bf16.mxu1 %v1341_v39 }
  0x2d   : > { %1237 = vmatpush3.bf16.msra.mxu0 %v1338_v37 }
  0x2e   : > { %1267 = vmatpush3.bf16.msra.mxu1 %v1338_v37  ;;  %1238 = vmatprep.subr.bf16.mxu0 %v1345_v41 }
  0x2f   : > { %1260 = vmatprep.subr.bf16.mxu1 %v1345_v41 }
  0x30   : > { %725 = vmatmul.mubr.bf16.gmra.mrb[4].mxu0 %v1343_v40 }
  0x31   : > { %790 = vmatmul.mubr.bf16.gmra.mrb[4].mxu1 %v1344_v42  ;;  %732 = vmatprep.mubr.bf16.mxu0 %v1347_v43 }
  0x32   : > { %1239 = vmatpush3.bf16.msra.mxu0 %v1345_v41  ;;  %797 = vmatprep.mubr.bf16.mxu1 %v1349_v45 }
  0x33   : > { %1268 = vmatpush3.bf16.msra.mxu1 %v1345_v41  ;;  %1240 = vmatprep.subr.bf16.mxu0 %v1346_v44 }
  0x34   : > { %1261 = vmatprep.subr.bf16.mxu1 %v1346_v44 }
  0x36   : > { %1241 = vmatpush3.bf16.msra.mxu0 %v1346_v44 }
  0x37   : > { %1269 = vmatpush3.bf16.msra.mxu1 %v1346_v44  ;;  %1242 = vmatprep.subr.bf16.mxu0 %v1353_v46 }
  0x38   : > { %733 = vmatmul.mubr.bf16.gmra.mrb[8].mxu0 %v1351_v47  ;;  %1262 = vmatprep.subr.bf16.mxu1 %v1353_v46 }
  0x39   : > { %798 = vmatmul.mubr.bf16.gmra.mrb[8].mxu1 %v1352_v48  ;;  %740 = vmatprep.mubr.bf16.mxu0 %v1355_v49 }
  0x3a   : > { %1243 = vmatpush3.bf16.msra.mxu0 %v1353_v46  ;;  %805 = vmatprep.mubr.bf16.mxu1 %v1357_v50 }
  0x3b   : > { %1270 = vmatpush3.bf16.msra.mxu1 %v1353_v46  ;;  %1244 = vmatprep.subr.bf16.mxu0 %v1354_v51 }
  0x3c   : > { %1263 = vmatprep.subr.bf16.mxu1 %v1354_v51 }
  0x3e   : > { %1245 = vmatpush3.bf16.msra.mxu0 %v1354_v51 }
  0x3f   : > { %1271 = vmatpush3.bf16.msra.mxu1 %v1354_v51  ;;  %1246 = vmatprep.subr.bf16.mxu0 %v1361_v52 }
  0x40   : > { %741 = vmatmul.mubr.bf16.gmra.mrb[12].mxu0 %v1359_v53  ;;  %1264 = vmatprep.subr.bf16.mxu1 %v1361_v52 }
  0x41   : > { %806 = vmatmul.mubr.bf16.gmra.mrb[12].mxu1 %v1360_v54  ;;  %1250 = vmatprep.mubr.bf16.mxu0 %v1363_v55 }
  0x42   : > { %1247 = vmatpush3.bf16.msra.mxu0 %v1361_v52  ;;  %1254 = vmatprep.mubr.bf16.mxu1 %v1364_v56 }
  0x43   : > { %1272 = vmatpush3.bf16.msra.mxu1 %v1361_v52  ;;  %1248 = vmatprep.subr.bf16.mxu0 %v1362_v57 }
  0x44   : > { %1265 = vmatprep.subr.bf16.mxu1 %v1362_v57 }
  0x46   : > { %1249 = vmatpush3.bf16.msra.mxu0 %v1362_v57 }
  0x47   : > { %1273 = vmatpush3.bf16.msra.mxu1 %v1362_v57 }
  0x49   : > { %1251 = vmatmul.mubr.bf16.vlgmr.msra.gmra.mrb[16].mxu0 %v1365_v58 }
  0x4a   : > { %1255 = vmatmul.mubr.bf16.vlgmr.msra.gmra.mrb[16].mxu1 %v1366_v59 }
  0xfb   : > { %v1158_v60 = vpop.f32.mrb[0].mxu0 }
  0xfc   : > { %v1198_v61 = vpop.f32.mrb[0].mxu1  ;;  %v1159_v63 = vpop.f32.mrb[1].mxu0 }
  0xfd   : > { %v1160_v0 = vadd.f32 %v1159_v63, %v1158_v60  ;;  %v1199_v1 = vpop.f32.mrb[1].mxu1  ;;  %v1161_v2 = vpop.f32.mrb[2].mxu0 }
  0xfe   : > { %v1200_v3 = vadd.f32 %v1199_v1, %v1198_v61  ;;  %v1201_v4 = vpop.f32.mrb[2].mxu1  ;;  %v1162_v5 = vpop.f32.mrb[3].mxu0 }
  0xff   : > { %v719_v6 = vadd.f32 %v1160_v0, %v1040_v62  ;;  %v1163_v7 = vadd.f32 %v1162_v5, %v1161_v2  ;;  %v1202_v8 = vpop.f32.mrb[3].mxu1 }
 0x100   : > { %v1203_v9 = vadd.f32 %v1202_v8, %v1201_v4 }
 0x101   : > { %v722_v10 = vadd.f32 %v1163_v7, %v1040_v62  ;;  %v784_v11 = vadd.f32 %v1200_v3, %v719_v6 }
 0x103   : > { %v1164_v12 = vpop.f32.mrb[4].mxu0  ;;  %v787_v13 = vadd.f32 %v1203_v9, %v722_v10 }
 0x104   : > { %v1204_v14 = vpop.f32.mrb[4].mxu1  ;;  %v1165_v15 = vpop.f32.mrb[5].mxu0 }
 0x105   : > { %v1166_v16 = vadd.f32 %v1165_v15, %v1164_v12  ;;  %v1205_v17 = vpop.f32.mrb[5].mxu1  ;;  %v1167_v18 = vpop.f32.mrb[6].mxu0 }
 0x106   : > { %v1206_v19 = vadd.f32 %v1205_v17, %v1204_v14  ;;  %v1207_v20 = vpop.f32.mrb[6].mxu1  ;;  %v1168_v21 = vpop.f32.mrb[7].mxu0 }
 0x107   : > { %v727_v22 = vadd.f32 %v1166_v16, %v1040_v62  ;;  %v1169_v23 = vadd.f32 %v1168_v21, %v1167_v18  ;;  %v1208_v24 = vpop.f32.mrb[7].mxu1 }
 0x108   : > { %v1209_v25 = vadd.f32 %v1208_v24, %v1207_v20 }
 0x109   : > { %v730_v26 = vadd.f32 %v1169_v23, %v1040_v62  ;;  %v792_v27 = vadd.f32 %v1206_v19, %v727_v22 }
 0x10b   : > { %v1170_v28 = vpop.f32.mrb[8].mxu0  ;;  %v795_v29 = vadd.f32 %v1209_v25, %v730_v26 }
 0x10c   : > { %v1210_v30 = vpop.f32.mrb[8].mxu1  ;;  %v1171_v31 = vpop.f32.mrb[9].mxu0 }
 0x10d   : > { %v1172_v32 = vadd.f32 %v1171_v31, %v1170_v28  ;;  %v1211_v33 = vpop.f32.mrb[9].mxu1  ;;  %v1173_v34 = vpop.f32.mrb[10].mxu0 }
 0x10e   : > { %v1212_v35 = vadd.f32 %v1211_v33, %v1210_v30  ;;  %v1213_v36 = vpop.f32.mrb[10].mxu1  ;;  %v1174_v37 = vpop.f32.mrb[11].mxu0 }
 0x10f   : > { %v735_v38 = vadd.f32 %v1172_v32, %v1040_v62  ;;  %v1175_v39 = vadd.f32 %v1174_v37, %v1173_v34  ;;  %v1214_v40 = vpop.f32.mrb[11].mxu1 }
 0x110   : > { %v1215_v41 = vadd.f32 %v1214_v40, %v1213_v36 }
 0x111   : > { %v738_v42 = vadd.f32 %v1175_v39, %v1040_v62  ;;  %v800_v43 = vadd.f32 %v1212_v35, %v735_v38 }
 0x113   : > { %v1176_v44 = vpop.f32.mrb[12].mxu0  ;;  %v803_v45 = vadd.f32 %v1215_v41, %v738_v42 }
 0x114   : > { %v1216_v46 = vpop.f32.mrb[12].mxu1  ;;  %v1177_v47 = vpop.f32.mrb[13].mxu0 }
 0x115   : > { %v1178_v48 = vadd.f32 %v1177_v47, %v1176_v44  ;;  %v1217_v49 = vpop.f32.mrb[13].mxu1  ;;  %v1179_v50 = vpop.f32.mrb[14].mxu0 }
 0x116   : > { %v1218_v51 = vadd.f32 %v1217_v49, %v1216_v46  ;;  %v1219_v52 = vpop.f32.mrb[14].mxu1  ;;  %v1180_v53 = vpop.f32.mrb[15].mxu0 }
 0x117   : > { %v743_v54 = vadd.f32 %v1178_v48, %v1040_v62  ;;  %v1181_v55 = vadd.f32 %v1180_v53, %v1179_v50  ;;  %v1220_v56 = vpop.f32.mrb[15].mxu1 }
 0x118   : > { %v1221_v57 = vadd.f32 %v1220_v56, %v1219_v52 }
 0x119   : > { %v746_v58 = vadd.f32 %v1181_v55, %v1040_v62  ;;  %v808_v59 = vadd.f32 %v1218_v51, %v743_v54 }
 0x11b   : > { %v811_v60 = vadd.f32 %v1221_v57, %v746_v58 }
 0x11c   : > { %v1252_v61 = vpop.f32.mrb[16].mxu0 }
 0x11d   : > { %v857_v63 = vadd.f32 %v1252_v61, %v792_v27  ;;  %v1256_v0 = vpop.f32.mrb[16].mxu1  ;;  %v848_v1 = vpop.f32.mrb[17].mxu0 }
 0x11e   : > { %v873_v2 = vadd.f32 %v1256_v0, %v808_v59  ;;  %v849_v3 = vadd.f32 %v848_v1, %v784_v11  ;;  %v864_v4 = vpop.f32.mrb[17].mxu1  ;;  %v1253_v5 = vpop.f32.mrb[18].mxu0 }
 0x11f   : > { %v865_v6 = vadd.f32 %v864_v4, %v800_v43  ;;  %v860_v7 = vadd.f32 %v1253_v5, %v795_v29  ;;  %v1257_v8 = vpop.f32.mrb[18].mxu1  ;;  %v851_v9 = vpop.f32.mrb[19].mxu0  ;;  %v881_v15 = vmax.f32 %v857_v63, 0.0 }
 0x120   : > { %v876_v10 = vadd.f32 %v1257_v8, %v811_v60  ;;  %v852_v12 = vadd.f32 %v851_v9, %v787_v13  ;;  %v867_v14 = vpop.f32.mrb[19].mxu1  ;;  %v885_v17 = vmax.f32 %v873_v2, 0.0  ;;  %v879_v18 = vmax.f32 %v849_v3, 0.0 }
 0x121   : > { %v882_v62 = vmax.f32 %v860_v7, 0.0  ;;  %v868_v16 = vadd.f32 %v867_v14, %v803_v45  ;;  %v883_v20 = vmax.f32 %v865_v6, 0.0 }
 0x122   : > { %v886_v11 = vmax.f32 %v876_v10, 0.0  ;;  %v880_v19 = vmax.f32 %v852_v12, 0.0 }
 0x123   : > { %v1127_v21 = vpack.c.bf16 %v882_v62, %v881_v15  ;;  %v884_v22 = vmax.f32 %v868_v16, 0.0 }
 0x124   : > { %v1137_v23 = vpack.c.bf16 %v886_v11, %v885_v17  ;;  %v1122_v24 = vpack.c.bf16 %v880_v19, %v879_v18 }
 0x125   : > { %1139 = vst [vmem:[%s226_s9 + $0x8] sm:$0xff] %v1127_v21   ;;  %v1132_v25 = vpack.c.bf16 %v884_v22, %v883_v20 }
 0x126   : > { %1141 = vst [vmem:[%s226_s9 + $0x18] sm:$0xff] %v1137_v23   ;;  %1123 = vst [vmem:[%s226_s9] sm:$0xff] %v1122_v24  }
 0x127   : > { %1140 = vst [vmem:[%s226_s9 + $0x10] sm:$0xff] %v1132_v25  }
 0x128 PF: > { %s13_s14 = sadd.s32 1, %s1389_s14   ;;  %s1600_s12 = smov %s1385_s13 }
 0x129   : > { %p10_p5 = scmp.ge.s32.totalorder %s13_s14, 4   ;;  %s1601_s13 = smov %s1603_s15 }
 0x12b   :  { %12 = sbr.rel (!%p10_p5) target bundleno = 2 (0x2), region = 68 }

// kernel: unetpp_forward.85
= control target key start
LH: loop header
LB: loop body
LE: loop exit
PB: predicated region body
PF: predicated region fallthrough
CT: control target
= control target key end

     0   :  { %s1523_s12 = smov 0   ;;  %s1525_s13 = smov 0   ;;  %s1745_s0 = inlined_call_operand.vmem [shape: bf16[128,768], index: 0, kind: input, shape index: {}]   ;;  %s1746_s1 = inlined_call_operand.vmem [shape: bf16[768,128], index: 1, kind: input, shape index: {}]   ;;  %s1747_s2 = inlined_call_operand.vmem [shape: f32[1,128], index: 2, kind: input, shape index: {}]   ;;  %s1748_s3 = inlined_call_operand.vmem [shape: bf16[128,128], index: 3, kind: output, shape index: {}]  }
   0x1   :  { %s1527_s14 = smov 0  }
   0x2 LB: > { %s25_s15 = sadd.s32 1, %s1497_s13  ;;  %p1115_p0 = scmp.ge.s32.totalorder %s1501_s14, 1  ;;  %s1501_s14 = sphi %s1527_s14, %s13_s14   ;;  %s1497_s13 = sphi %s1525_s13, %s1750_s13   ;;  %s1493_s12 = sphi %s1523_s12, %s1749_s12  }
   0x3   : > { %p27_p1 = scmp.ge.s32.totalorder %s25_s15, 2  ;;  %p170_p2 = scmp.lt.s32.totalorder %s1501_s14, 3 }
   0x5   : > { %s1752_s15 = smov (%p27_p1, %s25_s15), 0  ;;  %p171_p3 = pnand %p1115_p0, %p170_p2 }
   0x6   : > { %v1395_v0 = vld [vmem:[%s1746_s1 + $0x40] sm:$0xff] (!%p171_p3)   ;;  %v1399_v4 = vld [vmem:[%s1746_s1 + $0x48] sm:$0xff] (!%p171_p3)   ;;  %v1403_v8 = vld [vmem:[%s1746_s1 + $0x50] sm:$0xff] (!%p171_p3)   ;;  %s1116_s23 = sshll.u32 (!%p171_p3), %s1493_s12, 3 }
   0x7   : > { %174 = sbr.rel (%p171_p3) target bundleno = 306 (0x132), region = 32  ;;  %v1396_v1 = vld [vmem:[%s1746_s1 + $0xc0] sm:$0xff] (!%p171_p3)   ;;  %1234 = vmatprep.subr.bf16.mxu0 (!%p171_p3), %v1395_v0  ;;  %v1400_v5 = vld [vmem:[%s1746_s1 + $0xc8] sm:$0xff] (!%p171_p3)   ;;  %v1404_v9 = vld [vmem:[%s1746_s1 + $0xd0] sm:$0xff] (!%p171_p3)   ;;  %p206_p4 = scmp.lt.s32.totalorder (!%p171_p3), %s1116_s23, 15 }
   0x8   : > { %v1397_v2 = vld [vmem:[%s1746_s1] sm:$0xff] (!%p171_p3)   ;;  %1274 = vmatprep.subr.bf16.mxu1 (!%p171_p3), %v1396_v1  ;;  %v1401_v6 = vld [vmem:[%s1746_s1 + $0x8] sm:$0xff] (!%p171_p3)   ;;  %v1405_v10 = vld [vmem:[%s1746_s1 + $0x10] sm:$0xff] (!%p171_p3)  }
   0x9   : > { %v1398_v3 = vld [vmem:[%s1746_s1 + $0x80] sm:$0xff] (!%p171_p3)   ;;  %1235 = vmatpush3.bf16.msra.mxu0 (!%p171_p3), %v1397_v2  ;;  %v1402_v7 = vld [vmem:[%s1746_s1 + $0x88] sm:$0xff] (!%p171_p3)   ;;  %v1406_v11 = vld [vmem:[%s1746_s1 + $0x90] sm:$0xff] (!%p171_p3)  }
   0xa   : > { %1275 = vmatpush3.bf16.msra.mxu1 (!%p171_p3), %v1398_v3  ;;  %1236 = vmatprep.subr.bf16.mxu0 (!%p171_p3), %v1399_v4  ;;  %v1407_v12 = vld [vmem:[%s1746_s1 + $0x58] sm:$0xff] (!%p171_p3)   ;;  %v1411_v16 = vld [vmem:[%s1746_s1 + $0x60] sm:$0xff] (!%p171_p3)   ;;  %v1415_v20 = vld [vmem:[%s1746_s1 + $0x68] sm:$0xff] (!%p171_p3)  }
   0xb   : > { %1276 = vmatprep.subr.bf16.mxu1 (!%p171_p3), %v1400_v5  ;;  %v1408_v13 = vld [vmem:[%s1746_s1 + $0xd8] sm:$0xff] (!%p171_p3)   ;;  %v1412_v17 = vld [vmem:[%s1746_s1 + $0xe0] sm:$0xff] (!%p171_p3)   ;;  %v1416_v21 = vld [vmem:[%s1746_s1 + $0xe8] sm:$0xff] (!%p171_p3)  }
   0xc   : > { %v1409_v14 = vld [vmem:[%s1746_s1 + $0x18] sm:$0xff] (!%p171_p3)   ;;  %v1413_v18 = vld [vmem:[%s1746_s1 + $0x20] sm:$0xff] (!%p171_p3)   ;;  %v1417_v22 = vld [vmem:[%s1746_s1 + $0x28] sm:$0xff] (!%p171_p3)  }
   0xd   : > { %1237 = vmatpush3.bf16.msra.mxu0 (!%p171_p3), %v1401_v6  ;;  %v1410_v15 = vld [vmem:[%s1746_s1 + $0x98] sm:$0xff] (!%p171_p3)   ;;  %v1414_v19 = vld [vmem:[%s1746_s1 + $0xa0] sm:$0xff] (!%p171_p3)   ;;  %v1418_v23 = vld [vmem:[%s1746_s1 + $0xa8] sm:$0xff] (!%p171_p3)  }
   0xe   : > { %1277 = vmatpush3.bf16.msra.mxu1 %v1402_v7  ;;  %1238 = vmatprep.subr.bf16.mxu0 %v1403_v8  ;;  %s1754_s23 = smov (!%p206_p4, %s1116_s23), 15  ;;  %v1419_v24 = vld [vmem:[%s1746_s1 + $0x70] sm:$0xff]   ;;  %v1423_v28 = vld [vmem:[%s1746_s1 + $0x78] sm:$0xff]   ;;  %v1433_v36 = vld [vmem:[%s1746_s1 + $0x140] sm:$0xff]  }
   0xf   : > { %1278 = vmatprep.subr.bf16.mxu1 %v1404_v9  ;;  %v1420_v25 = vld [vmem:[%s1746_s1 + $0xf0] sm:$0xff]   ;;  %s1370_s22 = smul.u32 24, %s1754_s23  ;;  %v1424_v29 = vld [vmem:[%s1746_s1 + $0xf8] sm:$0xff]   ;;  %v1434_v37 = vld [vmem:[%s1746_s1 + $0x100] sm:$0xff]  }
  0x10   : > { %v1421_v26 = vld [vmem:[%s1746_s1 + $0x30] sm:$0xff]   ;;  %v1425_v30 = vld [vmem:[%s1746_s1 + $0x38] sm:$0xff]   ;;  %v1435_v38 = vld [vmem:[%s1746_s1 + $0x148] sm:$0xff]  }
  0x11   : > { %1239 = vmatpush3.bf16.msra.mxu0 %v1405_v10  ;;  %v1422_v27 = vld [vmem:[%s1746_s1 + $0xb0] sm:$0xff]   ;;  %s1640_s6 = scalar_lea.vmem %s1745_s0, %s1370_s22  ;;  %v1426_v31 = vld [vmem:[%s1746_s1 + $0xb8] sm:$0xff]   ;;  %v1436_v39 = vld [vmem:[%s1746_s1 + $0x108] sm:$0xff]  }
  0x12   : > { %1279 = vmatpush3.bf16.msra.mxu1 %v1406_v11  ;;  %1240 = vmatprep.subr.bf16.mxu0 %v1407_v12  ;;  %v1427_v32 = vld [vmem:[%s1640_s6] ss:$24 sps:$4 sm:$0xff]   ;;  %v1429_v33 = vld [vmem:[%s1640_s6 + $0x4] ss:$24 sps:$4 sm:$0xff]   ;;  %v1437_v40 = vld [vmem:[%s1640_s6 + $0x34] ss:$24 sps:$4 sm:$0xff]  }
  0x13   : > { %1280 = vmatprep.subr.bf16.mxu1 %v1408_v13  ;;  %v1430_v34 = vld [vmem:[%s1640_s6 + $0x8] ss:$24 sps:$4 sm:$0xff]   ;;  %v1432_v35 = vld [vmem:[%s1640_s6 + $0xc] ss:$24 sps:$4 sm:$0xff]   ;;  %796 = vmatprep.mubr.bf16.mxu0 %v1429_v33  ;;  %v1439_v41 = vld [vmem:[%s1640_s6 + $0x3c] ss:$24 sps:$4 sm:$0xff]  }
  0x14   : > { %861 = vmatprep.mubr.bf16.mxu1 %v1432_v35  ;;  %v1441_v42 = vld [vmem:[%s1640_s6 + $0x30] ss:$24 sps:$4 sm:$0xff]   ;;  %v1445_v46 = vld [vmem:[%s1746_s1 + $0x158] sm:$0xff]   ;;  %v1449_v49 = vld [vmem:[%s1640_s6 + $0x6c] ss:$24 sps:$4 sm:$0xff]  }
  0x15   : > { %1241 = vmatpush3.bf16.msra.mxu0 %v1409_v14  ;;  %v1442_v43 = vld [vmem:[%s1640_s6 + $0x38] ss:$24 sps:$4 sm:$0xff]   ;;  %v1447_v48 = vld [vmem:[%s1640_s6 + $0x64] ss:$24 sps:$4 sm:$0xff]   ;;  %v1452_v52 = vld [vmem:[%s1640_s6 + $0x68] ss:$24 sps:$4 sm:$0xff]  }
  0x16   : > { %1281 = vmatpush3.bf16.msra.mxu1 %v1410_v15  ;;  %1242 = vmatprep.subr.bf16.mxu0 %v1411_v16  ;;  %v1443_v44 = vld [vmem:[%s1746_s1 + $0x150] sm:$0xff]   ;;  %v1446_v47 = vld [vmem:[%s1746_s1 + $0x118] sm:$0xff]   ;;  %v1453_v51 = vld [vmem:[%s1746_s1 + $0x160] sm:$0xff]  }
  0x17   : > { %1282 = vmatprep.subr.bf16.mxu1 %v1412_v17  ;;  %v1444_v45 = vld [vmem:[%s1746_s1 + $0x110] sm:$0xff]   ;;  %v1451_v50 = vld [vmem:[%s1640_s6 + $0x60] ss:$24 sps:$4 sm:$0xff]   ;;  %v1455_v54 = vld [vmem:[%s1746_s1 + $0x168] sm:$0xff]  }
  0x18   : > { %v1454_v53 = vld [vmem:[%s1746_s1 + $0x120] sm:$0xff]   ;;  %v1457_v55 = vld [vmem:[%s1640_s6 + $0x94] ss:$24 sps:$4 sm:$0xff]   ;;  %v1461_v59 = vld [vmem:[%s1640_s6 + $0x90] ss:$24 sps:$4 sm:$0xff]  }
  0x19   : > { %1243 = vmatpush3.bf16.msra.mxu0 %v1413_v18  ;;  %v1459_v56 = vld [vmem:[%s1640_s6 + $0x9c] ss:$24 sps:$4 sm:$0xff]   ;;  %v1456_v57 = vld [vmem:[%s1746_s1 + $0x128] sm:$0xff]   ;;  %v1462_v60 = vld [vmem:[%s1640_s6 + $0x98] ss:$24 sps:$4 sm:$0xff]  }
  0x1a   : > { %1283 = vmatpush3.bf16.msra.mxu1 %v1414_v19  ;;  %1244 = vmatprep.subr.bf16.mxu0 %v1415_v20  ;;  %v1463_v58 = vld [vmem:[%s1746_s1 + $0x170] sm:$0xff]   ;;  %v1465_v62 = vld [vmem:[%s1746_s1 + $0x178] sm:$0xff]   ;;  %v1120_v10 = vld [vmem:[%s1747_s2] ss:$0 sm:$0xff] }
  0x1b   : > { %1284 = vmatprep.subr.bf16.mxu1 %v1416_v21  ;;  %v1464_v61 = vld [vmem:[%s1746_s1 + $0x130] sm:$0xff]   ;;  %v1466_v1 = vld [vmem:[%s1746_s1 + $0x138] sm:$0xff]  }
  0x1c   : > { %v1469_v63 = vld [vmem:[%s1640_s6 + $0x14] ss:$24 sps:$4 sm:$0xff]   ;;  %v1467_v2 = vld [vmem:[%s1640_s6 + $0x10] ss:$24 sps:$4 sm:$0xff]   ;;  %v1473_v4 = vld [vmem:[%s1640_s6 + $0x44] ss:$24 sps:$4 sm:$0xff]  }
  0x1d   : > { %1245 = vmatpush3.bf16.msra.mxu0 %v1417_v22  ;;  %v1472_v0 = vld [vmem:[%s1640_s6 + $0x74] ss:$24 sps:$4 sm:$0xff]   ;;  %v1470_v3 = vld [vmem:[%s1640_s6 + $0x70] ss:$24 sps:$4 sm:$0xff]   ;;  %v1475_v5 = vld [vmem:[%s1640_s6 + $0xa4] ss:$24 sps:$4 sm:$0xff]  }
  0x1e   : > { %1285 = vmatpush3.bf16.msra.mxu1 %v1418_v23  ;;  %1246 = vmatprep.subr.bf16.mxu0 %v1419_v24  ;;  %v1477_v6 = vld [vmem:[%s1640_s6 + $0x40] ss:$24 sps:$4 sm:$0xff]  }
  0x1f   : > { %1286 = vmatprep.subr.bf16.mxu1 %v1420_v25  ;;  %v1478_v7 = vld [vmem:[%s1640_s6 + $0xa0] ss:$24 sps:$4 sm:$0xff]   ;;  %s1119_s6 = sshll.u32 %s1754_s23, 2 }
  0x20   : > { %s226_s30 = scalar_lea.vmem %s1748_s3, %s1119_s6 }
  0x21   : > { %1247 = vmatpush3.bf16.msra.mxu0 %v1421_v26 }
  0x22   : > { %1287 = vmatpush3.bf16.msra.mxu1 %v1422_v27  ;;  %1248 = vmatprep.subr.bf16.mxu0 %v1423_v28 }
  0x23   : > { %1288 = vmatprep.subr.bf16.mxu1 %v1424_v29 }
  0x25   : > { %1249 = vmatpush3.bf16.msra.mxu0 %v1425_v30 }
  0x26   : > { %1289 = vmatpush3.bf16.msra.mxu1 %v1426_v31  ;;  %1314 = vmatprep.subr.bf16.mxu0 %v1433_v36 }
  0x27   : > { %1354 = vmatprep.subr.bf16.mxu1 %v1433_v36 }
  0x28   : > { %797 = vmatmul.mubr.bf16.vlgmr.msra.gmra.mrb[0].mxu0 %v1427_v32 }
  0x29   : > { %862 = vmatmul.mubr.bf16.vlgmr.msra.gmra.mrb[0].mxu1 %v1430_v34  ;;  %1315 = vmatpush3.bf16.msra.mxu0 %v1434_v37 }
  0x2a   : > { %1362 = vmatpush3.bf16.msra.mxu1 %v1434_v37  ;;  %1316 = vmatprep.subr.bf16.mxu0 %v1435_v38 }
  0x2b   : > { %1355 = vmatprep.subr.bf16.mxu1 %v1435_v38  ;;  %804 = vmatprep.mubr.bf16.mxu0 %v1437_v40 }
  0x2c   : > { %869 = vmatprep.mubr.bf16.mxu1 %v1439_v41 }
  0x2d   : > { %1317 = vmatpush3.bf16.msra.mxu0 %v1436_v39 }
  0x2e   : > { %1363 = vmatpush3.bf16.msra.mxu1 %v1436_v39  ;;  %1318 = vmatprep.subr.bf16.mxu0 %v1443_v44 }
  0x2f   : > { %1356 = vmatprep.subr.bf16.mxu1 %v1443_v44 }
  0x30   : > { %805 = vmatmul.mubr.bf16.gmra.mrb[4].mxu0 %v1441_v42 }
  0x31   : > { %870 = vmatmul.mubr.bf16.gmra.mrb[4].mxu1 %v1442_v43  ;;  %1319 = vmatpush3.bf16.msra.mxu0 %v1444_v45 }
  0x32   : > { %1364 = vmatpush3.bf16.msra.mxu1 %v1444_v45  ;;  %1320 = vmatprep.subr.bf16.mxu0 %v1445_v46 }
  0x33   : > { %1357 = vmatprep.subr.bf16.mxu1 %v1445_v46  ;;  %812 = vmatprep.mubr.bf16.mxu0 %v1447_v48 }
  0x34   : > { %877 = vmatprep.mubr.bf16.mxu1 %v1449_v49 }
  0x35   : > { %1321 = vmatpush3.bf16.msra.mxu0 %v1446_v47 }
  0x36   : > { %1365 = vmatpush3.bf16.msra.mxu1 %v1446_v47  ;;  %1322 = vmatprep.subr.bf16.mxu0 %v1453_v51 }
  0x37   : > { %1358 = vmatprep.subr.bf16.mxu1 %v1453_v51 }
  0x38   : > { %813 = vmatmul.mubr.bf16.gmra.mrb[8].mxu0 %v1451_v50 }
  0x39   : > { %878 = vmatmul.mubr.bf16.gmra.mrb[8].mxu1 %v1452_v52  ;;  %1323 = vmatpush3.bf16.msra.mxu0 %v1454_v53 }
  0x3a   : > { %820 = vmatprep.mubr.bf16.mxu0 %v1457_v55  ;;  %1366 = vmatpush3.bf16.msra.mxu1 %v1454_v53 }
  0x3b   : > { %1324 = vmatprep.subr.bf16.mxu0 %v1455_v54  ;;  %1359 = vmatprep.subr.bf16.mxu1 %v1455_v54 }
  0x3c   : > { %885 = vmatprep.mubr.bf16.mxu1 %v1459_v56 }
  0x3d   : > { %1325 = vmatpush3.bf16.msra.mxu0 %v1456_v57 }
  0x3e   : > { %1367 = vmatpush3.bf16.msra.mxu1 %v1456_v57  ;;  %1326 = vmatprep.subr.bf16.mxu0 %v1463_v58 }
  0x3f   : > { %1360 = vmatprep.subr.bf16.mxu1 %v1463_v58 }
  0x40   : > { %821 = vmatmul.mubr.bf16.gmra.mrb[12].mxu0 %v1461_v59 }
  0x41   : > { %886 = vmatmul.mubr.bf16.gmra.mrb[12].mxu1 %v1462_v60  ;;  %926 = vmatprep.mubr.bf16.mxu0 %v1469_v63 }
  0x42   : > { %1327 = vmatpush3.bf16.msra.mxu0 %v1464_v61  ;;  %1368 = vmatpush3.bf16.msra.mxu1 %v1464_v61 }
  0x43   : > { %1328 = vmatprep.subr.bf16.mxu0 %v1465_v62  ;;  %1361 = vmatprep.subr.bf16.mxu1 %v1465_v62 }
  0x44   : > { %942 = vmatprep.mubr.bf16.mxu1 %v1472_v0 }
  0x46   : > { %1329 = vmatpush3.bf16.msra.mxu0 %v1466_v1  ;;  %1369 = vmatpush3.bf16.msra.mxu1 %v1466_v1 }
  0x49   : > { %927 = vmatmul.mubr.bf16.vlgmr.msra.gmra.mrb[16].mxu0 %v1467_v2  ;;  %943 = vmatmul.mubr.bf16.vlgmr.msra.gmra.mrb[16].mxu1 %v1470_v3 }
  0x4a   : > { %934 = vmatprep.mubr.bf16.mxu0 %v1473_v4  ;;  %950 = vmatprep.mubr.bf16.mxu1 %v1475_v5 }
  0x51   : > { %935 = vmatmul.mubr.bf16.gmra.mrb[20].mxu0 %v1477_v6  ;;  %951 = vmatmul.mubr.bf16.gmra.mrb[20].mxu1 %v1478_v7 }
  0xfb   : > { %v1250_v8 = vpop.f32.mrb[0].mxu0 }
  0xfc   : > { %v1290_v9 = vpop.f32.mrb[0].mxu1  ;;  %v1251_v11 = vpop.f32.mrb[1].mxu0 }
  0xfd   : > { %v1252_v12 = vadd.f32 %v1251_v11, %v1250_v8  ;;  %v1291_v13 = vpop.f32.mrb[1].mxu1  ;;  %v1253_v14 = vpop.f32.mrb[2].mxu0 }
  0xfe   : > { %v1292_v15 = vadd.f32 %v1291_v13, %v1290_v9  ;;  %v1293_v16 = vpop.f32.mrb[2].mxu1  ;;  %v1254_v17 = vpop.f32.mrb[3].mxu0 }
  0xff   : > { %v799_v18 = vadd.f32 %v1252_v12, %v1120_v10  ;;  %v1255_v19 = vadd.f32 %v1254_v17, %v1253_v14  ;;  %v1294_v20 = vpop.f32.mrb[3].mxu1 }
 0x100   : > { %v1295_v21 = vadd.f32 %v1294_v20, %v1293_v16 }
 0x101   : > { %v864_v22 = vadd.f32 %v1292_v15, %v799_v18  ;;  %v802_v23 = vadd.f32 %v1255_v19, %v1120_v10 }
 0x103   : > { %v1723_v24 = vadd.f32 %v1295_v21, %v802_v23  ;;  %v1256_v25 = vpop.f32.mrb[4].mxu0 }
 0x104   : > { %v1296_v26 = vpop.f32.mrb[4].mxu1  ;;  %v1257_v27 = vpop.f32.mrb[5].mxu0 }
 0x105   : > { %v1258_v28 = vadd.f32 %v1257_v27, %v1256_v25  ;;  %v1297_v29 = vpop.f32.mrb[5].mxu1  ;;  %v1259_v30 = vpop.f32.mrb[6].mxu0 }
 0x106   : > { %v1298_v31 = vadd.f32 %v1297_v29, %v1296_v26  ;;  %v1299_v32 = vpop.f32.mrb[6].mxu1  ;;  %v1260_v33 = vpop.f32.mrb[7].mxu0 }
 0x107   : > { %v807_v34 = vadd.f32 %v1258_v28, %v1120_v10  ;;  %v1261_v35 = vadd.f32 %v1260_v33, %v1259_v30  ;;  %v1300_v36 = vpop.f32.mrb[7].mxu1 }
 0x108   : > { %v1301_v37 = vadd.f32 %v1300_v36, %v1299_v32 }
 0x109   : > { %v1725_v38 = vadd.f32 %v1298_v31, %v807_v34  ;;  %v810_v39 = vadd.f32 %v1261_v35, %v1120_v10 }
 0x10b   : > { %v1727_v40 = vadd.f32 %v1301_v37, %v810_v39  ;;  %v1262_v41 = vpop.f32.mrb[8].mxu0 }
 0x10c   : > { %v1302_v42 = vpop.f32.mrb[8].mxu1  ;;  %v1263_v43 = vpop.f32.mrb[9].mxu0 }
 0x10d   : > { %v1264_v44 = vadd.f32 %v1263_v43, %v1262_v41  ;;  %v1303_v45 = vpop.f32.mrb[9].mxu1  ;;  %v1265_v46 = vpop.f32.mrb[10].mxu0 }
 0x10e   : > { %v1304_v47 = vadd.f32 %v1303_v45, %v1302_v42  ;;  %v1305_v48 = vpop.f32.mrb[10].mxu1  ;;  %v1266_v49 = vpop.f32.mrb[11].mxu0 }
 0x10f   : > { %v815_v50 = vadd.f32 %v1264_v44, %v1120_v10  ;;  %v1267_v51 = vadd.f32 %v1266_v49, %v1265_v46  ;;  %v1306_v52 = vpop.f32.mrb[11].mxu1 }
 0x110   : > { %v1307_v53 = vadd.f32 %v1306_v52, %v1305_v48 }
 0x111   : > { %v880_v54 = vadd.f32 %v1304_v47, %v815_v50  ;;  %v818_v55 = vadd.f32 %v1267_v51, %v1120_v10 }
 0x113   : > { %v883_v56 = vadd.f32 %v1307_v53, %v818_v55  ;;  %v1268_v57 = vpop.f32.mrb[12].mxu0 }
 0x114   : > { %v1308_v58 = vpop.f32.mrb[12].mxu1  ;;  %v1269_v59 = vpop.f32.mrb[13].mxu0 }
 0x115   : > { %v1270_v60 = vadd.f32 %v1269_v59, %v1268_v57  ;;  %v1309_v61 = vpop.f32.mrb[13].mxu1  ;;  %v1271_v62 = vpop.f32.mrb[14].mxu0 }
 0x116   : > { %v1310_v63 = vadd.f32 %v1309_v61, %v1308_v58  ;;  %v1311_v0 = vpop.f32.mrb[14].mxu1  ;;  %v1272_v1 = vpop.f32.mrb[15].mxu0 }
 0x117   : > { %v823_v2 = vadd.f32 %v1270_v60, %v1120_v10  ;;  %v1273_v3 = vadd.f32 %v1272_v1, %v1271_v62  ;;  %v1312_v4 = vpop.f32.mrb[15].mxu1 }
 0x118   : > { %v1313_v5 = vadd.f32 %v1312_v4, %v1311_v0 }
 0x119   : > { %v888_v6 = vadd.f32 %v1310_v63, %v823_v2  ;;  %v826_v7 = vadd.f32 %v1273_v3, %v1120_v10 }
 0x11b   : > { %v891_v8 = vadd.f32 %v1313_v5, %v826_v7 }
 0x11c   : > { %v1330_v9 = vpop.f32.mrb[16].mxu0  ;;  %v1342_v11 = vpop.f32.mrb[16].mxu1 }
 0x11d   : > { %v1331_v12 = vpop.f32.mrb[17].mxu0  ;;  %v1343_v14 = vpop.f32.mrb[17].mxu1 }
 0x11e   : > { %v1332_v13 = vadd.f32 %v1331_v12, %v1330_v9  ;;  %v1333_v15 = vpop.f32.mrb[18].mxu0  ;;  %v1344_v16 = vadd.f32 %v1343_v14, %v1342_v11  ;;  %v1345_v17 = vpop.f32.mrb[18].mxu1 }
 0x11f   : > { %v1334_v18 = vpop.f32.mrb[19].mxu0  ;;  %v1346_v21 = vpop.f32.mrb[19].mxu1 }
 0x120   : > { %v929_v19 = vadd.f32 %v1332_v13, %v864_v22  ;;  %v1335_v20 = vadd.f32 %v1334_v18, %v1333_v15  ;;  %v945_v23 = vadd.f32 %v1344_v16, %v880_v54  ;;  %v1347_v25 = vadd.f32 %v1346_v21, %v1345_v17 }
 0x122   : > { %v932_v26 = vadd.f32 %v1335_v20, %v1723_v24  ;;  %v948_v10 = vadd.f32 %v1347_v25, %v883_v56  ;;  %v959_v27 = vmax.f32 %v929_v19, 0.0  ;;  %v963_v30 = vmax.f32 %v945_v23, 0.0 }
 0x124   : > { %v960_v28 = vmax.f32 %v932_v26, 0.0  ;;  %v1336_v29 = vpop.f32.mrb[20].mxu0  ;;  %v964_v31 = vmax.f32 %v948_v10, 0.0  ;;  %v1348_v32 = vpop.f32.mrb[20].mxu1 }
 0x125   : > { %v1337_v33 = vpop.f32.mrb[21].mxu0  ;;  %v1349_v35 = vpop.f32.mrb[21].mxu1 }
 0x126   : > { %v1214_v22 = vpack.c.bf16 %v960_v28, %v959_v27  ;;  %v1338_v34 = vadd.f32 %v1337_v33, %v1336_v29  ;;  %v1339_v36 = vpop.f32.mrb[22].mxu0  ;;  %v1224_v37 = vpack.c.bf16 %v964_v31, %v963_v30  ;;  %v1350_v39 = vadd.f32 %v1349_v35, %v1348_v32  ;;  %v1351_v41 = vpop.f32.mrb[22].mxu1 }
 0x127   : > { %v1340_v24 = vpop.f32.mrb[23].mxu0  ;;  %v1352_v44 = vpop.f32.mrb[23].mxu1 }
 0x128   : > { %1215 = vst [vmem:[%s226_s30] sm:$0xff] %v1214_v22   ;;  %v937_v42 = vadd.f32 %v1338_v34, %v1725_v38  ;;  %v1341_v43 = vadd.f32 %v1340_v24, %v1339_v36  ;;  %1232 = vst [vmem:[%s226_s30 + $0x10] sm:$0xff] %v1224_v37   ;;  %v953_v45 = vadd.f32 %v1350_v39, %v888_v6 }
 0x129   : > { %v1353_v46 = vadd.f32 %v1352_v44, %v1351_v41 }
 0x12a   : > { %v940_v47 = vadd.f32 %v1341_v43, %v1727_v40  ;;  %v961_v49 = vmax.f32 %v937_v42, 0.0  ;;  %v965_v51 = vmax.f32 %v953_v45, 0.0 }
 0x12b   : > { %v956_v48 = vadd.f32 %v1353_v46, %v891_v8 }
 0x12c   : > { %v962_v50 = vmax.f32 %v940_v47, 0.0 }
 0x12d   : > { %v966_v52 = vmax.f32 %v956_v48, 0.0 }
 0x12e   : > { %v1219_v53 = vpack.c.bf16 %v962_v50, %v961_v49 }
 0x12f   : > { %v1229_v54 = vpack.c.bf16 %v966_v52, %v965_v51 }
 0x130   : > { %1231 = vst [vmem:[%s226_s30 + $0x8] sm:$0xff] %v1219_v53  }
 0x131   : > { %1233 = vst [vmem:[%s226_s30 + $0x18] sm:$0xff] %v1229_v54  }
 0x132 PF: > { %s13_s14 = sadd.s32 1, %s1501_s14   ;;  %s1749_s12 = smov %s1497_s13 }
 0x133   : > { %p10_p5 = scmp.ge.s32.totalorder %s13_s14, 4   ;;  %s1750_s13 = smov %s1752_s15 }
 0x135   :  { %12 = sbr.rel (!%p10_p5) target bundleno = 2 (0x2), region = 68 }

// kernel: unetpp_forward.61
= control target key start
LH: loop header
LB: loop body
LE: loop exit
PB: predicated region body
PF: predicated region fallthrough
CT: control target
= control target key end

     0   :  { %s1494_s12 = smov 0   ;;  %s1496_s13 = smov 0   ;;  %s1668_s0 = inlined_call_operand.vmem [shape: bf16[512,256], index: 0, kind: input, shape index: {}]   ;;  %s1669_s1 = inlined_call_operand.vmem [shape: bf16[256,128], index: 1, kind: input, shape index: {}]   ;;  %s1670_s2 = inlined_call_operand.vmem [shape: f32[1,128], index: 2, kind: input, shape index: {}]   ;;  %s1671_s3 = inlined_call_operand.vmem [shape: bf16[512,128], index: 3, kind: output, shape index: {}]  }
   0x1   :  { %s1498_s14 = smov 0  }
   0x2 LB: > { %s25_s15 = sadd.s32 1, %s1468_s13  ;;  %p1017_p0 = scmp.ge.s32.totalorder %s1472_s14, 1  ;;  %s1472_s14 = sphi %s1498_s14, %s13_s14   ;;  %s1468_s13 = sphi %s1496_s13, %s1673_s13   ;;  %s1464_s12 = sphi %s1494_s12, %s1672_s12  }
   0x3   : > { %p27_p1 = scmp.ge.s32.totalorder %s25_s15, 2  ;;  %p170_p2 = scmp.lt.s32.totalorder %s1472_s14, 3 }
   0x5   : > { %s1675_s15 = smov (%p27_p1, %s25_s15), 0  ;;  %p171_p3 = pnand %p1017_p0, %p170_p2 }
   0x6   : > { %v1386_v0 = vld [vmem:[%s1669_s1 + $0x40] sm:$0xff] (!%p171_p3)   ;;  %s1018_s18 = sshll.u32 (!%p171_p3), %s1464_s12, 5  ;;  %v1388_v2 = vld [vmem:[%s1669_s1 + $0x48] sm:$0xff] (!%p171_p3)   ;;  %v1390_v4 = vld [vmem:[%s1669_s1 + $0x50] sm:$0xff] (!%p171_p3)  }
   0x7   : > { %174 = sbr.rel (%p171_p3) target bundleno = 320 (0x140), region = 32  ;;  %v1387_v1 = vld [vmem:[%s1669_s1] sm:$0xff] (!%p171_p3)   ;;  %1234 = vmatprep.subr.bf16.mxu0 (!%p171_p3), %v1386_v0  ;;  %1346 = vmatprep.subr.bf16.mxu1 (!%p171_p3), %v1386_v0  ;;  %v1389_v3 = vld [vmem:[%s1669_s1 + $0x8] sm:$0xff] (!%p171_p3)   ;;  %p206_p4 = scmp.lt.s32.totalorder (!%p171_p3), %s1018_s18, 63  ;;  %v1391_v5 = vld [vmem:[%s1669_s1 + $0x10] sm:$0xff] (!%p171_p3)  }
   0x8   : > { %1235 = vmatpush3.bf16.msra.mxu0 (!%p171_p3), %v1387_v1  ;;  %1354 = vmatpush3.bf16.msra.mxu1 (!%p171_p3), %v1387_v1  ;;  %v1392_v6 = vld [vmem:[%s1669_s1 + $0x58] sm:$0xff] (!%p171_p3)   ;;  %v1394_v8 = vld [vmem:[%s1669_s1 + $0x60] sm:$0xff] (!%p171_p3)   ;;  %v1396_v10 = vld [vmem:[%s1669_s1 + $0x68] sm:$0xff] (!%p171_p3)  }
   0x9   : > { %1236 = vmatprep.subr.bf16.mxu0 (!%p171_p3), %v1388_v2  ;;  %1347 = vmatprep.subr.bf16.mxu1 (!%p171_p3), %v1388_v2  ;;  %v1393_v7 = vld [vmem:[%s1669_s1 + $0x18] sm:$0xff] (!%p171_p3)   ;;  %v1395_v9 = vld [vmem:[%s1669_s1 + $0x20] sm:$0xff] (!%p171_p3)   ;;  %v1397_v13 = vld [vmem:[%s1669_s1 + $0x28] sm:$0xff] (!%p171_p3)  }
   0xa   : > { %v1398_v14 = vld [vmem:[%s1669_s1 + $0x70] sm:$0xff] (!%p171_p3)   ;;  %v1400_v16 = vld [vmem:[%s1669_s1 + $0x78] sm:$0xff] (!%p171_p3)   ;;  %v1603_v50 = vld [vmem:[%s1670_s2] ss:$0 sm:$0xff] (!%p171_p3) }
   0xb   : > { %v1399_v15 = vld [vmem:[%s1669_s1 + $0x30] sm:$0xff] (!%p171_p3)   ;;  %v1401_v17 = vld [vmem:[%s1669_s1 + $0x38] sm:$0xff] (!%p171_p3)  }
   0xc   : > { %1237 = vmatpush3.bf16.msra.mxu0 (!%p171_p3), %v1389_v3  ;;  %1355 = vmatpush3.bf16.msra.mxu1 (!%p171_p3), %v1389_v3 }
   0xd   : > { %1238 = vmatprep.subr.bf16.mxu0 (!%p171_p3), %v1390_v4  ;;  %1348 = vmatprep.subr.bf16.mxu1 (!%p171_p3), %v1390_v4 }
   0xe   : > { %s1677_s18 = smov (!%p206_p4, %s1018_s18), 63 }
   0xf   : > { %s1106_s6 = sshll.u32 %s1677_s18, 3  ;;  %s1022_s5 = sshll.u32 %s1677_s18, 2 }
  0x10   : > { %1239 = vmatpush3.bf16.msra.mxu0 %v1391_v5  ;;  %1356 = vmatpush3.bf16.msra.mxu1 %v1391_v5  ;;  %s1545_s11 = scalar_lea.vmem %s1668_s0, %s1106_s6  ;;  %s1613_s8 = scalar_lea.vmem %s1671_s3, %s1022_s5 }
  0x11   : > { %1240 = vmatprep.subr.bf16.mxu0 %v1392_v6  ;;  %1349 = vmatprep.subr.bf16.mxu1 %v1392_v6  ;;  %v1404_v11 = vld [vmem:[%s1545_s11 + $0x4] ss:$8 sps:$4 sm:$0xff]   ;;  %v1402_v18 = vld [vmem:[%s1545_s11] ss:$8 sps:$4 sm:$0xff]   ;;  %v1408_v20 = vld [vmem:[%s1545_s11 + $0x14] ss:$8 sps:$4 sm:$0xff]  }
  0x12   : > { %v1407_v12 = vld [vmem:[%s1545_s11 + $0x84] ss:$8 sps:$4 sm:$0xff]   ;;  %588 = vmatprep.mubr.bf16.mxu0 %v1404_v11  ;;  %v1405_v19 = vld [vmem:[%s1545_s11 + $0x80] ss:$8 sps:$4 sm:$0xff]   ;;  %v1410_v21 = vld [vmem:[%s1545_s11 + $0x94] ss:$8 sps:$4 sm:$0xff]  }
  0x13   : > { %652 = vmatprep.mubr.bf16.mxu1 %v1407_v12  ;;  %v1412_v22 = vld [vmem:[%s1545_s11 + $0x10] ss:$8 sps:$4 sm:$0xff]   ;;  %v1414_v24 = vld [vmem:[%s1545_s11 + $0x24] ss:$8 sps:$4 sm:$0xff]   ;;  %v1418_v26 = vld [vmem:[%s1545_s11 + $0x20] ss:$8 sps:$4 sm:$0xff]  }
  0x14   : > { %1241 = vmatpush3.bf16.msra.mxu0 %v1393_v7  ;;  %1357 = vmatpush3.bf16.msra.mxu1 %v1393_v7  ;;  %v1413_v23 = vld [vmem:[%s1545_s11 + $0x90] ss:$8 sps:$4 sm:$0xff]   ;;  %v1416_v25 = vld [vmem:[%s1545_s11 + $0xa4] ss:$8 sps:$4 sm:$0xff]   ;;  %v1419_v27 = vld [vmem:[%s1545_s11 + $0xa0] ss:$8 sps:$4 sm:$0xff]  }
  0x15   : > { %1242 = vmatprep.subr.bf16.mxu0 %v1394_v8  ;;  %1350 = vmatprep.subr.bf16.mxu1 %v1394_v8  ;;  %v1420_v28 = vld [vmem:[%s1545_s11 + $0x34] ss:$8 sps:$4 sm:$0xff]   ;;  %v1424_v30 = vld [vmem:[%s1545_s11 + $0x30] ss:$8 sps:$4 sm:$0xff]   ;;  %v1426_v32 = vld [vmem:[%s1545_s11 + $0x44] ss:$8 sps:$4 sm:$0xff]  }
  0x16   : > { %v1422_v29 = vld [vmem:[%s1545_s11 + $0xb4] ss:$8 sps:$4 sm:$0xff]   ;;  %v1425_v31 = vld [vmem:[%s1545_s11 + $0xb0] ss:$8 sps:$4 sm:$0xff]   ;;  %v1428_v33 = vld [vmem:[%s1545_s11 + $0xc4] ss:$8 sps:$4 sm:$0xff]  }
  0x17   : > { %v1430_v34 = vld [vmem:[%s1545_s11 + $0x40] ss:$8 sps:$4 sm:$0xff]   ;;  %v1432_v36 = vld [vmem:[%s1545_s11 + $0x54] ss:$8 sps:$4 sm:$0xff]   ;;  %v1436_v38 = vld [vmem:[%s1545_s11 + $0x50] ss:$8 sps:$4 sm:$0xff]  }
  0x18   : > { %1243 = vmatpush3.bf16.msra.mxu0 %v1395_v9  ;;  %1358 = vmatpush3.bf16.msra.mxu1 %v1395_v9  ;;  %v1431_v35 = vld [vmem:[%s1545_s11 + $0xc0] ss:$8 sps:$4 sm:$0xff]   ;;  %v1434_v37 = vld [vmem:[%s1545_s11 + $0xd4] ss:$8 sps:$4 sm:$0xff]   ;;  %v1437_v39 = vld [vmem:[%s1545_s11 + $0xd0] ss:$8 sps:$4 sm:$0xff]  }
  0x19   : > { %1244 = vmatprep.subr.bf16.mxu0 %v1396_v10  ;;  %1351 = vmatprep.subr.bf16.mxu1 %v1396_v10  ;;  %v1438_v40 = vld [vmem:[%s1545_s11 + $0x64] ss:$8 sps:$4 sm:$0xff]   ;;  %v1442_v42 = vld [vmem:[%s1545_s11 + $0x60] ss:$8 sps:$4 sm:$0xff]   ;;  %v1444_v44 = vld [vmem:[%s1545_s11 + $0x74] ss:$8 sps:$4 sm:$0xff]  }
  0x1a   : > { %v1440_v41 = vld [vmem:[%s1545_s11 + $0xe4] ss:$8 sps:$4 sm:$0xff]   ;;  %v1443_v43 = vld [vmem:[%s1545_s11 + $0xe0] ss:$8 sps:$4 sm:$0xff]   ;;  %v1446_v45 = vld [vmem:[%s1545_s11 + $0xf4] ss:$8 sps:$4 sm:$0xff]  }
  0x1b   : > { %v1448_v46 = vld [vmem:[%s1545_s11 + $0x70] ss:$8 sps:$4 sm:$0xff]  }
  0x1c   : > { %1245 = vmatpush3.bf16.msra.mxu0 %v1397_v13  ;;  %1359 = vmatpush3.bf16.msra.mxu1 %v1397_v13  ;;  %v1449_v47 = vld [vmem:[%s1545_s11 + $0xf0] ss:$8 sps:$4 sm:$0xff]  }
  0x1d   : > { %1246 = vmatprep.subr.bf16.mxu0 %v1398_v14  ;;  %1352 = vmatprep.subr.bf16.mxu1 %v1398_v14 }
  0x20   : > { %1247 = vmatpush3.bf16.msra.mxu0 %v1399_v15  ;;  %1360 = vmatpush3.bf16.msra.mxu1 %v1399_v15 }
  0x21   : > { %1248 = vmatprep.subr.bf16.mxu0 %v1400_v16  ;;  %1353 = vmatprep.subr.bf16.mxu1 %v1400_v16 }
  0x24   : > { %1249 = vmatpush3.bf16.msra.mxu0 %v1401_v17  ;;  %1361 = vmatpush3.bf16.msra.mxu1 %v1401_v17 }
  0x27   : > { %589 = vmatmul.mubr.bf16.vlgmr.msra.gmra.mrb[0].mxu0 %v1402_v18  ;;  %653 = vmatmul.mubr.bf16.vlgmr.msra.gmra.mrb[0].mxu1 %v1405_v19 }
  0x28   : > { %596 = vmatprep.mubr.bf16.mxu0 %v1408_v20  ;;  %660 = vmatprep.mubr.bf16.mxu1 %v1410_v21 }
  0x2f   : > { %597 = vmatmul.mubr.bf16.gmra.mrb[4].mxu0 %v1412_v22  ;;  %661 = vmatmul.mubr.bf16.gmra.mrb[4].mxu1 %v1413_v23 }
  0x30   : > { %604 = vmatprep.mubr.bf16.mxu0 %v1414_v24  ;;  %668 = vmatprep.mubr.bf16.mxu1 %v1416_v25 }
  0x37   : > { %605 = vmatmul.mubr.bf16.gmra.mrb[8].mxu0 %v1418_v26  ;;  %669 = vmatmul.mubr.bf16.gmra.mrb[8].mxu1 %v1419_v27 }
  0x38   : > { %612 = vmatprep.mubr.bf16.mxu0 %v1420_v28  ;;  %676 = vmatprep.mubr.bf16.mxu1 %v1422_v29 }
  0x3f   : > { %613 = vmatmul.mubr.bf16.gmra.mrb[12].mxu0 %v1424_v30  ;;  %677 = vmatmul.mubr.bf16.gmra.mrb[12].mxu1 %v1425_v31 }
  0x40   : > { %620 = vmatprep.mubr.bf16.mxu0 %v1426_v32  ;;  %684 = vmatprep.mubr.bf16.mxu1 %v1428_v33 }
  0x47   : > { %621 = vmatmul.mubr.bf16.gmra.mrb[16].mxu0 %v1430_v34  ;;  %685 = vmatmul.mubr.bf16.gmra.mrb[16].mxu1 %v1431_v35 }
  0x48   : > { %628 = vmatprep.mubr.bf16.mxu0 %v1432_v36  ;;  %692 = vmatprep.mubr.bf16.mxu1 %v1434_v37 }
  0x4f   : > { %629 = vmatmul.mubr.bf16.gmra.mrb[20].mxu0 %v1436_v38  ;;  %693 = vmatmul.mubr.bf16.gmra.mrb[20].mxu1 %v1437_v39 }
  0x50   : > { %636 = vmatprep.mubr.bf16.mxu0 %v1438_v40  ;;  %700 = vmatprep.mubr.bf16.mxu1 %v1440_v41 }
  0x57   : > { %637 = vmatmul.mubr.bf16.gmra.mrb[24].mxu0 %v1442_v42  ;;  %701 = vmatmul.mubr.bf16.gmra.mrb[24].mxu1 %v1443_v43 }
  0x58   : > { %644 = vmatprep.mubr.bf16.mxu0 %v1444_v44  ;;  %708 = vmatprep.mubr.bf16.mxu1 %v1446_v45 }
  0x5f   : > { %645 = vmatmul.mubr.bf16.gmra.mrb[28].mxu0 %v1448_v46  ;;  %709 = vmatmul.mubr.bf16.gmra.mrb[28].mxu1 %v1449_v47 }
  0xfa   : > { %v1250_v48 = vpop.f32.mrb[0].mxu0  ;;  %v1298_v49 = vpop.f32.mrb[0].mxu1 }
  0xfb   : > { %v1251_v51 = vpop.f32.mrb[1].mxu0  ;;  %v1299_v52 = vpop.f32.mrb[1].mxu1 }
  0xfc   : > { %v1252_v53 = vadd.f32 %v1251_v51, %v1250_v48  ;;  %v1300_v54 = vadd.f32 %v1299_v52, %v1298_v49  ;;  %v1253_v55 = vpop.f32.mrb[2].mxu0  ;;  %v1301_v56 = vpop.f32.mrb[2].mxu1 }
  0xfd   : > { %v1254_v57 = vpop.f32.mrb[3].mxu0  ;;  %v1302_v58 = vpop.f32.mrb[3].mxu1 }
  0xfe   : > { %v591_v59 = vadd.f32 %v1252_v53, %v1603_v50  ;;  %v655_v60 = vadd.f32 %v1300_v54, %v1603_v50  ;;  %v1255_v61 = vadd.f32 %v1254_v57, %v1253_v55  ;;  %v1303_v62 = vadd.f32 %v1302_v58, %v1301_v56 }
 0x100   : > { %v594_v63 = vadd.f32 %v1255_v61, %v1603_v50  ;;  %v658_v0 = vadd.f32 %v1303_v62, %v1603_v50  ;;  %v717_v1 = vmax.f32 %v591_v59, 0.0  ;;  %v733_v2 = vmax.f32 %v655_v60, 0.0 }
 0x102   : > { %v718_v3 = vmax.f32 %v594_v63, 0.0  ;;  %v734_v4 = vmax.f32 %v658_v0, 0.0  ;;  %v1256_v5 = vpop.f32.mrb[4].mxu0  ;;  %v1304_v6 = vpop.f32.mrb[4].mxu1 }
 0x103   : > { %v1257_v7 = vpop.f32.mrb[5].mxu0  ;;  %v1305_v8 = vpop.f32.mrb[5].mxu1 }
 0x104   : > { %v1142_v9 = vpack.c.bf16 %v718_v3, %v717_v1  ;;  %v1182_v10 = vpack.c.bf16 %v734_v4, %v733_v2  ;;  %v1258_v11 = vadd.f32 %v1257_v7, %v1256_v5  ;;  %v1306_v12 = vadd.f32 %v1305_v8, %v1304_v6  ;;  %v1259_v13 = vpop.f32.mrb[6].mxu0  ;;  %v1307_v14 = vpop.f32.mrb[6].mxu1 }
 0x105   : > { %v1260_v15 = vpop.f32.mrb[7].mxu0  ;;  %v1308_v16 = vpop.f32.mrb[7].mxu1 }
 0x106   : > { %1143 = vst [vmem:[%s1613_s8] sm:$0xff] %v1142_v9   ;;  %1226 = vst [vmem:[%s1613_s8 + $0x40] sm:$0xff] %v1182_v10   ;;  %v599_v17 = vadd.f32 %v1258_v11, %v1603_v50  ;;  %v663_v18 = vadd.f32 %v1306_v12, %v1603_v50  ;;  %v1261_v19 = vadd.f32 %v1260_v15, %v1259_v13 }
 0x107   : > { %v1309_v20 = vadd.f32 %v1308_v16, %v1307_v14 }
 0x108   : > { %v602_v21 = vadd.f32 %v1261_v19, %v1603_v50  ;;  %v719_v23 = vmax.f32 %v599_v17, 0.0  ;;  %v735_v24 = vmax.f32 %v663_v18, 0.0 }
 0x109   : > { %v666_v22 = vadd.f32 %v1309_v20, %v1603_v50 }
 0x10a   : > { %v720_v25 = vmax.f32 %v602_v21, 0.0  ;;  %v1262_v27 = vpop.f32.mrb[8].mxu0  ;;  %v1310_v28 = vpop.f32.mrb[8].mxu1 }
 0x10b   : > { %v736_v26 = vmax.f32 %v666_v22, 0.0  ;;  %v1263_v29 = vpop.f32.mrb[9].mxu0  ;;  %v1311_v30 = vpop.f32.mrb[9].mxu1 }
 0x10c   : > { %v1147_v31 = vpack.c.bf16 %v720_v25, %v719_v23  ;;  %v1264_v33 = vadd.f32 %v1263_v29, %v1262_v27  ;;  %v1312_v34 = vadd.f32 %v1311_v30, %v1310_v28  ;;  %v1265_v35 = vpop.f32.mrb[10].mxu0  ;;  %v1313_v36 = vpop.f32.mrb[10].mxu1 }
 0x10d   : > { %v1187_v32 = vpack.c.bf16 %v736_v26, %v735_v24  ;;  %v1266_v37 = vpop.f32.mrb[11].mxu0  ;;  %v1314_v38 = vpop.f32.mrb[11].mxu1 }
 0x10e   : > { %1219 = vst [vmem:[%s1613_s8 + $0x8] sm:$0xff] %v1147_v31   ;;  %v607_v39 = vadd.f32 %v1264_v33, %v1603_v50  ;;  %v671_v40 = vadd.f32 %v1312_v34, %v1603_v50  ;;  %v1267_v41 = vadd.f32 %v1266_v37, %v1265_v35  ;;  %v1315_v42 = vadd.f32 %v1314_v38, %v1313_v36 }
 0x10f   : > { %1227 = vst [vmem:[%s1613_s8 + $0x48] sm:$0xff] %v1187_v32  }
 0x110   : > { %v610_v43 = vadd.f32 %v1267_v41, %v1603_v50  ;;  %v674_v44 = vadd.f32 %v1315_v42, %v1603_v50  ;;  %v721_v45 = vmax.f32 %v607_v39, 0.0  ;;  %v737_v46 = vmax.f32 %v671_v40, 0.0 }
 0x112   : > { %v722_v47 = vmax.f32 %v610_v43, 0.0  ;;  %v738_v48 = vmax.f32 %v674_v44, 0.0  ;;  %v1268_v49 = vpop.f32.mrb[12].mxu0  ;;  %v1316_v51 = vpop.f32.mrb[12].mxu1 }
 0x113   : > { %v1269_v52 = vpop.f32.mrb[13].mxu0  ;;  %v1317_v53 = vpop.f32.mrb[13].mxu1 }
 0x114   : > { %v1152_v54 = vpack.c.bf16 %v722_v47, %v721_v45  ;;  %v1192_v55 = vpack.c.bf16 %v738_v48, %v737_v46  ;;  %v1270_v56 = vadd.f32 %v1269_v52, %v1268_v49  ;;  %v1318_v57 = vadd.f32 %v1317_v53, %v1316_v51  ;;  %v1271_v58 = vpop.f32.mrb[14].mxu0  ;;  %v1319_v59 = vpop.f32.mrb[14].mxu1 }
 0x115   : > { %v1272_v60 = vpop.f32.mrb[15].mxu0  ;;  %v1320_v61 = vpop.f32.mrb[15].mxu1 }
 0x116   : > { %1220 = vst [vmem:[%s1613_s8 + $0x10] sm:$0xff] %v1152_v54   ;;  %1228 = vst [vmem:[%s1613_s8 + $0x50] sm:$0xff] %v1192_v55   ;;  %v615_v62 = vadd.f32 %v1270_v56, %v1603_v50  ;;  %v679_v63 = vadd.f32 %v1318_v57, %v1603_v50  ;;  %v1273_v0 = vadd.f32 %v1272_v60, %v1271_v58 }
 0x117   : > { %v1321_v1 = vadd.f32 %v1320_v61, %v1319_v59 }
 0x118   : > { %v618_v2 = vadd.f32 %v1273_v0, %v1603_v50  ;;  %v723_v4 = vmax.f32 %v615_v62, 0.0  ;;  %v739_v5 = vmax.f32 %v679_v63, 0.0 }
 0x119   : > { %v682_v3 = vadd.f32 %v1321_v1, %v1603_v50 }
 0x11a   : > { %v724_v6 = vmax.f32 %v618_v2, 0.0  ;;  %v1274_v8 = vpop.f32.mrb[16].mxu0  ;;  %v1322_v9 = vpop.f32.mrb[16].mxu1 }
 0x11b   : > { %v740_v7 = vmax.f32 %v682_v3, 0.0  ;;  %v1275_v10 = vpop.f32.mrb[17].mxu0  ;;  %v1323_v11 = vpop.f32.mrb[17].mxu1 }
 0x11c   : > { %v1157_v12 = vpack.c.bf16 %v724_v6, %v723_v4  ;;  %v1276_v14 = vadd.f32 %v1275_v10, %v1274_v8  ;;  %v1324_v15 = vadd.f32 %v1323_v11, %v1322_v9  ;;  %v1277_v16 = vpop.f32.mrb[18].mxu0  ;;  %v1325_v17 = vpop.f32.mrb[18].mxu1 }
 0x11d   : > { %v1197_v13 = vpack.c.bf16 %v740_v7, %v739_v5  ;;  %v1278_v18 = vpop.f32.mrb[19].mxu0  ;;  %v1326_v19 = vpop.f32.mrb[19].mxu1 }
 0x11e   : > { %1221 = vst [vmem:[%s1613_s8 + $0x18] sm:$0xff] %v1157_v12   ;;  %v623_v20 = vadd.f32 %v1276_v14, %v1603_v50  ;;  %v687_v21 = vadd.f32 %v1324_v15, %v1603_v50  ;;  %v1279_v22 = vadd.f32 %v1278_v18, %v1277_v16  ;;  %v1327_v23 = vadd.f32 %v1326_v19, %v1325_v17 }
 0x11f   : > { %1229 = vst [vmem:[%s1613_s8 + $0x58] sm:$0xff] %v1197_v13  }
 0x120   : > { %v626_v24 = vadd.f32 %v1279_v22, %v1603_v50  ;;  %v690_v25 = vadd.f32 %v1327_v23, %v1603_v50  ;;  %v725_v26 = vmax.f32 %v623_v20, 0.0  ;;  %v741_v27 = vmax.f32 %v687_v21, 0.0 }
 0x122   : > { %v726_v28 = vmax.f32 %v626_v24, 0.0  ;;  %v742_v29 = vmax.f32 %v690_v25, 0.0  ;;  %v1280_v30 = vpop.f32.mrb[20].mxu0  ;;  %v1328_v31 = vpop.f32.mrb[20].mxu1 }
 0x123   : > { %v1281_v32 = vpop.f32.mrb[21].mxu0  ;;  %v1329_v33 = vpop.f32.mrb[21].mxu1 }
 0x124   : > { %v1162_v34 = vpack.c.bf16 %v726_v28, %v725_v26  ;;  %v1202_v35 = vpack.c.bf16 %v742_v29, %v741_v27  ;;  %v1282_v36 = vadd.f32 %v1281_v32, %v1280_v30  ;;  %v1330_v37 = vadd.f32 %v1329_v33, %v1328_v31  ;;  %v1283_v38 = vpop.f32.mrb[22].mxu0  ;;  %v1331_v39 = vpop.f32.mrb[22].mxu1 }
 0x125   : > { %v1284_v40 = vpop.f32.mrb[23].mxu0  ;;  %v1332_v41 = vpop.f32.mrb[23].mxu1 }
 0x126   : > { %1222 = vst [vmem:[%s1613_s8 + $0x20] sm:$0xff] %v1162_v34   ;;  %1230 = vst [vmem:[%s1613_s8 + $0x60] sm:$0xff] %v1202_v35   ;;  %v631_v42 = vadd.f32 %v1282_v36, %v1603_v50  ;;  %v695_v43 = vadd.f32 %v1330_v37, %v1603_v50  ;;  %v1285_v44 = vadd.f32 %v1284_v40, %v1283_v38 }
 0x127   : > { %v1333_v45 = vadd.f32 %v1332_v41, %v1331_v39 }
 0x128   : > { %v634_v46 = vadd.f32 %v1285_v44, %v1603_v50  ;;  %v727_v48 = vmax.f32 %v631_v42, 0.0  ;;  %v743_v49 = vmax.f32 %v695_v43, 0.0 }
 0x129   : > { %v698_v47 = vadd.f32 %v1333_v45, %v1603_v50 }
 0x12a   : > { %v728_v51 = vmax.f32 %v634_v46, 0.0  ;;  %v1286_v53 = vpop.f32.mrb[24].mxu0  ;;  %v1334_v54 = vpop.f32.mrb[24].mxu1 }
 0x12b   : > { %v744_v52 = vmax.f32 %v698_v47, 0.0  ;;  %v1287_v55 = vpop.f32.mrb[25].mxu0  ;;  %v1335_v56 = vpop.f32.mrb[25].mxu1 }
 0x12c   : > { %v1167_v57 = vpack.c.bf16 %v728_v51, %v727_v48  ;;  %v1288_v59 = vadd.f32 %v1287_v55, %v1286_v53  ;;  %v1336_v60 = vadd.f32 %v1335_v56, %v1334_v54  ;;  %v1289_v61 = vpop.f32.mrb[26].mxu0  ;;  %v1337_v62 = vpop.f32.mrb[26].mxu1 }
 0x12d   : > { %v1207_v58 = vpack.c.bf16 %v744_v52, %v743_v49  ;;  %v1290_v63 = vpop.f32.mrb[27].mxu0  ;;  %v1338_v0 = vpop.f32.mrb[27].mxu1 }
 0x12e   : > { %1223 = vst [vmem:[%s1613_s8 + $0x28] sm:$0xff] %v1167_v57   ;;  %v639_v1 = vadd.f32 %v1288_v59, %v1603_v50  ;;  %v703_v2 = vadd.f32 %v1336_v60, %v1603_v50  ;;  %v1291_v3 = vadd.f32 %v1290_v63, %v1289_v61  ;;  %v1339_v4 = vadd.f32 %v1338_v0, %v1337_v62 }
 0x12f   : > { %1231 = vst [vmem:[%s1613_s8 + $0x68] sm:$0xff] %v1207_v58  }
 0x130   : > { %v642_v5 = vadd.f32 %v1291_v3, %v1603_v50  ;;  %v706_v6 = vadd.f32 %v1339_v4, %v1603_v50  ;;  %v729_v7 = vmax.f32 %v639_v1, 0.0  ;;  %v745_v8 = vmax.f32 %v703_v2, 0.0 }
 0x132   : > { %v730_v9 = vmax.f32 %v642_v5, 0.0  ;;  %v746_v10 = vmax.f32 %v706_v6, 0.0  ;;  %v1292_v11 = vpop.f32.mrb[28].mxu0  ;;  %v1340_v12 = vpop.f32.mrb[28].mxu1 }
 0x133   : > { %v1293_v13 = vpop.f32.mrb[29].mxu0  ;;  %v1341_v14 = vpop.f32.mrb[29].mxu1 }
 0x134   : > { %v1172_v15 = vpack.c.bf16 %v730_v9, %v729_v7  ;;  %v1212_v16 = vpack.c.bf16 %v746_v10, %v745_v8  ;;  %v1294_v17 = vadd.f32 %v1293_v13, %v1292_v11  ;;  %v1342_v18 = vadd.f32 %v1341_v14, %v1340_v12  ;;  %v1295_v19 = vpop.f32.mrb[30].mxu0  ;;  %v1343_v20 = vpop.f32.mrb[30].mxu1 }
 0x135   : > { %v1296_v21 = vpop.f32.mrb[31].mxu0  ;;  %v1344_v22 = vpop.f32.mrb[31].mxu1 }
 0x136   : > { %1224 = vst [vmem:[%s1613_s8 + $0x30] sm:$0xff] %v1172_v15   ;;  %1232 = vst [vmem:[%s1613_s8 + $0x70] sm:$0xff] %v1212_v16   ;;  %v647_v23 = vadd.f32 %v1294_v17, %v1603_v50  ;;  %v711_v24 = vadd.f32 %v1342_v18, %v1603_v50  ;;  %v1297_v25 = vadd.f32 %v1296_v21, %v1295_v19 }
 0x137   : > { %v1345_v26 = vadd.f32 %v1344_v22, %v1343_v20 }
 0x138   : > { %v650_v27 = vadd.f32 %v1297_v25, %v1603_v50  ;;  %v731_v29 = vmax.f32 %v647_v23, 0.0  ;;  %v747_v30 = vmax.f32 %v711_v24, 0.0 }
 0x139   : > { %v714_v28 = vadd.f32 %v1345_v26, %v1603_v50 }
 0x13a   : > { %v732_v31 = vmax.f32 %v650_v27, 0.0 }
 0x13b   : > { %v748_v32 = vmax.f32 %v714_v28, 0.0 }
 0x13c   : > { %v1177_v33 = vpack.c.bf16 %v732_v31, %v731_v29 }
 0x13d   : > { %v1217_v34 = vpack.c.bf16 %v748_v32, %v747_v30 }
 0x13e   : > { %1225 = vst [vmem:[%s1613_s8 + $0x38] sm:$0xff] %v1177_v33  }
 0x13f   : > { %1233 = vst [vmem:[%s1613_s8 + $0x78] sm:$0xff] %v1217_v34  }
 0x140 PF: > { %s13_s14 = sadd.s32 1, %s1472_s14   ;;  %s1672_s12 = smov %s1468_s13 }
 0x141   : > { %p10_p5 = scmp.ge.s32.totalorder %s13_s14, 4   ;;  %s1673_s13 = smov %s1675_s15 }
 0x143   :  { %12 = sbr.rel (!%p10_p5) target bundleno = 2 (0x2), region = 68 }

// kernel: unetpp_forward.73
= control target key start
LH: loop header
LB: loop body
LE: loop exit
PB: predicated region body
PF: predicated region fallthrough
CT: control target
= control target key end

     0   :  { %s1966_s12 = smov 0   ;;  %s1968_s13 = smov 0   ;;  %s2210_s0 = inlined_call_operand.vmem [shape: bf16[512,384], index: 0, kind: input, shape index: {}]   ;;  %s2211_s1 = inlined_call_operand.vmem [shape: bf16[384,128], index: 1, kind: input, shape index: {}]   ;;  %s2212_s2 = inlined_call_operand.vmem [shape: f32[1,128], index: 2, kind: input, shape index: {}]   ;;  %s2213_s3 = inlined_call_operand.vmem [shape: bf16[512,128], index: 3, kind: output, shape index: {}]  }
   0x1   :  { %s1970_s14 = smov 0  }
   0x2 LB: > { %s25_s15 = sadd.s32 1, %s1940_s13  ;;  %p1370_p0 = scmp.ge.s32.totalorder %s1944_s14, 1  ;;  %s1944_s14 = sphi %s1970_s14, %s13_s14   ;;  %s1940_s13 = sphi %s1968_s13, %s2215_s13   ;;  %s1936_s12 = sphi %s1966_s12, %s2214_s12  }
   0x3   : > { %p27_p1 = scmp.ge.s32.totalorder %s25_s15, 2  ;;  %p170_p2 = scmp.lt.s32.totalorder %s1944_s14, 3 }
   0x5   : > { %s2217_s15 = smov (%p27_p1, %s25_s15), 0  ;;  %p171_p3 = pnand %p1370_p0, %p170_p2 }
   0x6   : > { %v1834_v0 = vld [vmem:[%s2211_s1 + $0x40] sm:$0xff] (!%p171_p3)   ;;  %s1371_s18 = sshll.u32 (!%p171_p3), %s1936_s12, 5  ;;  %v1836_v2 = vld [vmem:[%s2211_s1 + $0x48] sm:$0xff] (!%p171_p3)   ;;  %v1838_v4 = vld [vmem:[%s2211_s1 + $0x50] sm:$0xff] (!%p171_p3)  }
   0x7   : > { %174 = sbr.rel (%p171_p3) target bundleno = 353 (0x161), region = 32  ;;  %v1835_v1 = vld [vmem:[%s2211_s1] sm:$0xff] (!%p171_p3)   ;;  %1609 = vmatprep.subr.bf16.mxu0 (!%p171_p3), %v1834_v0  ;;  %1793 = vmatprep.subr.bf16.mxu1 (!%p171_p3), %v1834_v0  ;;  %p206_p4 = scmp.lt.s32.totalorder (!%p171_p3), %s1371_s18, 63  ;;  %v1837_v3 = vld [vmem:[%s2211_s1 + $0x8] sm:$0xff] (!%p171_p3)   ;;  %v1839_v5 = vld [vmem:[%s2211_s1 + $0x10] sm:$0xff] (!%p171_p3)  }
   0x8   : > { %1610 = vmatpush3.bf16.msra.mxu0 (!%p171_p3), %v1835_v1  ;;  %1801 = vmatpush3.bf16.msra.mxu1 (!%p171_p3), %v1835_v1  ;;  %v1840_v6 = vld [vmem:[%s2211_s1 + $0x58] sm:$0xff] (!%p171_p3)   ;;  %v1842_v8 = vld [vmem:[%s2211_s1 + $0x60] sm:$0xff] (!%p171_p3)   ;;  %v1844_v10 = vld [vmem:[%s2211_s1 + $0x68] sm:$0xff] (!%p171_p3)  }
   0x9   : > { %1611 = vmatprep.subr.bf16.mxu0 (!%p171_p3), %v1836_v2  ;;  %1794 = vmatprep.subr.bf16.mxu1 (!%p171_p3), %v1836_v2  ;;  %v1841_v7 = vld [vmem:[%s2211_s1 + $0x18] sm:$0xff] (!%p171_p3)   ;;  %v1843_v9 = vld [vmem:[%s2211_s1 + $0x20] sm:$0xff] (!%p171_p3)   ;;  %v1845_v13 = vld [vmem:[%s2211_s1 + $0x28] sm:$0xff] (!%p171_p3)  }
   0xa   : > { %v1846_v14 = vld [vmem:[%s2211_s1 + $0x70] sm:$0xff] (!%p171_p3)   ;;  %v1848_v16 = vld [vmem:[%s2211_s1 + $0x78] sm:$0xff] (!%p171_p3)   ;;  %v1856_v18 = vld [vmem:[%s2211_s1 + $0x80] sm:$0xff] (!%p171_p3)  }
   0xb   : > { %v1847_v15 = vld [vmem:[%s2211_s1 + $0x30] sm:$0xff] (!%p171_p3)   ;;  %v1849_v17 = vld [vmem:[%s2211_s1 + $0x38] sm:$0xff] (!%p171_p3)   ;;  %v1857_v22 = vld [vmem:[%s2211_s1 + $0x88] sm:$0xff] (!%p171_p3)  }
   0xc   : > { %1612 = vmatpush3.bf16.msra.mxu0 (!%p171_p3), %v1837_v3  ;;  %1802 = vmatpush3.bf16.msra.mxu1 (!%p171_p3), %v1837_v3  ;;  %v1864_v25 = vld [vmem:[%s2211_s1 + $0x90] sm:$0xff] (!%p171_p3)   ;;  %v1865_v27 = vld [vmem:[%s2211_s1 + $0x98] sm:$0xff] (!%p171_p3)   ;;  %v1872_v30 = vld [vmem:[%s2211_s1 + $0xa0] sm:$0xff] (!%p171_p3)  }
   0xd   : > { %1613 = vmatprep.subr.bf16.mxu0 (!%p171_p3), %v1838_v4  ;;  %1795 = vmatprep.subr.bf16.mxu1 (!%p171_p3), %v1838_v4  ;;  %v1873_v33 = vld [vmem:[%s2211_s1 + $0xa8] sm:$0xff] (!%p171_p3)   ;;  %v1880_v36 = vld [vmem:[%s2211_s1 + $0xb0] sm:$0xff] (!%p171_p3)   ;;  %v1881_v40 = vld [vmem:[%s2211_s1 + $0xb8] sm:$0xff] (!%p171_p3)  }
   0xe   : > { %s2219_s18 = smov (!%p206_p4, %s1371_s18), 63 }
   0xf   : > { %s1809_s4 = smul.u32 12, %s2219_s18  ;;  %s1374_s25 = sshll.u32 %s2219_s18, 2 }
  0x10   : > { %1614 = vmatpush3.bf16.msra.mxu0 %v1839_v5  ;;  %1803 = vmatpush3.bf16.msra.mxu1 %v1839_v5  ;;  %s2141_s28 = scalar_lea.vmem %s2213_s3, %s1374_s25 }
  0x11   : > { %1615 = vmatprep.subr.bf16.mxu0 %v1840_v6  ;;  %1796 = vmatprep.subr.bf16.mxu1 %v1840_v6  ;;  %s2017_s11 = scalar_lea.vmem %s2210_s0, %s1809_s4 }
  0x12   : > { %v1852_v11 = vld [vmem:[%s2017_s11 + $0x4] ss:$12 sps:$4 sm:$0xff]   ;;  %v1850_v19 = vld [vmem:[%s2017_s11] ss:$12 sps:$4 sm:$0xff]   ;;  %v1858_v21 = vld [vmem:[%s2017_s11 + $0x1c] ss:$12 sps:$4 sm:$0xff]  }
  0x13   : > { %v1855_v12 = vld [vmem:[%s2017_s11 + $0x124] ss:$12 sps:$4 sm:$0xff]   ;;  %780 = vmatprep.mubr.bf16.mxu0 %v1852_v11  ;;  %v1853_v20 = vld [vmem:[%s2017_s11 + $0x120] ss:$12 sps:$4 sm:$0xff]   ;;  %v1860_v23 = vld [vmem:[%s2017_s11 + $0x13c] ss:$12 sps:$4 sm:$0xff]  }
  0x14   : > { %1616 = vmatpush3.bf16.msra.mxu0 %v1841_v7  ;;  %1804 = vmatpush3.bf16.msra.mxu1 %v1841_v7  ;;  %v1862_v24 = vld [vmem:[%s2017_s11 + $0x18] ss:$12 sps:$4 sm:$0xff]   ;;  %v1866_v28 = vld [vmem:[%s2017_s11 + $0x34] ss:$12 sps:$4 sm:$0xff]   ;;  %v1870_v31 = vld [vmem:[%s2017_s11 + $0x30] ss:$12 sps:$4 sm:$0xff]  }
  0x15   : > { %1617 = vmatprep.subr.bf16.mxu0 %v1842_v8  ;;  %1797 = vmatprep.subr.bf16.mxu1 %v1842_v8  ;;  %v1863_v26 = vld [vmem:[%s2017_s11 + $0x138] ss:$12 sps:$4 sm:$0xff]   ;;  %v1868_v29 = vld [vmem:[%s2017_s11 + $0x154] ss:$12 sps:$4 sm:$0xff]   ;;  %v1871_v32 = vld [vmem:[%s2017_s11 + $0x150] ss:$12 sps:$4 sm:$0xff]  }
  0x16   : > { %876 = vmatprep.mubr.bf16.mxu1 %v1855_v12  ;;  %v1874_v34 = vld [vmem:[%s2017_s11 + $0x4c] ss:$12 sps:$4 sm:$0xff]   ;;  %v1878_v37 = vld [vmem:[%s2017_s11 + $0x48] ss:$12 sps:$4 sm:$0xff]   ;;  %v1882_v39 = vld [vmem:[%s2017_s11 + $0x64] ss:$12 sps:$4 sm:$0xff]  }
  0x17   : > { %v1876_v35 = vld [vmem:[%s2017_s11 + $0x16c] ss:$12 sps:$4 sm:$0xff]   ;;  %v1879_v38 = vld [vmem:[%s2017_s11 + $0x168] ss:$12 sps:$4 sm:$0xff]   ;;  %v1891_v47 = vld [vmem:[%s2017_s11 + $0x50] ss:$12 sps:$4 sm:$0xff]  }
  0x18   : > { %1618 = vmatpush3.bf16.msra.mxu0 %v1843_v9  ;;  %1805 = vmatpush3.bf16.msra.mxu1 %v1843_v9  ;;  %v1884_v41 = vld [vmem:[%s2017_s11 + $0x8] ss:$12 sps:$4 sm:$0xff]   ;;  %v1885_v42 = vld [vmem:[%s2017_s11 + $0x60] ss:$12 sps:$4 sm:$0xff]   ;;  %v1889_v45 = vld [vmem:[%s2017_s11 + $0x38] ss:$12 sps:$4 sm:$0xff]  }
  0x19   : > { %1619 = vmatprep.subr.bf16.mxu0 %v1844_v10  ;;  %1798 = vmatprep.subr.bf16.mxu1 %v1844_v10  ;;  %v1886_v43 = vld [vmem:[%s2017_s11 + $0x20] ss:$12 sps:$4 sm:$0xff]   ;;  %v1887_v44 = vld [vmem:[%s2017_s11 + $0x7c] ss:$12 sps:$4 sm:$0xff]   ;;  %v1890_v46 = vld [vmem:[%s2017_s11 + $0x78] ss:$12 sps:$4 sm:$0xff]  }
  0x1a   : > { %v1892_v48 = vld [vmem:[%s2017_s11 + $0x94] ss:$12 sps:$4 sm:$0xff]   ;;  %v1895_v50 = vld [vmem:[%s2017_s11 + $0x90] ss:$12 sps:$4 sm:$0xff]   ;;  %v1897_v52 = vld [vmem:[%s2017_s11 + $0xac] ss:$12 sps:$4 sm:$0xff]  }
  0x1b   : > { %v1894_v49 = vld [vmem:[%s2017_s11 + $0x68] ss:$12 sps:$4 sm:$0xff]   ;;  %v1896_v51 = vld [vmem:[%s2017_s11 + $0x80] ss:$12 sps:$4 sm:$0xff]   ;;  %v1899_v53 = vld [vmem:[%s2017_s11 + $0x98] ss:$12 sps:$4 sm:$0xff]  }
  0x1c   : > { %1620 = vmatpush3.bf16.msra.mxu0 %v1845_v13  ;;  %1806 = vmatpush3.bf16.msra.mxu1 %v1845_v13  ;;  %v1900_v54 = vld [vmem:[%s2017_s11 + $0xa8] ss:$12 sps:$4 sm:$0xff]   ;;  %v1901_v55 = vld [vmem:[%s2017_s11 + $0xb0] ss:$12 sps:$4 sm:$0xff]   ;;  %v1905_v58 = vld [vmem:[%s2017_s11 + $0xc0] ss:$12 sps:$4 sm:$0xff]  }
  0x1d   : > { %1621 = vmatprep.subr.bf16.mxu0 %v1846_v14  ;;  %1799 = vmatprep.subr.bf16.mxu1 %v1846_v14  ;;  %v1902_v56 = vld [vmem:[%s2017_s11 + $0xc4] ss:$12 sps:$4 sm:$0xff]   ;;  %v1904_v57 = vld [vmem:[%s2017_s11 + $0xc8] ss:$12 sps:$4 sm:$0xff]   ;;  %v1906_v59 = vld [vmem:[%s2017_s11 + $0xe0] ss:$12 sps:$4 sm:$0xff]  }
  0x1e   : > { %v1907_v60 = vld [vmem:[%s2017_s11 + $0xdc] ss:$12 sps:$4 sm:$0xff]   ;;  %v1909_v61 = vld [vmem:[%s2017_s11 + $0xf8] ss:$12 sps:$4 sm:$0xff]   ;;  %v1912_v0 = vld [vmem:[%s2017_s11 + $0xf4] ss:$12 sps:$4 sm:$0xff]  }
  0x1f   : > { %v1910_v62 = vld [vmem:[%s2017_s11 + $0xd8] ss:$12 sps:$4 sm:$0xff]   ;;  %v1911_v63 = vld [vmem:[%s2017_s11 + $0x110] ss:$12 sps:$4 sm:$0xff]   ;;  %v1914_v1 = vld [vmem:[%s2017_s11 + $0x128] ss:$12 sps:$4 sm:$0xff]  }
  0x20   : > { %1622 = vmatpush3.bf16.msra.mxu0 %v1847_v15  ;;  %1807 = vmatpush3.bf16.msra.mxu1 %v1847_v15  ;;  %v1915_v2 = vld [vmem:[%s2017_s11 + $0xf0] ss:$12 sps:$4 sm:$0xff]   ;;  %v1916_v3 = vld [vmem:[%s2017_s11 + $0x140] ss:$12 sps:$4 sm:$0xff]   ;;  %v1919_v5 = vld [vmem:[%s2017_s11 + $0x158] ss:$12 sps:$4 sm:$0xff]  }
  0x21   : > { %1623 = vmatprep.subr.bf16.mxu0 %v1848_v16  ;;  %1800 = vmatprep.subr.bf16.mxu1 %v1848_v16  ;;  %v1917_v4 = vld [vmem:[%s2017_s11 + $0x10c] ss:$12 sps:$4 sm:$0xff]   ;;  %v1920_v6 = vld [vmem:[%s2017_s11 + $0x108] ss:$12 sps:$4 sm:$0xff]   ;;  %v1921_v7 = vld [vmem:[%s2017_s11 + $0x170] ss:$12 sps:$4 sm:$0xff]  }
  0x24   : > { %1624 = vmatpush3.bf16.msra.mxu0 %v1849_v17  ;;  %1808 = vmatpush3.bf16.msra.mxu1 %v1849_v17 }
  0x25   : > { %1745 = vmatprep.subr.bf16.mxu1 %v1856_v18 }
  0x27   : > { %781 = vmatmul.mubr.bf16.vlgmr.msra.gmra.mrb[0].mxu0 %v1850_v19  ;;  %877 = vmatmul.mubr.bf16.vlgmr.msra.gmra.mrb[0].mxu1 %v1853_v20 }
  0x28   : > { %1746 = vmatpush3.bf16.msra.mxu1 %v1856_v18  ;;  %788 = vmatprep.mubr.bf16.mxu0 %v1858_v21 }
  0x29   : > { %1747 = vmatprep.subr.bf16.mxu1 %v1857_v22  ;;  %884 = vmatprep.mubr.bf16.mxu1 %v1860_v23 }
  0x2c   : > { %1748 = vmatpush3.bf16.msra.mxu1 %v1857_v22 }
  0x2d   : > { %1749 = vmatprep.subr.bf16.mxu1 %v1864_v25 }
  0x2f   : > { %789 = vmatmul.mubr.bf16.gmra.mrb[4].mxu0 %v1862_v24  ;;  %885 = vmatmul.mubr.bf16.gmra.mrb[4].mxu1 %v1863_v26 }
  0x30   : > { %1750 = vmatpush3.bf16.msra.mxu1 %v1864_v25  ;;  %796 = vmatprep.mubr.bf16.mxu0 %v1866_v28 }
  0x31   : > { %1751 = vmatprep.subr.bf16.mxu1 %v1865_v27  ;;  %892 = vmatprep.mubr.bf16.mxu1 %v1868_v29 }
  0x34   : > { %1752 = vmatpush3.bf16.msra.mxu1 %v1865_v27 }
  0x35   : > { %1753 = vmatprep.subr.bf16.mxu1 %v1872_v30 }
  0x37   : > { %797 = vmatmul.mubr.bf16.gmra.mrb[8].mxu0 %v1870_v31  ;;  %893 = vmatmul.mubr.bf16.gmra.mrb[8].mxu1 %v1871_v32 }
  0x38   : > { %1754 = vmatpush3.bf16.msra.mxu1 %v1872_v30  ;;  %804 = vmatprep.mubr.bf16.mxu0 %v1874_v34 }
  0x39   : > { %1755 = vmatprep.subr.bf16.mxu1 %v1873_v33  ;;  %900 = vmatprep.mubr.bf16.mxu1 %v1876_v35 }
  0x3c   : > { %1756 = vmatpush3.bf16.msra.mxu1 %v1873_v33 }
  0x3d   : > { %1757 = vmatprep.subr.bf16.mxu1 %v1880_v36 }
  0x3f   : > { %805 = vmatmul.mubr.bf16.gmra.mrb[12].mxu0 %v1878_v37  ;;  %901 = vmatmul.mubr.bf16.gmra.mrb[12].mxu1 %v1879_v38 }
  0x40   : > { %1758 = vmatpush3.bf16.msra.mxu1 %v1880_v36  ;;  %812 = vmatprep.mubr.bf16.mxu0 %v1882_v39 }
  0x41   : > { %1759 = vmatprep.subr.bf16.mxu1 %v1881_v40  ;;  %1761 = vmatprep.mubr.bf16.mxu1 %v1884_v41 }
  0x44   : > { %1760 = vmatpush3.bf16.msra.mxu1 %v1881_v40 }
  0x47   : > { %813 = vmatmul.mubr.bf16.gmra.mrb[16].mxu0 %v1885_v42  ;;  %1762 = vmatmul.mubr.bf16.vlgmr.msra.gmra.mrb[16].mxu1 %v1886_v43 }
  0x48   : > { %820 = vmatprep.mubr.bf16.mxu0 %v1887_v44  ;;  %1765 = vmatprep.mubr.bf16.mxu1 %v1889_v45 }
  0x4f   : > { %821 = vmatmul.mubr.bf16.gmra.mrb[20].mxu0 %v1890_v46  ;;  %1766 = vmatmul.mubr.bf16.gmra.mrb[20].mxu1 %v1891_v47 }
  0x50   : > { %828 = vmatprep.mubr.bf16.mxu0 %v1892_v48  ;;  %1769 = vmatprep.mubr.bf16.mxu1 %v1894_v49 }
  0x57   : > { %829 = vmatmul.mubr.bf16.gmra.mrb[24].mxu0 %v1895_v50  ;;  %1770 = vmatmul.mubr.bf16.gmra.mrb[24].mxu1 %v1896_v51 }
  0x58   : > { %836 = vmatprep.mubr.bf16.mxu0 %v1897_v52  ;;  %1773 = vmatprep.mubr.bf16.mxu1 %v1899_v53 }
  0x5f   : > { %837 = vmatmul.mubr.bf16.gmra.mrb[28].mxu0 %v1900_v54  ;;  %1774 = vmatmul.mubr.bf16.gmra.mrb[28].mxu1 %v1901_v55 }
  0x60   : > { %844 = vmatprep.mubr.bf16.mxu0 %v1902_v56  ;;  %1777 = vmatprep.mubr.bf16.mxu1 %v1904_v57  ;;  %v2131_v56 = vld [vmem:[%s2212_s2] ss:$0 sm:$0xff] }
  0x67   : > { %845 = vmatmul.mubr.bf16.gmra.mrb[32].mxu0 %v1905_v58  ;;  %1778 = vmatmul.mubr.bf16.gmra.mrb[32].mxu1 %v1906_v59 }
  0x68   : > { %852 = vmatprep.mubr.bf16.mxu0 %v1907_v60  ;;  %1781 = vmatprep.mubr.bf16.mxu1 %v1909_v61 }
  0x6f   : > { %853 = vmatmul.mubr.bf16.gmra.mrb[36].mxu0 %v1910_v62  ;;  %1782 = vmatmul.mubr.bf16.gmra.mrb[36].mxu1 %v1911_v63 }
  0x70   : > { %860 = vmatprep.mubr.bf16.mxu0 %v1912_v0  ;;  %1785 = vmatprep.mubr.bf16.mxu1 %v1914_v1 }
  0x77   : > { %861 = vmatmul.mubr.bf16.gmra.mrb[40].mxu0 %v1915_v2  ;;  %1786 = vmatmul.mubr.bf16.gmra.mrb[40].mxu1 %v1916_v3 }
  0x78   : > { %868 = vmatprep.mubr.bf16.mxu0 %v1917_v4  ;;  %1789 = vmatprep.mubr.bf16.mxu1 %v1919_v5 }
  0x7f   : > { %869 = vmatmul.mubr.bf16.gmra.mrb[44].mxu0 %v1920_v6  ;;  %1790 = vmatmul.mubr.bf16.gmra.mrb[44].mxu1 %v1921_v7 }
  0xfa   : > { %v1625_v8 = vpop.f32.mrb[0].mxu0  ;;  %v1697_v9 = vpop.f32.mrb[0].mxu1 }
  0xfb   : > { %v1626_v10 = vpop.f32.mrb[1].mxu0  ;;  %v1698_v11 = vpop.f32.mrb[1].mxu1 }
  0xfc   : > { %v1627_v12 = vadd.f32 %v1626_v10, %v1625_v8  ;;  %v1628_v13 = vpop.f32.mrb[2].mxu0  ;;  %v2112_v14 = vadd.f32 %v1698_v11, %v1697_v9  ;;  %v1700_v15 = vpop.f32.mrb[2].mxu1 }
  0xfd   : > { %v1629_v16 = vpop.f32.mrb[3].mxu0  ;;  %v1701_v17 = vpop.f32.mrb[3].mxu1 }
  0xfe   : > { %v1630_v18 = vadd.f32 %v1629_v16, %v1628_v13  ;;  %v2114_v19 = vadd.f32 %v1701_v17, %v1700_v15  ;;  %v783_v60 = vadd.f32 %v1627_v12, %v2131_v56 }
 0x100   : > { %v786_v5 = vadd.f32 %v1630_v18, %v2131_v56 }
 0x102   : > { %v1631_v20 = vpop.f32.mrb[4].mxu0  ;;  %v1703_v21 = vpop.f32.mrb[4].mxu1 }
 0x103   : > { %v1632_v22 = vpop.f32.mrb[5].mxu0  ;;  %v1704_v23 = vpop.f32.mrb[5].mxu1 }
 0x104   : > { %v1633_v24 = vadd.f32 %v1632_v22, %v1631_v20  ;;  %v1634_v25 = vpop.f32.mrb[6].mxu0  ;;  %v2116_v26 = vadd.f32 %v1704_v23, %v1703_v21  ;;  %v1706_v27 = vpop.f32.mrb[6].mxu1 }
 0x105   : > { %v1635_v28 = vpop.f32.mrb[7].mxu0  ;;  %v1707_v29 = vpop.f32.mrb[7].mxu1 }
 0x106   : > { %v1636_v30 = vadd.f32 %v1635_v28, %v1634_v25  ;;  %v2118_v31 = vadd.f32 %v1707_v29, %v1706_v27  ;;  %v791_v57 = vadd.f32 %v1633_v24, %v2131_v56 }
 0x108   : > { %v794_v0 = vadd.f32 %v1636_v30, %v2131_v56 }
 0x10a   : > { %v1637_v32 = vpop.f32.mrb[8].mxu0  ;;  %v1709_v33 = vpop.f32.mrb[8].mxu1 }
 0x10b   : > { %v1638_v34 = vpop.f32.mrb[9].mxu0  ;;  %v1710_v35 = vpop.f32.mrb[9].mxu1 }
 0x10c   : > { %v1639_v36 = vadd.f32 %v1638_v34, %v1637_v32  ;;  %v1640_v37 = vpop.f32.mrb[10].mxu0  ;;  %v2120_v38 = vadd.f32 %v1710_v35, %v1709_v33  ;;  %v1712_v39 = vpop.f32.mrb[10].mxu1 }
 0x10d   : > { %v1641_v40 = vpop.f32.mrb[11].mxu0  ;;  %v1713_v41 = vpop.f32.mrb[11].mxu1 }
 0x10e   : > { %v1642_v42 = vadd.f32 %v1641_v40, %v1640_v37  ;;  %v2122_v43 = vadd.f32 %v1713_v41, %v1712_v39  ;;  %v799_v22 = vadd.f32 %v1639_v36, %v2131_v56 }
 0x110   : > { %v802_v33 = vadd.f32 %v1642_v42, %v2131_v56 }
 0x112   : > { %v1643_v44 = vpop.f32.mrb[12].mxu0  ;;  %v1715_v45 = vpop.f32.mrb[12].mxu1 }
 0x113   : > { %v1644_v46 = vpop.f32.mrb[13].mxu0  ;;  %v1716_v47 = vpop.f32.mrb[13].mxu1 }
 0x114   : > { %v1645_v48 = vadd.f32 %v1644_v46, %v1643_v44  ;;  %v1646_v49 = vpop.f32.mrb[14].mxu0  ;;  %v2124_v50 = vadd.f32 %v1716_v47, %v1715_v45  ;;  %v1718_v51 = vpop.f32.mrb[14].mxu1 }
 0x115   : > { %v1647_v52 = vpop.f32.mrb[15].mxu0  ;;  %v1719_v53 = vpop.f32.mrb[15].mxu1 }
 0x116   : > { %v1648_v54 = vadd.f32 %v1647_v52, %v1646_v49  ;;  %v2126_v55 = vadd.f32 %v1719_v53, %v1718_v51  ;;  %v807_v17 = vadd.f32 %v1645_v48, %v2131_v56 }
 0x118   : > { %v810_v27 = vadd.f32 %v1648_v54, %v2131_v56 }
 0x11a   : > { %v1649_v58 = vpop.f32.mrb[16].mxu0  ;;  %v1763_v59 = vpop.f32.mrb[16].mxu1 }
 0x11b   : > { %v952_v61 = vadd.f32 %v1763_v59, %v791_v57  ;;  %v1650_v62 = vpop.f32.mrb[17].mxu0  ;;  %v943_v63 = vpop.f32.mrb[17].mxu1 }
 0x11c   : > { %v1651_v1 = vadd.f32 %v1650_v62, %v1649_v58  ;;  %v944_v2 = vadd.f32 %v943_v63, %v783_v60  ;;  %v1652_v3 = vpop.f32.mrb[18].mxu0  ;;  %v1764_v4 = vpop.f32.mrb[18].mxu1 }
 0x11d   : > { %v955_v6 = vadd.f32 %v1764_v4, %v794_v0  ;;  %v1653_v7 = vpop.f32.mrb[19].mxu0  ;;  %v946_v8 = vpop.f32.mrb[19].mxu1  ;;  %v1072_v11 = vmax.f32 %v952_v61, 0.0 }
 0x11e   : > { %v1654_v9 = vadd.f32 %v1653_v7, %v1652_v3  ;;  %v947_v10 = vadd.f32 %v946_v8, %v786_v5  ;;  %v1070_v12 = vmax.f32 %v944_v2, 0.0  ;;  %v815_v52 = vadd.f32 %v1651_v1, %v2131_v56 }
 0x11f   : > { %v1073_v13 = vmax.f32 %v955_v6, 0.0 }
 0x120   : > { %v1071_v15 = vmax.f32 %v947_v10, 0.0  ;;  %v818_v62 = vadd.f32 %v1654_v9, %v2131_v56 }
 0x121   : > { %v1522_v16 = vpack.c.bf16 %v1073_v13, %v1072_v11 }
 0x122   : > { %v1517_v18 = vpack.c.bf16 %v1071_v15, %v1070_v12  ;;  %v1655_v20 = vpop.f32.mrb[20].mxu0  ;;  %v1767_v21 = vpop.f32.mrb[20].mxu1 }
 0x123   : > { %1594 = vst [vmem:[%s2141_s28 + $0x8] sm:$0xff] %v1522_v16   ;;  %v968_v23 = vadd.f32 %v1767_v21, %v807_v17  ;;  %v1656_v24 = vpop.f32.mrb[21].mxu0  ;;  %v959_v25 = vpop.f32.mrb[21].mxu1 }
 0x124   : > { %1518 = vst [vmem:[%s2141_s28] sm:$0xff] %v1517_v18   ;;  %v1657_v28 = vadd.f32 %v1656_v24, %v1655_v20  ;;  %v960_v29 = vadd.f32 %v959_v25, %v799_v22  ;;  %v1658_v30 = vpop.f32.mrb[22].mxu0  ;;  %v1768_v32 = vpop.f32.mrb[22].mxu1 }
 0x125   : > { %v971_v34 = vadd.f32 %v1768_v32, %v810_v27  ;;  %v1659_v35 = vpop.f32.mrb[23].mxu0  ;;  %v962_v37 = vpop.f32.mrb[23].mxu1  ;;  %v1076_v36 = vmax.f32 %v968_v23, 0.0 }
 0x126   : > { %v1660_v39 = vadd.f32 %v1659_v35, %v1658_v30  ;;  %v963_v40 = vadd.f32 %v962_v37, %v802_v33  ;;  %v1074_v44 = vmax.f32 %v960_v29, 0.0  ;;  %v823_v47 = vadd.f32 %v1657_v28, %v2131_v56 }
 0x127   : > { %v1077_v41 = vmax.f32 %v971_v34, 0.0 }
 0x128   : > { %v1075_v45 = vmax.f32 %v963_v40, 0.0  ;;  %v826_v57 = vadd.f32 %v1660_v39, %v2131_v56 }
 0x129   : > { %v1532_v46 = vpack.c.bf16 %v1077_v41, %v1076_v36 }
 0x12a   : > { %v1527_v48 = vpack.c.bf16 %v1075_v45, %v1074_v44  ;;  %v1661_v49 = vpop.f32.mrb[24].mxu0  ;;  %v1771_v51 = vpop.f32.mrb[24].mxu1 }
 0x12b   : > { %1596 = vst [vmem:[%s2141_s28 + $0x18] sm:$0xff] %v1532_v46   ;;  %v984_v42 = vadd.f32 %v1771_v51, %v823_v47  ;;  %v1662_v53 = vpop.f32.mrb[25].mxu0  ;;  %v975_v54 = vpop.f32.mrb[25].mxu1 }
 0x12c   : > { %1595 = vst [vmem:[%s2141_s28 + $0x10] sm:$0xff] %v1527_v48   ;;  %v1663_v58 = vadd.f32 %v1662_v53, %v1661_v49  ;;  %v976_v59 = vadd.f32 %v975_v54, %v815_v52  ;;  %v1664_v60 = vpop.f32.mrb[26].mxu0  ;;  %v1772_v61 = vpop.f32.mrb[26].mxu1 }
 0x12d   : > { %v987_v63 = vadd.f32 %v1772_v61, %v826_v57  ;;  %v1665_v0 = vpop.f32.mrb[27].mxu0  ;;  %v978_v2 = vpop.f32.mrb[27].mxu1  ;;  %v1080_v4 = vmax.f32 %v984_v42, 0.0 }
 0x12e   : > { %v1666_v3 = vadd.f32 %v1665_v0, %v1664_v60  ;;  %v979_v1 = vadd.f32 %v978_v2, %v818_v62  ;;  %v1078_v6 = vmax.f32 %v976_v59, 0.0  ;;  %v831_v12 = vadd.f32 %v1663_v58, %v2131_v56 }
 0x12f   : > { %v1081_v5 = vmax.f32 %v987_v63, 0.0 }
 0x130   : > { %v1079_v7 = vmax.f32 %v979_v1, 0.0  ;;  %v834_v21 = vadd.f32 %v1666_v3, %v2131_v56 }
 0x131   : > { %v1542_v8 = vpack.c.bf16 %v1081_v5, %v1080_v4 }
 0x132   : > { %v1537_v10 = vpack.c.bf16 %v1079_v7, %v1078_v6  ;;  %v1667_v11 = vpop.f32.mrb[28].mxu0  ;;  %v1775_v13 = vpop.f32.mrb[28].mxu1 }
 0x133   : > { %1598 = vst [vmem:[%s2141_s28 + $0x28] sm:$0xff] %v1542_v8   ;;  %v1668_v15 = vpop.f32.mrb[29].mxu0  ;;  %v991_v16 = vpop.f32.mrb[29].mxu1 }
 0x134   : > { %1597 = vst [vmem:[%s2141_s28 + $0x20] sm:$0xff] %v1537_v10   ;;  %v1669_v9 = vadd.f32 %v1668_v15, %v1667_v11  ;;  %v992_v17 = vadd.f32 %v991_v16, %v831_v12  ;;  %v1670_v18 = vpop.f32.mrb[30].mxu0  ;;  %v1776_v20 = vpop.f32.mrb[30].mxu1  ;;  %v887_v10 = vadd.f32 %v2116_v26, %v2131_v56  ;;  %v879_v15 = vadd.f32 %v2112_v14, %v2131_v56 }
 0x135   : > { %v1671_v22 = vpop.f32.mrb[31].mxu0  ;;  %v994_v23 = vpop.f32.mrb[31].mxu1 }
 0x136   : > { %v839_v24 = vadd.f32 %v1669_v9, %v2131_v56  ;;  %v1672_v25 = vadd.f32 %v1671_v22, %v1670_v18  ;;  %v995_v27 = vadd.f32 %v994_v23, %v834_v21  ;;  %v1082_v29 = vmax.f32 %v992_v17, 0.0 }
 0x137   : > { %v890_v18 = vadd.f32 %v2118_v31, %v2131_v56 }
 0x138   : > { %v1000_v28 = vadd.f32 %v1775_v13, %v839_v24  ;;  %v842_v30 = vadd.f32 %v1672_v25, %v2131_v56  ;;  %v1083_v32 = vmax.f32 %v995_v27, 0.0 }
 0x13a   : > { %v1003_v33 = vadd.f32 %v1776_v20, %v842_v30  ;;  %v1547_v34 = vpack.c.bf16 %v1083_v32, %v1082_v29  ;;  %v1673_v35 = vpop.f32.mrb[32].mxu0  ;;  %v1779_v37 = vpop.f32.mrb[32].mxu1  ;;  %v1084_v36 = vmax.f32 %v1000_v28, 0.0  ;;  %v882_v28 = vadd.f32 %v2114_v19, %v2131_v56 }
 0x13b   : > { %v1674_v39 = vpop.f32.mrb[33].mxu0  ;;  %v1007_v40 = vpop.f32.mrb[33].mxu1 }
 0x13c   : > { %v1085_v41 = vmax.f32 %v1003_v33, 0.0  ;;  %1599 = vst [vmem:[%s2141_s28 + $0x30] sm:$0xff] %v1547_v34   ;;  %v1675_v44 = vadd.f32 %v1674_v39, %v1673_v35  ;;  %v1676_v45 = vpop.f32.mrb[34].mxu0  ;;  %v1780_v46 = vpop.f32.mrb[34].mxu1 }
 0x13d   : > { %v1677_v47 = vpop.f32.mrb[35].mxu0  ;;  %v1010_v48 = vpop.f32.mrb[35].mxu1 }
 0x13e   : > { %v1552_v49 = vpack.c.bf16 %v1085_v41, %v1084_v36  ;;  %v847_v51 = vadd.f32 %v1675_v44, %v2131_v56  ;;  %v1678_v52 = vadd.f32 %v1677_v47, %v1676_v45  ;;  %v903_v41 = vadd.f32 %v2124_v50, %v2131_v56 }
 0x140   : > { %1600 = vst [vmem:[%s2141_s28 + $0x38] sm:$0xff] %v1552_v49   ;;  %v1008_v42 = vadd.f32 %v1007_v40, %v847_v51  ;;  %v850_v53 = vadd.f32 %v1678_v52, %v2131_v56  ;;  %v906_v52 = vadd.f32 %v2126_v55, %v2131_v56 }
 0x142   : > { %v1011_v54 = vadd.f32 %v1010_v48, %v850_v53  ;;  %v1679_v57 = vpop.f32.mrb[36].mxu0  ;;  %v2165_v58 = vpop.f32.mrb[36].mxu1  ;;  %v1086_v61 = vmax.f32 %v1008_v42, 0.0 }
 0x143   : > { %v1680_v59 = vpop.f32.mrb[37].mxu0  ;;  %v1023_v60 = vpop.f32.mrb[37].mxu1 }
 0x144   : > { %v1087_v62 = vmax.f32 %v1011_v54, 0.0  ;;  %v1681_v63 = vadd.f32 %v1680_v59, %v1679_v57  ;;  %v1682_v0 = vpop.f32.mrb[38].mxu0  ;;  %v2167_v2 = vpop.f32.mrb[38].mxu1 }
 0x145   : > { %v1683_v3 = vpop.f32.mrb[39].mxu0  ;;  %v1026_v1 = vpop.f32.mrb[39].mxu1 }
 0x146   : > { %v1557_v4 = vpack.c.bf16 %v1087_v62, %v1086_v61  ;;  %v855_v5 = vadd.f32 %v1681_v63, %v2131_v56  ;;  %v1684_v6 = vadd.f32 %v1683_v3, %v1682_v0 }
 0x148   : > { %1601 = vst [vmem:[%s2141_s28 + $0x40] sm:$0xff] %v1557_v4   ;;  %v1016_v7 = vadd.f32 %v1779_v37, %v855_v5  ;;  %v858_v8 = vadd.f32 %v1684_v6, %v2131_v56 }
 0x14a   : > { %v1019_v11 = vadd.f32 %v1780_v46, %v858_v8  ;;  %v1685_v13 = vpop.f32.mrb[40].mxu0  ;;  %v1787_v12 = vpop.f32.mrb[40].mxu1  ;;  %v1088_v20 = vmax.f32 %v1016_v7, 0.0  ;;  %v895_v46 = vadd.f32 %v2120_v38, %v2131_v56  ;;  %v898_v38 = vadd.f32 %v2122_v43, %v2131_v56 }
 0x14b   : > { %v1048_v16 = vadd.f32 %v1787_v12, %v887_v10  ;;  %v1686_v9 = vpop.f32.mrb[41].mxu0  ;;  %v1039_v17 = vpop.f32.mrb[41].mxu1 }
 0x14c   : > { %v1089_v21 = vmax.f32 %v1019_v11, 0.0  ;;  %v1687_v22 = vadd.f32 %v1686_v9, %v1685_v13  ;;  %v1040_v23 = vadd.f32 %v1039_v17, %v879_v15  ;;  %v1688_v24 = vpop.f32.mrb[42].mxu0  ;;  %v1788_v25 = vpop.f32.mrb[42].mxu1 }
 0x14d   : > { %v1051_v26 = vadd.f32 %v1788_v25, %v890_v18  ;;  %v1689_v27 = vpop.f32.mrb[43].mxu0  ;;  %v1042_v29 = vpop.f32.mrb[43].mxu1  ;;  %v1096_v33 = vmax.f32 %v1048_v16, 0.0 }
 0x14e   : > { %v1562_v14 = vpack.c.bf16 %v1089_v21, %v1088_v20  ;;  %v863_v30 = vadd.f32 %v1687_v22, %v2131_v56  ;;  %v1690_v32 = vadd.f32 %v1689_v27, %v1688_v24  ;;  %v1043_v34 = vadd.f32 %v1042_v29, %v882_v28 }
 0x14f   : > { %v1097_v31 = vmax.f32 %v1051_v26, 0.0  ;;  %v1094_v39 = vmax.f32 %v1040_v23, 0.0 }
 0x150   : > { %1602 = vst [vmem:[%s2141_s28 + $0x48] sm:$0xff] %v1562_v14   ;;  %v1024_v35 = vadd.f32 %v1023_v60, %v863_v30  ;;  %v866_v37 = vadd.f32 %v1690_v32, %v2131_v56  ;;  %v1095_v36 = vmax.f32 %v1043_v34, 0.0 }
 0x151   : > { %v1582_v40 = vpack.c.bf16 %v1097_v31, %v1096_v33 }
 0x152   : > { %v1027_v19 = vadd.f32 %v1026_v1, %v866_v37  ;;  %v1691_v44 = vpop.f32.mrb[44].mxu0  ;;  %v1791_v45 = vpop.f32.mrb[44].mxu1  ;;  %v1577_v47 = vpack.c.bf16 %v1095_v36, %v1094_v39  ;;  %v1090_v42 = vmax.f32 %v1024_v35, 0.0 }
 0x153   : > { %1606 = vst [vmem:[%s2141_s28 + $0x68] sm:$0xff] %v1582_v40   ;;  %v1064_v48 = vadd.f32 %v1791_v45, %v903_v41  ;;  %v1692_v49 = vpop.f32.mrb[45].mxu0  ;;  %v1055_v51 = vpop.f32.mrb[45].mxu1 }
 0x154   : > { %v1091_v53 = vmax.f32 %v1027_v19, 0.0  ;;  %v1693_v54 = vadd.f32 %v1692_v49, %v1691_v44  ;;  %v1056_v50 = vadd.f32 %v1055_v51, %v895_v46  ;;  %v1694_v57 = vpop.f32.mrb[46].mxu0  ;;  %v1792_v59 = vpop.f32.mrb[46].mxu1  ;;  %1605 = vst [vmem:[%s2141_s28 + $0x60] sm:$0xff] %v1577_v47  }
 0x155   : > { %v1067_v60 = vadd.f32 %v1792_v59, %v906_v52  ;;  %v1695_v61 = vpop.f32.mrb[47].mxu0  ;;  %v1058_v62 = vpop.f32.mrb[47].mxu1  ;;  %v1100_v3 = vmax.f32 %v1064_v48, 0.0 }
 0x156   : > { %v1567_v63 = vpack.c.bf16 %v1091_v53, %v1090_v42  ;;  %v871_v0 = vadd.f32 %v1693_v54, %v2131_v56  ;;  %v1696_v55 = vadd.f32 %v1695_v61, %v1694_v57  ;;  %v1059_v4 = vadd.f32 %v1058_v62, %v898_v38 }
 0x157   : > { %v1101_v1 = vmax.f32 %v1067_v60, 0.0  ;;  %v1098_v7 = vmax.f32 %v1056_v50, 0.0 }
 0x158   : > { %1603 = vst [vmem:[%s2141_s28 + $0x50] sm:$0xff] %v1567_v63   ;;  %v1032_v5 = vadd.f32 %v2165_v58, %v871_v0  ;;  %v874_v6 = vadd.f32 %v1696_v55, %v2131_v56  ;;  %v1099_v10 = vmax.f32 %v1059_v4, 0.0 }
 0x159   : > { %v1592_v8 = vpack.c.bf16 %v1101_v1, %v1100_v3 }
 0x15a   : > { %v1035_v43 = vadd.f32 %v2167_v2, %v874_v6  ;;  %v1587_v11 = vpack.c.bf16 %v1099_v10, %v1098_v7  ;;  %v1092_v13 = vmax.f32 %v1032_v5, 0.0 }
 0x15b   : > { %1608 = vst [vmem:[%s2141_s28 + $0x78] sm:$0xff] %v1592_v8  }
 0x15c   : > { %v1093_v12 = vmax.f32 %v1035_v43, 0.0  ;;  %1607 = vst [vmem:[%s2141_s28 + $0x70] sm:$0xff] %v1587_v11  }
 0x15e   : > { %v1572_v15 = vpack.c.bf16 %v1093_v12, %v1092_v13 }
 0x160   : > { %1604 = vst [vmem:[%s2141_s28 + $0x58] sm:$0xff] %v1572_v15  }
 0x161 PF: > { %s13_s14 = sadd.s32 1, %s1944_s14   ;;  %s2214_s12 = smov %s1940_s13 }
 0x162   : > { %p10_p5 = scmp.ge.s32.totalorder %s13_s14, 4   ;;  %s2215_s13 = smov %s2217_s15 }
 0x164   :  { %12 = sbr.rel (!%p10_p5) target bundleno = 2 (0x2), region = 68 }

// kernel: unetpp_forward.88
= control target key start
LH: loop header
LB: loop body
LE: loop exit
PB: predicated region body
PF: predicated region fallthrough
CT: control target
= control target key end

     0   :  { %s2183_s12 = smov 0   ;;  %s2185_s13 = smov 0   ;;  %s2440_s0 = inlined_call_operand.vmem [shape: bf16[512,512], index: 0, kind: input, shape index: {}]   ;;  %s2441_s1 = inlined_call_operand.vmem [shape: bf16[512,128], index: 1, kind: input, shape index: {}]   ;;  %s2442_s2 = inlined_call_operand.vmem [shape: f32[1,128], index: 2, kind: input, shape index: {}]   ;;  %s2443_s3 = inlined_call_operand.vmem [shape: bf16[512,128], index: 3, kind: output, shape index: {}]  }
   0x1   :  { %s2187_s14 = smov 0  }
   0x2 LB: > { %s25_s15 = sadd.s32 1, %s2157_s13  ;;  %p1498_p0 = scmp.ge.s32.totalorder %s2161_s14, 1  ;;  %s2161_s14 = sphi %s2187_s14, %s13_s14   ;;  %s2157_s13 = sphi %s2185_s13, %s2445_s13   ;;  %s2153_s12 = sphi %s2183_s12, %s2444_s12  }
   0x3   : > { %p27_p1 = scmp.ge.s32.totalorder %s25_s15, 2  ;;  %p170_p2 = scmp.lt.s32.totalorder %s2161_s14, 3 }
   0x5   : > { %s2447_s15 = smov (%p27_p1, %s25_s15), 0  ;;  %p171_p3 = pnand %p1498_p0, %p170_p2 }
   0x6   : > { %v2011_v0 = vld [vmem:[%s2441_s1 + $0x40] sm:$0xff] (!%p171_p3)   ;;  %v2015_v4 = vld [vmem:[%s2441_s1 + $0x48] sm:$0xff] (!%p171_p3)   ;;  %v2019_v8 = vld [vmem:[%s2441_s1 + $0x50] sm:$0xff] (!%p171_p3)   ;;  %s1499_s25 = sshll.u32 (!%p171_p3), %s2153_s12, 5 }
   0x7   : > { %174 = sbr.rel (%p171_p3) target bundleno = 386 (0x182), region = 32  ;;  %v2012_v1 = vld [vmem:[%s2441_s1 + $0xc0] sm:$0xff] (!%p171_p3)   ;;  %1763 = vmatprep.subr.bf16.mxu0 (!%p171_p3), %v2011_v0  ;;  %v2016_v5 = vld [vmem:[%s2441_s1 + $0xc8] sm:$0xff] (!%p171_p3)   ;;  %v2020_v9 = vld [vmem:[%s2441_s1 + $0xd0] sm:$0xff] (!%p171_p3)   ;;  %p206_p4 = scmp.lt.s32.totalorder (!%p171_p3), %s1499_s25, 63 }
   0x8   : > { %v2013_v2 = vld [vmem:[%s2441_s1] sm:$0xff] (!%p171_p3)   ;;  %1875 = vmatprep.subr.bf16.mxu1 (!%p171_p3), %v2012_v1  ;;  %v2017_v6 = vld [vmem:[%s2441_s1 + $0x8] sm:$0xff] (!%p171_p3)   ;;  %v2021_v10 = vld [vmem:[%s2441_s1 + $0x10] sm:$0xff] (!%p171_p3)  }
   0x9   : > { %v2014_v3 = vld [vmem:[%s2441_s1 + $0x80] sm:$0xff] (!%p171_p3)   ;;  %1764 = vmatpush3.bf16.msra.mxu0 (!%p171_p3), %v2013_v2  ;;  %v2018_v7 = vld [vmem:[%s2441_s1 + $0x88] sm:$0xff] (!%p171_p3)   ;;  %v2022_v11 = vld [vmem:[%s2441_s1 + $0x90] sm:$0xff] (!%p171_p3)  }
   0xa   : > { %1876 = vmatpush3.bf16.msra.mxu1 (!%p171_p3), %v2014_v3  ;;  %1765 = vmatprep.subr.bf16.mxu0 (!%p171_p3), %v2015_v4  ;;  %v2023_v12 = vld [vmem:[%s2441_s1 + $0x58] sm:$0xff] (!%p171_p3)   ;;  %v2027_v16 = vld [vmem:[%s2441_s1 + $0x60] sm:$0xff] (!%p171_p3)   ;;  %v2031_v20 = vld [vmem:[%s2441_s1 + $0x68] sm:$0xff] (!%p171_p3)  }
   0xb   : > { %1877 = vmatprep.subr.bf16.mxu1 (!%p171_p3), %v2016_v5  ;;  %v2024_v13 = vld [vmem:[%s2441_s1 + $0xd8] sm:$0xff] (!%p171_p3)   ;;  %v2028_v17 = vld [vmem:[%s2441_s1 + $0xe0] sm:$0xff] (!%p171_p3)   ;;  %v2032_v21 = vld [vmem:[%s2441_s1 + $0xe8] sm:$0xff] (!%p171_p3)  }
   0xc   : > { %v2025_v14 = vld [vmem:[%s2441_s1 + $0x18] sm:$0xff] (!%p171_p3)   ;;  %v2029_v18 = vld [vmem:[%s2441_s1 + $0x20] sm:$0xff] (!%p171_p3)   ;;  %v2033_v22 = vld [vmem:[%s2441_s1 + $0x28] sm:$0xff] (!%p171_p3)  }
   0xd   : > { %1766 = vmatpush3.bf16.msra.mxu0 (!%p171_p3), %v2017_v6  ;;  %v2026_v15 = vld [vmem:[%s2441_s1 + $0x98] sm:$0xff] (!%p171_p3)   ;;  %v2030_v19 = vld [vmem:[%s2441_s1 + $0xa0] sm:$0xff] (!%p171_p3)   ;;  %v2034_v23 = vld [vmem:[%s2441_s1 + $0xa8] sm:$0xff] (!%p171_p3)  }
   0xe   : > { %1878 = vmatpush3.bf16.msra.mxu1 %v2018_v7  ;;  %1767 = vmatprep.subr.bf16.mxu0 %v2019_v8  ;;  %s2449_s25 = smov (!%p206_p4, %s1499_s25), 63  ;;  %v2035_v24 = vld [vmem:[%s2441_s1 + $0x70] sm:$0xff]   ;;  %v2039_v28 = vld [vmem:[%s2441_s1 + $0x78] sm:$0xff]  }
   0xf   : > { %1879 = vmatprep.subr.bf16.mxu1 %v2020_v9  ;;  %v2036_v25 = vld [vmem:[%s2441_s1 + $0xf0] sm:$0xff]   ;;  %s1635_s24 = sshll.u32 %s2449_s25, 4  ;;  %v2040_v29 = vld [vmem:[%s2441_s1 + $0xf8] sm:$0xff]   ;;  %s1503_s17 = sshll.u32 %s2449_s25, 2 }
  0x10   : > { %v2037_v26 = vld [vmem:[%s2441_s1 + $0x30] sm:$0xff]   ;;  %s2300_s12 = scalar_lea.vmem %s2440_s0, %s1635_s24  ;;  %v2041_v30 = vld [vmem:[%s2441_s1 + $0x38] sm:$0xff]   ;;  %s2383_s20 = scalar_lea.vmem %s2443_s3, %s1503_s17 }
  0x11   : > { %1768 = vmatpush3.bf16.msra.mxu0 %v2021_v10  ;;  %v2038_v27 = vld [vmem:[%s2441_s1 + $0xb0] sm:$0xff]   ;;  %v2042_v31 = vld [vmem:[%s2441_s1 + $0xb8] sm:$0xff]  }
  0x12   : > { %1880 = vmatpush3.bf16.msra.mxu1 %v2022_v11  ;;  %1769 = vmatprep.subr.bf16.mxu0 %v2023_v12  ;;  %v2043_v32 = vld [vmem:[%s2300_s12] ss:$16 sps:$4 sm:$0xff]   ;;  %v2045_v33 = vld [vmem:[%s2300_s12 + $0x4] ss:$16 sps:$4 sm:$0xff]   ;;  %v2046_v34 = vld [vmem:[%s2300_s12 + $0x8] ss:$16 sps:$4 sm:$0xff]  }
  0x13   : > { %1881 = vmatprep.subr.bf16.mxu1 %v2024_v13  ;;  %v2048_v35 = vld [vmem:[%s2300_s12 + $0xc] ss:$16 sps:$4 sm:$0xff]   ;;  %908 = vmatprep.mubr.bf16.mxu0 %v2045_v33  ;;  %v2049_v36 = vld [vmem:[%s2300_s12 + $0x24] ss:$16 sps:$4 sm:$0xff]   ;;  %v2053_v38 = vld [vmem:[%s2300_s12 + $0x20] ss:$16 sps:$4 sm:$0xff]  }
  0x14   : > { %1069 = vmatprep.mubr.bf16.mxu1 %v2048_v35  ;;  %v2051_v37 = vld [vmem:[%s2300_s12 + $0x2c] ss:$16 sps:$4 sm:$0xff]   ;;  %v2054_v39 = vld [vmem:[%s2300_s12 + $0x28] ss:$16 sps:$4 sm:$0xff]   ;;  %v2055_v40 = vld [vmem:[%s2300_s12 + $0x44] ss:$16 sps:$4 sm:$0xff]  }
  0x15   : > { %1770 = vmatpush3.bf16.msra.mxu0 %v2025_v14  ;;  %v2057_v41 = vld [vmem:[%s2300_s12 + $0x4c] ss:$16 sps:$4 sm:$0xff]   ;;  %v2059_v42 = vld [vmem:[%s2300_s12 + $0x40] ss:$16 sps:$4 sm:$0xff]   ;;  %v2060_v43 = vld [vmem:[%s2300_s12 + $0x48] ss:$16 sps:$4 sm:$0xff]  }
  0x16   : > { %1882 = vmatpush3.bf16.msra.mxu1 %v2026_v15  ;;  %1771 = vmatprep.subr.bf16.mxu0 %v2027_v16  ;;  %v2061_v44 = vld [vmem:[%s2300_s12 + $0x64] ss:$16 sps:$4 sm:$0xff]   ;;  %v2063_v45 = vld [vmem:[%s2300_s12 + $0x6c] ss:$16 sps:$4 sm:$0xff]   ;;  %v2065_v46 = vld [vmem:[%s2300_s12 + $0x60] ss:$16 sps:$4 sm:$0xff]  }
  0x17   : > { %1883 = vmatprep.subr.bf16.mxu1 %v2028_v17  ;;  %v2066_v47 = vld [vmem:[%s2300_s12 + $0x68] ss:$16 sps:$4 sm:$0xff]   ;;  %v2067_v48 = vld [vmem:[%s2300_s12 + $0x84] ss:$16 sps:$4 sm:$0xff]   ;;  %v2069_v49 = vld [vmem:[%s2300_s12 + $0x8c] ss:$16 sps:$4 sm:$0xff]  }
  0x18   : > { %v2071_v50 = vld [vmem:[%s2300_s12 + $0x80] ss:$16 sps:$4 sm:$0xff]   ;;  %v2072_v51 = vld [vmem:[%s2300_s12 + $0x88] ss:$16 sps:$4 sm:$0xff]   ;;  %v2073_v52 = vld [vmem:[%s2300_s12 + $0xa4] ss:$16 sps:$4 sm:$0xff]  }
  0x19   : > { %1772 = vmatpush3.bf16.msra.mxu0 %v2029_v18  ;;  %v2075_v53 = vld [vmem:[%s2300_s12 + $0xac] ss:$16 sps:$4 sm:$0xff]   ;;  %v2077_v54 = vld [vmem:[%s2300_s12 + $0xa0] ss:$16 sps:$4 sm:$0xff]   ;;  %v2078_v55 = vld [vmem:[%s2300_s12 + $0xa8] ss:$16 sps:$4 sm:$0xff]  }
  0x1a   : > { %1884 = vmatpush3.bf16.msra.mxu1 %v2030_v19  ;;  %1773 = vmatprep.subr.bf16.mxu0 %v2031_v20  ;;  %v2079_v56 = vld [vmem:[%s2300_s12 + $0xc4] ss:$16 sps:$4 sm:$0xff]   ;;  %v2081_v57 = vld [vmem:[%s2300_s12 + $0xcc] ss:$16 sps:$4 sm:$0xff]   ;;  %v2083_v58 = vld [vmem:[%s2300_s12 + $0xc0] ss:$16 sps:$4 sm:$0xff]  }
  0x1b   : > { %1885 = vmatprep.subr.bf16.mxu1 %v2032_v21  ;;  %v2084_v59 = vld [vmem:[%s2300_s12 + $0xc8] ss:$16 sps:$4 sm:$0xff]   ;;  %v2085_v60 = vld [vmem:[%s2300_s12 + $0xe4] ss:$16 sps:$4 sm:$0xff]   ;;  %v2087_v61 = vld [vmem:[%s2300_s12 + $0xec] ss:$16 sps:$4 sm:$0xff]  }
  0x1c   : > { %v2089_v62 = vld [vmem:[%s2300_s12 + $0xe0] ss:$16 sps:$4 sm:$0xff]   ;;  %v2090_v63 = vld [vmem:[%s2300_s12 + $0xe8] ss:$16 sps:$4 sm:$0xff]   ;;  %v2091_v0 = vld [vmem:[%s2300_s12 + $0x104] ss:$16 sps:$4 sm:$0xff]  }
  0x1d   : > { %1774 = vmatpush3.bf16.msra.mxu0 %v2033_v22  ;;  %v2093_v1 = vld [vmem:[%s2300_s12 + $0x10c] ss:$16 sps:$4 sm:$0xff]   ;;  %v2095_v2 = vld [vmem:[%s2300_s12 + $0x100] ss:$16 sps:$4 sm:$0xff]   ;;  %v2096_v3 = vld [vmem:[%s2300_s12 + $0x108] ss:$16 sps:$4 sm:$0xff]  }
  0x1e   : > { %1886 = vmatpush3.bf16.msra.mxu1 %v2034_v23  ;;  %1775 = vmatprep.subr.bf16.mxu0 %v2035_v24  ;;  %v2097_v4 = vld [vmem:[%s2300_s12 + $0x124] ss:$16 sps:$4 sm:$0xff]   ;;  %v2099_v5 = vld [vmem:[%s2300_s12 + $0x12c] ss:$16 sps:$4 sm:$0xff]   ;;  %v2101_v6 = vld [vmem:[%s2300_s12 + $0x120] ss:$16 sps:$4 sm:$0xff]  }
  0x1f   : > { %1887 = vmatprep.subr.bf16.mxu1 %v2036_v25  ;;  %v2102_v7 = vld [vmem:[%s2300_s12 + $0x128] ss:$16 sps:$4 sm:$0xff]   ;;  %v2103_v8 = vld [vmem:[%s2300_s12 + $0x144] ss:$16 sps:$4 sm:$0xff]   ;;  %v2105_v9 = vld [vmem:[%s2300_s12 + $0x14c] ss:$16 sps:$4 sm:$0xff]  }
  0x20   : > { %v2107_v10 = vld [vmem:[%s2300_s12 + $0x140] ss:$16 sps:$4 sm:$0xff]   ;;  %v2108_v11 = vld [vmem:[%s2300_s12 + $0x148] ss:$16 sps:$4 sm:$0xff]   ;;  %v2109_v12 = vld [vmem:[%s2300_s12 + $0x164] ss:$16 sps:$4 sm:$0xff]  }
  0x21   : > { %1776 = vmatpush3.bf16.msra.mxu0 %v2037_v26  ;;  %v2111_v13 = vld [vmem:[%s2300_s12 + $0x16c] ss:$16 sps:$4 sm:$0xff]   ;;  %v2113_v14 = vld [vmem:[%s2300_s12 + $0x160] ss:$16 sps:$4 sm:$0xff]   ;;  %v2114_v15 = vld [vmem:[%s2300_s12 + $0x168] ss:$16 sps:$4 sm:$0xff]  }
  0x22   : > { %1888 = vmatpush3.bf16.msra.mxu1 %v2038_v27  ;;  %1777 = vmatprep.subr.bf16.mxu0 %v2039_v28  ;;  %v2115_v16 = vld [vmem:[%s2300_s12 + $0x184] ss:$16 sps:$4 sm:$0xff]   ;;  %v2117_v17 = vld [vmem:[%s2300_s12 + $0x18c] ss:$16 sps:$4 sm:$0xff]   ;;  %v2119_v18 = vld [vmem:[%s2300_s12 + $0x180] ss:$16 sps:$4 sm:$0xff]  }
  0x23   : > { %1889 = vmatprep.subr.bf16.mxu1 %v2040_v29  ;;  %v2120_v19 = vld [vmem:[%s2300_s12 + $0x188] ss:$16 sps:$4 sm:$0xff]   ;;  %v2121_v20 = vld [vmem:[%s2300_s12 + $0x1a4] ss:$16 sps:$4 sm:$0xff]   ;;  %v2123_v21 = vld [vmem:[%s2300_s12 + $0x1ac] ss:$16 sps:$4 sm:$0xff]  }
  0x24   : > { %v2125_v22 = vld [vmem:[%s2300_s12 + $0x1a0] ss:$16 sps:$4 sm:$0xff]   ;;  %v2126_v23 = vld [vmem:[%s2300_s12 + $0x1a8] ss:$16 sps:$4 sm:$0xff]   ;;  %v2127_v24 = vld [vmem:[%s2300_s12 + $0x1c4] ss:$16 sps:$4 sm:$0xff]  }
  0x25   : > { %1778 = vmatpush3.bf16.msra.mxu0 %v2041_v30  ;;  %v2129_v25 = vld [vmem:[%s2300_s12 + $0x1cc] ss:$16 sps:$4 sm:$0xff]   ;;  %v2131_v26 = vld [vmem:[%s2300_s12 + $0x1c0] ss:$16 sps:$4 sm:$0xff]   ;;  %v2132_v27 = vld [vmem:[%s2300_s12 + $0x1c8] ss:$16 sps:$4 sm:$0xff]  }
  0x26   : > { %1890 = vmatpush3.bf16.msra.mxu1 %v2042_v31  ;;  %v2133_v28 = vld [vmem:[%s2300_s12 + $0x1e4] ss:$16 sps:$4 sm:$0xff]   ;;  %v2135_v29 = vld [vmem:[%s2300_s12 + $0x1ec] ss:$16 sps:$4 sm:$0xff]   ;;  %v2137_v30 = vld [vmem:[%s2300_s12 + $0x1e0] ss:$16 sps:$4 sm:$0xff]  }
  0x27   : > { %v2138_v31 = vld [vmem:[%s2300_s12 + $0x1e8] ss:$16 sps:$4 sm:$0xff]  }
  0x28   : > { %909 = vmatmul.mubr.bf16.vlgmr.msra.gmra.mrb[0].mxu0 %v2043_v32 }
  0x29   : > { %1070 = vmatmul.mubr.bf16.vlgmr.msra.gmra.mrb[0].mxu1 %v2046_v34  ;;  %916 = vmatprep.mubr.bf16.mxu0 %v2049_v36  ;;  %v2375_v34 = vld [vmem:[%s2442_s2] ss:$0 sm:$0xff] }
  0x2a   : > { %1077 = vmatprep.mubr.bf16.mxu1 %v2051_v37 }
  0x30   : > { %917 = vmatmul.mubr.bf16.gmra.mrb[4].mxu0 %v2053_v38 }
  0x31   : > { %1078 = vmatmul.mubr.bf16.gmra.mrb[4].mxu1 %v2054_v39  ;;  %924 = vmatprep.mubr.bf16.mxu0 %v2055_v40 }
  0x32   : > { %1085 = vmatprep.mubr.bf16.mxu1 %v2057_v41 }
  0x38   : > { %925 = vmatmul.mubr.bf16.gmra.mrb[8].mxu0 %v2059_v42 }
  0x39   : > { %1086 = vmatmul.mubr.bf16.gmra.mrb[8].mxu1 %v2060_v43  ;;  %932 = vmatprep.mubr.bf16.mxu0 %v2061_v44 }
  0x3a   : > { %1093 = vmatprep.mubr.bf16.mxu1 %v2063_v45 }
  0x40   : > { %933 = vmatmul.mubr.bf16.gmra.mrb[12].mxu0 %v2065_v46 }
  0x41   : > { %1094 = vmatmul.mubr.bf16.gmra.mrb[12].mxu1 %v2066_v47  ;;  %940 = vmatprep.mubr.bf16.mxu0 %v2067_v48 }
  0x42   : > { %1101 = vmatprep.mubr.bf16.mxu1 %v2069_v49 }
  0x48   : > { %941 = vmatmul.mubr.bf16.gmra.mrb[16].mxu0 %v2071_v50 }
  0x49   : > { %1102 = vmatmul.mubr.bf16.gmra.mrb[16].mxu1 %v2072_v51  ;;  %948 = vmatprep.mubr.bf16.mxu0 %v2073_v52 }
  0x4a   : > { %1109 = vmatprep.mubr.bf16.mxu1 %v2075_v53 }
  0x50   : > { %949 = vmatmul.mubr.bf16.gmra.mrb[20].mxu0 %v2077_v54 }
  0x51   : > { %1110 = vmatmul.mubr.bf16.gmra.mrb[20].mxu1 %v2078_v55  ;;  %956 = vmatprep.mubr.bf16.mxu0 %v2079_v56 }
  0x52   : > { %1117 = vmatprep.mubr.bf16.mxu1 %v2081_v57 }
  0x58   : > { %957 = vmatmul.mubr.bf16.gmra.mrb[24].mxu0 %v2083_v58 }
  0x59   : > { %1118 = vmatmul.mubr.bf16.gmra.mrb[24].mxu1 %v2084_v59  ;;  %964 = vmatprep.mubr.bf16.mxu0 %v2085_v60 }
  0x5a   : > { %1125 = vmatprep.mubr.bf16.mxu1 %v2087_v61 }
  0x60   : > { %965 = vmatmul.mubr.bf16.gmra.mrb[28].mxu0 %v2089_v62 }
  0x61   : > { %1126 = vmatmul.mubr.bf16.gmra.mrb[28].mxu1 %v2090_v63  ;;  %972 = vmatprep.mubr.bf16.mxu0 %v2091_v0 }
  0x62   : > { %1133 = vmatprep.mubr.bf16.mxu1 %v2093_v1 }
  0x68   : > { %973 = vmatmul.mubr.bf16.gmra.mrb[32].mxu0 %v2095_v2 }
  0x69   : > { %1134 = vmatmul.mubr.bf16.gmra.mrb[32].mxu1 %v2096_v3  ;;  %980 = vmatprep.mubr.bf16.mxu0 %v2097_v4 }
  0x6a   : > { %1141 = vmatprep.mubr.bf16.mxu1 %v2099_v5 }
  0x70   : > { %981 = vmatmul.mubr.bf16.gmra.mrb[36].mxu0 %v2101_v6 }
  0x71   : > { %1142 = vmatmul.mubr.bf16.gmra.mrb[36].mxu1 %v2102_v7  ;;  %988 = vmatprep.mubr.bf16.mxu0 %v2103_v8 }
  0x72   : > { %1149 = vmatprep.mubr.bf16.mxu1 %v2105_v9 }
  0x78   : > { %989 = vmatmul.mubr.bf16.gmra.mrb[40].mxu0 %v2107_v10 }
  0x79   : > { %1150 = vmatmul.mubr.bf16.gmra.mrb[40].mxu1 %v2108_v11  ;;  %996 = vmatprep.mubr.bf16.mxu0 %v2109_v12 }
  0x7a   : > { %1157 = vmatprep.mubr.bf16.mxu1 %v2111_v13 }
  0x80   : > { %997 = vmatmul.mubr.bf16.gmra.mrb[44].mxu0 %v2113_v14 }
  0x81   : > { %1158 = vmatmul.mubr.bf16.gmra.mrb[44].mxu1 %v2114_v15  ;;  %1004 = vmatprep.mubr.bf16.mxu0 %v2115_v16 }
  0x82   : > { %1165 = vmatprep.mubr.bf16.mxu1 %v2117_v17 }
  0x88   : > { %1005 = vmatmul.mubr.bf16.gmra.mrb[48].mxu0 %v2119_v18 }
  0x89   : > { %1166 = vmatmul.mubr.bf16.gmra.mrb[48].mxu1 %v2120_v19  ;;  %1012 = vmatprep.mubr.bf16.mxu0 %v2121_v20 }
  0x8a   : > { %1173 = vmatprep.mubr.bf16.mxu1 %v2123_v21 }
  0x90   : > { %1013 = vmatmul.mubr.bf16.gmra.mrb[52].mxu0 %v2125_v22 }
  0x91   : > { %1174 = vmatmul.mubr.bf16.gmra.mrb[52].mxu1 %v2126_v23  ;;  %1020 = vmatprep.mubr.bf16.mxu0 %v2127_v24 }
  0x92   : > { %1181 = vmatprep.mubr.bf16.mxu1 %v2129_v25 }
  0x98   : > { %1021 = vmatmul.mubr.bf16.gmra.mrb[56].mxu0 %v2131_v26 }
  0x99   : > { %1182 = vmatmul.mubr.bf16.gmra.mrb[56].mxu1 %v2132_v27  ;;  %1028 = vmatprep.mubr.bf16.mxu0 %v2133_v28 }
  0x9a   : > { %1189 = vmatprep.mubr.bf16.mxu1 %v2135_v29 }
  0xa0   : > { %1029 = vmatmul.mubr.bf16.gmra.mrb[60].mxu0 %v2137_v30 }
  0xa1   : > { %1190 = vmatmul.mubr.bf16.gmra.mrb[60].mxu1 %v2138_v31 }
  0xfb   : > { %v1779_v32 = vpop.f32.mrb[0].mxu0 }
  0xfc   : > { %v1891_v33 = vpop.f32.mrb[0].mxu1  ;;  %v1780_v35 = vpop.f32.mrb[1].mxu0 }
  0xfd   : > { %v1781_v36 = vadd.f32 %v1780_v35, %v1779_v32  ;;  %v1892_v37 = vpop.f32.mrb[1].mxu1  ;;  %v1782_v38 = vpop.f32.mrb[2].mxu0 }
  0xfe   : > { %v1893_v39 = vadd.f32 %v1892_v37, %v1891_v33  ;;  %v1894_v40 = vpop.f32.mrb[2].mxu1  ;;  %v1783_v41 = vpop.f32.mrb[3].mxu0 }
  0xff   : > { %v911_v42 = vadd.f32 %v1781_v36, %v2375_v34  ;;  %v1784_v43 = vadd.f32 %v1783_v41, %v1782_v38  ;;  %v1895_v44 = vpop.f32.mrb[3].mxu1 }
 0x100   : > { %v1896_v45 = vadd.f32 %v1895_v44, %v1894_v40 }
 0x101   : > { %v1072_v46 = vadd.f32 %v1893_v39, %v911_v42  ;;  %v914_v47 = vadd.f32 %v1784_v43, %v2375_v34 }
 0x103   : > { %v1075_v48 = vadd.f32 %v1896_v45, %v914_v47  ;;  %v1785_v49 = vpop.f32.mrb[4].mxu0  ;;  %v1198_v52 = vmax.f32 %v1072_v46, 0.0 }
 0x104   : > { %v1897_v50 = vpop.f32.mrb[4].mxu1  ;;  %v1786_v51 = vpop.f32.mrb[5].mxu0 }
 0x105   : > { %v1199_v53 = vmax.f32 %v1075_v48, 0.0  ;;  %v1787_v54 = vadd.f32 %v1786_v51, %v1785_v49  ;;  %v1898_v55 = vpop.f32.mrb[5].mxu1  ;;  %v1788_v56 = vpop.f32.mrb[6].mxu0 }
 0x106   : > { %v1899_v57 = vadd.f32 %v1898_v55, %v1897_v50  ;;  %v1900_v58 = vpop.f32.mrb[6].mxu1  ;;  %v1789_v59 = vpop.f32.mrb[7].mxu0 }
 0x107   : > { %v1671_v60 = vpack.c.bf16 %v1199_v53, %v1198_v52  ;;  %v919_v61 = vadd.f32 %v1787_v54, %v2375_v34  ;;  %v1790_v62 = vadd.f32 %v1789_v59, %v1788_v56  ;;  %v1901_v63 = vpop.f32.mrb[7].mxu1 }
 0x108   : > { %v1902_v0 = vadd.f32 %v1901_v63, %v1900_v58 }
 0x109   : > { %1672 = vst [vmem:[%s2383_s20] sm:$0xff] %v1671_v60   ;;  %v1080_v1 = vadd.f32 %v1899_v57, %v919_v61  ;;  %v922_v2 = vadd.f32 %v1790_v62, %v2375_v34 }
 0x10b   : > { %v1083_v3 = vadd.f32 %v1902_v0, %v922_v2  ;;  %v1791_v4 = vpop.f32.mrb[8].mxu0  ;;  %v1200_v7 = vmax.f32 %v1080_v1, 0.0 }
 0x10c   : > { %v1903_v5 = vpop.f32.mrb[8].mxu1  ;;  %v1792_v6 = vpop.f32.mrb[9].mxu0 }
 0x10d   : > { %v1201_v8 = vmax.f32 %v1083_v3, 0.0  ;;  %v1793_v9 = vadd.f32 %v1792_v6, %v1791_v4  ;;  %v1904_v10 = vpop.f32.mrb[9].mxu1  ;;  %v1794_v11 = vpop.f32.mrb[10].mxu0 }
 0x10e   : > { %v1905_v12 = vadd.f32 %v1904_v10, %v1903_v5  ;;  %v1906_v13 = vpop.f32.mrb[10].mxu1  ;;  %v1795_v14 = vpop.f32.mrb[11].mxu0 }
 0x10f   : > { %v1676_v15 = vpack.c.bf16 %v1201_v8, %v1200_v7  ;;  %v927_v16 = vadd.f32 %v1793_v9, %v2375_v34  ;;  %v1796_v17 = vadd.f32 %v1795_v14, %v1794_v11  ;;  %v1907_v18 = vpop.f32.mrb[11].mxu1 }
 0x110   : > { %v1908_v19 = vadd.f32 %v1907_v18, %v1906_v13 }
 0x111   : > { %1748 = vst [vmem:[%s2383_s20 + $0x8] sm:$0xff] %v1676_v15   ;;  %v1088_v20 = vadd.f32 %v1905_v12, %v927_v16  ;;  %v930_v21 = vadd.f32 %v1796_v17, %v2375_v34 }
 0x113   : > { %v1091_v22 = vadd.f32 %v1908_v19, %v930_v21  ;;  %v1797_v23 = vpop.f32.mrb[12].mxu0  ;;  %v1202_v26 = vmax.f32 %v1088_v20, 0.0 }
 0x114   : > { %v1909_v24 = vpop.f32.mrb[12].mxu1  ;;  %v1798_v25 = vpop.f32.mrb[13].mxu0 }
 0x115   : > { %v1203_v27 = vmax.f32 %v1091_v22, 0.0  ;;  %v1799_v28 = vadd.f32 %v1798_v25, %v1797_v23  ;;  %v1910_v29 = vpop.f32.mrb[13].mxu1  ;;  %v1800_v30 = vpop.f32.mrb[14].mxu0 }
 0x116   : > { %v1911_v31 = vadd.f32 %v1910_v29, %v1909_v24  ;;  %v1912_v32 = vpop.f32.mrb[14].mxu1  ;;  %v1801_v33 = vpop.f32.mrb[15].mxu0 }
 0x117   : > { %v1681_v35 = vpack.c.bf16 %v1203_v27, %v1202_v26  ;;  %v935_v36 = vadd.f32 %v1799_v28, %v2375_v34  ;;  %v1802_v37 = vadd.f32 %v1801_v33, %v1800_v30  ;;  %v1913_v38 = vpop.f32.mrb[15].mxu1 }
 0x118   : > { %v1914_v39 = vadd.f32 %v1913_v38, %v1912_v32 }
 0x119   : > { %1749 = vst [vmem:[%s2383_s20 + $0x10] sm:$0xff] %v1681_v35   ;;  %v1096_v40 = vadd.f32 %v1911_v31, %v935_v36  ;;  %v938_v41 = vadd.f32 %v1802_v37, %v2375_v34 }
 0x11b   : > { %v1099_v42 = vadd.f32 %v1914_v39, %v938_v41  ;;  %v1803_v43 = vpop.f32.mrb[16].mxu0  ;;  %v1204_v46 = vmax.f32 %v1096_v40, 0.0 }
 0x11c   : > { %v1915_v44 = vpop.f32.mrb[16].mxu1  ;;  %v1804_v45 = vpop.f32.mrb[17].mxu0 }
 0x11d   : > { %v1205_v47 = vmax.f32 %v1099_v42, 0.0  ;;  %v1805_v48 = vadd.f32 %v1804_v45, %v1803_v43  ;;  %v1916_v49 = vpop.f32.mrb[17].mxu1  ;;  %v1806_v50 = vpop.f32.mrb[18].mxu0 }
 0x11e   : > { %v1917_v51 = vadd.f32 %v1916_v49, %v1915_v44  ;;  %v1918_v52 = vpop.f32.mrb[18].mxu1  ;;  %v1807_v53 = vpop.f32.mrb[19].mxu0 }
 0x11f   : > { %v1686_v54 = vpack.c.bf16 %v1205_v47, %v1204_v46  ;;  %v943_v55 = vadd.f32 %v1805_v48, %v2375_v34  ;;  %v1808_v56 = vadd.f32 %v1807_v53, %v1806_v50  ;;  %v1919_v57 = vpop.f32.mrb[19].mxu1 }
 0x120   : > { %v1920_v58 = vadd.f32 %v1919_v57, %v1918_v52 }
 0x121   : > { %1750 = vst [vmem:[%s2383_s20 + $0x18] sm:$0xff] %v1686_v54   ;;  %v1104_v59 = vadd.f32 %v1917_v51, %v943_v55  ;;  %v946_v60 = vadd.f32 %v1808_v56, %v2375_v34 }
 0x123   : > { %v1107_v61 = vadd.f32 %v1920_v58, %v946_v60  ;;  %v1809_v62 = vpop.f32.mrb[20].mxu0  ;;  %v1206_v1 = vmax.f32 %v1104_v59, 0.0 }
 0x124   : > { %v1921_v63 = vpop.f32.mrb[20].mxu1  ;;  %v1810_v0 = vpop.f32.mrb[21].mxu0 }
 0x125   : > { %v1207_v2 = vmax.f32 %v1107_v61, 0.0  ;;  %v1811_v3 = vadd.f32 %v1810_v0, %v1809_v62  ;;  %v1922_v4 = vpop.f32.mrb[21].mxu1  ;;  %v1812_v5 = vpop.f32.mrb[22].mxu0 }
 0x126   : > { %v1923_v6 = vadd.f32 %v1922_v4, %v1921_v63  ;;  %v1924_v7 = vpop.f32.mrb[22].mxu1  ;;  %v1813_v8 = vpop.f32.mrb[23].mxu0 }
 0x127   : > { %v1691_v9 = vpack.c.bf16 %v1207_v2, %v1206_v1  ;;  %v951_v10 = vadd.f32 %v1811_v3, %v2375_v34  ;;  %v1814_v11 = vadd.f32 %v1813_v8, %v1812_v5  ;;  %v1925_v12 = vpop.f32.mrb[23].mxu1 }
 0x128   : > { %v1926_v13 = vadd.f32 %v1925_v12, %v1924_v7 }
 0x129   : > { %1751 = vst [vmem:[%s2383_s20 + $0x20] sm:$0xff] %v1691_v9   ;;  %v1112_v14 = vadd.f32 %v1923_v6, %v951_v10  ;;  %v954_v15 = vadd.f32 %v1814_v11, %v2375_v34 }
 0x12b   : > { %v1115_v16 = vadd.f32 %v1926_v13, %v954_v15  ;;  %v1815_v17 = vpop.f32.mrb[24].mxu0  ;;  %v1208_v20 = vmax.f32 %v1112_v14, 0.0 }
 0x12c   : > { %v1927_v18 = vpop.f32.mrb[24].mxu1  ;;  %v1816_v19 = vpop.f32.mrb[25].mxu0 }
 0x12d   : > { %v1209_v21 = vmax.f32 %v1115_v16, 0.0  ;;  %v1817_v22 = vadd.f32 %v1816_v19, %v1815_v17  ;;  %v1928_v23 = vpop.f32.mrb[25].mxu1  ;;  %v1818_v24 = vpop.f32.mrb[26].mxu0 }
 0x12e   : > { %v1929_v25 = vadd.f32 %v1928_v23, %v1927_v18  ;;  %v1930_v26 = vpop.f32.mrb[26].mxu1  ;;  %v1819_v27 = vpop.f32.mrb[27].mxu0 }
 0x12f   : > { %v1696_v28 = vpack.c.bf16 %v1209_v21, %v1208_v20  ;;  %v959_v29 = vadd.f32 %v1817_v22, %v2375_v34  ;;  %v1820_v30 = vadd.f32 %v1819_v27, %v1818_v24  ;;  %v1931_v31 = vpop.f32.mrb[27].mxu1 }
 0x130   : > { %v1932_v32 = vadd.f32 %v1931_v31, %v1930_v26 }
 0x131   : > { %1752 = vst [vmem:[%s2383_s20 + $0x28] sm:$0xff] %v1696_v28   ;;  %v1120_v33 = vadd.f32 %v1929_v25, %v959_v29  ;;  %v962_v35 = vadd.f32 %v1820_v30, %v2375_v34 }
 0x133   : > { %v1123_v36 = vadd.f32 %v1932_v32, %v962_v35  ;;  %v1821_v37 = vpop.f32.mrb[28].mxu0  ;;  %v1210_v40 = vmax.f32 %v1120_v33, 0.0 }
 0x134   : > { %v1933_v38 = vpop.f32.mrb[28].mxu1  ;;  %v1822_v39 = vpop.f32.mrb[29].mxu0 }
 0x135   : > { %v1211_v41 = vmax.f32 %v1123_v36, 0.0  ;;  %v1823_v42 = vadd.f32 %v1822_v39, %v1821_v37  ;;  %v1934_v43 = vpop.f32.mrb[29].mxu1  ;;  %v1824_v44 = vpop.f32.mrb[30].mxu0 }
 0x136   : > { %v1935_v45 = vadd.f32 %v1934_v43, %v1933_v38  ;;  %v1936_v46 = vpop.f32.mrb[30].mxu1  ;;  %v1825_v47 = vpop.f32.mrb[31].mxu0 }
 0x137   : > { %v1701_v48 = vpack.c.bf16 %v1211_v41, %v1210_v40  ;;  %v967_v49 = vadd.f32 %v1823_v42, %v2375_v34  ;;  %v1826_v50 = vadd.f32 %v1825_v47, %v1824_v44  ;;  %v1937_v51 = vpop.f32.mrb[31].mxu1 }
 0x138   : > { %v1938_v52 = vadd.f32 %v1937_v51, %v1936_v46 }
 0x139   : > { %1753 = vst [vmem:[%s2383_s20 + $0x30] sm:$0xff] %v1701_v48   ;;  %v1128_v53 = vadd.f32 %v1935_v45, %v967_v49  ;;  %v970_v54 = vadd.f32 %v1826_v50, %v2375_v34 }
 0x13b   : > { %v1131_v55 = vadd.f32 %v1938_v52, %v970_v54  ;;  %v1827_v56 = vpop.f32.mrb[32].mxu0  ;;  %v1212_v59 = vmax.f32 %v1128_v53, 0.0 }
 0x13c   : > { %v1939_v57 = vpop.f32.mrb[32].mxu1  ;;  %v1828_v58 = vpop.f32.mrb[33].mxu0 }
 0x13d   : > { %v1213_v60 = vmax.f32 %v1131_v55, 0.0  ;;  %v1829_v61 = vadd.f32 %v1828_v58, %v1827_v56  ;;  %v1940_v62 = vpop.f32.mrb[33].mxu1  ;;  %v1830_v63 = vpop.f32.mrb[34].mxu0 }
 0x13e   : > { %v1941_v0 = vadd.f32 %v1940_v62, %v1939_v57  ;;  %v1942_v1 = vpop.f32.mrb[34].mxu1  ;;  %v1831_v2 = vpop.f32.mrb[35].mxu0 }
 0x13f   : > { %v1706_v3 = vpack.c.bf16 %v1213_v60, %v1212_v59  ;;  %v975_v4 = vadd.f32 %v1829_v61, %v2375_v34  ;;  %v1832_v5 = vadd.f32 %v1831_v2, %v1830_v63  ;;  %v1943_v6 = vpop.f32.mrb[35].mxu1 }
 0x140   : > { %v1944_v7 = vadd.f32 %v1943_v6, %v1942_v1 }
 0x141   : > { %1754 = vst [vmem:[%s2383_s20 + $0x38] sm:$0xff] %v1706_v3   ;;  %v1136_v8 = vadd.f32 %v1941_v0, %v975_v4  ;;  %v978_v9 = vadd.f32 %v1832_v5, %v2375_v34 }
 0x143   : > { %v1139_v10 = vadd.f32 %v1944_v7, %v978_v9  ;;  %v1833_v11 = vpop.f32.mrb[36].mxu0  ;;  %v1214_v14 = vmax.f32 %v1136_v8, 0.0 }
 0x144   : > { %v1945_v12 = vpop.f32.mrb[36].mxu1  ;;  %v1834_v13 = vpop.f32.mrb[37].mxu0 }
 0x145   : > { %v1215_v15 = vmax.f32 %v1139_v10, 0.0  ;;  %v1835_v16 = vadd.f32 %v1834_v13, %v1833_v11  ;;  %v1946_v17 = vpop.f32.mrb[37].mxu1  ;;  %v1836_v18 = vpop.f32.mrb[38].mxu0 }
 0x146   : > { %v1947_v19 = vadd.f32 %v1946_v17, %v1945_v12  ;;  %v1948_v20 = vpop.f32.mrb[38].mxu1  ;;  %v1837_v21 = vpop.f32.mrb[39].mxu0 }
 0x147   : > { %v1711_v22 = vpack.c.bf16 %v1215_v15, %v1214_v14  ;;  %v983_v23 = vadd.f32 %v1835_v16, %v2375_v34  ;;  %v1838_v24 = vadd.f32 %v1837_v21, %v1836_v18  ;;  %v1949_v25 = vpop.f32.mrb[39].mxu1 }
 0x148   : > { %v1950_v26 = vadd.f32 %v1949_v25, %v1948_v20 }
 0x149   : > { %1755 = vst [vmem:[%s2383_s20 + $0x40] sm:$0xff] %v1711_v22   ;;  %v1144_v27 = vadd.f32 %v1947_v19, %v983_v23  ;;  %v986_v28 = vadd.f32 %v1838_v24, %v2375_v34 }
 0x14b   : > { %v1147_v29 = vadd.f32 %v1950_v26, %v986_v28  ;;  %v1839_v30 = vpop.f32.mrb[40].mxu0  ;;  %v1216_v33 = vmax.f32 %v1144_v27, 0.0 }
 0x14c   : > { %v1951_v31 = vpop.f32.mrb[40].mxu1  ;;  %v1840_v32 = vpop.f32.mrb[41].mxu0 }
 0x14d   : > { %v1217_v35 = vmax.f32 %v1147_v29, 0.0  ;;  %v1841_v36 = vadd.f32 %v1840_v32, %v1839_v30  ;;  %v1952_v37 = vpop.f32.mrb[41].mxu1  ;;  %v1842_v38 = vpop.f32.mrb[42].mxu0 }
 0x14e   : > { %v1953_v39 = vadd.f32 %v1952_v37, %v1951_v31  ;;  %v1954_v40 = vpop.f32.mrb[42].mxu1  ;;  %v1843_v41 = vpop.f32.mrb[43].mxu0 }
 0x14f   : > { %v1716_v42 = vpack.c.bf16 %v1217_v35, %v1216_v33  ;;  %v991_v43 = vadd.f32 %v1841_v36, %v2375_v34  ;;  %v1844_v44 = vadd.f32 %v1843_v41, %v1842_v38  ;;  %v1955_v45 = vpop.f32.mrb[43].mxu1 }
 0x150   : > { %v1956_v46 = vadd.f32 %v1955_v45, %v1954_v40 }
 0x151   : > { %1756 = vst [vmem:[%s2383_s20 + $0x48] sm:$0xff] %v1716_v42   ;;  %v1152_v47 = vadd.f32 %v1953_v39, %v991_v43  ;;  %v994_v48 = vadd.f32 %v1844_v44, %v2375_v34 }
 0x153   : > { %v1155_v49 = vadd.f32 %v1956_v46, %v994_v48  ;;  %v1845_v50 = vpop.f32.mrb[44].mxu0  ;;  %v1218_v53 = vmax.f32 %v1152_v47, 0.0 }
 0x154   : > { %v1957_v51 = vpop.f32.mrb[44].mxu1  ;;  %v1846_v52 = vpop.f32.mrb[45].mxu0 }
 0x155   : > { %v1219_v54 = vmax.f32 %v1155_v49, 0.0  ;;  %v1847_v55 = vadd.f32 %v1846_v52, %v1845_v50  ;;  %v1958_v56 = vpop.f32.mrb[45].mxu1  ;;  %v1848_v57 = vpop.f32.mrb[46].mxu0 }
 0x156   : > { %v1959_v58 = vadd.f32 %v1958_v56, %v1957_v51  ;;  %v1960_v59 = vpop.f32.mrb[46].mxu1  ;;  %v1849_v60 = vpop.f32.mrb[47].mxu0 }
 0x157   : > { %v1721_v61 = vpack.c.bf16 %v1219_v54, %v1218_v53  ;;  %v999_v62 = vadd.f32 %v1847_v55, %v2375_v34  ;;  %v1850_v63 = vadd.f32 %v1849_v60, %v1848_v57  ;;  %v1961_v0 = vpop.f32.mrb[47].mxu1 }
 0x158   : > { %v1962_v1 = vadd.f32 %v1961_v0, %v1960_v59 }
 0x159   : > { %1757 = vst [vmem:[%s2383_s20 + $0x50] sm:$0xff] %v1721_v61   ;;  %v1160_v2 = vadd.f32 %v1959_v58, %v999_v62  ;;  %v1002_v3 = vadd.f32 %v1850_v63, %v2375_v34 }
 0x15b   : > { %v1163_v4 = vadd.f32 %v1962_v1, %v1002_v3  ;;  %v1851_v5 = vpop.f32.mrb[48].mxu0  ;;  %v1220_v8 = vmax.f32 %v1160_v2, 0.0 }
 0x15c   : > { %v1963_v6 = vpop.f32.mrb[48].mxu1  ;;  %v1852_v7 = vpop.f32.mrb[49].mxu0 }
 0x15d   : > { %v1221_v9 = vmax.f32 %v1163_v4, 0.0  ;;  %v1853_v10 = vadd.f32 %v1852_v7, %v1851_v5  ;;  %v1964_v11 = vpop.f32.mrb[49].mxu1  ;;  %v1854_v12 = vpop.f32.mrb[50].mxu0 }
 0x15e   : > { %v1965_v13 = vadd.f32 %v1964_v11, %v1963_v6  ;;  %v1966_v14 = vpop.f32.mrb[50].mxu1  ;;  %v1855_v15 = vpop.f32.mrb[51].mxu0 }
 0x15f   : > { %v1726_v16 = vpack.c.bf16 %v1221_v9, %v1220_v8  ;;  %v1007_v17 = vadd.f32 %v1853_v10, %v2375_v34  ;;  %v1856_v18 = vadd.f32 %v1855_v15, %v1854_v12  ;;  %v1967_v19 = vpop.f32.mrb[51].mxu1 }
 0x160   : > { %v1968_v20 = vadd.f32 %v1967_v19, %v1966_v14 }
 0x161   : > { %1758 = vst [vmem:[%s2383_s20 + $0x58] sm:$0xff] %v1726_v16   ;;  %v1168_v21 = vadd.f32 %v1965_v13, %v1007_v17  ;;  %v1010_v22 = vadd.f32 %v1856_v18, %v2375_v34 }
 0x163   : > { %v1171_v23 = vadd.f32 %v1968_v20, %v1010_v22  ;;  %v1857_v24 = vpop.f32.mrb[52].mxu0  ;;  %v1222_v27 = vmax.f32 %v1168_v21, 0.0 }
 0x164   : > { %v1969_v25 = vpop.f32.mrb[52].mxu1  ;;  %v1858_v26 = vpop.f32.mrb[53].mxu0 }
 0x165   : > { %v1223_v28 = vmax.f32 %v1171_v23, 0.0  ;;  %v1859_v29 = vadd.f32 %v1858_v26, %v1857_v24  ;;  %v1970_v30 = vpop.f32.mrb[53].mxu1  ;;  %v1860_v31 = vpop.f32.mrb[54].mxu0 }
 0x166   : > { %v1971_v32 = vadd.f32 %v1970_v30, %v1969_v25  ;;  %v1972_v33 = vpop.f32.mrb[54].mxu1  ;;  %v1861_v35 = vpop.f32.mrb[55].mxu0 }
 0x167   : > { %v1731_v36 = vpack.c.bf16 %v1223_v28, %v1222_v27  ;;  %v1015_v37 = vadd.f32 %v1859_v29, %v2375_v34  ;;  %v1862_v38 = vadd.f32 %v1861_v35, %v1860_v31  ;;  %v1973_v39 = vpop.f32.mrb[55].mxu1 }
 0x168   : > { %v1974_v40 = vadd.f32 %v1973_v39, %v1972_v33 }
 0x169   : > { %1759 = vst [vmem:[%s2383_s20 + $0x60] sm:$0xff] %v1731_v36   ;;  %v1176_v41 = vadd.f32 %v1971_v32, %v1015_v37  ;;  %v1018_v42 = vadd.f32 %v1862_v38, %v2375_v34 }
 0x16b   : > { %v1179_v43 = vadd.f32 %v1974_v40, %v1018_v42  ;;  %v1863_v44 = vpop.f32.mrb[56].mxu0  ;;  %v1224_v47 = vmax.f32 %v1176_v41, 0.0 }
 0x16c   : > { %v1975_v45 = vpop.f32.mrb[56].mxu1  ;;  %v1864_v46 = vpop.f32.mrb[57].mxu0 }
 0x16d   : > { %v1225_v48 = vmax.f32 %v1179_v43, 0.0  ;;  %v1865_v49 = vadd.f32 %v1864_v46, %v1863_v44  ;;  %v1976_v50 = vpop.f32.mrb[57].mxu1  ;;  %v1866_v51 = vpop.f32.mrb[58].mxu0 }
 0x16e   : > { %v1977_v52 = vadd.f32 %v1976_v50, %v1975_v45  ;;  %v1978_v53 = vpop.f32.mrb[58].mxu1  ;;  %v1867_v54 = vpop.f32.mrb[59].mxu0 }
 0x16f   : > { %v1736_v55 = vpack.c.bf16 %v1225_v48, %v1224_v47  ;;  %v1023_v56 = vadd.f32 %v1865_v49, %v2375_v34  ;;  %v1868_v57 = vadd.f32 %v1867_v54, %v1866_v51  ;;  %v1979_v58 = vpop.f32.mrb[59].mxu1 }
 0x170   : > { %v1980_v59 = vadd.f32 %v1979_v58, %v1978_v53 }
 0x171   : > { %1760 = vst [vmem:[%s2383_s20 + $0x68] sm:$0xff] %v1736_v55   ;;  %v1184_v60 = vadd.f32 %v1977_v52, %v1023_v56  ;;  %v1026_v61 = vadd.f32 %v1868_v57, %v2375_v34 }
 0x173   : > { %v1187_v62 = vadd.f32 %v1980_v59, %v1026_v61  ;;  %v1869_v63 = vpop.f32.mrb[60].mxu0  ;;  %v1226_v2 = vmax.f32 %v1184_v60, 0.0 }
 0x174   : > { %v1981_v0 = vpop.f32.mrb[60].mxu1  ;;  %v1870_v1 = vpop.f32.mrb[61].mxu0 }
 0x175   : > { %v1227_v3 = vmax.f32 %v1187_v62, 0.0  ;;  %v1871_v4 = vadd.f32 %v1870_v1, %v1869_v63  ;;  %v1982_v5 = vpop.f32.mrb[61].mxu1  ;;  %v1872_v6 = vpop.f32.mrb[62].mxu0 }
 0x176   : > { %v1983_v7 = vadd.f32 %v1982_v5, %v1981_v0  ;;  %v1984_v8 = vpop.f32.mrb[62].mxu1  ;;  %v1873_v9 = vpop.f32.mrb[63].mxu0 }
 0x177   : > { %v1741_v10 = vpack.c.bf16 %v1227_v3, %v1226_v2  ;;  %v1031_v11 = vadd.f32 %v1871_v4, %v2375_v34  ;;  %v1874_v12 = vadd.f32 %v1873_v9, %v1872_v6  ;;  %v1985_v13 = vpop.f32.mrb[63].mxu1 }
 0x178   : > { %v1986_v14 = vadd.f32 %v1985_v13, %v1984_v8 }
 0x179   : > { %1761 = vst [vmem:[%s2383_s20 + $0x70] sm:$0xff] %v1741_v10   ;;  %v1192_v15 = vadd.f32 %v1983_v7, %v1031_v11  ;;  %v1034_v16 = vadd.f32 %v1874_v12, %v2375_v34 }
 0x17b   : > { %v1195_v17 = vadd.f32 %v1986_v14, %v1034_v16  ;;  %v1228_v18 = vmax.f32 %v1192_v15, 0.0 }
 0x17d   : > { %v1229_v19 = vmax.f32 %v1195_v17, 0.0 }
 0x17f   : > { %v1746_v20 = vpack.c.bf16 %v1229_v19, %v1228_v18 }
 0x181   : > { %1762 = vst [vmem:[%s2383_s20 + $0x78] sm:$0xff] %v1746_v20  }
 0x182 PF: > { %s13_s14 = sadd.s32 1, %s2161_s14   ;;  %s2444_s12 = smov %s2157_s13 }
 0x183   : > { %p10_p5 = scmp.ge.s32.totalorder %s13_s14, 4   ;;  %s2445_s13 = smov %s2447_s15 }
 0x185   :  { %12 = sbr.rel (!%p10_p5) target bundleno = 2 (0x2), region = 68 }

// kernel: unetpp_forward.91
= control target key start
LH: loop header
LB: loop body
LE: loop exit
PB: predicated region body
PF: predicated region fallthrough
CT: control target
= control target key end

     0   :  { %s938_s12 = smov 0   ;;  %s940_s13 = smov 0   ;;  %s1088_s0 = inlined_call_operand.vmem [shape: bf16[512,128], index: 0, kind: input, shape index: {}]   ;;  %s1089_s1 = inlined_call_operand.vmem [shape: bf16[128,128], index: 1, kind: input, shape index: {}]   ;;  %s1090_s2 = inlined_call_operand.vmem [shape: f32[1,128], index: 2, kind: input, shape index: {}]   ;;  %s1091_s3 = inlined_call_operand.vmem [shape: f32[512,128], index: 3, kind: output, shape index: {}]  }
   0x1   :  { %s942_s14 = smov 0  }
   0x2 LB: > { %s25_s15 = sadd.s32 1, %s912_s13  ;;  %p726_p0 = scmp.ge.s32.totalorder %s916_s14, 1  ;;  %s916_s14 = sphi %s942_s14, %s13_s14   ;;  %s912_s13 = sphi %s940_s13, %s1093_s13   ;;  %s908_s12 = sphi %s938_s12, %s1092_s12  }
   0x3   : > { %p27_p1 = scmp.ge.s32.totalorder %s25_s15, 2  ;;  %p169_p2 = scmp.lt.s32.totalorder %s916_s14, 3 }
   0x5   : > { %s1095_s15 = smov (%p27_p1, %s25_s15), 0  ;;  %p170_p3 = pnand %p726_p0, %p169_p2 }
   0x6   : > { %v870_v0 = vld [vmem:[%s1089_s1] sm:$0xff] (!%p170_p3)   ;;  %s727_s18 = sshll.u32 (!%p170_p3), %s908_s12, 5  ;;  %v871_v1 = vld [vmem:[%s1089_s1 + $0x8] sm:$0xff] (!%p170_p3)   ;;  %v872_v2 = vld [vmem:[%s1089_s1 + $0x10] sm:$0xff] (!%p170_p3)  }
   0x7   : > { %173 = sbr.rel (%p170_p3) target bundleno = 281 (0x119), region = 32  ;;  %p204_p4 = scmp.lt.s32.totalorder (!%p170_p3), %s727_s18, 63  ;;  %782 = vmatprep.subr.bf16.mxu0 (!%p170_p3), %v870_v0  ;;  %830 = vmatprep.subr.bf16.mxu1 (!%p170_p3), %v870_v0  ;;  %v873_v3 = vld [vmem:[%s1089_s1 + $0x18] sm:$0xff] (!%p170_p3)   ;;  %v874_v6 = vld [vmem:[%s1089_s1 + $0x20] sm:$0xff] (!%p170_p3)   ;;  %v875_v7 = vld [vmem:[%s1089_s1 + $0x28] sm:$0xff] (!%p170_p3)  }
   0x8   : > { %783 = vmatpush3.bf16.msra.mxu0 (!%p170_p3), %v870_v0  ;;  %838 = vmatpush3.bf16.msra.mxu1 (!%p170_p3), %v870_v0  ;;  %v876_v8 = vld [vmem:[%s1089_s1 + $0x30] sm:$0xff] (!%p170_p3)   ;;  %v877_v9 = vld [vmem:[%s1089_s1 + $0x38] sm:$0xff] (!%p170_p3)   ;;  %v1008_v24 = vld [vmem:[%s1090_s2] ss:$0 sm:$0xff] (!%p170_p3) }
   0x9   : > { %784 = vmatprep.subr.bf16.mxu0 (!%p170_p3), %v871_v1  ;;  %831 = vmatprep.subr.bf16.mxu1 (!%p170_p3), %v871_v1 }
   0xc   : > { %785 = vmatpush3.bf16.msra.mxu0 (!%p170_p3), %v871_v1  ;;  %839 = vmatpush3.bf16.msra.mxu1 (!%p170_p3), %v871_v1 }
   0xd   : > { %786 = vmatprep.subr.bf16.mxu0 (!%p170_p3), %v872_v2  ;;  %832 = vmatprep.subr.bf16.mxu1 (!%p170_p3), %v872_v2 }
   0xe   : > { %s1097_s18 = smov (!%p204_p4, %s727_s18), 63 }
   0xf   : > { %s728_s23 = sshll.u32 %s1097_s18, 2  ;;  %s730_s10 = sshll.u32 %s1097_s18, 3 }
  0x10   : > { %s971_s26 = scalar_lea.vmem %s1088_s0, %s728_s23  ;;  %787 = vmatpush3.bf16.msra.mxu0 %v872_v2  ;;  %840 = vmatpush3.bf16.msra.mxu1 %v872_v2  ;;  %s1013_s19 = scalar_lea.vmem %s1091_s3, %s730_s10 }
  0x11   : > { %v878_v4 = vld [vmem:[%s971_s26] sm:$0xff]   ;;  %788 = vmatprep.subr.bf16.mxu0 %v873_v3  ;;  %833 = vmatprep.subr.bf16.mxu1 %v873_v3  ;;  %v880_v10 = vld [vmem:[%s971_s26 + $0x8] sm:$0xff]   ;;  %v882_v12 = vld [vmem:[%s971_s26 + $0x10] sm:$0xff]  }
  0x12   : > { %v879_v5 = vld [vmem:[%s971_s26 + $0x40] sm:$0xff]   ;;  %798 = vmatprep.mubr.bf16.mxu0 %v878_v4  ;;  %v881_v11 = vld [vmem:[%s971_s26 + $0x48] sm:$0xff]   ;;  %v883_v13 = vld [vmem:[%s971_s26 + $0x50] sm:$0xff]  }
  0x13   : > { %814 = vmatprep.mubr.bf16.mxu1 %v879_v5  ;;  %v884_v14 = vld [vmem:[%s971_s26 + $0x18] sm:$0xff]   ;;  %v886_v16 = vld [vmem:[%s971_s26 + $0x20] sm:$0xff]   ;;  %v888_v18 = vld [vmem:[%s971_s26 + $0x28] sm:$0xff]  }
  0x14   : > { %789 = vmatpush3.bf16.msra.mxu0 %v873_v3  ;;  %841 = vmatpush3.bf16.msra.mxu1 %v873_v3  ;;  %v885_v15 = vld [vmem:[%s971_s26 + $0x58] sm:$0xff]   ;;  %v887_v17 = vld [vmem:[%s971_s26 + $0x60] sm:$0xff]   ;;  %v889_v19 = vld [vmem:[%s971_s26 + $0x68] sm:$0xff]  }
  0x15   : > { %790 = vmatprep.subr.bf16.mxu0 %v874_v6  ;;  %834 = vmatprep.subr.bf16.mxu1 %v874_v6  ;;  %v890_v20 = vld [vmem:[%s971_s26 + $0x30] sm:$0xff]   ;;  %v892_v22 = vld [vmem:[%s971_s26 + $0x38] sm:$0xff]  }
  0x16   : > { %v891_v21 = vld [vmem:[%s971_s26 + $0x70] sm:$0xff]   ;;  %v893_v23 = vld [vmem:[%s971_s26 + $0x78] sm:$0xff]  }
  0x18   : > { %791 = vmatpush3.bf16.msra.mxu0 %v874_v6  ;;  %842 = vmatpush3.bf16.msra.mxu1 %v874_v6 }
  0x19   : > { %792 = vmatprep.subr.bf16.mxu0 %v875_v7  ;;  %835 = vmatprep.subr.bf16.mxu1 %v875_v7 }
  0x1c   : > { %793 = vmatpush3.bf16.msra.mxu0 %v875_v7  ;;  %843 = vmatpush3.bf16.msra.mxu1 %v875_v7 }
  0x1d   : > { %794 = vmatprep.subr.bf16.mxu0 %v876_v8  ;;  %836 = vmatprep.subr.bf16.mxu1 %v876_v8 }
  0x20   : > { %795 = vmatpush3.bf16.msra.mxu0 %v876_v8  ;;  %844 = vmatpush3.bf16.msra.mxu1 %v876_v8 }
  0x21   : > { %796 = vmatprep.subr.bf16.mxu0 %v877_v9  ;;  %837 = vmatprep.subr.bf16.mxu1 %v877_v9 }
  0x24   : > { %797 = vmatpush3.bf16.msra.mxu0 %v877_v9  ;;  %845 = vmatpush3.bf16.msra.mxu1 %v877_v9 }
  0x27   : > { %799 = vmatmul.mubr.bf16.vlgmr.msra.gmra.mrb[0].mxu0 %v880_v10  ;;  %815 = vmatmul.mubr.bf16.vlgmr.msra.gmra.mrb[0].mxu1 %v881_v11 }
  0x28   : > { %802 = vmatprep.mubr.bf16.mxu0 %v882_v12  ;;  %818 = vmatprep.mubr.bf16.mxu1 %v883_v13 }
  0x2f   : > { %803 = vmatmul.mubr.bf16.gmra.mrb[4].mxu0 %v884_v14  ;;  %819 = vmatmul.mubr.bf16.gmra.mrb[4].mxu1 %v885_v15 }
  0x30   : > { %806 = vmatprep.mubr.bf16.mxu0 %v886_v16  ;;  %822 = vmatprep.mubr.bf16.mxu1 %v887_v17 }
  0x37   : > { %807 = vmatmul.mubr.bf16.gmra.mrb[8].mxu0 %v888_v18  ;;  %823 = vmatmul.mubr.bf16.gmra.mrb[8].mxu1 %v889_v19 }
  0x38   : > { %810 = vmatprep.mubr.bf16.mxu0 %v890_v20  ;;  %826 = vmatprep.mubr.bf16.mxu1 %v891_v21 }
  0x3f   : > { %811 = vmatmul.mubr.bf16.gmra.mrb[12].mxu0 %v892_v22  ;;  %827 = vmatmul.mubr.bf16.gmra.mrb[12].mxu1 %v893_v23 }
  0xfa   : > { %v800_v25 = vpop.f32.mrb[0].mxu0  ;;  %v816_v26 = vpop.f32.mrb[0].mxu1 }
  0xfb   : > { %v468_v27 = vadd.f32 %v800_v25, %v1008_v24  ;;  %v532_v28 = vadd.f32 %v816_v26, %v1008_v24  ;;  %v459_v29 = vpop.f32.mrb[1].mxu0  ;;  %v523_v30 = vpop.f32.mrb[1].mxu1 }
  0xfc   : > { %v460_v31 = vadd.f32 %v1008_v24, %v459_v29  ;;  %v524_v32 = vadd.f32 %v1008_v24, %v523_v30  ;;  %v801_v33 = vpop.f32.mrb[2].mxu0  ;;  %v817_v34 = vpop.f32.mrb[2].mxu1 }
  0xfd   : > { %588 = vst [vmem:[%s1013_s19 + $0x10] sm:$0xff] %v468_v27  ;;  %604 = vst [vmem:[%s1013_s19 + $0x90] sm:$0xff] %v532_v28  ;;  %v471_v35 = vadd.f32 %v801_v33, %v1008_v24  ;;  %v535_v36 = vadd.f32 %v817_v34, %v1008_v24  ;;  %v462_v37 = vpop.f32.mrb[3].mxu0  ;;  %v526_v38 = vpop.f32.mrb[3].mxu1 }
  0xfe   : > { %586 = vst [vmem:[%s1013_s19] sm:$0xff] %v460_v31  ;;  %602 = vst [vmem:[%s1013_s19 + $0x80] sm:$0xff] %v524_v32  ;;  %v463_v39 = vadd.f32 %v1008_v24, %v462_v37  ;;  %v527_v40 = vadd.f32 %v1008_v24, %v526_v38 }
  0xff   : > { %589 = vst [vmem:[%s1013_s19 + $0x18] sm:$0xff] %v471_v35  ;;  %605 = vst [vmem:[%s1013_s19 + $0x98] sm:$0xff] %v535_v36 }
 0x100   : > { %587 = vst [vmem:[%s1013_s19 + $0x8] sm:$0xff] %v463_v39  ;;  %603 = vst [vmem:[%s1013_s19 + $0x88] sm:$0xff] %v527_v40 }
 0x102   : > { %v804_v41 = vpop.f32.mrb[4].mxu0  ;;  %v820_v42 = vpop.f32.mrb[4].mxu1 }
 0x103   : > { %v484_v43 = vadd.f32 %v804_v41, %v1008_v24  ;;  %v548_v44 = vadd.f32 %v820_v42, %v1008_v24  ;;  %v475_v45 = vpop.f32.mrb[5].mxu0  ;;  %v539_v46 = vpop.f32.mrb[5].mxu1 }
 0x104   : > { %v476_v47 = vadd.f32 %v1008_v24, %v475_v45  ;;  %v540_v48 = vadd.f32 %v1008_v24, %v539_v46  ;;  %v805_v49 = vpop.f32.mrb[6].mxu0  ;;  %v821_v50 = vpop.f32.mrb[6].mxu1 }
 0x105   : > { %592 = vst [vmem:[%s1013_s19 + $0x30] sm:$0xff] %v484_v43  ;;  %608 = vst [vmem:[%s1013_s19 + $0xb0] sm:$0xff] %v548_v44  ;;  %v487_v51 = vadd.f32 %v805_v49, %v1008_v24  ;;  %v551_v52 = vadd.f32 %v821_v50, %v1008_v24  ;;  %v478_v53 = vpop.f32.mrb[7].mxu0  ;;  %v542_v54 = vpop.f32.mrb[7].mxu1 }
 0x106   : > { %590 = vst [vmem:[%s1013_s19 + $0x20] sm:$0xff] %v476_v47  ;;  %606 = vst [vmem:[%s1013_s19 + $0xa0] sm:$0xff] %v540_v48  ;;  %v479_v55 = vadd.f32 %v1008_v24, %v478_v53  ;;  %v543_v56 = vadd.f32 %v1008_v24, %v542_v54 }
 0x107   : > { %593 = vst [vmem:[%s1013_s19 + $0x38] sm:$0xff] %v487_v51  ;;  %609 = vst [vmem:[%s1013_s19 + $0xb8] sm:$0xff] %v551_v52 }
 0x108   : > { %591 = vst [vmem:[%s1013_s19 + $0x28] sm:$0xff] %v479_v55  ;;  %607 = vst [vmem:[%s1013_s19 + $0xa8] sm:$0xff] %v543_v56 }
 0x10a   : > { %v808_v57 = vpop.f32.mrb[8].mxu0  ;;  %v824_v58 = vpop.f32.mrb[8].mxu1 }
 0x10b   : > { %v500_v59 = vadd.f32 %v808_v57, %v1008_v24  ;;  %v564_v60 = vadd.f32 %v824_v58, %v1008_v24  ;;  %v491_v61 = vpop.f32.mrb[9].mxu0  ;;  %v555_v62 = vpop.f32.mrb[9].mxu1 }
 0x10c   : > { %v492_v63 = vadd.f32 %v1008_v24, %v491_v61  ;;  %v556_v0 = vadd.f32 %v1008_v24, %v555_v62  ;;  %v809_v1 = vpop.f32.mrb[10].mxu0  ;;  %v825_v2 = vpop.f32.mrb[10].mxu1 }
 0x10d   : > { %596 = vst [vmem:[%s1013_s19 + $0x50] sm:$0xff] %v500_v59  ;;  %612 = vst [vmem:[%s1013_s19 + $0xd0] sm:$0xff] %v564_v60  ;;  %v503_v3 = vadd.f32 %v809_v1, %v1008_v24  ;;  %v567_v4 = vadd.f32 %v825_v2, %v1008_v24  ;;  %v494_v5 = vpop.f32.mrb[11].mxu0  ;;  %v558_v6 = vpop.f32.mrb[11].mxu1 }
 0x10e   : > { %594 = vst [vmem:[%s1013_s19 + $0x40] sm:$0xff] %v492_v63  ;;  %610 = vst [vmem:[%s1013_s19 + $0xc0] sm:$0xff] %v556_v0  ;;  %v495_v7 = vadd.f32 %v1008_v24, %v494_v5  ;;  %v559_v8 = vadd.f32 %v1008_v24, %v558_v6 }
 0x10f   : > { %597 = vst [vmem:[%s1013_s19 + $0x58] sm:$0xff] %v503_v3  ;;  %613 = vst [vmem:[%s1013_s19 + $0xd8] sm:$0xff] %v567_v4 }
 0x110   : > { %595 = vst [vmem:[%s1013_s19 + $0x48] sm:$0xff] %v495_v7  ;;  %611 = vst [vmem:[%s1013_s19 + $0xc8] sm:$0xff] %v559_v8 }
 0x112   : > { %v812_v9 = vpop.f32.mrb[12].mxu0  ;;  %v828_v10 = vpop.f32.mrb[12].mxu1 }
 0x113   : > { %v516_v11 = vadd.f32 %v812_v9, %v1008_v24  ;;  %v580_v12 = vadd.f32 %v828_v10, %v1008_v24  ;;  %v507_v13 = vpop.f32.mrb[13].mxu0  ;;  %v571_v14 = vpop.f32.mrb[13].mxu1 }
 0x114   : > { %v508_v15 = vadd.f32 %v1008_v24, %v507_v13  ;;  %v572_v16 = vadd.f32 %v1008_v24, %v571_v14  ;;  %v813_v17 = vpop.f32.mrb[14].mxu0  ;;  %v829_v18 = vpop.f32.mrb[14].mxu1 }
 0x115   : > { %600 = vst [vmem:[%s1013_s19 + $0x70] sm:$0xff] %v516_v11  ;;  %616 = vst [vmem:[%s1013_s19 + $0xf0] sm:$0xff] %v580_v12  ;;  %v519_v19 = vadd.f32 %v813_v17, %v1008_v24  ;;  %v583_v20 = vadd.f32 %v829_v18, %v1008_v24  ;;  %v510_v21 = vpop.f32.mrb[15].mxu0  ;;  %v574_v22 = vpop.f32.mrb[15].mxu1 }
 0x116   : > { %598 = vst [vmem:[%s1013_s19 + $0x60] sm:$0xff] %v508_v15  ;;  %614 = vst [vmem:[%s1013_s19 + $0xe0] sm:$0xff] %v572_v16  ;;  %v511_v23 = vadd.f32 %v1008_v24, %v510_v21  ;;  %v575_v25 = vadd.f32 %v1008_v24, %v574_v22 }
 0x117   : > { %601 = vst [vmem:[%s1013_s19 + $0x78] sm:$0xff] %v519_v19  ;;  %617 = vst [vmem:[%s1013_s19 + $0xf8] sm:$0xff] %v583_v20 }
 0x118   : > { %599 = vst [vmem:[%s1013_s19 + $0x68] sm:$0xff] %v511_v23  ;;  %615 = vst [vmem:[%s1013_s19 + $0xe8] sm:$0xff] %v575_v25 }
 0x119 PF: > { %s13_s14 = sadd.s32 1, %s916_s14   ;;  %s1092_s12 = smov %s912_s13 }
 0x11a   : > { %p10_p5 = scmp.ge.s32.totalorder %s13_s14, 4   ;;  %s1093_s13 = smov %s1095_s15 }
 0x11c   :  { %12 = sbr.rel (!%p10_p5) target bundleno = 2 (0x2), region = 68 }

</bundles_post_ra>
